<compile_context>
chip_gen: v7x
topology: tpu7x:2x2x1
jax: 0.10.0
libtpu: 0.0.40
codegen_flags: <defaults>
</compile_context>

<pallas_src>
import functools
import math

import jax
import jax.numpy as jnp
from jax import lax
from jax.experimental import pallas as pl
from jax.experimental.pallas import tpu as pltpu

# ----------------------------- constants -------------------------------------
GRID_SIZE = 5
SPLINE_ORDER = 3
GRID_RANGE = (-1.0, 1.0)
LAYER_COUNT = 3
LN_EPS = 1e-5

_H = (GRID_RANGE[1] - GRID_RANGE[0]) / GRID_SIZE
# grid[i] = grid_range[0] + (i - spline_order) * h,  i = 0 .. grid_size + 2*order
GRID_VALS = tuple(
    GRID_RANGE[0] + (i - SPLINE_ORDER) * _H
    for i in range(GRID_SIZE + 2 * SPLINE_ORDER + 1)
)
NUM_BASES = GRID_SIZE + SPLINE_ORDER  # 8
# On a uniform grid every Cox-de Boor denominator at level k equals k*h, so the whole
# normalisation is one constant; it is folded into the spline weights at prep time.
_BSPLINE_FOLD = 1.0 / (math.factorial(SPLINE_ORDER) * (_H ** SPLINE_ORDER))


def _round_up(v, m):
    return ((v + m - 1) // m) * m


def _pick_row_tile(n):
    """Largest row tile <= 256 that divides N (bounds the basis-recursion working set)."""
    for tn in (256, 128, 64, 32, 16, 8):
        if n % tn == 0:
            return tn
    return n


# ----------------------------- B-spline basis (kernel form) -------------------
def _raw_bspline_bases(x):
    """Unnormalised Cox-de Boor bases on the fixed uniform grid.

    Uniform-grid simplification: divisions are factored out (folded into the spline
    weights), t_j = x - g[j] is computed once and each recursion term is
    t_j*b_j - t_{j+k+1}*b_{j+1}  (2 mul + 1 sub on the VPU per term).
    """
    g = GRID_VALS
    d = [(x >= g[j]).astype(jnp.float32) for j in range(len(g))]   # monotone indicators
    b = [d[j] - d[j + 1] for j in range(len(g) - 1)]               # level-0 bases
    t = [x - g[j] for j in range(len(g))]                          # reused at all levels
    for k in range(1, SPLINE_ORDER + 1):
        b = [t[j] * b[j] - t[j + k + 1] * b[j + 1] for j in range(len(b) - 1)]
    return b                                                       # NUM_BASES arrays


# ----------------------------- fused Pallas kernel ----------------------------
def _kan_block_kernel(H, W, C, TN, eps,
                      x_ref, lnw_ref, lnb_ref, ww_ref, cw_ref, cb_ref,
                      o_ref, h_ref, pad_ref, stage_ref):
    """Whole KANBlock for one image: LN + 3 x (KANLinear + dwconv3x3) + residual."""
    N = H * W
    Cp = h_ref.shape[-1]
    n_chunks = N // TN
    f32 = jnp.float32

    # ---------------- LayerNorm over the true C channels (unpadded input) ----
    x = x_ref[0]                                        # (N, C) f32
    mu = jnp.mean(x, axis=-1, keepdims=True)
    xc = x - mu
    var = jnp.mean(xc * xc, axis=-1, keepdims=True)
    ln = xc * lax.rsqrt(var + eps) * lnw_ref[...] + lnb_ref[...]

    # Lane-pad ONCE in VMEM; padded lanes must be exact zeros so the first layer's
    # SiLU / bases stay finite (their weight rows are zero, so values don't matter).
    h_ref[...] = jnp.zeros((N, Cp), f32)
    h_ref[:, 0:C] = ln

    # ---------------- per-image conv constants --------------------------------
    row = lax.broadcasted_iota(jnp.int32, (N, 1), 0)
    col = jnp.bitwise_and(row, W - 1) if (W & (W - 1)) == 0 else row % W
    not_first = (col != 0).astype(f32)                  # left neighbour exists
    not_last = (col != W - 1).astype(f32)               # right neighbour exists

    # Zero the one-image-row halos of the conv buffer once (interior rewritten per layer).
    pad_ref[0:W, :] = jnp.zeros((W, Cp), f32)
    pad_ref[W + N:W + N + W, :] = jnp.zeros((W, Cp), f32)

    out = None
    for layer in range(LAYER_COUNT):
        # ============ KANLinear: SiLU base branch + B-spline branch ============
        # Row-tiled so only ~TN rows of recursion temps are live at once.  SiLU and
        # the 8 bases are staged as bf16 at 128-aligned lane blocks and contracted
        # with ONE wide (TN, 9*Cp) x (9*Cp, Cp) MXU dot (f32 accumulation).
        def kan_chunk(i, carry):
            r0 = 0 if n_chunks == 1 else pl.multiple_of(i * TN, TN)
            hc = h_ref[pl.ds(r0, TN), :]                # (TN, Cp) f32
            silu = hc / (1.0 + jnp.exp(-hc))            # exp/div -> EUP slot
            stage_ref[:, 0:Cp] = silu.astype(jnp.bfloat16)
            bs = _raw_bspline_bases(hc)
            for j in range(NUM_BASES):
                stage_ref[:, (j + 1) * Cp:(j + 2) * Cp] = bs[j].astype(jnp.bfloat16)
            acc = jnp.dot(stage_ref[...], ww_ref[layer],
                          preferred_element_type=jnp.float32)      # (TN, Cp) f32
            pad_ref[pl.ds(W + r0, TN), :] = acc         # write conv-buffer interior
            return carry

        if n_chunks == 1:
            kan_chunk(0, 0)
        else:
            lax.fori_loop(0, n_chunks, kan_chunk, 0)

        # ============ depthwise 3x3 conv (SAME, zero pad) =======================
        # Taps grouped by dx: three sublane-aligned reads (row offsets 0 / W / 2W of
        # the zero-haloed buffer) are combined per dx column; dx = +/-1 columns are
        # applied with a single XLU roll and one wrap mask each.  The dx=0 column
        # plus bias initialises the accumulator (no zero materialisation).
        w9 = cw_ref[layer]                              # (9, Cp); index = (dy+1)*3+(dx+1)
        v_m = pad_ref[0:N, :]                           # in[r - W]  (top halo rows = 0)
        v_0 = pad_ref[W:W + N, :]                       # in[r]
        v_p = pad_ref[2 * W:2 * W + N, :]               # in[r + W]  (bottom halo rows = 0)
        u_m1 = v_m * w9[0:1, :] + v_0 * w9[3:4, :] + v_p * w9[6:7, :]   # dx = -1 taps
        u_0 = v_m * w9[1:2, :] + v_0 * w9[4:5, :] + v_p * w9[7:8, :]    # dx =  0 taps
        u_p1 = v_m * w9[2:3, :] + v_0 * w9[5:6, :] + v_p * w9[8:9, :]   # dx = +1 taps
        out = u_0 + cb_ref[layer]
        # out[r] += u_p1[r + 1] unless r is the last column (shift N-1 == -1, kept >= 0).
        out = out + pltpu.roll(u_p1, N - 1, 0) * not_last
        # out[r] += u_m1[r - 1] unless r is the first column.
        out = out + pltpu.roll(u_m1, 1, 0) * not_first

        if layer < LAYER_COUNT - 1:
            h_ref[...] = out                            # feeds the next KANLinear

    # ---------------- fused residual add + true-width store -------------------
    o_ref[0] = (out[:, 0:C] + x_ref[0]).astype(o_ref.dtype)


# ----------------------------- parameter prep ---------------------------------
def _prepare_params(params, C, Cp):
    """Lane-pad to Cp, fold the spline normalisation into the spline weights, and stack
    [base | spline_0..7] into one (9*Cp, Cp) bf16 matrix per layer (MXU operands)."""
    pc = Cp - C
    lnw = params["ln_w"].astype(jnp.float32).reshape(1, C)
    lnb = params["ln_b"].astype(jnp.float32).reshape(1, C)
    ww, cw, cb = [], [], []
    for lp in params["layers"]:
        base_t = jnp.pad(lp["base_w"].T, ((0, pc), (0, pc)))                   # (Cp, Cp) [in,out]
        s = jnp.transpose(lp["scaled_spline_w"], (2, 1, 0)) * _BSPLINE_FOLD    # (NB, in, out)
        s = jnp.pad(s, ((0, 0), (0, pc), (0, pc)))                             # (NB, Cp, Cp)
        wide = jnp.concatenate([base_t[None], s], axis=0)                      # (NB+1, Cp, Cp)
        ww.append(wide.reshape((NUM_BASES + 1) * Cp, Cp))
        cw.append(jnp.pad(lp["conv_w"].reshape(9, C), ((0, 0), (0, pc))))      # (9, Cp)
        cb.append(jnp.pad(lp["conv_b"], (0, pc)).reshape(1, Cp))               # (1, Cp)
    return (lnw, lnb,
            jnp.stack(ww).astype(jnp.bfloat16),     # bf16 MXU operands, f32 accumulation
            jnp.stack(cw).astype(jnp.float32),
            jnp.stack(cb).astype(jnp.float32))


# ----------------------------- wrapper ----------------------------------------
def kan_block_forward(x, patch, params):
    """x: (B, N, C) float32, patch = (H, W) with H * W == N."""
    B, N, C = x.shape
    H, W = patch
    assert H * W == N
    Cp = _round_up(C, 128)                              # lane-dense working width
    TN = _pick_row_tile(N)                              # row tile for the KANLinear stage

    lnw, lnb, ww, cw, cb = _prepare_params(params, C, Cp)
    kernel = functools.partial(_kan_block_kernel, H, W, C, TN, LN_EPS)

    grid_spec = pltpu.PrefetchScalarGridSpec(
        num_scalar_prefetch=0,
        grid=(B,),                                      # one image per grid step
        in_specs=[
            pl.BlockSpec((1, N, C), lambda b: (b, 0, 0)),               # x (also residual)
            pl.BlockSpec((1, C), lambda b: (0, 0)),                     # LN weight
            pl.BlockSpec((1, C), lambda b: (0, 0)),                     # LN bias
            pl.BlockSpec((LAYER_COUNT, (NUM_BASES + 1) * Cp, Cp),
                         lambda b: (0, 0, 0)),                          # wide KAN weights (bf16)
            pl.BlockSpec((LAYER_COUNT, 9, Cp), lambda b: (0, 0, 0)),    # dwconv taps
            pl.BlockSpec((LAYER_COUNT, 1, Cp), lambda b: (0, 0, 0)),    # dwconv bias
        ],
        out_specs=pl.BlockSpec((1, N, C), lambda b: (b, 0, 0)),         # true-width output
        scratch_shapes=[
            pltpu.VMEM((N, Cp), jnp.float32),                           # lane-padded activation
            pltpu.VMEM((N + 2 * W, Cp), jnp.float32),                   # conv buffer + zero halos
            pltpu.VMEM((TN, (NUM_BASES + 1) * Cp), jnp.bfloat16),       # wide-dot staging
        ],
    )
    return pl.pallas_call(
        kernel,
        out_shape=jax.ShapeDtypeStruct((B, N, C), x.dtype),
        grid_spec=grid_spec,
        compiler_params=pltpu.CompilerParams(
            dimension_semantics=("parallel",),          # images across megacore / v7x TCs
            vmem_limit_bytes=48 * 1024 * 1024,          # explicit budget (< v7x 64 MiB physical)
        ),
    )(x, lnw, lnb, ww, cw, cb)


# ----------------------------- param init (true-C, PyTorch-like) ---------------
def init_params(key, C):
    keys = jax.random.split(key, LAYER_COUNT * 4)
    layers = []
    for i in range(LAYER_COUNT):
        k0, k1, k2, k3 = keys[4 * i: 4 * i + 4]
        base_w = jax.random.normal(k0, (C, C), jnp.float32) / math.sqrt(C)        # (out, in)
        spline_w = 0.1 * jax.random.normal(k1, (C, C, NUM_BASES), jnp.float32)    # (out, in, NB)
        scaler = jax.random.normal(k2, (C, C), jnp.float32) / math.sqrt(C)        # (out, in)
        scaled = spline_w * scaler[:, :, None]                                    # scaled_spline_weight
        conv_w = math.sqrt(2.0 / 9.0) * jax.random.normal(k3, (3, 3, C), jnp.float32)
        conv_b = jnp.zeros((C,), jnp.float32)
        layers.append(dict(base_w=base_w, scaled_spline_w=scaled,
                           conv_w=conv_w, conv_b=conv_b))
    return dict(ln_w=jnp.ones((C,), jnp.float32),
                ln_b=jnp.zeros((C,), jnp.float32),
                layers=layers)


# ----------------------------- pure-JAX reference ------------------------------
def _reference_bspline_bases(x):
    """Textbook Cox-de Boor with explicit knot-difference divisions (mirrors PyTorch
    KANLinear.b_splines).  Intentionally DIFFERENT math from the kernel so the self-check
    validates the uniform-grid simplification + weight folding."""
    g = jnp.asarray(GRID_VALS, jnp.float32)
    xe = x[..., None]
    b = ((xe >= g[:-1]) & (xe < g[1:])).astype(jnp.float32)
    for k in range(1, SPLINE_ORDER + 1):
        left = (xe - g[:-(k + 1)]) / (g[k:-1] - g[:-(k + 1)]) * b[..., :-1]
        right = (g[k + 1:] - xe) / (g[k + 1:] - g[1:-k]) * b[..., 1:]
        b = left + right
    return b                                            # (..., NUM_BASES)


def reference_forward(x, patch, params):
    B, N, C = x.shape
    H, W = patch
    hi = lax.Precision.HIGHEST
    res = x
    h = x.reshape(B * N, C)
    mu = jnp.mean(h, axis=-1, keepdims=True)
    var = jnp.mean((h - mu) ** 2, axis=-1, keepdims=True)
    h = (h - mu) * lax.rsqrt(var + LN_EPS) * params["ln_w"] + params["ln_b"]
    for lp in params["layers"]:
        base = jnp.dot(h * jax.nn.sigmoid(h), lp["base_w"].T, precision=hi)
        bases = _reference_bspline_bases(h)                                     # (T, C, NB)
        spline = jnp.einsum("tik,oik->to", bases, lp["scaled_spline_w"], precision=hi)
        h = base + spline
        img = h.reshape(B, H, W, C)
        k = lp["conv_w"][:, :, None, :]                                         # (3,3,1,C) HWIO
        img = lax.conv_general_dilated(img, k, (1, 1), "SAME",
                                       dimension_numbers=("NHWC", "HWIO", "NHWC"),
                                       feature_group_count=C, precision=hi)
        img = img + lp["conv_b"].reshape(1, 1, 1, C)
        h = img.reshape(B * N, C)
    return h.reshape(B, N, C) + res


# ----------------------------- main --------------------------------------------
if __name__ == "__main__":
    # B=4 so the "parallel" batch axis keeps both v7x TensorCores busy and the
    # BlockSpec pipeline has more than one step per core.
    B, H, W, C = 4, 8, 8, 32
    N = H * W
    key = jax.random.PRNGKey(0)
    kx, kp = jax.random.split(key)
    x = jax.random.normal(kx, (B, N, C), jnp.float32)
    params = init_params(kp, C)

    fwd = jax.jit(lambda xx, pp: kan_block_forward(xx, (H, W), pp))
    out = jax.block_until_ready(fwd(x, params))

    assert out.shape == (B, N, C), out.shape
    assert out.dtype == jnp.float32
    assert bool(jnp.all(jnp.isfinite(out)))

    ref = jax.block_until_ready(reference_forward(x, (H, W), params))
    max_ref = float(jnp.max(jnp.abs(ref)))
    err = float(jnp.max(jnp.abs(out - ref)))
    # bf16 MXU operands vs a HIGHEST-precision f32 reference: allow ~3% of output range.
    assert err <= 3e-2 * (1.0 + max_ref), f"kernel vs reference mismatch: {err} (ref max {max_ref})"

    print("KERNEL_OK")
</pallas_src>

<mosaic_0001>
module attributes {stable_mosaic.version = 11 : i64} {
  func.func @_kan_block_kernel(%arg0: i32, %arg1: memref<1x64x32xf32, #tpu.memory_space<vmem>>, %arg2: memref<1x32xf32, #tpu.memory_space<vmem>>, %arg3: memref<1x32xf32, #tpu.memory_space<vmem>>, %arg4: memref<3x1152x128xbf16, #tpu.memory_space<vmem>>, %arg5: memref<3x9x128xf32, #tpu.memory_space<vmem>>, %arg6: memref<3x1x128xf32, #tpu.memory_space<vmem>>, %arg7: memref<1x64x32xf32, #tpu.memory_space<vmem>>, %arg8: memref<64x128xf32, #tpu.memory_space<vmem>>, %arg9: memref<80x128xf32, #tpu.memory_space<vmem>>, %arg10: memref<64x1152xbf16, #tpu.memory_space<vmem>>) attributes {dimension_semantics = [#tpu.dimension_semantics<parallel>], iteration_bounds = array<i64: 4>, scalar_prefetch = 0 : i64, scratch_operands = 3 : i64, tpu.core_type = #tpu.core_type<tc>, window_params = [{transform_indices = @transform_0, window_bounds = array<i64: 1, 64, 32>}, {pipeline_mode = #tpu.pipeline_mode<synchronous>, transform_indices = @transform_1, window_bounds = array<i64: 1, 32>}, {pipeline_mode = #tpu.pipeline_mode<synchronous>, transform_indices = @transform_2, window_bounds = array<i64: 1, 32>}, {pipeline_mode = #tpu.pipeline_mode<synchronous>, transform_indices = @transform_3, window_bounds = array<i64: 3, 1152, 128>}, {pipeline_mode = #tpu.pipeline_mode<synchronous>, transform_indices = @transform_4, window_bounds = array<i64: 3, 9, 128>}, {pipeline_mode = #tpu.pipeline_mode<synchronous>, transform_indices = @transform_5, window_bounds = array<i64: 3, 1, 128>}, {transform_indices = @transform_6, window_bounds = array<i64: 1, 64, 32>}]} {
    %c0 = arith.constant 0 : index
    %c0_0 = arith.constant 0 : index
    %c0_1 = arith.constant 0 : index
    %0 = vector.load %arg1[%c0, %c0_0, %c0_1] : memref<1x64x32xf32, #tpu.memory_space<vmem>>, vector<1x64x32xf32>
    %1 = vector.shape_cast %0 : vector<1x64x32xf32> to vector<64x32xf32>
    %cst = arith.constant dense<0.000000e+00> : vector<64xf32>
    %2 = vector.multi_reduction <add>, %1, %cst [1] : vector<64x32xf32> to vector<64xf32>
    %3 = vector.shape_cast %2 : vector<64xf32> to vector<64x1xf32>
    %cst_2 = arith.constant 3.200000e+01 : f32
    %4 = vector.broadcast %cst_2 : f32 to vector<64x1xf32>
    %5 = arith.divf %3, %4 : vector<64x1xf32>
    %6 = vector.broadcast %5 : vector<64x1xf32> to vector<64x32xf32>
    %7 = arith.subf %1, %6 : vector<64x32xf32>
    %8 = arith.mulf %7, %7 : vector<64x32xf32>
    %cst_3 = arith.constant dense<0.000000e+00> : vector<64xf32>
    %9 = vector.multi_reduction <add>, %8, %cst_3 [1] : vector<64x32xf32> to vector<64xf32>
    %10 = vector.shape_cast %9 : vector<64xf32> to vector<64x1xf32>
    %cst_4 = arith.constant 3.200000e+01 : f32
    %11 = vector.broadcast %cst_4 : f32 to vector<64x1xf32>
    %12 = arith.divf %10, %11 : vector<64x1xf32>
    %cst_5 = arith.constant 9.99999974E-6 : f32
    %13 = vector.broadcast %cst_5 : f32 to vector<64x1xf32>
    %14 = arith.addf %12, %13 : vector<64x1xf32>
    %15 = math.rsqrt %14 : vector<64x1xf32>
    %16 = vector.broadcast %15 : vector<64x1xf32> to vector<64x32xf32>
    %17 = arith.mulf %7, %16 : vector<64x32xf32>
    %c0_6 = arith.constant 0 : index
    %c0_7 = arith.constant 0 : index
    %18 = vector.load %arg2[%c0_6, %c0_7] : memref<1x32xf32, #tpu.memory_space<vmem>>, vector<1x32xf32>
    %19 = vector.broadcast %18 : vector<1x32xf32> to vector<64x32xf32>
    %20 = arith.mulf %17, %19 : vector<64x32xf32>
    %c0_8 = arith.constant 0 : index
    %c0_9 = arith.constant 0 : index
    %21 = vector.load %arg3[%c0_8, %c0_9] : memref<1x32xf32, #tpu.memory_space<vmem>>, vector<1x32xf32>
    %22 = vector.broadcast %21 : vector<1x32xf32> to vector<64x32xf32>
    %23 = arith.addf %20, %22 : vector<64x32xf32>
    %cst_10 = arith.constant 0.000000e+00 : f32
    %24 = vector.broadcast %cst_10 : f32 to vector<64x128xf32>
    %c0_11 = arith.constant 0 : index
    %c0_12 = arith.constant 0 : index
    %25 = vector.load %arg8[%c0_11, %c0_12] : memref<64x128xf32, #tpu.memory_space<vmem>>, vector<64x128xf32>
    tpu.vector_store %arg8[%c0_11, %c0_12], %24 {strides = array<i32>} : memref<64x128xf32, #tpu.memory_space<vmem>>, vector<64x128xf32>,
    %c0_13 = arith.constant 0 : index
    %c0_14 = arith.constant 0 : index
    %26 = vector.load %arg8[%c0_13, %c0_14] : memref<64x128xf32, #tpu.memory_space<vmem>>, vector<64x32xf32>
    tpu.vector_store %arg8[%c0_13, %c0_14], %23 {strides = array<i32>} : memref<64x128xf32, #tpu.memory_space<vmem>>, vector<64x32xf32>,
    %27 = tpu.iota {dimensions = array<i32: 0>} : vector<64x1xi32>
    %c7_i32 = arith.constant 7 : i32
    %28 = vector.broadcast %c7_i32 : i32 to vector<64x1xi32>
    %29 = arith.andi %27, %28 : vector<64x1xi32>
    %c0_i32 = arith.constant 0 : i32
    %30 = vector.broadcast %c0_i32 : i32 to vector<64x1xi32>
    %31 = arith.cmpi ne, %29, %30 : vector<64x1xi32>
    %32 = arith.extui %31 : vector<64x1xi1> to vector<64x1xi32>
    %33 = arith.sitofp %32 : vector<64x1xi32> to vector<64x1xf32>
    %c7_i32_15 = arith.constant 7 : i32
    %34 = vector.broadcast %c7_i32_15 : i32 to vector<64x1xi32>
    %35 = arith.cmpi ne, %29, %34 : vector<64x1xi32>
    %36 = arith.extui %35 : vector<64x1xi1> to vector<64x1xi32>
    %37 = arith.sitofp %36 : vector<64x1xi32> to vector<64x1xf32>
    %cst_16 = arith.constant 0.000000e+00 : f32
    %38 = vector.broadcast %cst_16 : f32 to vector<8x128xf32>
    %c0_17 = arith.constant 0 : index
    %c0_18 = arith.constant 0 : index
    %39 = vector.load %arg9[%c0_17, %c0_18] : memref<80x128xf32, #tpu.memory_space<vmem>>, vector<8x128xf32>
    tpu.vector_store %arg9[%c0_17, %c0_18], %38 {strides = array<i32>} : memref<80x128xf32, #tpu.memory_space<vmem>>, vector<8x128xf32>,
    %cst_19 = arith.constant 0.000000e+00 : f32
    %40 = vector.broadcast %cst_19 : f32 to vector<8x128xf32>
    %c72 = arith.constant 72 : index
    %c0_20 = arith.constant 0 : index
    %41 = vector.load %arg9[%c72, %c0_20] : memref<80x128xf32, #tpu.memory_space<vmem>>, vector<8x128xf32>
    tpu.vector_store %arg9[%c72, %c0_20], %40 {strides = array<i32>} : memref<80x128xf32, #tpu.memory_space<vmem>>, vector<8x128xf32>,
    %c0_21 = arith.constant 0 : index
    %c0_22 = arith.constant 0 : index
    %42 = vector.load %arg8[%c0_21, %c0_22] : memref<64x128xf32, #tpu.memory_space<vmem>>, vector<64x128xf32>
    %cst_23 = arith.constant 0.000000e+00 : f32
    %43 = vector.broadcast %cst_23 : f32 to vector<64x128xf32>
    %44 = arith.subf %43, %42 : vector<64x128xf32>
    %45 = math.exp %44 : vector<64x128xf32>
    %cst_24 = arith.constant 1.000000e+00 : f32
    %46 = vector.broadcast %cst_24 : f32 to vector<64x128xf32>
    %47 = arith.addf %46, %45 : vector<64x128xf32>
    %48 = arith.divf %42, %47 : vector<64x128xf32>
    %49 = arith.truncf %48 : vector<64x128xf32> to vector<64x128xbf16>
    %c0_25 = arith.constant 0 : index
    %c0_26 = arith.constant 0 : index
    %50 = vector.load %arg10[%c0_25, %c0_26] : memref<64x1152xbf16, #tpu.memory_space<vmem>>, vector<64x128xbf16>
    tpu.vector_store %arg10[%c0_25, %c0_26], %49 {strides = array<i32>} : memref<64x1152xbf16, #tpu.memory_space<vmem>>, vector<64x128xbf16>,
    %cst_27 = arith.constant -2.200000e+00 : f32
    %51 = vector.broadcast %cst_27 : f32 to vector<64x128xf32>
    %52 = arith.cmpf oge, %42, %51 : vector<64x128xf32>
    %53 = arith.extui %52 : vector<64x128xi1> to vector<64x128xi32>
    %54 = arith.sitofp %53 : vector<64x128xi32> to vector<64x128xf32>
    %cst_28 = arith.constant -1.800000e+00 : f32
    %55 = vector.broadcast %cst_28 : f32 to vector<64x128xf32>
    %56 = arith.cmpf oge, %42, %55 : vector<64x128xf32>
    %57 = arith.extui %56 : vector<64x128xi1> to vector<64x128xi32>
    %58 = arith.sitofp %57 : vector<64x128xi32> to vector<64x128xf32>
    %cst_29 = arith.constant -1.400000e+00 : f32
    %59 = vector.broadcast %cst_29 : f32 to vector<64x128xf32>
    %60 = arith.cmpf oge, %42, %59 : vector<64x128xf32>
    %61 = arith.extui %60 : vector<64x128xi1> to vector<64x128xi32>
    %62 = arith.sitofp %61 : vector<64x128xi32> to vector<64x128xf32>
    %cst_30 = arith.constant -1.000000e+00 : f32
    %63 = vector.broadcast %cst_30 : f32 to vector<64x128xf32>
    %64 = arith.cmpf oge, %42, %63 : vector<64x128xf32>
    %65 = arith.extui %64 : vector<64x128xi1> to vector<64x128xi32>
    %66 = arith.sitofp %65 : vector<64x128xi32> to vector<64x128xf32>
    %cst_31 = arith.constant -6.000000e-01 : f32
    %67 = vector.broadcast %cst_31 : f32 to vector<64x128xf32>
    %68 = arith.cmpf oge, %42, %67 : vector<64x128xf32>
    %69 = arith.extui %68 : vector<64x128xi1> to vector<64x128xi32>
    %70 = arith.sitofp %69 : vector<64x128xi32> to vector<64x128xf32>
    %cst_32 = arith.constant -2.000000e-01 : f32
    %71 = vector.broadcast %cst_32 : f32 to vector<64x128xf32>
    %72 = arith.cmpf oge, %42, %71 : vector<64x128xf32>
    %73 = arith.extui %72 : vector<64x128xi1> to vector<64x128xi32>
    %74 = arith.sitofp %73 : vector<64x128xi32> to vector<64x128xf32>
    %cst_33 = arith.constant 2.000000e-01 : f32
    %75 = vector.broadcast %cst_33 : f32 to vector<64x128xf32>
    %76 = arith.cmpf oge, %42, %75 : vector<64x128xf32>
    %77 = arith.extui %76 : vector<64x128xi1> to vector<64x128xi32>
    %78 = arith.sitofp %77 : vector<64x128xi32> to vector<64x128xf32>
    %cst_34 = arith.constant 6.000000e-01 : f32
    %79 = vector.broadcast %cst_34 : f32 to vector<64x128xf32>
    %80 = arith.cmpf oge, %42, %79 : vector<64x128xf32>
    %81 = arith.extui %80 : vector<64x128xi1> to vector<64x128xi32>
    %82 = arith.sitofp %81 : vector<64x128xi32> to vector<64x128xf32>
    %cst_35 = arith.constant 1.000000e+00 : f32
    %83 = vector.broadcast %cst_35 : f32 to vector<64x128xf32>
    %84 = arith.cmpf oge, %42, %83 : vector<64x128xf32>
    %85 = arith.extui %84 : vector<64x128xi1> to vector<64x128xi32>
    %86 = arith.sitofp %85 : vector<64x128xi32> to vector<64x128xf32>
    %cst_36 = arith.constant 1.400000e+00 : f32
    %87 = vector.broadcast %cst_36 : f32 to vector<64x128xf32>
    %88 = arith.cmpf oge, %42, %87 : vector<64x128xf32>
    %89 = arith.extui %88 : vector<64x128xi1> to vector<64x128xi32>
    %90 = arith.sitofp %89 : vector<64x128xi32> to vector<64x128xf32>
    %cst_37 = arith.constant 1.800000e+00 : f32
    %91 = vector.broadcast %cst_37 : f32 to vector<64x128xf32>
    %92 = arith.cmpf oge, %42, %91 : vector<64x128xf32>
    %93 = arith.extui %92 : vector<64x128xi1> to vector<64x128xi32>
    %94 = arith.sitofp %93 : vector<64x128xi32> to vector<64x128xf32>
    %cst_38 = arith.constant 2.200000e+00 : f32
    %95 = vector.broadcast %cst_38 : f32 to vector<64x128xf32>
    %96 = arith.cmpf oge, %42, %95 : vector<64x128xf32>
    %97 = arith.extui %96 : vector<64x128xi1> to vector<64x128xi32>
    %98 = arith.sitofp %97 : vector<64x128xi32> to vector<64x128xf32>
    %99 = arith.subf %54, %58 : vector<64x128xf32>
    %100 = arith.subf %58, %62 : vector<64x128xf32>
    %101 = arith.subf %62, %66 : vector<64x128xf32>
    %102 = arith.subf %66, %70 : vector<64x128xf32>
    %103 = arith.subf %70, %74 : vector<64x128xf32>
    %104 = arith.subf %74, %78 : vector<64x128xf32>
    %105 = arith.subf %78, %82 : vector<64x128xf32>
    %106 = arith.subf %82, %86 : vector<64x128xf32>
    %107 = arith.subf %86, %90 : vector<64x128xf32>
    %108 = arith.subf %90, %94 : vector<64x128xf32>
    %109 = arith.subf %94, %98 : vector<64x128xf32>
    %cst_39 = arith.constant -2.200000e+00 : f32
    %110 = vector.broadcast %cst_39 : f32 to vector<64x128xf32>
    %111 = arith.subf %42, %110 : vector<64x128xf32>
    %cst_40 = arith.constant -1.800000e+00 : f32
    %112 = vector.broadcast %cst_40 : f32 to vector<64x128xf32>
    %113 = arith.subf %42, %112 : vector<64x128xf32>
    %cst_41 = arith.constant -1.400000e+00 : f32
    %114 = vector.broadcast %cst_41 : f32 to vector<64x128xf32>
    %115 = arith.subf %42, %114 : vector<64x128xf32>
    %cst_42 = arith.constant -1.000000e+00 : f32
    %116 = vector.broadcast %cst_42 : f32 to vector<64x128xf32>
    %117 = arith.subf %42, %116 : vector<64x128xf32>
    %cst_43 = arith.constant -6.000000e-01 : f32
    %118 = vector.broadcast %cst_43 : f32 to vector<64x128xf32>
    %119 = arith.subf %42, %118 : vector<64x128xf32>
    %cst_44 = arith.constant -2.000000e-01 : f32
    %120 = vector.broadcast %cst_44 : f32 to vector<64x128xf32>
    %121 = arith.subf %42, %120 : vector<64x128xf32>
    %cst_45 = arith.constant 2.000000e-01 : f32
    %122 = vector.broadcast %cst_45 : f32 to vector<64x128xf32>
    %123 = arith.subf %42, %122 : vector<64x128xf32>
    %cst_46 = arith.constant 6.000000e-01 : f32
    %124 = vector.broadcast %cst_46 : f32 to vector<64x128xf32>
    %125 = arith.subf %42, %124 : vector<64x128xf32>
    %cst_47 = arith.constant 1.000000e+00 : f32
    %126 = vector.broadcast %cst_47 : f32 to vector<64x128xf32>
    %127 = arith.subf %42, %126 : vector<64x128xf32>
    %cst_48 = arith.constant 1.400000e+00 : f32
    %128 = vector.broadcast %cst_48 : f32 to vector<64x128xf32>
    %129 = arith.subf %42, %128 : vector<64x128xf32>
    %cst_49 = arith.constant 1.800000e+00 : f32
    %130 = vector.broadcast %cst_49 : f32 to vector<64x128xf32>
    %131 = arith.subf %42, %130 : vector<64x128xf32>
    %cst_50 = arith.constant 2.200000e+00 : f32
    %132 = vector.broadcast %cst_50 : f32 to vector<64x128xf32>
    %133 = arith.subf %42, %132 : vector<64x128xf32>
    %134 = arith.mulf %111, %99 : vector<64x128xf32>
    %135 = arith.mulf %115, %100 : vector<64x128xf32>
    %136 = arith.subf %134, %135 : vector<64x128xf32>
    %137 = arith.mulf %113, %100 : vector<64x128xf32>
    %138 = arith.mulf %117, %101 : vector<64x128xf32>
    %139 = arith.subf %137, %138 : vector<64x128xf32>
    %140 = arith.mulf %115, %101 : vector<64x128xf32>
    %141 = arith.mulf %119, %102 : vector<64x128xf32>
    %142 = arith.subf %140, %141 : vector<64x128xf32>
    %143 = arith.mulf %117, %102 : vector<64x128xf32>
    %144 = arith.mulf %121, %103 : vector<64x128xf32>
    %145 = arith.subf %143, %144 : vector<64x128xf32>
    %146 = arith.mulf %119, %103 : vector<64x128xf32>
    %147 = arith.mulf %123, %104 : vector<64x128xf32>
    %148 = arith.subf %146, %147 : vector<64x128xf32>
    %149 = arith.mulf %121, %104 : vector<64x128xf32>
    %150 = arith.mulf %125, %105 : vector<64x128xf32>
    %151 = arith.subf %149, %150 : vector<64x128xf32>
    %152 = arith.mulf %123, %105 : vector<64x128xf32>
    %153 = arith.mulf %127, %106 : vector<64x128xf32>
    %154 = arith.subf %152, %153 : vector<64x128xf32>
    %155 = arith.mulf %125, %106 : vector<64x128xf32>
    %156 = arith.mulf %129, %107 : vector<64x128xf32>
    %157 = arith.subf %155, %156 : vector<64x128xf32>
    %158 = arith.mulf %127, %107 : vector<64x128xf32>
    %159 = arith.mulf %131, %108 : vector<64x128xf32>
    %160 = arith.subf %158, %159 : vector<64x128xf32>
    %161 = arith.mulf %129, %108 : vector<64x128xf32>
    %162 = arith.mulf %133, %109 : vector<64x128xf32>
    %163 = arith.subf %161, %162 : vector<64x128xf32>
    %164 = arith.mulf %111, %136 : vector<64x128xf32>
    %165 = arith.mulf %117, %139 : vector<64x128xf32>
    %166 = arith.subf %164, %165 : vector<64x128xf32>
    %167 = arith.mulf %113, %139 : vector<64x128xf32>
    %168 = arith.mulf %119, %142 : vector<64x128xf32>
    %169 = arith.subf %167, %168 : vector<64x128xf32>
    %170 = arith.mulf %115, %142 : vector<64x128xf32>
    %171 = arith.mulf %121, %145 : vector<64x128xf32>
    %172 = arith.subf %170, %171 : vector<64x128xf32>
    %173 = arith.mulf %117, %145 : vector<64x128xf32>
    %174 = arith.mulf %123, %148 : vector<64x128xf32>
    %175 = arith.subf %173, %174 : vector<64x128xf32>
    %176 = arith.mulf %119, %148 : vector<64x128xf32>
    %177 = arith.mulf %125, %151 : vector<64x128xf32>
    %178 = arith.subf %176, %177 : vector<64x128xf32>
    %179 = arith.mulf %121, %151 : vector<64x128xf32>
    %180 = arith.mulf %127, %154 : vector<64x128xf32>
    %181 = arith.subf %179, %180 : vector<64x128xf32>
    %182 = arith.mulf %123, %154 : vector<64x128xf32>
    %183 = arith.mulf %129, %157 : vector<64x128xf32>
    %184 = arith.subf %182, %183 : vector<64x128xf32>
    %185 = arith.mulf %125, %157 : vector<64x128xf32>
    %186 = arith.mulf %131, %160 : vector<64x128xf32>
    %187 = arith.subf %185, %186 : vector<64x128xf32>
    %188 = arith.mulf %127, %160 : vector<64x128xf32>
    %189 = arith.mulf %133, %163 : vector<64x128xf32>
    %190 = arith.subf %188, %189 : vector<64x128xf32>
    %191 = arith.mulf %111, %166 : vector<64x128xf32>
    %192 = arith.mulf %119, %169 : vector<64x128xf32>
    %193 = arith.subf %191, %192 : vector<64x128xf32>
    %194 = arith.mulf %113, %169 : vector<64x128xf32>
    %195 = arith.mulf %121, %172 : vector<64x128xf32>
    %196 = arith.subf %194, %195 : vector<64x128xf32>
    %197 = arith.mulf %115, %172 : vector<64x128xf32>
    %198 = arith.mulf %123, %175 : vector<64x128xf32>
    %199 = arith.subf %197, %198 : vector<64x128xf32>
    %200 = arith.mulf %117, %175 : vector<64x128xf32>
    %201 = arith.mulf %125, %178 : vector<64x128xf32>
    %202 = arith.subf %200, %201 : vector<64x128xf32>
    %203 = arith.mulf %119, %178 : vector<64x128xf32>
    %204 = arith.mulf %127, %181 : vector<64x128xf32>
    %205 = arith.subf %203, %204 : vector<64x128xf32>
    %206 = arith.mulf %121, %181 : vector<64x128xf32>
    %207 = arith.mulf %129, %184 : vector<64x128xf32>
    %208 = arith.subf %206, %207 : vector<64x128xf32>
    %209 = arith.mulf %123, %184 : vector<64x128xf32>
    %210 = arith.mulf %131, %187 : vector<64x128xf32>
    %211 = arith.subf %209, %210 : vector<64x128xf32>
    %212 = arith.mulf %125, %187 : vector<64x128xf32>
    %213 = arith.mulf %133, %190 : vector<64x128xf32>
    %214 = arith.subf %212, %213 : vector<64x128xf32>
    %215 = arith.truncf %193 : vector<64x128xf32> to vector<64x128xbf16>
    %c0_51 = arith.constant 0 : index
    %c128 = arith.constant 128 : index
    %216 = vector.load %arg10[%c0_51, %c128] : memref<64x1152xbf16, #tpu.memory_space<vmem>>, vector<64x128xbf16>
    tpu.vector_store %arg10[%c0_51, %c128], %215 {strides = array<i32>} : memref<64x1152xbf16, #tpu.memory_space<vmem>>, vector<64x128xbf16>,
    %217 = arith.truncf %196 : vector<64x128xf32> to vector<64x128xbf16>
    %c0_52 = arith.constant 0 : index
    %c256 = arith.constant 256 : index
    %218 = vector.load %arg10[%c0_52, %c256] : memref<64x1152xbf16, #tpu.memory_space<vmem>>, vector<64x128xbf16>
    tpu.vector_store %arg10[%c0_52, %c256], %217 {strides = array<i32>} : memref<64x1152xbf16, #tpu.memory_space<vmem>>, vector<64x128xbf16>,
    %219 = arith.truncf %199 : vector<64x128xf32> to vector<64x128xbf16>
    %c0_53 = arith.constant 0 : index
    %c384 = arith.constant 384 : index
    %220 = vector.load %arg10[%c0_53, %c384] : memref<64x1152xbf16, #tpu.memory_space<vmem>>, vector<64x128xbf16>
    tpu.vector_store %arg10[%c0_53, %c384], %219 {strides = array<i32>} : memref<64x1152xbf16, #tpu.memory_space<vmem>>, vector<64x128xbf16>,
    %221 = arith.truncf %202 : vector<64x128xf32> to vector<64x128xbf16>
    %c0_54 = arith.constant 0 : index
    %c512 = arith.constant 512 : index
    %222 = vector.load %arg10[%c0_54, %c512] : memref<64x1152xbf16, #tpu.memory_space<vmem>>, vector<64x128xbf16>
    tpu.vector_store %arg10[%c0_54, %c512], %221 {strides = array<i32>} : memref<64x1152xbf16, #tpu.memory_space<vmem>>, vector<64x128xbf16>,
    %223 = arith.truncf %205 : vector<64x128xf32> to vector<64x128xbf16>
    %c0_55 = arith.constant 0 : index
    %c640 = arith.constant 640 : index
    %224 = vector.load %arg10[%c0_55, %c640] : memref<64x1152xbf16, #tpu.memory_space<vmem>>, vector<64x128xbf16>
    tpu.vector_store %arg10[%c0_55, %c640], %223 {strides = array<i32>} : memref<64x1152xbf16, #tpu.memory_space<vmem>>, vector<64x128xbf16>,
    %225 = arith.truncf %208 : vector<64x128xf32> to vector<64x128xbf16>
    %c0_56 = arith.constant 0 : index
    %c768 = arith.constant 768 : index
    %226 = vector.load %arg10[%c0_56, %c768] : memref<64x1152xbf16, #tpu.memory_space<vmem>>, vector<64x128xbf16>
    tpu.vector_store %arg10[%c0_56, %c768], %225 {strides = array<i32>} : memref<64x1152xbf16, #tpu.memory_space<vmem>>, vector<64x128xbf16>,
    %227 = arith.truncf %211 : vector<64x128xf32> to vector<64x128xbf16>
    %c0_57 = arith.constant 0 : index
    %c896 = arith.constant 896 : index
    %228 = vector.load %arg10[%c0_57, %c896] : memref<64x1152xbf16, #tpu.memory_space<vmem>>, vector<64x128xbf16>
    tpu.vector_store %arg10[%c0_57, %c896], %227 {strides = array<i32>} : memref<64x1152xbf16, #tpu.memory_space<vmem>>, vector<64x128xbf16>,
    %229 = arith.truncf %214 : vector<64x128xf32> to vector<64x128xbf16>
    %c0_58 = arith.constant 0 : index
    %c1024 = arith.constant 1024 : index
    %230 = vector.load %arg10[%c0_58, %c1024] : memref<64x1152xbf16, #tpu.memory_space<vmem>>, vector<64x128xbf16>
    tpu.vector_store %arg10[%c0_58, %c1024], %229 {strides = array<i32>} : memref<64x1152xbf16, #tpu.memory_space<vmem>>, vector<64x128xbf16>,
    %c0_59 = arith.constant 0 : index
    %c0_60 = arith.constant 0 : index
    %231 = vector.load %arg10[%c0_59, %c0_60] : memref<64x1152xbf16, #tpu.memory_space<vmem>>, vector<64x1152xbf16>
    %c0_61 = arith.constant 0 : index
    %c0_62 = arith.constant 0 : index
    %c0_63 = arith.constant 0 : index
    %232 = vector.load %arg4[%c0_61, %c0_62, %c0_63] : memref<3x1152x128xbf16, #tpu.memory_space<vmem>>, vector<1x1152x128xbf16>
    %233 = vector.shape_cast %232 : vector<1x1152x128xbf16> to vector<1152x128xbf16>
    %cst_64 = arith.constant dense<0.000000e+00> : vector<64x128xf32>
    %234 = tpu.matmul %231, %233, %cst_64 {dimension_numbers = #tpu.dot_dimension_numbers<[1], [0], [0], [1], [0, 0, 1, 1], [], []>} : vector<64x1152xbf16>, vector<1152x128xbf16>, vector<64x128xf32> -> vector<64x128xf32>
    %c8 = arith.constant 8 : index
    %c0_65 = arith.constant 0 : index
    %235 = vector.load %arg9[%c8, %c0_65] : memref<80x128xf32, #tpu.memory_space<vmem>>, vector<64x128xf32>
    tpu.vector_store %arg9[%c8, %c0_65], %234 {strides = array<i32>} : memref<80x128xf32, #tpu.memory_space<vmem>>, vector<64x128xf32>,
    %c0_66 = arith.constant 0 : index
    %c0_67 = arith.constant 0 : index
    %c0_68 = arith.constant 0 : index
    %236 = vector.load %arg5[%c0_66, %c0_67, %c0_68] : memref<3x9x128xf32, #tpu.memory_space<vmem>>, vector<1x9x128xf32>
    %237 = vector.shape_cast %236 : vector<1x9x128xf32> to vector<9x128xf32>
    %c0_69 = arith.constant 0 : index
    %c0_70 = arith.constant 0 : index
    %238 = vector.load %arg9[%c0_69, %c0_70] : memref<80x128xf32, #tpu.memory_space<vmem>>, vector<64x128xf32>
    %c8_71 = arith.constant 8 : index
    %c0_72 = arith.constant 0 : index
    %239 = vector.load %arg9[%c8_71, %c0_72] : memref<80x128xf32, #tpu.memory_space<vmem>>, vector<64x128xf32>
    %c16 = arith.constant 16 : index
    %c0_73 = arith.constant 0 : index
    %240 = vector.load %arg9[%c16, %c0_73] : memref<80x128xf32, #tpu.memory_space<vmem>>, vector<64x128xf32>
    %241 = vector.extract_strided_slice %237 {offsets = [0, 0], sizes = [1, 128], strides = [1, 1]} : vector<9x128xf32> to vector<1x128xf32>
    %242 = vector.broadcast %241 : vector<1x128xf32> to vector<64x128xf32>
    %243 = arith.mulf %238, %242 : vector<64x128xf32>
    %244 = vector.extract_strided_slice %237 {offsets = [3, 0], sizes = [1, 128], strides = [1, 1]} : vector<9x128xf32> to vector<1x128xf32>
    %245 = vector.broadcast %244 : vector<1x128xf32> to vector<64x128xf32>
    %246 = arith.mulf %239, %245 : vector<64x128xf32>
    %247 = arith.addf %243, %246 : vector<64x128xf32>
    %248 = vector.extract_strided_slice %237 {offsets = [6, 0], sizes = [1, 128], strides = [1, 1]} : vector<9x128xf32> to vector<1x128xf32>
    %249 = vector.broadcast %248 : vector<1x128xf32> to vector<64x128xf32>
    %250 = arith.mulf %240, %249 : vector<64x128xf32>
    %251 = arith.addf %247, %250 : vector<64x128xf32>
    %252 = vector.extract_strided_slice %237 {offsets = [1, 0], sizes = [1, 128], strides = [1, 1]} : vector<9x128xf32> to vector<1x128xf32>
    %253 = vector.broadcast %252 : vector<1x128xf32> to vector<64x128xf32>
    %254 = arith.mulf %238, %253 : vector<64x128xf32>
    %255 = vector.extract_strided_slice %237 {offsets = [4, 0], sizes = [1, 128], strides = [1, 1]} : vector<9x128xf32> to vector<1x128xf32>
    %256 = vector.broadcast %255 : vector<1x128xf32> to vector<64x128xf32>
    %257 = arith.mulf %239, %256 : vector<64x128xf32>
    %258 = arith.addf %254, %257 : vector<64x128xf32>
    %259 = vector.extract_strided_slice %237 {offsets = [7, 0], sizes = [1, 128], strides = [1, 1]} : vector<9x128xf32> to vector<1x128xf32>
    %260 = vector.broadcast %259 : vector<1x128xf32> to vector<64x128xf32>
    %261 = arith.mulf %240, %260 : vector<64x128xf32>
    %262 = arith.addf %258, %261 : vector<64x128xf32>
    %263 = vector.extract_strided_slice %237 {offsets = [2, 0], sizes = [1, 128], strides = [1, 1]} : vector<9x128xf32> to vector<1x128xf32>
    %264 = vector.broadcast %263 : vector<1x128xf32> to vector<64x128xf32>
    %265 = arith.mulf %238, %264 : vector<64x128xf32>
    %266 = vector.extract_strided_slice %237 {offsets = [5, 0], sizes = [1, 128], strides = [1, 1]} : vector<9x128xf32> to vector<1x128xf32>
    %267 = vector.broadcast %266 : vector<1x128xf32> to vector<64x128xf32>
    %268 = arith.mulf %239, %267 : vector<64x128xf32>
    %269 = arith.addf %265, %268 : vector<64x128xf32>
    %270 = vector.extract_strided_slice %237 {offsets = [8, 0], sizes = [1, 128], strides = [1, 1]} : vector<9x128xf32> to vector<1x128xf32>
    %271 = vector.broadcast %270 : vector<1x128xf32> to vector<64x128xf32>
    %272 = arith.mulf %240, %271 : vector<64x128xf32>
    %273 = arith.addf %269, %272 : vector<64x128xf32>
    %c0_74 = arith.constant 0 : index
    %c0_75 = arith.constant 0 : index
    %c0_76 = arith.constant 0 : index
    %274 = vector.load %arg6[%c0_74, %c0_75, %c0_76] : memref<3x1x128xf32, #tpu.memory_space<vmem>>, vector<1x1x128xf32>
    %275 = vector.shape_cast %274 : vector<1x1x128xf32> to vector<1x128xf32>
    %276 = vector.broadcast %275 : vector<1x128xf32> to vector<64x128xf32>
    %277 = arith.addf %262, %276 : vector<64x128xf32>
    %c63_i32 = arith.constant 63 : i32
    %278 = tpu.dynamic_rotate %273 by %c63_i32 dim 0 : vector<64x128xf32>, i32 -> vector<64x128xf32>
    %279 = vector.broadcast %37 : vector<64x1xf32> to vector<64x128xf32>
    %280 = arith.mulf %278, %279 : vector<64x128xf32>
    %281 = arith.addf %277, %280 : vector<64x128xf32>
    %c1_i32 = arith.constant 1 : i32
    %282 = tpu.dynamic_rotate %251 by %c1_i32 dim 0 : vector<64x128xf32>, i32 -> vector<64x128xf32>
    %283 = vector.broadcast %33 : vector<64x1xf32> to vector<64x128xf32>
    %284 = arith.mulf %282, %283 : vector<64x128xf32>
    %285 = arith.addf %281, %284 : vector<64x128xf32>
    %c0_77 = arith.constant 0 : index
    %c0_78 = arith.constant 0 : index
    %286 = vector.load %arg8[%c0_77, %c0_78] : memref<64x128xf32, #tpu.memory_space<vmem>>, vector<64x128xf32>
    tpu.vector_store %arg8[%c0_77, %c0_78], %285 {strides = array<i32>} : memref<64x128xf32, #tpu.memory_space<vmem>>, vector<64x128xf32>,
    %c0_79 = arith.constant 0 : index
    %c0_80 = arith.constant 0 : index
    %287 = vector.load %arg8[%c0_79, %c0_80] : memref<64x128xf32, #tpu.memory_space<vmem>>, vector<64x128xf32>
    %cst_81 = arith.constant 0.000000e+00 : f32
    %288 = vector.broadcast %cst_81 : f32 to vector<64x128xf32>
    %289 = arith.subf %288, %287 : vector<64x128xf32>
    %290 = math.exp %289 : vector<64x128xf32>
    %cst_82 = arith.constant 1.000000e+00 : f32
    %291 = vector.broadcast %cst_82 : f32 to vector<64x128xf32>
    %292 = arith.addf %291, %290 : vector<64x128xf32>
    %293 = arith.divf %287, %292 : vector<64x128xf32>
    %294 = arith.truncf %293 : vector<64x128xf32> to vector<64x128xbf16>
    %c0_83 = arith.constant 0 : index
    %c0_84 = arith.constant 0 : index
    %295 = vector.load %arg10[%c0_83, %c0_84] : memref<64x1152xbf16, #tpu.memory_space<vmem>>, vector<64x128xbf16>
    tpu.vector_store %arg10[%c0_83, %c0_84], %294 {strides = array<i32>} : memref<64x1152xbf16, #tpu.memory_space<vmem>>, vector<64x128xbf16>,
    %cst_85 = arith.constant -2.200000e+00 : f32
    %296 = vector.broadcast %cst_85 : f32 to vector<64x128xf32>
    %297 = arith.cmpf oge, %287, %296 : vector<64x128xf32>
    %298 = arith.extui %297 : vector<64x128xi1> to vector<64x128xi32>
    %299 = arith.sitofp %298 : vector<64x128xi32> to vector<64x128xf32>
    %cst_86 = arith.constant -1.800000e+00 : f32
    %300 = vector.broadcast %cst_86 : f32 to vector<64x128xf32>
    %301 = arith.cmpf oge, %287, %300 : vector<64x128xf32>
    %302 = arith.extui %301 : vector<64x128xi1> to vector<64x128xi32>
    %303 = arith.sitofp %302 : vector<64x128xi32> to vector<64x128xf32>
    %cst_87 = arith.constant -1.400000e+00 : f32
    %304 = vector.broadcast %cst_87 : f32 to vector<64x128xf32>
    %305 = arith.cmpf oge, %287, %304 : vector<64x128xf32>
    %306 = arith.extui %305 : vector<64x128xi1> to vector<64x128xi32>
    %307 = arith.sitofp %306 : vector<64x128xi32> to vector<64x128xf32>
    %cst_88 = arith.constant -1.000000e+00 : f32
    %308 = vector.broadcast %cst_88 : f32 to vector<64x128xf32>
    %309 = arith.cmpf oge, %287, %308 : vector<64x128xf32>
    %310 = arith.extui %309 : vector<64x128xi1> to vector<64x128xi32>
    %311 = arith.sitofp %310 : vector<64x128xi32> to vector<64x128xf32>
    %cst_89 = arith.constant -6.000000e-01 : f32
    %312 = vector.broadcast %cst_89 : f32 to vector<64x128xf32>
    %313 = arith.cmpf oge, %287, %312 : vector<64x128xf32>
    %314 = arith.extui %313 : vector<64x128xi1> to vector<64x128xi32>
    %315 = arith.sitofp %314 : vector<64x128xi32> to vector<64x128xf32>
    %cst_90 = arith.constant -2.000000e-01 : f32
    %316 = vector.broadcast %cst_90 : f32 to vector<64x128xf32>
    %317 = arith.cmpf oge, %287, %316 : vector<64x128xf32>
    %318 = arith.extui %317 : vector<64x128xi1> to vector<64x128xi32>
    %319 = arith.sitofp %318 : vector<64x128xi32> to vector<64x128xf32>
    %cst_91 = arith.constant 2.000000e-01 : f32
    %320 = vector.broadcast %cst_91 : f32 to vector<64x128xf32>
    %321 = arith.cmpf oge, %287, %320 : vector<64x128xf32>
    %322 = arith.extui %321 : vector<64x128xi1> to vector<64x128xi32>
    %323 = arith.sitofp %322 : vector<64x128xi32> to vector<64x128xf32>
    %cst_92 = arith.constant 6.000000e-01 : f32
    %324 = vector.broadcast %cst_92 : f32 to vector<64x128xf32>
    %325 = arith.cmpf oge, %287, %324 : vector<64x128xf32>
    %326 = arith.extui %325 : vector<64x128xi1> to vector<64x128xi32>
    %327 = arith.sitofp %326 : vector<64x128xi32> to vector<64x128xf32>
    %cst_93 = arith.constant 1.000000e+00 : f32
    %328 = vector.broadcast %cst_93 : f32 to vector<64x128xf32>
    %329 = arith.cmpf oge, %287, %328 : vector<64x128xf32>
    %330 = arith.extui %329 : vector<64x128xi1> to vector<64x128xi32>
    %331 = arith.sitofp %330 : vector<64x128xi32> to vector<64x128xf32>
    %cst_94 = arith.constant 1.400000e+00 : f32
    %332 = vector.broadcast %cst_94 : f32 to vector<64x128xf32>
    %333 = arith.cmpf oge, %287, %332 : vector<64x128xf32>
    %334 = arith.extui %333 : vector<64x128xi1> to vector<64x128xi32>
    %335 = arith.sitofp %334 : vector<64x128xi32> to vector<64x128xf32>
    %cst_95 = arith.constant 1.800000e+00 : f32
    %336 = vector.broadcast %cst_95 : f32 to vector<64x128xf32>
    %337 = arith.cmpf oge, %287, %336 : vector<64x128xf32>
    %338 = arith.extui %337 : vector<64x128xi1> to vector<64x128xi32>
    %339 = arith.sitofp %338 : vector<64x128xi32> to vector<64x128xf32>
    %cst_96 = arith.constant 2.200000e+00 : f32
    %340 = vector.broadcast %cst_96 : f32 to vector<64x128xf32>
    %341 = arith.cmpf oge, %287, %340 : vector<64x128xf32>
    %342 = arith.extui %341 : vector<64x128xi1> to vector<64x128xi32>
    %343 = arith.sitofp %342 : vector<64x128xi32> to vector<64x128xf32>
    %344 = arith.subf %299, %303 : vector<64x128xf32>
    %345 = arith.subf %303, %307 : vector<64x128xf32>
    %346 = arith.subf %307, %311 : vector<64x128xf32>
    %347 = arith.subf %311, %315 : vector<64x128xf32>
    %348 = arith.subf %315, %319 : vector<64x128xf32>
    %349 = arith.subf %319, %323 : vector<64x128xf32>
    %350 = arith.subf %323, %327 : vector<64x128xf32>
    %351 = arith.subf %327, %331 : vector<64x128xf32>
    %352 = arith.subf %331, %335 : vector<64x128xf32>
    %353 = arith.subf %335, %339 : vector<64x128xf32>
    %354 = arith.subf %339, %343 : vector<64x128xf32>
    %cst_97 = arith.constant -2.200000e+00 : f32
    %355 = vector.broadcast %cst_97 : f32 to vector<64x128xf32>
    %356 = arith.subf %287, %355 : vector<64x128xf32>
    %cst_98 = arith.constant -1.800000e+00 : f32
    %357 = vector.broadcast %cst_98 : f32 to vector<64x128xf32>
    %358 = arith.subf %287, %357 : vector<64x128xf32>
    %cst_99 = arith.constant -1.400000e+00 : f32
    %359 = vector.broadcast %cst_99 : f32 to vector<64x128xf32>
    %360 = arith.subf %287, %359 : vector<64x128xf32>
    %cst_100 = arith.constant -1.000000e+00 : f32
    %361 = vector.broadcast %cst_100 : f32 to vector<64x128xf32>
    %362 = arith.subf %287, %361 : vector<64x128xf32>
    %cst_101 = arith.constant -6.000000e-01 : f32
    %363 = vector.broadcast %cst_101 : f32 to vector<64x128xf32>
    %364 = arith.subf %287, %363 : vector<64x128xf32>
    %cst_102 = arith.constant -2.000000e-01 : f32
    %365 = vector.broadcast %cst_102 : f32 to vector<64x128xf32>
    %366 = arith.subf %287, %365 : vector<64x128xf32>
    %cst_103 = arith.constant 2.000000e-01 : f32
    %367 = vector.broadcast %cst_103 : f32 to vector<64x128xf32>
    %368 = arith.subf %287, %367 : vector<64x128xf32>
    %cst_104 = arith.constant 6.000000e-01 : f32
    %369 = vector.broadcast %cst_104 : f32 to vector<64x128xf32>
    %370 = arith.subf %287, %369 : vector<64x128xf32>
    %cst_105 = arith.constant 1.000000e+00 : f32
    %371 = vector.broadcast %cst_105 : f32 to vector<64x128xf32>
    %372 = arith.subf %287, %371 : vector<64x128xf32>
    %cst_106 = arith.constant 1.400000e+00 : f32
    %373 = vector.broadcast %cst_106 : f32 to vector<64x128xf32>
    %374 = arith.subf %287, %373 : vector<64x128xf32>
    %cst_107 = arith.constant 1.800000e+00 : f32
    %375 = vector.broadcast %cst_107 : f32 to vector<64x128xf32>
    %376 = arith.subf %287, %375 : vector<64x128xf32>
    %cst_108 = arith.constant 2.200000e+00 : f32
    %377 = vector.broadcast %cst_108 : f32 to vector<64x128xf32>
    %378 = arith.subf %287, %377 : vector<64x128xf32>
    %379 = arith.mulf %356, %344 : vector<64x128xf32>
    %380 = arith.mulf %360, %345 : vector<64x128xf32>
    %381 = arith.subf %379, %380 : vector<64x128xf32>
    %382 = arith.mulf %358, %345 : vector<64x128xf32>
    %383 = arith.mulf %362, %346 : vector<64x128xf32>
    %384 = arith.subf %382, %383 : vector<64x128xf32>
    %385 = arith.mulf %360, %346 : vector<64x128xf32>
    %386 = arith.mulf %364, %347 : vector<64x128xf32>
    %387 = arith.subf %385, %386 : vector<64x128xf32>
    %388 = arith.mulf %362, %347 : vector<64x128xf32>
    %389 = arith.mulf %366, %348 : vector<64x128xf32>
    %390 = arith.subf %388, %389 : vector<64x128xf32>
    %391 = arith.mulf %364, %348 : vector<64x128xf32>
    %392 = arith.mulf %368, %349 : vector<64x128xf32>
    %393 = arith.subf %391, %392 : vector<64x128xf32>
    %394 = arith.mulf %366, %349 : vector<64x128xf32>
    %395 = arith.mulf %370, %350 : vector<64x128xf32>
    %396 = arith.subf %394, %395 : vector<64x128xf32>
    %397 = arith.mulf %368, %350 : vector<64x128xf32>
    %398 = arith.mulf %372, %351 : vector<64x128xf32>
    %399 = arith.subf %397, %398 : vector<64x128xf32>
    %400 = arith.mulf %370, %351 : vector<64x128xf32>
    %401 = arith.mulf %374, %352 : vector<64x128xf32>
    %402 = arith.subf %400, %401 : vector<64x128xf32>
    %403 = arith.mulf %372, %352 : vector<64x128xf32>
    %404 = arith.mulf %376, %353 : vector<64x128xf32>
    %405 = arith.subf %403, %404 : vector<64x128xf32>
    %406 = arith.mulf %374, %353 : vector<64x128xf32>
    %407 = arith.mulf %378, %354 : vector<64x128xf32>
    %408 = arith.subf %406, %407 : vector<64x128xf32>
    %409 = arith.mulf %356, %381 : vector<64x128xf32>
    %410 = arith.mulf %362, %384 : vector<64x128xf32>
    %411 = arith.subf %409, %410 : vector<64x128xf32>
    %412 = arith.mulf %358, %384 : vector<64x128xf32>
    %413 = arith.mulf %364, %387 : vector<64x128xf32>
    %414 = arith.subf %412, %413 : vector<64x128xf32>
    %415 = arith.mulf %360, %387 : vector<64x128xf32>
    %416 = arith.mulf %366, %390 : vector<64x128xf32>
    %417 = arith.subf %415, %416 : vector<64x128xf32>
    %418 = arith.mulf %362, %390 : vector<64x128xf32>
    %419 = arith.mulf %368, %393 : vector<64x128xf32>
    %420 = arith.subf %418, %419 : vector<64x128xf32>
    %421 = arith.mulf %364, %393 : vector<64x128xf32>
    %422 = arith.mulf %370, %396 : vector<64x128xf32>
    %423 = arith.subf %421, %422 : vector<64x128xf32>
    %424 = arith.mulf %366, %396 : vector<64x128xf32>
    %425 = arith.mulf %372, %399 : vector<64x128xf32>
    %426 = arith.subf %424, %425 : vector<64x128xf32>
    %427 = arith.mulf %368, %399 : vector<64x128xf32>
    %428 = arith.mulf %374, %402 : vector<64x128xf32>
    %429 = arith.subf %427, %428 : vector<64x128xf32>
    %430 = arith.mulf %370, %402 : vector<64x128xf32>
    %431 = arith.mulf %376, %405 : vector<64x128xf32>
    %432 = arith.subf %430, %431 : vector<64x128xf32>
    %433 = arith.mulf %372, %405 : vector<64x128xf32>
    %434 = arith.mulf %378, %408 : vector<64x128xf32>
    %435 = arith.subf %433, %434 : vector<64x128xf32>
    %436 = arith.mulf %356, %411 : vector<64x128xf32>
    %437 = arith.mulf %364, %414 : vector<64x128xf32>
    %438 = arith.subf %436, %437 : vector<64x128xf32>
    %439 = arith.mulf %358, %414 : vector<64x128xf32>
    %440 = arith.mulf %366, %417 : vector<64x128xf32>
    %441 = arith.subf %439, %440 : vector<64x128xf32>
    %442 = arith.mulf %360, %417 : vector<64x128xf32>
    %443 = arith.mulf %368, %420 : vector<64x128xf32>
    %444 = arith.subf %442, %443 : vector<64x128xf32>
    %445 = arith.mulf %362, %420 : vector<64x128xf32>
    %446 = arith.mulf %370, %423 : vector<64x128xf32>
    %447 = arith.subf %445, %446 : vector<64x128xf32>
    %448 = arith.mulf %364, %423 : vector<64x128xf32>
    %449 = arith.mulf %372, %426 : vector<64x128xf32>
    %450 = arith.subf %448, %449 : vector<64x128xf32>
    %451 = arith.mulf %366, %426 : vector<64x128xf32>
    %452 = arith.mulf %374, %429 : vector<64x128xf32>
    %453 = arith.subf %451, %452 : vector<64x128xf32>
    %454 = arith.mulf %368, %429 : vector<64x128xf32>
    %455 = arith.mulf %376, %432 : vector<64x128xf32>
    %456 = arith.subf %454, %455 : vector<64x128xf32>
    %457 = arith.mulf %370, %432 : vector<64x128xf32>
    %458 = arith.mulf %378, %435 : vector<64x128xf32>
    %459 = arith.subf %457, %458 : vector<64x128xf32>
    %460 = arith.truncf %438 : vector<64x128xf32> to vector<64x128xbf16>
    %c0_109 = arith.constant 0 : index
    %c128_110 = arith.constant 128 : index
    %461 = vector.load %arg10[%c0_109, %c128_110] : memref<64x1152xbf16, #tpu.memory_space<vmem>>, vector<64x128xbf16>
    tpu.vector_store %arg10[%c0_109, %c128_110], %460 {strides = array<i32>} : memref<64x1152xbf16, #tpu.memory_space<vmem>>, vector<64x128xbf16>,
    %462 = arith.truncf %441 : vector<64x128xf32> to vector<64x128xbf16>
    %c0_111 = arith.constant 0 : index
    %c256_112 = arith.constant 256 : index
    %463 = vector.load %arg10[%c0_111, %c256_112] : memref<64x1152xbf16, #tpu.memory_space<vmem>>, vector<64x128xbf16>
    tpu.vector_store %arg10[%c0_111, %c256_112], %462 {strides = array<i32>} : memref<64x1152xbf16, #tpu.memory_space<vmem>>, vector<64x128xbf16>,
    %464 = arith.truncf %444 : vector<64x128xf32> to vector<64x128xbf16>
    %c0_113 = arith.constant 0 : index
    %c384_114 = arith.constant 384 : index
    %465 = vector.load %arg10[%c0_113, %c384_114] : memref<64x1152xbf16, #tpu.memory_space<vmem>>, vector<64x128xbf16>
    tpu.vector_store %arg10[%c0_113, %c384_114], %464 {strides = array<i32>} : memref<64x1152xbf16, #tpu.memory_space<vmem>>, vector<64x128xbf16>,
    %466 = arith.truncf %447 : vector<64x128xf32> to vector<64x128xbf16>
    %c0_115 = arith.constant 0 : index
    %c512_116 = arith.constant 512 : index
    %467 = vector.load %arg10[%c0_115, %c512_116] : memref<64x1152xbf16, #tpu.memory_space<vmem>>, vector<64x128xbf16>
    tpu.vector_store %arg10[%c0_115, %c512_116], %466 {strides = array<i32>} : memref<64x1152xbf16, #tpu.memory_space<vmem>>, vector<64x128xbf16>,
    %468 = arith.truncf %450 : vector<64x128xf32> to vector<64x128xbf16>
    %c0_117 = arith.constant 0 : index
    %c640_118 = arith.constant 640 : index
    %469 = vector.load %arg10[%c0_117, %c640_118] : memref<64x1152xbf16, #tpu.memory_space<vmem>>, vector<64x128xbf16>
    tpu.vector_store %arg10[%c0_117, %c640_118], %468 {strides = array<i32>} : memref<64x1152xbf16, #tpu.memory_space<vmem>>, vector<64x128xbf16>,
    %470 = arith.truncf %453 : vector<64x128xf32> to vector<64x128xbf16>
    %c0_119 = arith.constant 0 : index
    %c768_120 = arith.constant 768 : index
    %471 = vector.load %arg10[%c0_119, %c768_120] : memref<64x1152xbf16, #tpu.memory_space<vmem>>, vector<64x128xbf16>
    tpu.vector_store %arg10[%c0_119, %c768_120], %470 {strides = array<i32>} : memref<64x1152xbf16, #tpu.memory_space<vmem>>, vector<64x128xbf16>,
    %472 = arith.truncf %456 : vector<64x128xf32> to vector<64x128xbf16>
    %c0_121 = arith.constant 0 : index
    %c896_122 = arith.constant 896 : index
    %473 = vector.load %arg10[%c0_121, %c896_122] : memref<64x1152xbf16, #tpu.memory_space<vmem>>, vector<64x128xbf16>
    tpu.vector_store %arg10[%c0_121, %c896_122], %472 {strides = array<i32>} : memref<64x1152xbf16, #tpu.memory_space<vmem>>, vector<64x128xbf16>,
    %474 = arith.truncf %459 : vector<64x128xf32> to vector<64x128xbf16>
    %c0_123 = arith.constant 0 : index
    %c1024_124 = arith.constant 1024 : index
    %475 = vector.load %arg10[%c0_123, %c1024_124] : memref<64x1152xbf16, #tpu.memory_space<vmem>>, vector<64x128xbf16>
    tpu.vector_store %arg10[%c0_123, %c1024_124], %474 {strides = array<i32>} : memref<64x1152xbf16, #tpu.memory_space<vmem>>, vector<64x128xbf16>,
    %c0_125 = arith.constant 0 : index
    %c0_126 = arith.constant 0 : index
    %476 = vector.load %arg10[%c0_125, %c0_126] : memref<64x1152xbf16, #tpu.memory_space<vmem>>, vector<64x1152xbf16>
    %c1 = arith.constant 1 : index
    %c0_127 = arith.constant 0 : index
    %c0_128 = arith.constant 0 : index
    %477 = vector.load %arg4[%c1, %c0_127, %c0_128] : memref<3x1152x128xbf16, #tpu.memory_space<vmem>>, vector<1x1152x128xbf16>
    %478 = vector.shape_cast %477 : vector<1x1152x128xbf16> to vector<1152x128xbf16>
    %cst_129 = arith.constant dense<0.000000e+00> : vector<64x128xf32>
    %479 = tpu.matmul %476, %478, %cst_129 {dimension_numbers = #tpu.dot_dimension_numbers<[1], [0], [0], [1], [0, 0, 1, 1], [], []>} : vector<64x1152xbf16>, vector<1152x128xbf16>, vector<64x128xf32> -> vector<64x128xf32>
    %c8_130 = arith.constant 8 : index
    %c0_131 = arith.constant 0 : index
    %480 = vector.load %arg9[%c8_130, %c0_131] : memref<80x128xf32, #tpu.memory_space<vmem>>, vector<64x128xf32>
    tpu.vector_store %arg9[%c8_130, %c0_131], %479 {strides = array<i32>} : memref<80x128xf32, #tpu.memory_space<vmem>>, vector<64x128xf32>,
    %c1_132 = arith.constant 1 : index
    %c0_133 = arith.constant 0 : index
    %c0_134 = arith.constant 0 : index
    %481 = vector.load %arg5[%c1_132, %c0_133, %c0_134] : memref<3x9x128xf32, #tpu.memory_space<vmem>>, vector<1x9x128xf32>
    %482 = vector.shape_cast %481 : vector<1x9x128xf32> to vector<9x128xf32>
    %c0_135 = arith.constant 0 : index
    %c0_136 = arith.constant 0 : index
    %483 = vector.load %arg9[%c0_135, %c0_136] : memref<80x128xf32, #tpu.memory_space<vmem>>, vector<64x128xf32>
    %c8_137 = arith.constant 8 : index
    %c0_138 = arith.constant 0 : index
    %484 = vector.load %arg9[%c8_137, %c0_138] : memref<80x128xf32, #tpu.memory_space<vmem>>, vector<64x128xf32>
    %c16_139 = arith.constant 16 : index
    %c0_140 = arith.constant 0 : index
    %485 = vector.load %arg9[%c16_139, %c0_140] : memref<80x128xf32, #tpu.memory_space<vmem>>, vector<64x128xf32>
    %486 = vector.extract_strided_slice %482 {offsets = [0, 0], sizes = [1, 128], strides = [1, 1]} : vector<9x128xf32> to vector<1x128xf32>
    %487 = vector.broadcast %486 : vector<1x128xf32> to vector<64x128xf32>
    %488 = arith.mulf %483, %487 : vector<64x128xf32>
    %489 = vector.extract_strided_slice %482 {offsets = [3, 0], sizes = [1, 128], strides = [1, 1]} : vector<9x128xf32> to vector<1x128xf32>
    %490 = vector.broadcast %489 : vector<1x128xf32> to vector<64x128xf32>
    %491 = arith.mulf %484, %490 : vector<64x128xf32>
    %492 = arith.addf %488, %491 : vector<64x128xf32>
    %493 = vector.extract_strided_slice %482 {offsets = [6, 0], sizes = [1, 128], strides = [1, 1]} : vector<9x128xf32> to vector<1x128xf32>
    %494 = vector.broadcast %493 : vector<1x128xf32> to vector<64x128xf32>
    %495 = arith.mulf %485, %494 : vector<64x128xf32>
    %496 = arith.addf %492, %495 : vector<64x128xf32>
    %497 = vector.extract_strided_slice %482 {offsets = [1, 0], sizes = [1, 128], strides = [1, 1]} : vector<9x128xf32> to vector<1x128xf32>
    %498 = vector.broadcast %497 : vector<1x128xf32> to vector<64x128xf32>
    %499 = arith.mulf %483, %498 : vector<64x128xf32>
    %500 = vector.extract_strided_slice %482 {offsets = [4, 0], sizes = [1, 128], strides = [1, 1]} : vector<9x128xf32> to vector<1x128xf32>
    %501 = vector.broadcast %500 : vector<1x128xf32> to vector<64x128xf32>
    %502 = arith.mulf %484, %501 : vector<64x128xf32>
    %503 = arith.addf %499, %502 : vector<64x128xf32>
    %504 = vector.extract_strided_slice %482 {offsets = [7, 0], sizes = [1, 128], strides = [1, 1]} : vector<9x128xf32> to vector<1x128xf32>
    %505 = vector.broadcast %504 : vector<1x128xf32> to vector<64x128xf32>
    %506 = arith.mulf %485, %505 : vector<64x128xf32>
    %507 = arith.addf %503, %506 : vector<64x128xf32>
    %508 = vector.extract_strided_slice %482 {offsets = [2, 0], sizes = [1, 128], strides = [1, 1]} : vector<9x128xf32> to vector<1x128xf32>
    %509 = vector.broadcast %508 : vector<1x128xf32> to vector<64x128xf32>
    %510 = arith.mulf %483, %509 : vector<64x128xf32>
    %511 = vector.extract_strided_slice %482 {offsets = [5, 0], sizes = [1, 128], strides = [1, 1]} : vector<9x128xf32> to vector<1x128xf32>
    %512 = vector.broadcast %511 : vector<1x128xf32> to vector<64x128xf32>
    %513 = arith.mulf %484, %512 : vector<64x128xf32>
    %514 = arith.addf %510, %513 : vector<64x128xf32>
    %515 = vector.extract_strided_slice %482 {offsets = [8, 0], sizes = [1, 128], strides = [1, 1]} : vector<9x128xf32> to vector<1x128xf32>
    %516 = vector.broadcast %515 : vector<1x128xf32> to vector<64x128xf32>
    %517 = arith.mulf %485, %516 : vector<64x128xf32>
    %518 = arith.addf %514, %517 : vector<64x128xf32>
    %c1_141 = arith.constant 1 : index
    %c0_142 = arith.constant 0 : index
    %c0_143 = arith.constant 0 : index
    %519 = vector.load %arg6[%c1_141, %c0_142, %c0_143] : memref<3x1x128xf32, #tpu.memory_space<vmem>>, vector<1x1x128xf32>
    %520 = vector.shape_cast %519 : vector<1x1x128xf32> to vector<1x128xf32>
    %521 = vector.broadcast %520 : vector<1x128xf32> to vector<64x128xf32>
    %522 = arith.addf %507, %521 : vector<64x128xf32>
    %c63_i32_144 = arith.constant 63 : i32
    %523 = tpu.dynamic_rotate %518 by %c63_i32_144 dim 0 : vector<64x128xf32>, i32 -> vector<64x128xf32>
    %524 = vector.broadcast %37 : vector<64x1xf32> to vector<64x128xf32>
    %525 = arith.mulf %523, %524 : vector<64x128xf32>
    %526 = arith.addf %522, %525 : vector<64x128xf32>
    %c1_i32_145 = arith.constant 1 : i32
    %527 = tpu.dynamic_rotate %496 by %c1_i32_145 dim 0 : vector<64x128xf32>, i32 -> vector<64x128xf32>
    %528 = vector.broadcast %33 : vector<64x1xf32> to vector<64x128xf32>
    %529 = arith.mulf %527, %528 : vector<64x128xf32>
    %530 = arith.addf %526, %529 : vector<64x128xf32>
    %c0_146 = arith.constant 0 : index
    %c0_147 = arith.constant 0 : index
    %531 = vector.load %arg8[%c0_146, %c0_147] : memref<64x128xf32, #tpu.memory_space<vmem>>, vector<64x128xf32>
    tpu.vector_store %arg8[%c0_146, %c0_147], %530 {strides = array<i32>} : memref<64x128xf32, #tpu.memory_space<vmem>>, vector<64x128xf32>,
    %c0_148 = arith.constant 0 : index
    %c0_149 = arith.constant 0 : index
    %532 = vector.load %arg8[%c0_148, %c0_149] : memref<64x128xf32, #tpu.memory_space<vmem>>, vector<64x128xf32>
    %cst_150 = arith.constant 0.000000e+00 : f32
    %533 = vector.broadcast %cst_150 : f32 to vector<64x128xf32>
    %534 = arith.subf %533, %532 : vector<64x128xf32>
    %535 = math.exp %534 : vector<64x128xf32>
    %cst_151 = arith.constant 1.000000e+00 : f32
    %536 = vector.broadcast %cst_151 : f32 to vector<64x128xf32>
    %537 = arith.addf %536, %535 : vector<64x128xf32>
    %538 = arith.divf %532, %537 : vector<64x128xf32>
    %539 = arith.truncf %538 : vector<64x128xf32> to vector<64x128xbf16>
    %c0_152 = arith.constant 0 : index
    %c0_153 = arith.constant 0 : index
    %540 = vector.load %arg10[%c0_152, %c0_153] : memref<64x1152xbf16, #tpu.memory_space<vmem>>, vector<64x128xbf16>
    tpu.vector_store %arg10[%c0_152, %c0_153], %539 {strides = array<i32>} : memref<64x1152xbf16, #tpu.memory_space<vmem>>, vector<64x128xbf16>,
    %cst_154 = arith.constant -2.200000e+00 : f32
    %541 = vector.broadcast %cst_154 : f32 to vector<64x128xf32>
    %542 = arith.cmpf oge, %532, %541 : vector<64x128xf32>
    %543 = arith.extui %542 : vector<64x128xi1> to vector<64x128xi32>
    %544 = arith.sitofp %543 : vector<64x128xi32> to vector<64x128xf32>
    %cst_155 = arith.constant -1.800000e+00 : f32
    %545 = vector.broadcast %cst_155 : f32 to vector<64x128xf32>
    %546 = arith.cmpf oge, %532, %545 : vector<64x128xf32>
    %547 = arith.extui %546 : vector<64x128xi1> to vector<64x128xi32>
    %548 = arith.sitofp %547 : vector<64x128xi32> to vector<64x128xf32>
    %cst_156 = arith.constant -1.400000e+00 : f32
    %549 = vector.broadcast %cst_156 : f32 to vector<64x128xf32>
    %550 = arith.cmpf oge, %532, %549 : vector<64x128xf32>
    %551 = arith.extui %550 : vector<64x128xi1> to vector<64x128xi32>
    %552 = arith.sitofp %551 : vector<64x128xi32> to vector<64x128xf32>
    %cst_157 = arith.constant -1.000000e+00 : f32
    %553 = vector.broadcast %cst_157 : f32 to vector<64x128xf32>
    %554 = arith.cmpf oge, %532, %553 : vector<64x128xf32>
    %555 = arith.extui %554 : vector<64x128xi1> to vector<64x128xi32>
    %556 = arith.sitofp %555 : vector<64x128xi32> to vector<64x128xf32>
    %cst_158 = arith.constant -6.000000e-01 : f32
    %557 = vector.broadcast %cst_158 : f32 to vector<64x128xf32>
    %558 = arith.cmpf oge, %532, %557 : vector<64x128xf32>
    %559 = arith.extui %558 : vector<64x128xi1> to vector<64x128xi32>
    %560 = arith.sitofp %559 : vector<64x128xi32> to vector<64x128xf32>
    %cst_159 = arith.constant -2.000000e-01 : f32
    %561 = vector.broadcast %cst_159 : f32 to vector<64x128xf32>
    %562 = arith.cmpf oge, %532, %561 : vector<64x128xf32>
    %563 = arith.extui %562 : vector<64x128xi1> to vector<64x128xi32>
    %564 = arith.sitofp %563 : vector<64x128xi32> to vector<64x128xf32>
    %cst_160 = arith.constant 2.000000e-01 : f32
    %565 = vector.broadcast %cst_160 : f32 to vector<64x128xf32>
    %566 = arith.cmpf oge, %532, %565 : vector<64x128xf32>
    %567 = arith.extui %566 : vector<64x128xi1> to vector<64x128xi32>
    %568 = arith.sitofp %567 : vector<64x128xi32> to vector<64x128xf32>
    %cst_161 = arith.constant 6.000000e-01 : f32
    %569 = vector.broadcast %cst_161 : f32 to vector<64x128xf32>
    %570 = arith.cmpf oge, %532, %569 : vector<64x128xf32>
    %571 = arith.extui %570 : vector<64x128xi1> to vector<64x128xi32>
    %572 = arith.sitofp %571 : vector<64x128xi32> to vector<64x128xf32>
    %cst_162 = arith.constant 1.000000e+00 : f32
    %573 = vector.broadcast %cst_162 : f32 to vector<64x128xf32>
    %574 = arith.cmpf oge, %532, %573 : vector<64x128xf32>
    %575 = arith.extui %574 : vector<64x128xi1> to vector<64x128xi32>
    %576 = arith.sitofp %575 : vector<64x128xi32> to vector<64x128xf32>
    %cst_163 = arith.constant 1.400000e+00 : f32
    %577 = vector.broadcast %cst_163 : f32 to vector<64x128xf32>
    %578 = arith.cmpf oge, %532, %577 : vector<64x128xf32>
    %579 = arith.extui %578 : vector<64x128xi1> to vector<64x128xi32>
    %580 = arith.sitofp %579 : vector<64x128xi32> to vector<64x128xf32>
    %cst_164 = arith.constant 1.800000e+00 : f32
    %581 = vector.broadcast %cst_164 : f32 to vector<64x128xf32>
    %582 = arith.cmpf oge, %532, %581 : vector<64x128xf32>
    %583 = arith.extui %582 : vector<64x128xi1> to vector<64x128xi32>
    %584 = arith.sitofp %583 : vector<64x128xi32> to vector<64x128xf32>
    %cst_165 = arith.constant 2.200000e+00 : f32
    %585 = vector.broadcast %cst_165 : f32 to vector<64x128xf32>
    %586 = arith.cmpf oge, %532, %585 : vector<64x128xf32>
    %587 = arith.extui %586 : vector<64x128xi1> to vector<64x128xi32>
    %588 = arith.sitofp %587 : vector<64x128xi32> to vector<64x128xf32>
    %589 = arith.subf %544, %548 : vector<64x128xf32>
    %590 = arith.subf %548, %552 : vector<64x128xf32>
    %591 = arith.subf %552, %556 : vector<64x128xf32>
    %592 = arith.subf %556, %560 : vector<64x128xf32>
    %593 = arith.subf %560, %564 : vector<64x128xf32>
    %594 = arith.subf %564, %568 : vector<64x128xf32>
    %595 = arith.subf %568, %572 : vector<64x128xf32>
    %596 = arith.subf %572, %576 : vector<64x128xf32>
    %597 = arith.subf %576, %580 : vector<64x128xf32>
    %598 = arith.subf %580, %584 : vector<64x128xf32>
    %599 = arith.subf %584, %588 : vector<64x128xf32>
    %cst_166 = arith.constant -2.200000e+00 : f32
    %600 = vector.broadcast %cst_166 : f32 to vector<64x128xf32>
    %601 = arith.subf %532, %600 : vector<64x128xf32>
    %cst_167 = arith.constant -1.800000e+00 : f32
    %602 = vector.broadcast %cst_167 : f32 to vector<64x128xf32>
    %603 = arith.subf %532, %602 : vector<64x128xf32>
    %cst_168 = arith.constant -1.400000e+00 : f32
    %604 = vector.broadcast %cst_168 : f32 to vector<64x128xf32>
    %605 = arith.subf %532, %604 : vector<64x128xf32>
    %cst_169 = arith.constant -1.000000e+00 : f32
    %606 = vector.broadcast %cst_169 : f32 to vector<64x128xf32>
    %607 = arith.subf %532, %606 : vector<64x128xf32>
    %cst_170 = arith.constant -6.000000e-01 : f32
    %608 = vector.broadcast %cst_170 : f32 to vector<64x128xf32>
    %609 = arith.subf %532, %608 : vector<64x128xf32>
    %cst_171 = arith.constant -2.000000e-01 : f32
    %610 = vector.broadcast %cst_171 : f32 to vector<64x128xf32>
    %611 = arith.subf %532, %610 : vector<64x128xf32>
    %cst_172 = arith.constant 2.000000e-01 : f32
    %612 = vector.broadcast %cst_172 : f32 to vector<64x128xf32>
    %613 = arith.subf %532, %612 : vector<64x128xf32>
    %cst_173 = arith.constant 6.000000e-01 : f32
    %614 = vector.broadcast %cst_173 : f32 to vector<64x128xf32>
    %615 = arith.subf %532, %614 : vector<64x128xf32>
    %cst_174 = arith.constant 1.000000e+00 : f32
    %616 = vector.broadcast %cst_174 : f32 to vector<64x128xf32>
    %617 = arith.subf %532, %616 : vector<64x128xf32>
    %cst_175 = arith.constant 1.400000e+00 : f32
    %618 = vector.broadcast %cst_175 : f32 to vector<64x128xf32>
    %619 = arith.subf %532, %618 : vector<64x128xf32>
    %cst_176 = arith.constant 1.800000e+00 : f32
    %620 = vector.broadcast %cst_176 : f32 to vector<64x128xf32>
    %621 = arith.subf %532, %620 : vector<64x128xf32>
    %cst_177 = arith.constant 2.200000e+00 : f32
    %622 = vector.broadcast %cst_177 : f32 to vector<64x128xf32>
    %623 = arith.subf %532, %622 : vector<64x128xf32>
    %624 = arith.mulf %601, %589 : vector<64x128xf32>
    %625 = arith.mulf %605, %590 : vector<64x128xf32>
    %626 = arith.subf %624, %625 : vector<64x128xf32>
    %627 = arith.mulf %603, %590 : vector<64x128xf32>
    %628 = arith.mulf %607, %591 : vector<64x128xf32>
    %629 = arith.subf %627, %628 : vector<64x128xf32>
    %630 = arith.mulf %605, %591 : vector<64x128xf32>
    %631 = arith.mulf %609, %592 : vector<64x128xf32>
    %632 = arith.subf %630, %631 : vector<64x128xf32>
    %633 = arith.mulf %607, %592 : vector<64x128xf32>
    %634 = arith.mulf %611, %593 : vector<64x128xf32>
    %635 = arith.subf %633, %634 : vector<64x128xf32>
    %636 = arith.mulf %609, %593 : vector<64x128xf32>
    %637 = arith.mulf %613, %594 : vector<64x128xf32>
    %638 = arith.subf %636, %637 : vector<64x128xf32>
    %639 = arith.mulf %611, %594 : vector<64x128xf32>
    %640 = arith.mulf %615, %595 : vector<64x128xf32>
    %641 = arith.subf %639, %640 : vector<64x128xf32>
    %642 = arith.mulf %613, %595 : vector<64x128xf32>
    %643 = arith.mulf %617, %596 : vector<64x128xf32>
    %644 = arith.subf %642, %643 : vector<64x128xf32>
    %645 = arith.mulf %615, %596 : vector<64x128xf32>
    %646 = arith.mulf %619, %597 : vector<64x128xf32>
    %647 = arith.subf %645, %646 : vector<64x128xf32>
    %648 = arith.mulf %617, %597 : vector<64x128xf32>
    %649 = arith.mulf %621, %598 : vector<64x128xf32>
    %650 = arith.subf %648, %649 : vector<64x128xf32>
    %651 = arith.mulf %619, %598 : vector<64x128xf32>
    %652 = arith.mulf %623, %599 : vector<64x128xf32>
    %653 = arith.subf %651, %652 : vector<64x128xf32>
    %654 = arith.mulf %601, %626 : vector<64x128xf32>
    %655 = arith.mulf %607, %629 : vector<64x128xf32>
    %656 = arith.subf %654, %655 : vector<64x128xf32>
    %657 = arith.mulf %603, %629 : vector<64x128xf32>
    %658 = arith.mulf %609, %632 : vector<64x128xf32>
    %659 = arith.subf %657, %658 : vector<64x128xf32>
    %660 = arith.mulf %605, %632 : vector<64x128xf32>
    %661 = arith.mulf %611, %635 : vector<64x128xf32>
    %662 = arith.subf %660, %661 : vector<64x128xf32>
    %663 = arith.mulf %607, %635 : vector<64x128xf32>
    %664 = arith.mulf %613, %638 : vector<64x128xf32>
    %665 = arith.subf %663, %664 : vector<64x128xf32>
    %666 = arith.mulf %609, %638 : vector<64x128xf32>
    %667 = arith.mulf %615, %641 : vector<64x128xf32>
    %668 = arith.subf %666, %667 : vector<64x128xf32>
    %669 = arith.mulf %611, %641 : vector<64x128xf32>
    %670 = arith.mulf %617, %644 : vector<64x128xf32>
    %671 = arith.subf %669, %670 : vector<64x128xf32>
    %672 = arith.mulf %613, %644 : vector<64x128xf32>
    %673 = arith.mulf %619, %647 : vector<64x128xf32>
    %674 = arith.subf %672, %673 : vector<64x128xf32>
    %675 = arith.mulf %615, %647 : vector<64x128xf32>
    %676 = arith.mulf %621, %650 : vector<64x128xf32>
    %677 = arith.subf %675, %676 : vector<64x128xf32>
    %678 = arith.mulf %617, %650 : vector<64x128xf32>
    %679 = arith.mulf %623, %653 : vector<64x128xf32>
    %680 = arith.subf %678, %679 : vector<64x128xf32>
    %681 = arith.mulf %601, %656 : vector<64x128xf32>
    %682 = arith.mulf %609, %659 : vector<64x128xf32>
    %683 = arith.subf %681, %682 : vector<64x128xf32>
    %684 = arith.mulf %603, %659 : vector<64x128xf32>
    %685 = arith.mulf %611, %662 : vector<64x128xf32>
    %686 = arith.subf %684, %685 : vector<64x128xf32>
    %687 = arith.mulf %605, %662 : vector<64x128xf32>
    %688 = arith.mulf %613, %665 : vector<64x128xf32>
    %689 = arith.subf %687, %688 : vector<64x128xf32>
    %690 = arith.mulf %607, %665 : vector<64x128xf32>
    %691 = arith.mulf %615, %668 : vector<64x128xf32>
    %692 = arith.subf %690, %691 : vector<64x128xf32>
    %693 = arith.mulf %609, %668 : vector<64x128xf32>
    %694 = arith.mulf %617, %671 : vector<64x128xf32>
    %695 = arith.subf %693, %694 : vector<64x128xf32>
    %696 = arith.mulf %611, %671 : vector<64x128xf32>
    %697 = arith.mulf %619, %674 : vector<64x128xf32>
    %698 = arith.subf %696, %697 : vector<64x128xf32>
    %699 = arith.mulf %613, %674 : vector<64x128xf32>
    %700 = arith.mulf %621, %677 : vector<64x128xf32>
    %701 = arith.subf %699, %700 : vector<64x128xf32>
    %702 = arith.mulf %615, %677 : vector<64x128xf32>
    %703 = arith.mulf %623, %680 : vector<64x128xf32>
    %704 = arith.subf %702, %703 : vector<64x128xf32>
    %705 = arith.truncf %683 : vector<64x128xf32> to vector<64x128xbf16>
    %c0_178 = arith.constant 0 : index
    %c128_179 = arith.constant 128 : index
    %706 = vector.load %arg10[%c0_178, %c128_179] : memref<64x1152xbf16, #tpu.memory_space<vmem>>, vector<64x128xbf16>
    tpu.vector_store %arg10[%c0_178, %c128_179], %705 {strides = array<i32>} : memref<64x1152xbf16, #tpu.memory_space<vmem>>, vector<64x128xbf16>,
    %707 = arith.truncf %686 : vector<64x128xf32> to vector<64x128xbf16>
    %c0_180 = arith.constant 0 : index
    %c256_181 = arith.constant 256 : index
    %708 = vector.load %arg10[%c0_180, %c256_181] : memref<64x1152xbf16, #tpu.memory_space<vmem>>, vector<64x128xbf16>
    tpu.vector_store %arg10[%c0_180, %c256_181], %707 {strides = array<i32>} : memref<64x1152xbf16, #tpu.memory_space<vmem>>, vector<64x128xbf16>,
    %709 = arith.truncf %689 : vector<64x128xf32> to vector<64x128xbf16>
    %c0_182 = arith.constant 0 : index
    %c384_183 = arith.constant 384 : index
    %710 = vector.load %arg10[%c0_182, %c384_183] : memref<64x1152xbf16, #tpu.memory_space<vmem>>, vector<64x128xbf16>
    tpu.vector_store %arg10[%c0_182, %c384_183], %709 {strides = array<i32>} : memref<64x1152xbf16, #tpu.memory_space<vmem>>, vector<64x128xbf16>,
    %711 = arith.truncf %692 : vector<64x128xf32> to vector<64x128xbf16>
    %c0_184 = arith.constant 0 : index
    %c512_185 = arith.constant 512 : index
    %712 = vector.load %arg10[%c0_184, %c512_185] : memref<64x1152xbf16, #tpu.memory_space<vmem>>, vector<64x128xbf16>
    tpu.vector_store %arg10[%c0_184, %c512_185], %711 {strides = array<i32>} : memref<64x1152xbf16, #tpu.memory_space<vmem>>, vector<64x128xbf16>,
    %713 = arith.truncf %695 : vector<64x128xf32> to vector<64x128xbf16>
    %c0_186 = arith.constant 0 : index
    %c640_187 = arith.constant 640 : index
    %714 = vector.load %arg10[%c0_186, %c640_187] : memref<64x1152xbf16, #tpu.memory_space<vmem>>, vector<64x128xbf16>
    tpu.vector_store %arg10[%c0_186, %c640_187], %713 {strides = array<i32>} : memref<64x1152xbf16, #tpu.memory_space<vmem>>, vector<64x128xbf16>,
    %715 = arith.truncf %698 : vector<64x128xf32> to vector<64x128xbf16>
    %c0_188 = arith.constant 0 : index
    %c768_189 = arith.constant 768 : index
    %716 = vector.load %arg10[%c0_188, %c768_189] : memref<64x1152xbf16, #tpu.memory_space<vmem>>, vector<64x128xbf16>
    tpu.vector_store %arg10[%c0_188, %c768_189], %715 {strides = array<i32>} : memref<64x1152xbf16, #tpu.memory_space<vmem>>, vector<64x128xbf16>,
    %717 = arith.truncf %701 : vector<64x128xf32> to vector<64x128xbf16>
    %c0_190 = arith.constant 0 : index
    %c896_191 = arith.constant 896 : index
    %718 = vector.load %arg10[%c0_190, %c896_191] : memref<64x1152xbf16, #tpu.memory_space<vmem>>, vector<64x128xbf16>
    tpu.vector_store %arg10[%c0_190, %c896_191], %717 {strides = array<i32>} : memref<64x1152xbf16, #tpu.memory_space<vmem>>, vector<64x128xbf16>,
    %719 = arith.truncf %704 : vector<64x128xf32> to vector<64x128xbf16>
    %c0_192 = arith.constant 0 : index
    %c1024_193 = arith.constant 1024 : index
    %720 = vector.load %arg10[%c0_192, %c1024_193] : memref<64x1152xbf16, #tpu.memory_space<vmem>>, vector<64x128xbf16>
    tpu.vector_store %arg10[%c0_192, %c1024_193], %719 {strides = array<i32>} : memref<64x1152xbf16, #tpu.memory_space<vmem>>, vector<64x128xbf16>,
    %c0_194 = arith.constant 0 : index
    %c0_195 = arith.constant 0 : index
    %721 = vector.load %arg10[%c0_194, %c0_195] : memref<64x1152xbf16, #tpu.memory_space<vmem>>, vector<64x1152xbf16>
    %c2 = arith.constant 2 : index
    %c0_196 = arith.constant 0 : index
    %c0_197 = arith.constant 0 : index
    %722 = vector.load %arg4[%c2, %c0_196, %c0_197] : memref<3x1152x128xbf16, #tpu.memory_space<vmem>>, vector<1x1152x128xbf16>
    %723 = vector.shape_cast %722 : vector<1x1152x128xbf16> to vector<1152x128xbf16>
    %cst_198 = arith.constant dense<0.000000e+00> : vector<64x128xf32>
    %724 = tpu.matmul %721, %723, %cst_198 {dimension_numbers = #tpu.dot_dimension_numbers<[1], [0], [0], [1], [0, 0, 1, 1], [], []>} : vector<64x1152xbf16>, vector<1152x128xbf16>, vector<64x128xf32> -> vector<64x128xf32>
    %c8_199 = arith.constant 8 : index
    %c0_200 = arith.constant 0 : index
    %725 = vector.load %arg9[%c8_199, %c0_200] : memref<80x128xf32, #tpu.memory_space<vmem>>, vector<64x128xf32>
    tpu.vector_store %arg9[%c8_199, %c0_200], %724 {strides = array<i32>} : memref<80x128xf32, #tpu.memory_space<vmem>>, vector<64x128xf32>,
    %c2_201 = arith.constant 2 : index
    %c0_202 = arith.constant 0 : index
    %c0_203 = arith.constant 0 : index
    %726 = vector.load %arg5[%c2_201, %c0_202, %c0_203] : memref<3x9x128xf32, #tpu.memory_space<vmem>>, vector<1x9x128xf32>
    %727 = vector.shape_cast %726 : vector<1x9x128xf32> to vector<9x128xf32>
    %c0_204 = arith.constant 0 : index
    %c0_205 = arith.constant 0 : index
    %728 = vector.load %arg9[%c0_204, %c0_205] : memref<80x128xf32, #tpu.memory_space<vmem>>, vector<64x128xf32>
    %c8_206 = arith.constant 8 : index
    %c0_207 = arith.constant 0 : index
    %729 = vector.load %arg9[%c8_206, %c0_207] : memref<80x128xf32, #tpu.memory_space<vmem>>, vector<64x128xf32>
    %c16_208 = arith.constant 16 : index
    %c0_209 = arith.constant 0 : index
    %730 = vector.load %arg9[%c16_208, %c0_209] : memref<80x128xf32, #tpu.memory_space<vmem>>, vector<64x128xf32>
    %731 = vector.extract_strided_slice %727 {offsets = [0, 0], sizes = [1, 128], strides = [1, 1]} : vector<9x128xf32> to vector<1x128xf32>
    %732 = vector.broadcast %731 : vector<1x128xf32> to vector<64x128xf32>
    %733 = arith.mulf %728, %732 : vector<64x128xf32>
    %734 = vector.extract_strided_slice %727 {offsets = [3, 0], sizes = [1, 128], strides = [1, 1]} : vector<9x128xf32> to vector<1x128xf32>
    %735 = vector.broadcast %734 : vector<1x128xf32> to vector<64x128xf32>
    %736 = arith.mulf %729, %735 : vector<64x128xf32>
    %737 = arith.addf %733, %736 : vector<64x128xf32>
    %738 = vector.extract_strided_slice %727 {offsets = [6, 0], sizes = [1, 128], strides = [1, 1]} : vector<9x128xf32> to vector<1x128xf32>
    %739 = vector.broadcast %738 : vector<1x128xf32> to vector<64x128xf32>
    %740 = arith.mulf %730, %739 : vector<64x128xf32>
    %741 = arith.addf %737, %740 : vector<64x128xf32>
    %742 = vector.extract_strided_slice %727 {offsets = [1, 0], sizes = [1, 128], strides = [1, 1]} : vector<9x128xf32> to vector<1x128xf32>
    %743 = vector.broadcast %742 : vector<1x128xf32> to vector<64x128xf32>
    %744 = arith.mulf %728, %743 : vector<64x128xf32>
    %745 = vector.extract_strided_slice %727 {offsets = [4, 0], sizes = [1, 128], strides = [1, 1]} : vector<9x128xf32> to vector<1x128xf32>
    %746 = vector.broadcast %745 : vector<1x128xf32> to vector<64x128xf32>
    %747 = arith.mulf %729, %746 : vector<64x128xf32>
    %748 = arith.addf %744, %747 : vector<64x128xf32>
    %749 = vector.extract_strided_slice %727 {offsets = [7, 0], sizes = [1, 128], strides = [1, 1]} : vector<9x128xf32> to vector<1x128xf32>
    %750 = vector.broadcast %749 : vector<1x128xf32> to vector<64x128xf32>
    %751 = arith.mulf %730, %750 : vector<64x128xf32>
    %752 = arith.addf %748, %751 : vector<64x128xf32>
    %753 = vector.extract_strided_slice %727 {offsets = [2, 0], sizes = [1, 128], strides = [1, 1]} : vector<9x128xf32> to vector<1x128xf32>
    %754 = vector.broadcast %753 : vector<1x128xf32> to vector<64x128xf32>
    %755 = arith.mulf %728, %754 : vector<64x128xf32>
    %756 = vector.extract_strided_slice %727 {offsets = [5, 0], sizes = [1, 128], strides = [1, 1]} : vector<9x128xf32> to vector<1x128xf32>
    %757 = vector.broadcast %756 : vector<1x128xf32> to vector<64x128xf32>
    %758 = arith.mulf %729, %757 : vector<64x128xf32>
    %759 = arith.addf %755, %758 : vector<64x128xf32>
    %760 = vector.extract_strided_slice %727 {offsets = [8, 0], sizes = [1, 128], strides = [1, 1]} : vector<9x128xf32> to vector<1x128xf32>
    %761 = vector.broadcast %760 : vector<1x128xf32> to vector<64x128xf32>
    %762 = arith.mulf %730, %761 : vector<64x128xf32>
    %763 = arith.addf %759, %762 : vector<64x128xf32>
    %c2_210 = arith.constant 2 : index
    %c0_211 = arith.constant 0 : index
    %c0_212 = arith.constant 0 : index
    %764 = vector.load %arg6[%c2_210, %c0_211, %c0_212] : memref<3x1x128xf32, #tpu.memory_space<vmem>>, vector<1x1x128xf32>
    %765 = vector.shape_cast %764 : vector<1x1x128xf32> to vector<1x128xf32>
    %766 = vector.broadcast %765 : vector<1x128xf32> to vector<64x128xf32>
    %767 = arith.addf %752, %766 : vector<64x128xf32>
    %c63_i32_213 = arith.constant 63 : i32
    %768 = tpu.dynamic_rotate %763 by %c63_i32_213 dim 0 : vector<64x128xf32>, i32 -> vector<64x128xf32>
    %769 = vector.broadcast %37 : vector<64x1xf32> to vector<64x128xf32>
    %770 = arith.mulf %768, %769 : vector<64x128xf32>
    %771 = arith.addf %767, %770 : vector<64x128xf32>
    %c1_i32_214 = arith.constant 1 : i32
    %772 = tpu.dynamic_rotate %741 by %c1_i32_214 dim 0 : vector<64x128xf32>, i32 -> vector<64x128xf32>
    %773 = vector.broadcast %33 : vector<64x1xf32> to vector<64x128xf32>
    %774 = arith.mulf %772, %773 : vector<64x128xf32>
    %775 = arith.addf %771, %774 : vector<64x128xf32>
    %776 = vector.extract_strided_slice %775 {offsets = [0, 0], sizes = [64, 32], strides = [1, 1]} : vector<64x128xf32> to vector<64x32xf32>
    %c0_215 = arith.constant 0 : index
    %c0_216 = arith.constant 0 : index
    %c0_217 = arith.constant 0 : index
    %777 = vector.load %arg1[%c0_215, %c0_216, %c0_217] : memref<1x64x32xf32, #tpu.memory_space<vmem>>, vector<1x64x32xf32>
    %778 = vector.shape_cast %777 : vector<1x64x32xf32> to vector<64x32xf32>
    %779 = arith.addf %776, %778 : vector<64x32xf32>
    %c0_218 = arith.constant 0 : index
    %c0_219 = arith.constant 0 : index
    %c0_220 = arith.constant 0 : index
    %780 = vector.load %arg7[%c0_218, %c0_219, %c0_220] : memref<1x64x32xf32, #tpu.memory_space<vmem>>, vector<1x64x32xf32>
    %781 = vector.shape_cast %780 : vector<1x64x32xf32> to vector<64x32xf32>
    %782 = vector.shape_cast %779 : vector<64x32xf32> to vector<1x64x32xf32>
    tpu.vector_store %arg7[%c0_218, %c0_219, %c0_220], %782 {strides = array<i32>} : memref<1x64x32xf32, #tpu.memory_space<vmem>>, vector<1x64x32xf32>,
    return
  }
  func.func @transform_0(%arg0: i32) -> (i32, i32, i32) {
    %c0_i32 = arith.constant 0 : i32
    %c0_i32_0 = arith.constant 0 : i32
    %c0_i32_1 = arith.constant 0 : i32
    return %arg0, %c0_i32, %c0_i32_0 : i32, i32, i32
  }
  func.func @transform_1(%arg0: i32) -> (i32, i32) {
    %c0_i32 = arith.constant 0 : i32
    %c0_i32_0 = arith.constant 0 : i32
    %c0_i32_1 = arith.constant 0 : i32
    return %c0_i32, %c0_i32_0 : i32, i32
  }
  func.func @transform_2(%arg0: i32) -> (i32, i32) {
    %c0_i32 = arith.constant 0 : i32
    %c0_i32_0 = arith.constant 0 : i32
    %c0_i32_1 = arith.constant 0 : i32
    return %c0_i32, %c0_i32_0 : i32, i32
  }
  func.func @transform_3(%arg0: i32) -> (i32, i32, i32) {
    %c0_i32 = arith.constant 0 : i32
    %c0_i32_0 = arith.constant 0 : i32
    %c0_i32_1 = arith.constant 0 : i32
    %c0_i32_2 = arith.constant 0 : i32
    return %c0_i32, %c0_i32_0, %c0_i32_1 : i32, i32, i32
  }
  func.func @transform_4(%arg0: i32) -> (i32, i32, i32) {
    %c0_i32 = arith.constant 0 : i32
    %c0_i32_0 = arith.constant 0 : i32
    %c0_i32_1 = arith.constant 0 : i32
    %c0_i32_2 = arith.constant 0 : i32
    return %c0_i32, %c0_i32_0, %c0_i32_1 : i32, i32, i32
  }
  func.func @transform_5(%arg0: i32) -> (i32, i32, i32) {
    %c0_i32 = arith.constant 0 : i32
    %c0_i32_0 = arith.constant 0 : i32
    %c0_i32_1 = arith.constant 0 : i32
    %c0_i32_2 = arith.constant 0 : i32
    return %c0_i32, %c0_i32_0, %c0_i32_1 : i32, i32, i32
  }
  func.func @transform_6(%arg0: i32) -> (i32, i32, i32) {
    %c0_i32 = arith.constant 0 : i32
    %c0_i32_0 = arith.constant 0 : i32
    %c0_i32_1 = arith.constant 0 : i32
    return %arg0, %c0_i32, %c0_i32_0 : i32, i32, i32
  }
}

</mosaic_0001>

<bundles_post_ra>
// kernel: _lambda_.1
= control target key start
LH: loop header
LB: loop body
LE: loop exit
PB: predicated region body
PF: predicated region fallthrough
CT: control target
= control target key end

     0   :  { %s10061_s21 = smov 0   ;;  %s16038_s0 = inlined_call_operand.vmem [shape: f32[4,64,32], index: 0, kind: input, shape index: {}]   ;;  %s16039_s1 = inlined_call_operand.vmem [shape: f32[1,32], index: 1, kind: input, shape index: {}]   ;;  %s16040_s2 = inlined_call_operand.vmem [shape: f32[1,32], index: 2, kind: input, shape index: {}]   ;;  %s16041_s3 = inlined_call_operand.vmem [shape: bf16[3,1152,128], index: 3, kind: input, shape index: {}]   ;;  %s16042_s4 = inlined_call_operand.vmem [shape: f32[3,9,128], index: 4, kind: input, shape index: {}]   ;;  %s16043_s5 = inlined_call_operand.vmem [shape: f32[3,1,128], index: 5, kind: input, shape index: {}]   ;;  %s16044_s6 = inlined_call_operand.vmem [shape: f32[4,64,32], index: 6, kind: output, shape index: {}]  }
   0x1 LB: > { %s7924_s22 = sadd.s32 4294967295, %s10023_s21   ;;  %p7928_p0 = scmp.ge.s32.totalorder %s10023_s21, 1  ;;  %s10023_s21 = sphi %s10061_s21, %s16_s21  }
   0x2   : > { %p212_p1 = scmp.lt.s32.totalorder %s10023_s21, 5 }
   0x4   : > { %p213_p2 = pnand %p7928_p0, %p212_p1 }
   0x6   : > { %216 = sbr.rel (%p213_p2) target bundleno = 1967 (0x7af), region = 44 }
   0xd   : > { %p242_p3 = scmp.lt.s32.totalorder %s7924_s22, 3  ;;  %vm261_vm0 = vcmask 261120   ;;  %v10025_v16 = vmov 0.0   ;;  %v9660_v57 = vld [vmem:[%s16041_s3 + $0xc0] sm:$0xff]   ;;  %v9662_v59 = vld [vmem:[%s16041_s3 + $0xc8] sm:$0xff]   ;;  %v9664_v61 = vld [vmem:[%s16041_s3 + $0xd0] sm:$0xff]  }
   0xe   : > { %397 = vst [vmem:[#allocation2] sm:$0xff] %v10025_v16  ;;  %398 = vst [vmem:[#allocation2 + $0x8] sm:$0xff] %v10025_v16  ;;  %v9661_v58 = vld [vmem:[%s16041_s3 + $0x80] sm:$0xff]   ;;  %9087 = vmatprep.subr.bf16.mxu1 %v9660_v57  ;;  %v9663_v60 = vld [vmem:[%s16041_s3 + $0x88] sm:$0xff]  }
   0xf   : > { %s17035_s22 = smov (!%p242_p3, %s7924_s22), 3  ;;  %399 = vst [vmem:[#allocation2 + $0x10] sm:$0xff] %v10025_v16  ;;  %400 = vst [vmem:[#allocation2 + $0x18] sm:$0xff] %v10025_v16  ;;  %9088 = vmatpush3.bf16.msra.mxu1 %v9661_v58  ;;  %v9665_v62 = vld [vmem:[%s16041_s3 + $0x90] sm:$0xff]   ;;  %v9667_v63 = vld [vmem:[%s16041_s3 + $0xd8] sm:$0xff]  }
  0x10   : > { %s9045_s23 = sshll.u32 %s17035_s22, 6  ;;  %401 = vst [vmem:[#allocation2 + $0x20] sm:$0xff] %v10025_v16  ;;  %402 = vst [vmem:[#allocation2 + $0x28] sm:$0xff] %v10025_v16  ;;  %9089 = vmatprep.subr.bf16.mxu1 %v9662_v59 }
  0x11   : > { %s10077_s26 = scalar_lea.vmem %s16038_s0, %s9045_s23  ;;  %403 = vst [vmem:[#allocation2 + $0x30] sm:$0xff] %v10025_v16  ;;  %404 = vst [vmem:[#allocation2 + $0x38] sm:$0xff] %v10025_v16  ;;  %s15915_s24 = scalar_lea.vmem %s16044_s6, %s9045_s23 }
  0x12   : > { %v253_v0 = vld [vmem:[%s10077_s26] sm:$0xff]  ;;  %v255_v1 = vld [vmem:[%s10077_s26 + $0x10] sm:$0xff]  ;;  %v254_v2 = vld [vmem:[%s10077_s26 + $0x8] sm:$0xff] }
  0x13   : > { %v262_v3 = vsel %vm261_vm0, %v253_v0, 0.0  ;;  %v268_v4 = vsel %vm261_vm0, %v255_v1, 0.0  ;;  %v256_v5 = vld [vmem:[%s10077_s26 + $0x18] sm:$0xff]  ;;  %v257_v6 = vld [vmem:[%s10077_s26 + $0x20] sm:$0xff]  ;;  %v258_v7 = vld [vmem:[%s10077_s26 + $0x28] sm:$0xff]  ;;  %v265_v8 = vsel %vm261_vm0, %v254_v2, 0.0  ;;  %9090 = vmatpush3.bf16.msra.mxu1 %v9663_v60 }
  0x14   : > { %263 = vadd.xlane.f32.xlu0 %v262_v3  ;;  %269 = vadd.xlane.f32.xlu1 %v268_v4  ;;  %v271_v9 = vsel %vm261_vm0, %v256_v5, 0.0  ;;  %v274_v10 = vsel %vm261_vm0, %v257_v6, 0.0  ;;  %v277_v11 = vsel %vm261_vm0, %v258_v7, 0.0  ;;  %v259_v12 = vld [vmem:[%s10077_s26 + $0x30] sm:$0xff]  ;;  %v260_v13 = vld [vmem:[%s10077_s26 + $0x38] sm:$0xff]  ;;  %v9671_v3 = vld [vmem:[%s16041_s3 + $0xe0] sm:$0xff]  }
  0x15   : > { %v280_v14 = vsel %vm261_vm0, %v259_v12, 0.0  ;;  %v283_v15 = vsel %vm261_vm0, %v260_v13, 0.0  ;;  %9091 = vmatprep.subr.bf16.mxu1 %v9664_v61  ;;  %v9670_v4 = vld [vmem:[%s16041_s3 + $0x48] sm:$0xff]   ;;  %v7934_v61 = vld [vmem:[%s16040_s2] ss:$0 sm:$0xff] }
  0x17   : > { %9092 = vmatpush3.bf16.msra.mxu1 %v9665_v62 }
  0x18   : > { %266 = vadd.xlane.f32.xlu0 %v265_v8  ;;  %272 = vadd.xlane.f32.xlu1 %v271_v9  ;;  %v9674_v8 = vld [vmem:[%s16041_s3 + $0x50] sm:$0xff]   ;;  %v9677_v9 = vld [vmem:[%s16041_s3 + $0xa8] sm:$0xff]  }
  0x19   : > { %9093 = vmatprep.subr.bf16.mxu1 %v9667_v63 }
  0x1c   : > { %275 = vadd.xlane.f32.xlu0 %v274_v10  ;;  %278 = vadd.xlane.f32.xlu1 %v277_v11  ;;  %v9676_v10 = vld [vmem:[%s16041_s3 + $0x10] sm:$0xff]  }
  0x1d   : > { %v9679_v11 = vld [vmem:[%s16041_s3 + $0xf0] sm:$0xff]  }
  0x20   : > { %281 = vadd.xlane.f32.xlu0 %v280_v14  ;;  %284 = vadd.xlane.f32.xlu1 %v283_v15  ;;  %v9681_v14 = vld [vmem:[%s16041_s3 + $0xb0] sm:$0xff]   ;;  %v9682_v15 = vld [vmem:[%s16041_s3 + $0x60] sm:$0xff]  }
  0xa1   : > { %v264_v17 = vpop.xlane.xlu0 %263  ;;  %v270_v18 = vpop.xlane.xlu1 %269 }
  0xa2   : > { %v287_v19 = vmul.f32 0.03125, %v264_v17  ;;  %v289_v20 = vmul.f32 0.03125, %v270_v18  ;;  %v9683_v17 = vld [vmem:[%s16041_s3 + $0xf8] sm:$0xff]  }
  0xa3   : > { %v9685_v18 = vld [vmem:[%s16041_s3 + $0xb8] sm:$0xff]  }
  0xa4   : > { %v10103_v21 = vsub.f32 %v253_v0, %v287_v19  ;;  %v10105_v22 = vsub.f32 %v255_v1, %v289_v20  ;;  %v9666_v0 = vld [vmem:[%s16041_s3 + $0x40] sm:$0xff]   ;;  %v9669_v1 = vld [vmem:[%s16041_s3 + $0x98] sm:$0xff]   ;;  %v9686_v20 = vld [vmem:[%s16041_s3 + $0x68] sm:$0xff]  }
  0xa5   : > { %v267_v23 = vpop.xlane.xlu0 %266  ;;  %v273_v24 = vpop.xlane.xlu1 %272  ;;  %9047 = vmatprep.subr.bf16.mxu0 %v9666_v0  ;;  %9094 = vmatpush3.bf16.msra.mxu1 %v9669_v1  ;;  %v9684_v19 = vld [vmem:[%s16041_s3 + $0x20] sm:$0xff]  }
  0xa6   : > { %v288_v25 = vmul.f32 0.03125, %v267_v23  ;;  %v290_v26 = vmul.f32 0.03125, %v273_v24  ;;  %v303_v27 = vmul.f32 %v10103_v21, %v10103_v21  ;;  %v305_v28 = vmul.f32 %v10105_v22, %v10105_v22  ;;  %9095 = vmatprep.subr.bf16.mxu1 %v9671_v3  ;;  %v9687_v23 = vld [vmem:[%s16041_s3 + $0x1c0] sm:$0xff]   ;;  %v9688_v24 = vld [vmem:[%s16041_s3 + $0x28] sm:$0xff]  }
  0xa8   : > { %v10111_v29 = vsub.f32 %v254_v2, %v288_v25  ;;  %v10113_v30 = vsub.f32 %v256_v5, %v290_v26  ;;  %v311_v31 = vsel %vm261_vm0, %v303_v27, 0.0  ;;  %v317_v34 = vsel %vm261_vm0, %v305_v28, 0.0  ;;  %v9668_v2 = vld [vmem:[%s16041_s3] sm:$0xff]   ;;  %v9690_v25 = vld [vmem:[%s16041_s3 + $0x70] sm:$0xff]   ;;  %v9694_v27 = vld [vmem:[%s16041_s3 + $0x78] sm:$0xff]  }
  0xa9   : > { %312 = vadd.xlane.f32.xlu0 %v311_v31  ;;  %v276_v32 = vpop.xlane.xlu0 %275  ;;  %v279_v33 = vpop.xlane.xlu1 %278  ;;  %9048 = vmatpush3.bf16.msra.mxu0 %v9668_v2  ;;  %v9673_v5 = vld [vmem:[%s16041_s3 + $0xa0] sm:$0xff]   ;;  %v9692_v26 = vld [vmem:[%s16041_s3 + $0x30] sm:$0xff]   ;;  %v9696_v28 = vld [vmem:[%s16041_s3 + $0x38] sm:$0xff]  }
  0xaa   : > { %v291_v35 = vmul.f32 0.03125, %v276_v32  ;;  %v292_v36 = vmul.f32 0.03125, %v279_v33  ;;  %v304_v37 = vmul.f32 %v10111_v29, %v10111_v29  ;;  %v306_v38 = vmul.f32 %v10113_v30, %v10113_v30  ;;  %9049 = vmatprep.subr.bf16.mxu0 %v9670_v4  ;;  %9096 = vmatpush3.bf16.msra.mxu1 %v9673_v5  ;;  %v9698_v31 = vld [vmem:[%s16041_s3 + $0x140] sm:$0xff]  }
  0xac   : > { %v10121_v39 = vsub.f32 %v257_v6, %v291_v35  ;;  %v10123_v40 = vsub.f32 %v258_v7, %v292_v36  ;;  %v314_v41 = vsel %vm261_vm0, %v304_v37, 0.0  ;;  %v320_v44 = vsel %vm261_vm0, %v306_v38, 0.0  ;;  %v9672_v6 = vld [vmem:[%s16041_s3 + $0x8] sm:$0xff]  }
  0xad   : > { %318 = vadd.xlane.f32.xlu0 %v317_v34  ;;  %315 = vadd.xlane.f32.xlu1 %v314_v41  ;;  %v282_v42 = vpop.xlane.xlu0 %281  ;;  %v285_v43 = vpop.xlane.xlu1 %284  ;;  %v9675_v7 = vld [vmem:[%s16041_s3 + $0xe8] sm:$0xff]  }
  0xae   : > { %v293_v45 = vmul.f32 0.03125, %v282_v42  ;;  %v294_v46 = vmul.f32 0.03125, %v285_v43  ;;  %v307_v47 = vmul.f32 %v10121_v39, %v10121_v39  ;;  %v308_v48 = vmul.f32 %v10123_v40, %v10123_v40  ;;  %9050 = vmatpush3.bf16.msra.mxu0 %v9672_v6  ;;  %9097 = vmatprep.subr.bf16.mxu1 %v9675_v7 }
  0xaf   : > { %9051 = vmatprep.subr.bf16.mxu0 %v9674_v8  ;;  %9098 = vmatpush3.bf16.msra.mxu1 %v9677_v9 }
  0xb0   : > { %v10131_v49 = vsub.f32 %v259_v12, %v293_v45  ;;  %v10133_v50 = vsub.f32 %v260_v13, %v294_v46  ;;  %v323_v51 = vsel %vm261_vm0, %v307_v47, 0.0  ;;  %v326_v52 = vsel %vm261_vm0, %v308_v48, 0.0  ;;  %v9678_v12 = vld [vmem:[%s16041_s3 + $0x58] sm:$0xff]   ;;  %9099 = vmatprep.subr.bf16.mxu1 %v9679_v11 }
  0xb1   : > { %321 = vadd.xlane.f32.xlu1 %v320_v44  ;;  %324 = vadd.xlane.f32.xlu0 %v323_v51  ;;  %v9680_v13 = vld [vmem:[%s16041_s3 + $0x18] sm:$0xff]  }
  0xb2   : > { %v309_v53 = vmul.f32 %v10131_v49, %v10131_v49  ;;  %v310_v54 = vmul.f32 %v10133_v50, %v10133_v50  ;;  %9052 = vmatpush3.bf16.msra.mxu0 %v9676_v10 }
  0xb3   : > { %9053 = vmatprep.subr.bf16.mxu0 %v9678_v12  ;;  %9100 = vmatpush3.bf16.msra.mxu1 %v9681_v14 }
  0xb4   : > { %v329_v55 = vsel %vm261_vm0, %v309_v53, 0.0  ;;  %v332_v56 = vsel %vm261_vm0, %v310_v54, 0.0  ;;  %9101 = vmatprep.subr.bf16.mxu1 %v9683_v17 }
  0xb5   : > { %327 = vadd.xlane.f32.xlu1 %v326_v52  ;;  %330 = vadd.xlane.f32.xlu0 %v329_v55 }
  0xb6   : > { %9054 = vmatpush3.bf16.msra.mxu0 %v9680_v13 }
  0xb7   : > { %9055 = vmatprep.subr.bf16.mxu0 %v9682_v15  ;;  %9102 = vmatpush3.bf16.msra.mxu1 %v9685_v18 }
  0xb8   : > { %9167 = vmatprep.subr.bf16.mxu1 %v9687_v23 }
  0xb9   : > { %333 = vadd.xlane.f32.xlu1 %v332_v56  ;;  %v7933_v56 = vld [vmem:[%s16039_s1] ss:$0 sm:$0xff] }
  0xba   : > { %9056 = vmatpush3.bf16.msra.mxu0 %v9684_v19 }
  0xbb   : > { %9057 = vmatprep.subr.bf16.mxu0 %v9686_v20 }
  0xbe   : > { %9058 = vmatpush3.bf16.msra.mxu0 %v9688_v24 }
  0xbf   : > { %9059 = vmatprep.subr.bf16.mxu0 %v9690_v25 }
  0xc2   : > { %9060 = vmatpush3.bf16.msra.mxu0 %v9692_v26 }
  0xc3   : > { %9061 = vmatprep.subr.bf16.mxu0 %v9694_v27 }
  0xc6   : > { %9062 = vmatpush3.bf16.msra.mxu0 %v9696_v28 }
  0xc7   : > { %9127 = vmatprep.subr.bf16.mxu0 %v9698_v31 }
 0x136   : > { %v313_v32 = vpop.xlane.xlu0 %312 }
 0x137   : > { %v335_v33 = vmul.f32 0.03125, %v313_v32 }
 0x139   : > { %v343_v34 = vadd.f32 1e-05, %v335_v33 }
 0x13a   : > { %v316_v35 = vpop.xlane.xlu1 %315  ;;  %v319_v36 = vpop.xlane.xlu0 %318 }
 0x13b   : > { %9876 = vrsqrt.f32 %v343_v34  ;;  %v336_v37 = vmul.f32 0.03125, %v316_v35  ;;  %v337_v38 = vmul.f32 0.03125, %v319_v36 }
 0x13d   : > { %v344_v41 = vadd.f32 1e-05, %v336_v37  ;;  %v345_v42 = vadd.f32 1e-05, %v337_v38 }
 0x13e   : > { %v322_v43 = vpop.xlane.xlu1 %321  ;;  %v325_v44 = vpop.xlane.xlu0 %324 }
 0x13f   : > { %9878 = vrsqrt.f32 %v344_v41  ;;  %v338_v45 = vmul.f32 0.03125, %v322_v43  ;;  %v339_v46 = vmul.f32 0.03125, %v325_v44 }
 0x140   : > { %9880 = vrsqrt.f32 %v345_v42 }
 0x141   : > { %v346_v47 = vadd.f32 1e-05, %v338_v45  ;;  %v347_v48 = vadd.f32 1e-05, %v339_v46 }
 0x142   : > { %v328_v51 = vpop.xlane.xlu1 %327  ;;  %v331_v52 = vpop.xlane.xlu0 %330 }
 0x143   : > { %9882 = vrsqrt.f32 %v346_v47  ;;  %v340_v53 = vmul.f32 0.03125, %v328_v51  ;;  %v341_v54 = vmul.f32 0.03125, %v331_v52 }
 0x144   : > { %9884 = vrsqrt.f32 %v347_v48 }
 0x145   : > { %v9877_v55 = vpop.eup %9876  ;;  %v348_v57 = vadd.f32 1e-05, %v340_v53  ;;  %v349_v58 = vadd.f32 1e-05, %v341_v54 }
 0x146   : > { %v359_v59 = vmul.f32 %v9877_v55, %v10103_v21  ;;  %v334_v60 = vpop.xlane.xlu1 %333 }
 0x147   : > { %9886 = vrsqrt.f32 %v348_v57  ;;  %v342_v62 = vmul.f32 0.03125, %v334_v60 }
 0x148   : > { %v374_v63 = vmul.f32 %v7933_v56, %v359_v59  ;;  %9888 = vrsqrt.f32 %v349_v58 }
 0x149   : > { %v9879_v0 = vpop.eup %9878  ;;  %v350_v1 = vadd.f32 1e-05, %v342_v62 }
 0x14a   : > { %v9881_v2 = vpop.eup %9880  ;;  %v389_v3 = vadd.f32 %v7934_v61, %v374_v63  ;;  %v360_v4 = vmul.f32 %v9879_v0, %v10111_v29 }
 0x14b   : > { %v361_v5 = vmul.f32 %v9881_v2, %v10105_v22  ;;  %9890 = vrsqrt.f32 %v350_v1 }
 0x14c   : > { %405 = vst.msk [vmem:[#allocation2] sm:$0xff] %vm261_vm0, %v389_v3  ;;  %v375_v21 = vmul.f32 %v7933_v56, %v360_v4 }
 0x14d   : > { %v9883_v6 = vpop.eup %9882  ;;  %v376_v7 = vmul.f32 %v7933_v56, %v361_v5 }
 0x14e   : > { %v9885_v8 = vpop.eup %9884  ;;  %v390_v9 = vadd.f32 %v7934_v61, %v375_v21  ;;  %v362_v10 = vmul.f32 %v9883_v6, %v10113_v30 }
 0x14f   : > { %v391_v11 = vadd.f32 %v7934_v61, %v376_v7  ;;  %v363_v12 = vmul.f32 %v9885_v8, %v10121_v39 }
 0x150   : > { %406 = vst.msk [vmem:[#allocation2 + $0x8] sm:$0xff] %vm261_vm0, %v390_v9  ;;  %v377_v13 = vmul.f32 %v7933_v56, %v362_v10 }
 0x151   : > { %v9887_v14 = vpop.eup %9886  ;;  %407 = vst.msk [vmem:[#allocation2 + $0x10] sm:$0xff] %vm261_vm0, %v391_v11  ;;  %v378_v22 = vmul.f32 %v7933_v56, %v363_v12 }
 0x152   : > { %v9889_v29 = vpop.eup %9888  ;;  %v392_v15 = vadd.f32 %v7934_v61, %v377_v13  ;;  %v364_v17 = vmul.f32 %v9887_v14, %v10123_v40 }
 0x153   : > { %v10260_v18 = vld [vmem:[#allocation2] sm:$0xff]  ;;  %v393_v19 = vadd.f32 %v7934_v61, %v378_v22  ;;  %v365_v20 = vmul.f32 %v9889_v29, %v10131_v49 }
 0x154   : > { %408 = vst.msk [vmem:[#allocation2 + $0x18] sm:$0xff] %vm261_vm0, %v392_v15  ;;  %v379_v30 = vmul.f32 %v7933_v56, %v364_v17  ;;  %vm544_vm1 = vcmp.ge.f32.partialorder %v10260_v18, -2.2  ;;  %vm568_vm2 = vcmp.ge.f32.partialorder %v10260_v18, -1.8  ;;  %vm616_vm4 = vcmp.ge.f32.partialorder %v10260_v18, -1.0 }
 0x155   : > { %vm592_vm3 = vcmp.ge.f32.partialorder %v10260_v18, -1.4  ;;  %v9891_v39 = vpop.eup %9890  ;;  %409 = vst.msk [vmem:[#allocation2 + $0x20] sm:$0xff] %vm261_vm0, %v393_v19  ;;  %v380_v23 = vmul.f32 %v7933_v56, %v365_v20  ;;  %v7951_v40 = vsel %vm544_vm1, 1.0, %v10025_v16  ;;  %v7959_v24 = vsel %vm568_vm2, 1.0, %v10025_v16 }
 0x156   : > { %v394_v25 = vadd.f32 %v7934_v61, %v379_v30  ;;  %v366_v49 = vmul.f32 %v9891_v39, %v10133_v50  ;;  %vm640_vm5 = vcmp.ge.f32.partialorder %v10260_v18, -0.6  ;;  %v7967_v28 = vsel %vm592_vm3, 1.0, %v10025_v16  ;;  %v10285_v50 = vld [vmem:[#allocation2 + $0x38] sm:$0xff] }
 0x157   : > { %v10273_v26 = vld [vmem:[#allocation2 + $0x8] sm:$0xff]  ;;  %v395_v27 = vadd.f32 %v7934_v61, %v380_v23  ;;  %v7975_v31 = vsel %vm616_vm4, 1.0, %v10025_v16  ;;  %v10278_v32 = vsel %vm640_vm5, 1.0, %v10025_v16  ;;  %16394 = vst [vmem:[#allocation5_spill] sm:$0xff] %v10285_v50  ;;  %v832_v38 = vsub.f32 %v7951_v40, %v7959_v24 }
 0x158   : > { %410 = vst.msk [vmem:[#allocation2 + $0x28] sm:$0xff] %vm261_vm0, %v394_v25  ;;  %v381_v33 = vmul.f32 %v7933_v56, %v366_v49  ;;  %vm545_vm6 = vcmp.ge.f32.partialorder %v10273_v26, -2.2  ;;  %vm569_vm7 = vcmp.ge.f32.partialorder %v10273_v26, -1.8  ;;  %vm617_vm8 = vcmp.ge.f32.partialorder %v10273_v26, -1.0 }
 0x159   : > { %411 = vst.msk [vmem:[#allocation2 + $0x30] sm:$0xff] %vm261_vm0, %v395_v27  ;;  %v7952_v34 = vsel %vm545_vm6, 1.0, %v10285_v50  ;;  %v7960_v35 = vsel %vm569_vm7, 1.0, %v10285_v50  ;;  %vm593_vm9 = vcmp.ge.f32.partialorder %v10273_v26, -1.4  ;;  %v7976_v16 = vsel %vm617_vm8, 1.0, %v10285_v50 }
 0x15a   : > { %v396_v36 = vadd.f32 %v7934_v61, %v381_v33  ;;  %v7968_v37 = vsel %vm593_vm9, 1.0, %v10285_v50  ;;  %vm641_vm10 = vcmp.ge.f32.partialorder %v10273_v26, -0.6  ;;  %v833_v42 = vsub.f32 %v7952_v34, %v7960_v35 }
 0x15b   : > { %v10294_v41 = vsel %vm641_vm10, 1.0, %v10285_v50  ;;  %v840_v43 = vsub.f32 %v7959_v24, %v7967_v28  ;;  %v841_v44 = vsub.f32 %v7960_v35, %v7968_v37  ;;  %v848_v45 = vsub.f32 %v7967_v28, %v7975_v31 }
 0x15c   : > { %412 = vst.msk [vmem:[#allocation2 + $0x38] sm:$0xff] %vm261_vm0, %v396_v36  ;;  %v849_v46 = vsub.f32 %v7968_v37, %v7976_v16  ;;  %v10298_v47 = vsub.f32 %v7975_v31, %v10278_v32  ;;  %v8047_v48 = vadd.f32 2.2, %v10260_v18  ;;  %v10302_v51 = vsub.f32 %v7976_v16, %v10294_v41 }
 0x15d   : > { %v8048_v52 = vadd.f32 2.2, %v10273_v26  ;;  %v10306_v53 = vadd.f32 1.8, %v10260_v18  ;;  %v10309_v54 = vadd.f32 1.8, %v10273_v26 }
 0x15e   : > { %v10312_v55 = vadd.f32 1.4, %v10260_v18  ;;  %v10315_v56 = vadd.f32 1.4, %v10273_v26  ;;  %v10318_v57 = vadd.f32 1.0, %v10260_v18  ;;  %v10321_v58 = vadd.f32 1.0, %v10273_v26 }
 0x15f   : > { %v10324_v59 = vadd.f32 0.6, %v10260_v18  ;;  %v10327_v60 = vadd.f32 0.6, %v10273_v26  ;;  %v1016_v61 = vmul.f32 %v8047_v48, %v832_v38  ;;  %v1017_v62 = vmul.f32 %v8048_v52, %v833_v42 }
 0x160   : > { %v1024_v63 = vmul.f32 %v10312_v55, %v840_v43  ;;  %v1025_v0 = vmul.f32 %v10315_v56, %v841_v44  ;;  %v1040_v1 = vmul.f32 %v10306_v53, %v840_v43  ;;  %v1041_v2 = vmul.f32 %v10309_v54, %v841_v44 }
 0x161   : > { %16395 = vst [vmem:[#allocation6_spill] sm:$0xff] %v10324_v59  ;;  %16396 = vst [vmem:[#allocation7_spill] sm:$0xff] %v10327_v60  ;;  %v1048_v3 = vmul.f32 %v10318_v57, %v848_v45  ;;  %v1049_v4 = vmul.f32 %v10321_v58, %v849_v46  ;;  %v1064_v5 = vmul.f32 %v10312_v55, %v848_v45  ;;  %vm664_vm11 = vcmp.ge.f32.partialorder %v10260_v18, -0.2 }
 0x162   : > { %v1065_v21 = vmul.f32 %v10315_v56, %v849_v46  ;;  %v1032_v6 = vsub.f32 %v1016_v61, %v1024_v63  ;;  %v1033_v7 = vsub.f32 %v1017_v62, %v1025_v0  ;;  %v1072_v8 = vmul.f32 %v10324_v59, %v10298_v47 }
 0x163   : > { %v1073_v9 = vmul.f32 %v10327_v60, %v10302_v51  ;;  %v1056_v10 = vsub.f32 %v1040_v1, %v1048_v3  ;;  %v1057_v11 = vsub.f32 %v1041_v2, %v1049_v4  ;;  %vm665_vm12 = vcmp.ge.f32.partialorder %v10273_v26, -0.2 }
 0x164   : > { %v1080_v12 = vsub.f32 %v1064_v5, %v1072_v8  ;;  %v1256_v14 = vmul.f32 %v8047_v48, %v1032_v6  ;;  %v1257_v22 = vmul.f32 %v8048_v52, %v1033_v7  ;;  %v7991_v39 = vsel %vm664_vm11, 1.0, %v10285_v50 }
 0x165   : > { %v1081_v13 = vsub.f32 %v1065_v21, %v1073_v9  ;;  %v1264_v29 = vmul.f32 %v10318_v57, %v1056_v10  ;;  %v1265_v15 = vmul.f32 %v10321_v58, %v1057_v11  ;;  %v1280_v17 = vmul.f32 %v10306_v53, %v1056_v10 }
 0x166   : > { %v1281_v19 = vmul.f32 %v10309_v54, %v1057_v11  ;;  %v1288_v20 = vmul.f32 %v10324_v59, %v1080_v12  ;;  %v7992_v23 = vsel %vm665_vm12, 1.0, %v10285_v50  ;;  %vm688_vm13 = vcmp.ge.f32.partialorder %v10260_v18, 0.2 }
 0x167   : > { %v1289_v30 = vmul.f32 %v10327_v60, %v1081_v13  ;;  %v1272_v40 = vsub.f32 %v1256_v14, %v1264_v29  ;;  %v1273_v24 = vsub.f32 %v1257_v22, %v1265_v15  ;;  %vm689_vm14 = vcmp.ge.f32.partialorder %v10273_v26, 0.2 }
 0x168   : > { %v10353_v25 = vsub.f32 %v1280_v17, %v1288_v20  ;;  %v7999_v27 = vsel %vm688_vm13, 1.0, %v10285_v50  ;;  %v8000_v28 = vsel %vm689_vm14, 1.0, %v10285_v50  ;;  %vm712_vm15 = vcmp.ge.f32.partialorder %v10260_v18, 0.6 }
 0x169   : > { %v10355_v49 = vsub.f32 %v1281_v19, %v1289_v30  ;;  %v1472_v31 = vmul.f32 %v8047_v48, %v1272_v40  ;;  %v1473_v33 = vmul.f32 %v8048_v52, %v1273_v24  ;;  %vm713_vm1 = vcmp.ge.f32.partialorder %v10273_v26, 0.6 }
 0x16a   : > { %v1480_v34 = vmul.f32 %v10324_v59, %v10353_v25  ;;  %v10366_v16 = vsel %vm712_vm15, 1.0, %v10285_v50  ;;  %v10369_v36 = vsel %vm713_vm1, 1.0, %v10285_v50  ;;  %v864_v37 = vsub.f32 %v10278_v32, %v7991_v39 }
 0x16b   : > { %v1481_v35 = vmul.f32 %v10327_v60, %v10355_v49  ;;  %v865_v38 = vsub.f32 %v10294_v41, %v7992_v23  ;;  %v872_v42 = vsub.f32 %v7991_v39, %v7999_v27  ;;  %v873_v43 = vsub.f32 %v7992_v23, %v8000_v28 }
 0x16c   : > { %v1488_v44 = vsub.f32 %v1472_v31, %v1480_v34  ;;  %v10374_v46 = vsub.f32 %v7999_v27, %v10366_v16  ;;  %v10377_v48 = vsub.f32 %v8000_v28, %v10369_v36  ;;  %v10380_v52 = vadd.f32 0.2, %v10260_v18 }
 0x16d   : > { %v1489_v45 = vsub.f32 %v1473_v33, %v1481_v35  ;;  %v10383_v61 = vadd.f32 0.2, %v10273_v26  ;;  %v10386_v32 = vadd.f32 -0.2, %v10260_v18  ;;  %v1088_v41 = vmul.f32 %v10318_v57, %v10298_v47 }
 0x16e   : > { %16397 = vst [vmem:[#allocation8_spill] sm:$0xff] %v10380_v52  ;;  %v10391_v63 = vadd.f32 -0.2, %v10273_v26  ;;  %v10394_v0 = vadd.f32 -0.6, %v10260_v18  ;;  %v1089_v2 = vmul.f32 %v10321_v58, %v10302_v51  ;;  %v1096_v3 = vmul.f32 %v10380_v52, %v864_v37 }
 0x16f   : > { %16398 = vst [vmem:[#allocation9_spill] sm:$0xff] %v10383_v61  ;;  %v1664_v62 = vpack.c.bf16 %v1489_v45, %v1488_v44  ;;  %v10397_v1 = vadd.f32 -0.6, %v10273_v26  ;;  %v1097_v4 = vmul.f32 %v10383_v61, %v865_v38  ;;  %v1112_v5 = vmul.f32 %v10324_v59, %v864_v37  ;;  %v10437_v44 = vld [vmem:[#allocation2 + $0x18] sm:$0xff] }
 0x170   : > { %16399 = vst [vmem:[#allocation10_spill] sm:$0xff] %v10394_v0  ;;  %v1113_v47 = vmul.f32 %v10327_v60, %v865_v38  ;;  %v1120_v21 = vmul.f32 %v10386_v32, %v872_v42  ;;  %v1121_v6 = vmul.f32 %v10391_v63, %v873_v43  ;;  %v1136_v7 = vmul.f32 %v10380_v52, %v872_v42 }
 0x171   : > { %16400 = vst [vmem:[#allocation11_spill] sm:$0xff] %v10397_v1  ;;  %2372 = vmatprep.mubr.bf16.mxu0 %v1664_v62  ;;  %v1104_v8 = vsub.f32 %v1088_v41, %v1096_v3  ;;  %v1105_v9 = vsub.f32 %v1089_v2, %v1097_v4  ;;  %v1137_v10 = vmul.f32 %v10383_v61, %v873_v43  ;;  %v10435_v43 = vld [vmem:[#allocation2 + $0x10] sm:$0xff]  ;;  %vm595_vm3 = vcmp.ge.f32.partialorder %v10437_v44, -1.4 }
 0x172   : > { %v1144_v51 = vmul.f32 %v10394_v0, %v10374_v46  ;;  %v1128_v11 = vsub.f32 %v1112_v5, %v1120_v21  ;;  %v1129_v14 = vsub.f32 %v1113_v47, %v1121_v6  ;;  %v1145_v22 = vmul.f32 %v10397_v1, %v10377_v48 }
 0x173   : > { %v1304_v29 = vmul.f32 %v10312_v55, %v1080_v12  ;;  %v1305_v17 = vmul.f32 %v10315_v56, %v1081_v13  ;;  %v1312_v19 = vmul.f32 %v10380_v52, %v1104_v8  ;;  %v1313_v20 = vmul.f32 %v10383_v61, %v1105_v9 }
 0x174   : > { %v10414_v15 = vsub.f32 %v1136_v7, %v1144_v51  ;;  %v10419_v30 = vsub.f32 %v1137_v10, %v1145_v22  ;;  %v1328_v39 = vmul.f32 %v10318_v57, %v1104_v8  ;;  %v1329_v23 = vmul.f32 %v10321_v58, %v1105_v9  ;;  %v9689_v8 = vld [vmem:[%s16041_s3 + $0x180] sm:$0xff]  }
 0x175   : > { %v1336_v40 = vmul.f32 %v10386_v32, %v1128_v11  ;;  %v1320_v24 = vsub.f32 %v1304_v29, %v1312_v19  ;;  %v1321_v27 = vsub.f32 %v1305_v17, %v1313_v20  ;;  %v1337_v12 = vmul.f32 %v10391_v63, %v1129_v14 }
 0x176   : > { %16401 = vst [vmem:[#allocation12_spill] sm:$0xff] %v10414_v15  ;;  %16402 = vst [vmem:[#allocation13_spill] sm:$0xff] %v10419_v30  ;;  %v1352_v28 = vmul.f32 %v10324_v59, %v1128_v11  ;;  %v1353_v13 = vmul.f32 %v10327_v60, %v1129_v14  ;;  %v1360_v33 = vmul.f32 %v10394_v0, %v10414_v15  ;;  %vm594_vm2 = vcmp.ge.f32.partialorder %v10435_v43, -1.4  ;;  %v9691_v14 = vld [vmem:[%s16041_s3 + $0x1c8] sm:$0xff]  }
 0x177   : > { %v1344_v31 = vsub.f32 %v1328_v39, %v1336_v40  ;;  %v1361_v34 = vmul.f32 %v10397_v1, %v10419_v30  ;;  %v1345_v35 = vsub.f32 %v1329_v23, %v1337_v12  ;;  %v1520_v37 = vmul.f32 %v10312_v55, %v1320_v24  ;;  %v9693_v40 = vld [vmem:[%s16041_s3 + $0x188] sm:$0xff]  }
 0x178   : > { %v1521_v38 = vmul.f32 %v10315_v56, %v1321_v27  ;;  %v1496_v42 = vmul.f32 %v10306_v53, %v10353_v25  ;;  %v10439_v45 = vsub.f32 %v1352_v28, %v1360_v33  ;;  %v1497_v53 = vmul.f32 %v10309_v54, %v10355_v49 }
 0x179   : > { %v10441_v41 = vsub.f32 %v1353_v13, %v1361_v34  ;;  %v1528_v62 = vmul.f32 %v10386_v32, %v1344_v31  ;;  %v10445_v2 = vmul.f32 %v10318_v57, %v1344_v31  ;;  %v1529_v55 = vmul.f32 %v10391_v63, %v1345_v35  ;;  %v9695_v31 = vld [vmem:[%s16041_s3 + $0x1d0] sm:$0xff]  }
 0x17a   : > { %16403 = vst [vmem:[#allocation14_spill] sm:$0xff] %v10439_v45  ;;  %v10449_v56 = vmul.f32 %v10321_v58, %v1345_v35  ;;  %v1504_v25 = vmul.f32 %v10380_v52, %v1320_v24  ;;  %v10456_v4 = vmul.f32 %v10394_v0, %v10439_v45  ;;  %v1505_v57 = vmul.f32 %v10383_v61, %v1321_v27 }
 0x17b   : > { %16404 = vst [vmem:[#allocation15_spill] sm:$0xff] %v10441_v41  ;;  %16405 = vst [vmem:[#allocation16_spill] sm:$0xff] %v10445_v2  ;;  %v1536_v3 = vsub.f32 %v1520_v37, %v1528_v62  ;;  %v10460_v5 = vmul.f32 %v10397_v1, %v10441_v41  ;;  %v1537_v47 = vsub.f32 %v1521_v38, %v1529_v55  ;;  %v10470_v6 = vsel %vm594_vm2, 1.0, %v10285_v50  ;;  %v9697_v37 = vld [vmem:[%s16041_s3 + $0x190] sm:$0xff]  }
 0x17c   : > { %16406 = vst [vmem:[#allocation17_spill] sm:$0xff] %v10449_v56  ;;  %16407 = vst [vmem:[#allocation18_spill] sm:$0xff] %v10456_v4  ;;  %v1512_v21 = vsub.f32 %v1496_v42, %v1504_v25  ;;  %v1513_v49 = vsub.f32 %v1497_v53, %v1505_v57  ;;  %v10476_v9 = vsel %vm595_vm3, 1.0, %v10285_v50  ;;  %vm618_vm4 = vcmp.ge.f32.partialorder %v10435_v43, -1.0 }
 0x17d   : > { %16408 = vst [vmem:[#allocation19_spill] sm:$0xff] %v10460_v5  ;;  %v1680_v7 = vpack.c.bf16 %v1537_v47, %v1536_v3  ;;  %vm619_vm5 = vcmp.ge.f32.partialorder %v10437_v44, -1.0  ;;  %v7977_v51 = vsel %vm618_vm4, 1.0, %v10285_v50  ;;  %vm642_vm6 = vcmp.ge.f32.partialorder %v10435_v43, -0.6 }
 0x17e   : > { %v1672_v10 = vpack.c.bf16 %v1513_v49, %v1512_v21  ;;  %v7978_v11 = vsel %vm619_vm5, 1.0, %v10285_v50  ;;  %vm643_vm7 = vcmp.ge.f32.partialorder %v10437_v44, -0.6  ;;  %v7985_v22 = vsel %vm642_vm6, 1.0, %v10285_v50 }
 0x17f   : > { %2437 = vmatprep.mubr.bf16.mxu1 %v1680_v7  ;;  %vm666_vm8 = vcmp.ge.f32.partialorder %v10435_v43, -0.2  ;;  %v10490_v29 = vsub.f32 %v10470_v6, %v7977_v51  ;;  %v7986_v17 = vsel %vm643_vm7, 1.0, %v10285_v50  ;;  %vm667_vm9 = vcmp.ge.f32.partialorder %v10437_v44, -0.2 }
 0x180   : > { %2438 = vmatmul.mubr.bf16.vlgmr.msra.gmra.mrb[0].mxu1 %v1672_v10  ;;  %v7993_v19 = vsel %vm666_vm8, 1.0, %v10285_v50  ;;  %vm690_vm10 = vcmp.ge.f32.partialorder %v10435_v43, 0.2  ;;  %v7994_v20 = vsel %vm667_vm9, 1.0, %v10285_v50  ;;  %vm691_vm11 = vcmp.ge.f32.partialorder %v10437_v44, 0.2 }
 0x181   : > { %9168 = vmatpush3.bf16.msra.mxu1 %v9689_v8  ;;  %v10499_v39 = vsel %vm690_vm10, 1.0, %v10285_v50  ;;  %v10502_v23 = vsub.f32 %v10476_v9, %v7978_v11  ;;  %v10508_v24 = vsel %vm691_vm11, 1.0, %v10285_v50  ;;  %v858_v27 = vsub.f32 %v7977_v51, %v7985_v22  ;;  %v9699_v8 = vld [vmem:[%s16041_s3 + $0x1d8] sm:$0xff]  }
 0x182   : > { %16409 = vst [vmem:[#allocation20_spill] sm:$0xff] %v10499_v39  ;;  %16410 = vst [vmem:[#allocation21_spill] sm:$0xff] %v10508_v24  ;;  %v859_v12 = vsub.f32 %v7978_v11, %v7986_v17  ;;  %v866_v28 = vsub.f32 %v7985_v22, %v7993_v19  ;;  %9169 = vmatprep.subr.bf16.mxu1 %v9691_v14  ;;  %v867_v13 = vsub.f32 %v7986_v17, %v7994_v20 }
 0x183   : > { %v10514_v33 = vsub.f32 %v7993_v19, %v10499_v39  ;;  %v10517_v34 = vsub.f32 %v7994_v20, %v10508_v24  ;;  %v10520_v35 = vadd.f32 1.4, %v10435_v43  ;;  %v10526_v38 = vadd.f32 1.4, %v10437_v44 }
 0x184   : > { %v10529_v42 = vadd.f32 1.0, %v10435_v43  ;;  %v10532_v62 = vadd.f32 1.0, %v10437_v44  ;;  %v10535_v55 = vadd.f32 0.6, %v10435_v43  ;;  %v10538_v53 = vadd.f32 0.6, %v10437_v44 }
 0x185   : > { %16411 = vst [vmem:[#allocation22_spill] sm:$0xff] %v10514_v33  ;;  %16412 = vst [vmem:[#allocation23_spill] sm:$0xff] %v10517_v34  ;;  %v10541_v25 = vadd.f32 0.2, %v10435_v43  ;;  %v10544_v3 = vadd.f32 0.2, %v10437_v44  ;;  %v1066_v57 = vmul.f32 %v10520_v35, %v10490_v29  ;;  %9170 = vmatpush3.bf16.msra.mxu1 %v9693_v40  ;;  %v1067_v49 = vmul.f32 %v10526_v38, %v10502_v23 }
 0x186   : > { %16413 = vst [vmem:[#allocation24_spill] sm:$0xff] %v10529_v42  ;;  %16414 = vst [vmem:[#allocation25_spill] sm:$0xff] %v10532_v62  ;;  %v10549_v47 = vadd.f32 -0.2, %v10435_v43  ;;  %v10552_v21 = vadd.f32 -0.2, %v10437_v44  ;;  %v1074_v7 = vmul.f32 %v10535_v55, %v858_v27  ;;  %9171 = vmatprep.subr.bf16.mxu1 %v9695_v31  ;;  %v1075_v10 = vmul.f32 %v10538_v53, %v859_v12 }
 0x187   : > { %16415 = vst [vmem:[#allocation26_spill] sm:$0xff] %v10535_v55  ;;  %16416 = vst [vmem:[#allocation27_spill] sm:$0xff] %v10538_v53  ;;  %v1090_v51 = vmul.f32 %v10529_v42, %v858_v27  ;;  %v1091_v11 = vmul.f32 %v10532_v62, %v859_v12  ;;  %v1098_v14 = vmul.f32 %v10541_v25, %v866_v28  ;;  %v9701_v27 = vld [vmem:[%s16041_s3 + $0x198] sm:$0xff]   ;;  %vm570_vm12 = vcmp.ge.f32.partialorder %v10435_v43, -1.8 }
 0x188   : > { %16417 = vst [vmem:[#allocation28_spill] sm:$0xff] %v10541_v25  ;;  %16418 = vst [vmem:[#allocation29_spill] sm:$0xff] %v10544_v3  ;;  %v1082_v22 = vsub.f32 %v1066_v57, %v1074_v7  ;;  %v1099_v17 = vmul.f32 %v10544_v3, %v867_v13  ;;  %v1114_v19 = vmul.f32 %v10535_v55, %v866_v28  ;;  %vm571_vm13 = vcmp.ge.f32.partialorder %v10437_v44, -1.8  ;;  %v9703_v28 = vld [vmem:[%s16041_s3 + $0x1e0] sm:$0xff]  }
 0x189   : > { %16419 = vst [vmem:[#allocation30_spill] sm:$0xff] %v10549_v47  ;;  %16420 = vst [vmem:[#allocation31_spill] sm:$0xff] %v10552_v21  ;;  %v1115_v20 = vmul.f32 %v10538_v53, %v867_v13  ;;  %v1083_v40 = vsub.f32 %v1067_v49, %v1075_v10  ;;  %v1106_v31 = vsub.f32 %v1090_v51, %v1098_v14  ;;  %9172 = vmatpush3.bf16.msra.mxu1 %v9697_v37 }
 0x18a   : > { %v1122_v58 = vmul.f32 %v10549_v47, %v10514_v33  ;;  %v1123_v54 = vmul.f32 %v10552_v21, %v10517_v34  ;;  %v1107_v12 = vsub.f32 %v1091_v11, %v1099_v17  ;;  %v1306_v57 = vmul.f32 %v10520_v35, %v1082_v22  ;;  %9173 = vmatprep.subr.bf16.mxu1 %v9699_v8 }
 0x18b   : > { %v1307_v37 = vmul.f32 %v10526_v38, %v1083_v40  ;;  %v1314_v7 = vmul.f32 %v10541_v25, %v1106_v31  ;;  %v1330_v51 = vmul.f32 %v10529_v42, %v1106_v31  ;;  %v10590_v8 = vsel %vm570_vm12, 1.0, %v10285_v50 }
 0x18c   : > { %v10580_v13 = vsub.f32 %v1114_v19, %v1122_v58  ;;  %v10582_v49 = vsub.f32 %v1115_v20, %v1123_v54  ;;  %v1315_v10 = vmul.f32 %v10544_v3, %v1107_v12  ;;  %v1331_v11 = vmul.f32 %v10532_v62, %v1107_v12  ;;  %v9705_v19 = vld [vmem:[%s16041_s3 + $0x1a0] sm:$0xff]  }
 0x18d   : > { %v1322_v14 = vsub.f32 %v1306_v57, %v1314_v7  ;;  %v10597_v17 = vsel %vm571_vm13, 1.0, %v10285_v50  ;;  %9174 = vmatpush3.bf16.msra.mxu1 %v9701_v27  ;;  %v10604_v31 = vsub.f32 %v10590_v8, %v10470_v6  ;;  %v8057_v57 = vadd.f32 1.8, %v10435_v43  ;;  %v9707_v27 = vld [vmem:[%s16041_s3 + $0x1e8] sm:$0xff]  }
 0x18e   : > { %16421 = vst [vmem:[#allocation32_spill] sm:$0xff] %v10580_v13  ;;  %16422 = vst [vmem:[#allocation33_spill] sm:$0xff] %v10582_v49  ;;  %v1338_v58 = vmul.f32 %v10549_v47, %v10580_v13  ;;  %v1339_v54 = vmul.f32 %v10552_v21, %v10582_v49  ;;  %v1323_v20 = vsub.f32 %v1307_v37, %v1315_v10  ;;  %9175 = vmatprep.subr.bf16.mxu1 %v9703_v28  ;;  %v10620_v10 = vld [vmem:[#allocation2 + $0x20] sm:$0xff] }
 0x18f   : > { %v10608_v12 = vsub.f32 %v10597_v17, %v10476_v9  ;;  %v1522_v37 = vmul.f32 %v10520_v35, %v1322_v14  ;;  %v8058_v6 = vadd.f32 1.8, %v10437_v44  ;;  %v1042_v13 = vmul.f32 %v8057_v57, %v10604_v31 }
 0x190   : > { %v10614_v7 = vsub.f32 %v1330_v51, %v1338_v58  ;;  %v10616_v49 = vsub.f32 %v1331_v11, %v1339_v54  ;;  %v1523_v9 = vmul.f32 %v10526_v38, %v1323_v20  ;;  %v1050_v28 = vmul.f32 %v10529_v42, %v10490_v29  ;;  %v10628_v51 = vld [vmem:[#allocation2 + $0x28] sm:$0xff] }
 0x191   : > { %v1051_v5 = vmul.f32 %v10532_v62, %v10502_v23  ;;  %v1043_v54 = vmul.f32 %v8058_v6, %v10608_v12  ;;  %v1290_v56 = vmul.f32 %v10535_v55, %v1082_v22  ;;  %9176 = vmatpush3.bf16.msra.mxu1 %v9705_v19  ;;  %v9709_v29 = vld [vmem:[%s16041_s3 + $0x1a8] sm:$0xff]   ;;  %v1291_v23 = vmul.f32 %v10538_v53, %v1083_v40 }
 0x192   : > { %16423 = vst [vmem:[#allocation34_spill] sm:$0xff] %v10614_v7  ;;  %16424 = vst [vmem:[#allocation35_spill] sm:$0xff] %v10616_v49  ;;  %v1530_v11 = vmul.f32 %v10549_v47, %v10614_v7  ;;  %v1531_v58 = vmul.f32 %v10552_v21, %v10616_v49  ;;  %v10639_v4 = vsub.f32 %v1042_v13, %v1050_v28  ;;  %9177 = vmatprep.subr.bf16.mxu1 %v9707_v27  ;;  %v9711_v49 = vld [vmem:[%s16041_s3 + $0x1f0] sm:$0xff]  }
 0x193   : > { %v1506_v2 = vmul.f32 %v10541_v25, %v1322_v14  ;;  %v1507_v7 = vmul.f32 %v10544_v3, %v1323_v20  ;;  %v10647_v19 = vsub.f32 %v1043_v54, %v1051_v5  ;;  %vm596_vm14 = vcmp.ge.f32.partialorder %v10620_v10, -1.4  ;;  %v9713_v5 = vld [vmem:[%s16041_s3 + $0x1b0] sm:$0xff]  }
 0x194   : > { %v1538_v34 = vsub.f32 %v1522_v37, %v1530_v11  ;;  %v1539_v22 = vsub.f32 %v1523_v9, %v1531_v58  ;;  %v1282_v13 = vmul.f32 %v8057_v57, %v10639_v4  ;;  %vm597_vm15 = vcmp.ge.f32.partialorder %v10628_v51, -1.4 }
 0x195   : > { %v10653_v40 = vsel %vm596_vm14, 1.0, %v10285_v50  ;;  %vm620_vm1 = vcmp.ge.f32.partialorder %v10620_v10, -1.0  ;;  %v1283_v20 = vmul.f32 %v8058_v6, %v10647_v19  ;;  %v10658_v27 = vsel %vm597_vm15, 1.0, %v10285_v50  ;;  %9178 = vmatpush3.bf16.msra.mxu1 %v9709_v29 }
 0x196   : > { %v1681_v14 = vpack.c.bf16 %v1539_v22, %v1538_v34  ;;  %vm621_vm2 = vcmp.ge.f32.partialorder %v10628_v51, -1.0  ;;  %v10664_v37 = vsub.f32 %v1282_v13, %v1290_v56  ;;  %v7979_v9 = vsel %vm620_vm1, 1.0, %v10285_v50  ;;  %9179 = vmatprep.subr.bf16.mxu1 %v9711_v49  ;;  %v9715_v34 = vld [vmem:[%s16041_s3 + $0x1f8] sm:$0xff]  }
 0x197   : > { %v7980_v28 = vsel %vm621_vm2, 1.0, %v10285_v50  ;;  %vm644_vm3 = vcmp.ge.f32.partialorder %v10620_v10, -0.6  ;;  %v10672_v11 = vsub.f32 %v1283_v20, %v1291_v23  ;;  %vm645_vm4 = vcmp.ge.f32.partialorder %v10628_v51, -0.6  ;;  %v9717_v23 = vld [vmem:[%s16041_s3 + $0x1b8] sm:$0xff]  }
 0x198   : > { %2445 = vmatprep.mubr.bf16.mxu1 %v1681_v14  ;;  %v7987_v58 = vsel %vm644_vm3, 1.0, %v10285_v50  ;;  %vm668_vm5 = vcmp.ge.f32.partialorder %v10620_v10, -0.2  ;;  %v1498_v56 = vmul.f32 %v8057_v57, %v10664_v37  ;;  %v7988_v54 = vsel %vm645_vm4, 1.0, %v10285_v50 }
 0x199   : > { %vm669_vm6 = vcmp.ge.f32.partialorder %v10628_v51, -0.2  ;;  %v7995_v49 = vsel %vm668_vm5, 1.0, %v10285_v50  ;;  %v1499_v29 = vmul.f32 %v8058_v6, %v10672_v11  ;;  %vm692_vm7 = vcmp.ge.f32.partialorder %v10620_v10, 0.2  ;;  %9180 = vmatpush3.bf16.msra.mxu1 %v9713_v5 }
 0x19a   : > { %v7996_v22 = vsel %vm669_vm6, 1.0, %v10285_v50  ;;  %vm693_vm8 = vcmp.ge.f32.partialorder %v10628_v51, 0.2  ;;  %v1514_v57 = vsub.f32 %v1498_v56, %v1506_v2  ;;  %v10689_v13 = vsel %vm692_vm7, 1.0, %v10285_v50  ;;  %9181 = vmatprep.subr.bf16.mxu1 %v9715_v34 }
 0x19b   : > { %16425 = vst [vmem:[#allocation36_spill] sm:$0xff] %v10689_v13  ;;  %v10692_v14 = vsel %vm693_vm8, 1.0, %v10285_v50  ;;  %v10695_v6 = vsub.f32 %v10653_v40, %v7979_v9  ;;  %v1515_v20 = vsub.f32 %v1499_v29, %v1507_v7  ;;  %v10698_v3 = vsub.f32 %v10658_v27, %v7980_v28 }
 0x19c   : > { %16426 = vst [vmem:[#allocation37_spill] sm:$0xff] %v10692_v14  ;;  %v860_v5 = vsub.f32 %v7979_v9, %v7987_v58  ;;  %v861_v25 = vsub.f32 %v7980_v28, %v7988_v54  ;;  %v868_v33 = vsub.f32 %v7987_v58, %v7995_v49  ;;  %v869_v60 = vsub.f32 %v7988_v54, %v7996_v22 }
 0x19d   : > { %v10701_v2 = vsub.f32 %v7995_v49, %v10689_v13  ;;  %v10704_v56 = vsub.f32 %v7996_v22, %v10692_v14  ;;  %v1673_v41 = vpack.c.bf16 %v1515_v20, %v1514_v57  ;;  %v10707_v59 = vadd.f32 1.4, %v10620_v10  ;;  %9182 = vmatpush3.bf16.msra.mxu1 %v9717_v23 }
 0x19e   : > { %v10710_v34 = vadd.f32 1.4, %v10628_v51  ;;  %v10713_v7 = vadd.f32 1.0, %v10620_v10  ;;  %v10716_v9 = vadd.f32 1.0, %v10628_v51  ;;  %v10719_v28 = vadd.f32 0.6, %v10620_v10 }
 0x19f   : > { %16427 = vst [vmem:[#allocation38_spill] sm:$0xff] %v10701_v2  ;;  %16428 = vst [vmem:[#allocation39_spill] sm:$0xff] %v10704_v56  ;;  %v10722_v58 = vadd.f32 0.6, %v10628_v51  ;;  %v488_v54 = vsub.f32 0.0, %v10260_v18  ;;  %2446 = vmatmul.mubr.bf16.gmra.mrb[4].mxu1 %v1673_v41  ;;  %v1068_v23 = vmul.f32 %v10707_v59, %v10695_v6 }
 0x1a0   : > { %16429 = vst [vmem:[#allocation40_spill] sm:$0xff] %v10713_v7  ;;  %16430 = vst [vmem:[#allocation41_spill] sm:$0xff] %v10716_v9  ;;  %v10726_v49 = vadd.f32 0.2, %v10620_v10  ;;  %v10729_v29 = vadd.f32 0.2, %v10628_v51  ;;  %v1069_v20 = vmul.f32 %v10710_v34, %v10698_v3  ;;  %v1076_v41 = vmul.f32 %v10719_v28, %v860_v5 }
 0x1a1   : > { %v10732_v22 = vadd.f32 -0.2, %v10620_v10  ;;  %v10737_v57 = vadd.f32 -0.2, %v10628_v51  ;;  %v1077_v14 = vmul.f32 %v10722_v58, %v861_v25  ;;  %v1092_v13 = vmul.f32 %v10713_v7, %v860_v5 }
 0x1a2   : > { %16431 = vst [vmem:[#allocation42_spill] sm:$0xff] %v10726_v49  ;;  %16432 = vst [vmem:[#allocation43_spill] sm:$0xff] %v10729_v29  ;;  %v1093_v45 = vmul.f32 %v10716_v9, %v861_v25  ;;  %v1100_v21 = vmul.f32 %v10726_v49, %v868_v33  ;;  %v1101_v47 = vmul.f32 %v10729_v29, %v869_v60  ;;  %vm546_vm9 = vcmp.ge.f32.partialorder %v10435_v43, -2.2 }
 0x1a3   : > { %16433 = vst [vmem:[#allocation44_spill] sm:$0xff] %v10737_v57  ;;  %v10747_v24 = vsub.f32 %v1068_v23, %v1076_v41  ;;  %v10749_v39 = vsub.f32 %v1069_v20, %v1077_v14  ;;  %v1116_v61 = vmul.f32 %v10719_v28, %v868_v33  ;;  %v1117_v30 = vmul.f32 %v10722_v58, %v869_v60 }
 0x1a4   : > { %v1108_v52 = vsub.f32 %v1092_v13, %v1100_v21  ;;  %v1109_v15 = vsub.f32 %v1093_v45, %v1101_v47  ;;  %v1124_v1 = vmul.f32 %v10732_v22, %v10701_v2  ;;  %v1125_v25 = vmul.f32 %v10737_v57, %v10704_v56 }
 0x1a5   : > { %v1308_v5 = vmul.f32 %v10707_v59, %v10747_v24  ;;  %v1309_v23 = vmul.f32 %v10710_v34, %v10749_v39  ;;  %v489_v14 = vsub.f32 0.0, %v10273_v26  ;;  %v496_v20 = vmul.f32 1.442695, %v488_v54 }
 0x1a6   : > { %v10762_v33 = vsub.f32 %v1116_v61, %v1124_v1  ;;  %v10764_v60 = vsub.f32 %v1117_v30, %v1125_v25  ;;  %v1316_v45 = vmul.f32 %v10726_v49, %v1108_v52  ;;  %v1317_v47 = vmul.f32 %v10729_v29, %v1109_v15 }
 0x1a7   : > { %v1332_v21 = vmul.f32 %v10713_v7, %v1108_v52  ;;  %v1333_v13 = vmul.f32 %v10716_v9, %v1109_v15  ;;  %9892 = vpow2.f32 %v496_v20  ;;  %v498_v41 = vmul.f32 1.442695, %v489_v14 }
 0x1a8   : > { %16434 = vst [vmem:[#allocation45_spill] sm:$0xff] %v10762_v33  ;;  %16435 = vst [vmem:[#allocation46_spill] sm:$0xff] %v10764_v60  ;;  %v1324_v56 = vsub.f32 %v1308_v5, %v1316_v45  ;;  %v1325_v2 = vsub.f32 %v1309_v23, %v1317_v47  ;;  %v1340_v0 = vmul.f32 %v10732_v22, %v10762_v33  ;;  %vm547_vm10 = vcmp.ge.f32.partialorder %v10437_v44, -2.2 }
 0x1a9   : > { %v1341_v61 = vmul.f32 %v10737_v57, %v10764_v60  ;;  %9894 = vpow2.f32 %v498_v41  ;;  %v8049_v1 = vadd.f32 2.2, %v10435_v43  ;;  %v7953_v25 = vsel %vm546_vm9, 1.0, %v10285_v50 }
 0x1aa   : > { %v10777_v52 = vsub.f32 %v1332_v21, %v1340_v0  ;;  %v1524_v30 = vmul.f32 %v10707_v59, %v1324_v56  ;;  %v1525_v54 = vmul.f32 %v10710_v34, %v1325_v2  ;;  %v7954_v5 = vsel %vm547_vm10, 1.0, %v10285_v50 }
 0x1ab   : > { %v10779_v15 = vsub.f32 %v1333_v13, %v1341_v61  ;;  %v8050_v23 = vadd.f32 2.2, %v10437_v44  ;;  %v1026_v14 = vmul.f32 %v10520_v35, %v10604_v31  ;;  %v834_v45 = vsub.f32 %v7953_v25, %v10590_v8 }
 0x1ac   : > { %16436 = vst [vmem:[#allocation47_spill] sm:$0xff] %v10777_v52  ;;  %v1532_v20 = vmul.f32 %v10732_v22, %v10777_v52  ;;  %v835_v47 = vsub.f32 %v7954_v5, %v10597_v17  ;;  %v1027_v21 = vmul.f32 %v10526_v38, %v10608_v12  ;;  %v1266_v13 = vmul.f32 %v10529_v42, %v10639_v4 }
 0x1ad   : > { %16437 = vst [vmem:[#allocation48_spill] sm:$0xff] %v10779_v15  ;;  %v1533_v0 = vmul.f32 %v10737_v57, %v10779_v15  ;;  %v1267_v41 = vmul.f32 %v10532_v62, %v10647_v19  ;;  %v1482_v35 = vmul.f32 %v10535_v55, %v10664_v37  ;;  %v1018_v52 = vmul.f32 %v8049_v1, %v834_v45 }
 0x1ae   : > { %v1540_v31 = vsub.f32 %v1524_v30, %v1532_v20  ;;  %v1019_v15 = vmul.f32 %v8050_v23, %v835_v47  ;;  %v1483_v8 = vmul.f32 %v10538_v53, %v10672_v11  ;;  %vm572_vm11 = vcmp.ge.f32.partialorder %v10620_v10, -1.8 }
 0x1af   : > { %v1541_v61 = vsub.f32 %v1525_v54, %v1533_v0  ;;  %vm573_vm12 = vcmp.ge.f32.partialorder %v10628_v51, -1.8  ;;  %v8059_v38 = vadd.f32 1.8, %v10620_v10  ;;  %v1034_v17 = vsub.f32 %v1018_v52, %v1026_v14  ;;  %v10824_v0 = vld [vmem:[#allocation2 + $0x30] sm:$0xff] }
 0x1b0   : > { %v1035_v12 = vsub.f32 %v1019_v15, %v1027_v21  ;;  %v10808_v19 = vsel %vm572_vm11, 1.0, %v10285_v50  ;;  %v10811_v30 = vsel %vm573_vm12, 1.0, %v10285_v50  ;;  %v8060_v11 = vadd.f32 1.8, %v10628_v51  ;;  %v10833_v21 = vld [vmem:[#allocation2 + $0x38] sm:$0xff] }
 0x1b1   : > { %v1682_v4 = vpack.c.bf16 %v1541_v61, %v1540_v31  ;;  %v9893_v37 = vpop.eup %9892  ;;  %v10815_v54 = vsub.f32 %v10808_v19, %v10653_v40  ;;  %v1052_v25 = vmul.f32 %v10713_v7, %v10695_v6  ;;  %v1258_v52 = vmul.f32 %v8049_v1, %v1034_v17 }
 0x1b2   : > { %v512_v5 = vadd.f32 1.0, %v9893_v37  ;;  %v1259_v15 = vmul.f32 %v8050_v23, %v1035_v12  ;;  %v10822_v14 = vsub.f32 %v10811_v30, %v10658_v27  ;;  %v1053_v40 = vmul.f32 %v10716_v9, %v10698_v3 }
 0x1b3   : > { %2453 = vmatprep.mubr.bf16.mxu1 %v1682_v4  ;;  %v9895_v20 = vpop.eup %9894  ;;  %v1044_v45 = vmul.f32 %v8059_v38, %v10815_v54  ;;  %v1292_v47 = vmul.f32 %v10719_v28, %v10747_v24  ;;  %v1293_v6 = vmul.f32 %v10722_v58, %v10749_v39  ;;  %v1274_v27 = vsub.f32 %v1258_v52, %v1266_v13 }
 0x1b4   : > { %v513_v31 = vadd.f32 1.0, %v9895_v20  ;;  %9896 = vrcp.f32 %v512_v5  ;;  %v1275_v61 = vsub.f32 %v1259_v15, %v1267_v41  ;;  %v1045_v4 = vmul.f32 %v8060_v11, %v10822_v14 }
 0x1b5   : > { %v10836_v17 = vsub.f32 %v1044_v45, %v1052_v25  ;;  %v1508_v12 = vmul.f32 %v10726_v49, %v1324_v56  ;;  %v1509_v3 = vmul.f32 %v10729_v29, %v1325_v2  ;;  %v1474_v37 = vmul.f32 %v8049_v1, %v1274_v27 }
 0x1b6   : > { %9898 = vrcp.f32 %v513_v31  ;;  %v1475_v24 = vmul.f32 %v8050_v23, %v1275_v61  ;;  %vm598_vm13 = vcmp.ge.f32.partialorder %v10824_v0, -1.4  ;;  %v10841_v39 = vsub.f32 %v1045_v4, %v1053_v40 }
 0x1b7   : > { %v1284_v20 = vmul.f32 %v8059_v38, %v10836_v17  ;;  %vm599_vm14 = vcmp.ge.f32.partialorder %v10833_v21, -1.4  ;;  %v10846_v13 = vsel %vm598_vm13, 1.0, %v10285_v50  ;;  %v1490_v41 = vsub.f32 %v1474_v37, %v1482_v35 }
 0x1b8   : > { %v1491_v25 = vsub.f32 %v1475_v24, %v1483_v8  ;;  %v10849_v56 = vsel %vm599_vm14, 1.0, %v10285_v50  ;;  %vm622_vm15 = vcmp.ge.f32.partialorder %v10824_v0, -1.0  ;;  %v1285_v2 = vmul.f32 %v8060_v11, %v10841_v39 }
 0x1b9   : > { %v10853_v1 = vsub.f32 %v1284_v20, %v1292_v47  ;;  %vm623_vm1 = vcmp.ge.f32.partialorder %v10833_v21, -1.0  ;;  %v7981_v23 = vsel %vm622_vm15, 1.0, %v10285_v50  ;;  %vm646_vm2 = vcmp.ge.f32.partialorder %v10824_v0, -0.6 }
 0x1ba   : > { %v1665_v5 = vpack.c.bf16 %v1491_v25, %v1490_v41  ;;  %v7982_v52 = vsel %vm623_vm1, 1.0, %v10285_v50  ;;  %vm647_vm3 = vcmp.ge.f32.partialorder %v10833_v21, -0.6  ;;  %v10860_v35 = vsub.f32 %v1285_v2, %v1293_v6 }
 0x1bb   : > { %v1500_v8 = vmul.f32 %v8059_v38, %v10853_v1  ;;  %v7989_v15 = vsel %vm646_vm2, 1.0, %v10285_v50  ;;  %v7990_v45 = vsel %vm647_vm3, 1.0, %v10285_v50  ;;  %vm670_vm4 = vcmp.ge.f32.partialorder %v10824_v0, -0.2 }
 0x1bc   : > { %vm671_vm5 = vcmp.ge.f32.partialorder %v10833_v21, -0.2  ;;  %vm694_vm6 = vcmp.ge.f32.partialorder %v10824_v0, 0.2  ;;  %v10869_v40 = vsub.f32 %v10846_v13, %v7981_v23  ;;  %v1501_v47 = vmul.f32 %v8060_v11, %v10860_v35 }
 0x1bd   : > { %v1516_v31 = vsub.f32 %v1500_v8, %v1508_v12  ;;  %v7997_v6 = vsel %vm670_vm4, 1.0, %v10285_v50  ;;  %v7998_v38 = vsel %vm671_vm5, 1.0, %v10285_v50  ;;  %vm695_vm7 = vcmp.ge.f32.partialorder %v10833_v21, 0.2 }
 0x1be   : > { %v9897_v27 = vpop.eup %9896  ;;  %v10876_v61 = vsel %vm694_vm6, 1.0, %v10285_v50  ;;  %v10879_v4 = vsub.f32 %v10849_v56, %v7982_v52  ;;  %v862_v37 = vsub.f32 %v7981_v23, %v7989_v15  ;;  %v1517_v20 = vsub.f32 %v1501_v47, %v1509_v3  ;;  %v9702_v23 = vld [vmem:[%s16041_s3 + $0x148] sm:$0xff]  }
 0x1bf   : > { %16438 = vst [vmem:[#allocation49_spill] sm:$0xff] %v10876_v61  ;;  %v521_v24 = vmul.f32 %v9897_v27, %v10260_v18  ;;  %v10883_v11 = vsel %vm695_vm7, 1.0, %v10285_v50  ;;  %v863_v12 = vsub.f32 %v7982_v52, %v7990_v45  ;;  %v870_v25 = vsub.f32 %v7989_v15, %v7997_v6  ;;  %v9700_v18 = vld [vmem:[%s16041_s3 + $0x100] sm:$0xff]  }
 0x1c0   : > { %16439 = vst [vmem:[#allocation50_spill] sm:$0xff] %v10883_v11  ;;  %v9899_v41 = vpop.eup %9898  ;;  %v871_v2 = vsub.f32 %v7990_v45, %v7998_v38  ;;  %v10886_v8 = vsub.f32 %v7997_v6, %v10876_v61  ;;  %v10889_v60 = vsub.f32 %v7998_v38, %v10883_v11  ;;  %v1674_v3 = vpack.c.bf16 %v1517_v20, %v1516_v31 }
 0x1c1   : > { %v523_v33 = vmul.f32 %v9899_v41, %v10273_v26  ;;  %v10899_v52 = vadd.f32 1.4, %v10824_v0  ;;  %v10902_v15 = vadd.f32 1.4, %v10833_v21  ;;  %v10905_v45 = vadd.f32 1.0, %v10824_v0 }
 0x1c2   : > { %16440 = vst [vmem:[#allocation51_spill] sm:$0xff] %v10886_v8  ;;  %16441 = vst [vmem:[#allocation52_spill] sm:$0xff] %v10889_v60  ;;  %v10908_v26 = vadd.f32 1.0, %v10833_v21  ;;  %v10911_v47 = vadd.f32 0.6, %v10824_v0  ;;  %2454 = vmatmul.mubr.bf16.gmra.mrb[8].mxu1 %v1674_v3  ;;  %v490_v55 = vsub.f32 0.0, %v10435_v43 }
 0x1c3   : > { %v10914_v31 = vadd.f32 0.6, %v10833_v21  ;;  %v536_v6 = vpack.c.bf16 %v523_v33, %v521_v24  ;;  %v10917_v38 = vadd.f32 0.2, %v10824_v0  ;;  %v10920_v27 = vadd.f32 0.2, %v10833_v21 }
 0x1c4   : > { %v10923_v20 = vadd.f32 -0.2, %v10824_v0  ;;  %v10926_v41 = vadd.f32 -0.2, %v10833_v21  ;;  %v1070_v62 = vmul.f32 %v10899_v52, %v10869_v40  ;;  %v1071_v42 = vmul.f32 %v10902_v15, %v10879_v4 }
 0x1c5   : > { %16442 = vst [vmem:[#allocation53_spill] sm:$0xff] %v10917_v38  ;;  %16443 = vst [vmem:[#allocation54_spill] sm:$0xff] %v10920_v27  ;;  %v1078_v33 = vmul.f32 %v10911_v47, %v862_v37  ;;  %2373 = vmatmul.mubr.bf16.vlgmr.msra.gmra.mrb[0].mxu0 %v536_v6  ;;  %v1079_v24 = vmul.f32 %v10914_v31, %v863_v12  ;;  %v1094_v3 = vmul.f32 %v10905_v45, %v862_v37  ;;  %v9704_v6 = vld [vmem:[%s16041_s3 + $0x108] sm:$0xff]  }
 0x1c6   : > { %v1095_v11 = vmul.f32 %v10908_v26, %v863_v12  ;;  %v1102_v61 = vmul.f32 %v10917_v38, %v870_v25  ;;  %9128 = vmatpush3.bf16.msra.mxu0 %v9700_v18  ;;  %2380 = vmatprep.mubr.bf16.mxu0 %v1665_v5  ;;  %v1103_v49 = vmul.f32 %v10920_v27, %v871_v2  ;;  %v9706_v5 = vld [vmem:[%s16041_s3 + $0x150] sm:$0xff]   ;;  %vm548_vm8 = vcmp.ge.f32.partialorder %v10620_v10, -2.2 }
 0x1c7   : > { %v10937_v29 = vsub.f32 %v1070_v62, %v1078_v33  ;;  %v1118_v53 = vmul.f32 %v10911_v47, %v870_v25  ;;  %9129 = vmatprep.subr.bf16.mxu0 %v9702_v23  ;;  %v10945_v37 = vsub.f32 %v1071_v42, %v1079_v24  ;;  %v1119_v57 = vmul.f32 %v10914_v31, %v871_v2 }
 0x1c8   : > { %v1110_v12 = vsub.f32 %v1094_v3, %v1102_v61  ;;  %v1126_v62 = vmul.f32 %v10923_v20, %v10886_v8  ;;  %v1111_v25 = vsub.f32 %v1095_v11, %v1103_v49  ;;  %v1127_v18 = vmul.f32 %v10926_v41, %v10889_v60 }
 0x1c9   : > { %v1310_v43 = vmul.f32 %v10899_v52, %v10937_v29  ;;  %v491_v42 = vsub.f32 0.0, %v10437_v44  ;;  %v1311_v61 = vmul.f32 %v10902_v15, %v10945_v37  ;;  %v500_v3 = vmul.f32 1.442695, %v490_v55  ;;  %v9708_v44 = vld [vmem:[%s16041_s3 + $0x110] sm:$0xff]  }
 0x1ca   : > { %v10958_v23 = vsub.f32 %v1118_v53, %v1126_v62  ;;  %v1318_v2 = vmul.f32 %v10917_v38, %v1110_v12  ;;  %v1334_v33 = vmul.f32 %v10905_v45, %v1110_v12  ;;  %v10964_v24 = vsub.f32 %v1119_v57, %v1127_v18  ;;  %9130 = vmatpush3.bf16.msra.mxu0 %v9704_v6  ;;  %v9710_v57 = vld [vmem:[%s16041_s3 + $0x158] sm:$0xff]  }
 0x1cb   : > { %v1319_v49 = vmul.f32 %v10920_v27, %v1111_v25  ;;  %v1335_v11 = vmul.f32 %v10908_v26, %v1111_v25  ;;  %9131 = vmatprep.subr.bf16.mxu0 %v9706_v5  ;;  %v502_v60 = vmul.f32 1.442695, %v491_v42  ;;  %9900 = vpow2.f32 %v500_v3  ;;  %v9714_v3 = vld [vmem:[%s16041_s3 + $0x160] sm:$0xff]  }
 0x1cc   : > { %16444 = vst [vmem:[#allocation55_spill] sm:$0xff] %v10958_v23  ;;  %16445 = vst [vmem:[#allocation56_spill] sm:$0xff] %v10964_v24  ;;  %v10971_v53 = vsub.f32 %v1310_v43, %v1318_v2  ;;  %v1342_v62 = vmul.f32 %v10923_v20, %v10958_v23  ;;  %v1343_v55 = vmul.f32 %v10926_v41, %v10964_v24  ;;  %vm549_vm9 = vcmp.ge.f32.partialorder %v10628_v51, -2.2  ;;  %v9712_v2 = vld [vmem:[%s16041_s3 + $0x118] sm:$0xff]  }
 0x1cd   : > { %v10979_v12 = vsub.f32 %v1311_v61, %v1319_v49  ;;  %9902 = vpow2.f32 %v502_v60  ;;  %v7955_v25 = vsel %vm548_vm8, 1.0, %v10285_v50  ;;  %v7956_v42 = vsel %vm549_vm9, 1.0, %v10285_v50 }
 0x1ce   : > { %v10984_v6 = vsub.f32 %v1334_v33, %v1342_v62  ;;  %v1526_v5 = vmul.f32 %v10899_v52, %v10971_v53  ;;  %v10989_v18 = vsub.f32 %v1335_v11, %v1343_v55  ;;  %9132 = vmatpush3.bf16.msra.mxu0 %v9708_v44  ;;  %v836_v61 = vsub.f32 %v7955_v25, %v10808_v19 }
 0x1cf   : > { %v1527_v43 = vmul.f32 %v10902_v15, %v10979_v12  ;;  %v837_v60 = vsub.f32 %v7956_v42, %v10811_v30  ;;  %v8051_v49 = vadd.f32 2.2, %v10620_v10  ;;  %v8052_v11 = vadd.f32 2.2, %v10628_v51  ;;  %9133 = vmatprep.subr.bf16.mxu0 %v9710_v57 }
 0x1d0   : > { %16446 = vst [vmem:[#allocation57_spill] sm:$0xff] %v10984_v6  ;;  %16447 = vst [vmem:[#allocation58_spill] sm:$0xff] %v10989_v18  ;;  %v1534_v33 = vmul.f32 %v10923_v20, %v10984_v6  ;;  %v1535_v19 = vmul.f32 %v10926_v41, %v10989_v18  ;;  %v1028_v44 = vmul.f32 %v10707_v59, %v10815_v54  ;;  %vm574_vm10 = vcmp.ge.f32.partialorder %v10824_v0, -1.8 }
 0x1d1   : > { %v1029_v62 = vmul.f32 %v10710_v34, %v10822_v14  ;;  %v1268_v30 = vmul.f32 %v10713_v7, %v10836_v17  ;;  %v1020_v25 = vmul.f32 %v8051_v49, %v836_v61  ;;  %v1021_v42 = vmul.f32 %v8052_v11, %v837_v60  ;;  %v9716_v14 = vld [vmem:[%s16041_s3 + $0x120] sm:$0xff]  }
 0x1d2   : > { %v1542_v55 = vsub.f32 %v1526_v5, %v1534_v33  ;;  %v1269_v57 = vmul.f32 %v10716_v9, %v10841_v39  ;;  %v1543_v6 = vsub.f32 %v1527_v43, %v1535_v19  ;;  %v1484_v24 = vmul.f32 %v10719_v28, %v10853_v1  ;;  %9134 = vmatpush3.bf16.msra.mxu0 %v9712_v2  ;;  %v9718_v5 = vld [vmem:[%s16041_s3 + $0x168] sm:$0xff]  }
 0x1d3   : > { %v1485_v18 = vmul.f32 %v10722_v58, %v10860_v35  ;;  %v1036_v59 = vsub.f32 %v1020_v25, %v1028_v44  ;;  %v1037_v34 = vsub.f32 %v1021_v42, %v1029_v62  ;;  %vm575_vm11 = vcmp.ge.f32.partialorder %v10833_v21, -1.8  ;;  %9135 = vmatprep.subr.bf16.mxu0 %v9714_v3  ;;  %v9719_v42 = vld [vmem:[%s16041_s3 + $0x128] sm:$0xff]  }
 0x1d4   : > { %v11023_v54 = vsel %vm574_vm10, 1.0, %v10285_v50  ;;  %v1683_v17 = vpack.c.bf16 %v1543_v6, %v1542_v55  ;;  %v11029_v39 = vsel %vm575_vm11, 1.0, %v10285_v50  ;;  %v8061_v35 = vadd.f32 1.8, %v10824_v0 }
 0x1d5   : > { %v11033_v1 = vsub.f32 %v11023_v54, %v10846_v13  ;;  %v1260_v43 = vmul.f32 %v8051_v49, %v1036_v59  ;;  %v1261_v61 = vmul.f32 %v8052_v11, %v1037_v34  ;;  %v11041_v2 = vsub.f32 %v11029_v39, %v10849_v56  ;;  %v9901_v33 = vpop.eup %9900 }
 0x1d6   : > { %v8062_v6 = vadd.f32 1.8, %v10833_v21  ;;  %2461 = vmatprep.mubr.bf16.mxu1 %v1683_v17  ;;  %v1054_v13 = vmul.f32 %v10905_v45, %v10869_v40  ;;  %v1055_v3 = vmul.f32 %v10908_v26, %v10879_v4  ;;  %v1294_v19 = vmul.f32 %v10911_v47, %v10937_v29  ;;  %9136 = vmatpush3.bf16.msra.mxu0 %v9716_v14  ;;  %v9720_v4 = vld [vmem:[%s16041_s3 + $0x170] sm:$0xff]  }
 0x1d7   : > { %v1046_v60 = vmul.f32 %v8061_v35, %v11033_v1  ;;  %v9903_v44 = vpop.eup %9902  ;;  %v514_v62 = vadd.f32 1.0, %v9901_v33  ;;  %v1276_v55 = vsub.f32 %v1260_v43, %v1268_v30  ;;  %v1277_v56 = vsub.f32 %v1261_v61, %v1269_v57  ;;  %9137 = vmatprep.subr.bf16.mxu0 %v9718_v5  ;;  %v9990_v33 = vld [vmem:[#allocation2 + $0x8] sm:$0xff] }
 0x1d8   : > { %v1047_v25 = vmul.f32 %v8062_v6, %v11041_v2  ;;  %v515_v59 = vadd.f32 1.0, %v9903_v44  ;;  %v1295_v40 = vmul.f32 %v10914_v31, %v10945_v37  ;;  %v1510_v29 = vmul.f32 %v10917_v38, %v10971_v53  ;;  %v9989_v37 = vld [vmem:[#allocation2] sm:$0xff] }
 0x1d9   : > { %v11055_v34 = vsub.f32 %v1046_v60, %v1054_v13  ;;  %9904 = vrcp.f32 %v514_v62  ;;  %v1476_v30 = vmul.f32 %v8051_v49, %v1276_v55  ;;  %v1477_v57 = vmul.f32 %v8052_v11, %v1277_v56  ;;  %v9721_v49 = vld [vmem:[%s16041_s3 + $0x130] sm:$0xff]  }
 0x1da   : > { %v11064_v14 = vsub.f32 %v1047_v25, %v1055_v3  ;;  %9906 = vrcp.f32 %v515_v59  ;;  %v1511_v43 = vmul.f32 %v10920_v27, %v10979_v12  ;;  %vm736_vm12 = vcmp.ge.f32.partialorder %v9989_v37, 1.0  ;;  %9138 = vmatpush3.bf16.msra.mxu0 %v9719_v42  ;;  %v9723_v42 = vld [vmem:[%s16041_s3 + $0x138] sm:$0xff]  }
 0x1db   : > { %v1286_v17 = vmul.f32 %v8061_v35, %v11055_v34  ;;  %v1492_v61 = vsub.f32 %v1476_v30, %v1484_v24  ;;  %v1493_v53 = vsub.f32 %v1477_v57, %v1485_v18  ;;  %vm737_vm13 = vcmp.ge.f32.partialorder %v9990_v33, 1.0  ;;  %9139 = vmatprep.subr.bf16.mxu0 %v9720_v4  ;;  %v9722_v24 = vld [vmem:[%s16041_s3 + $0x178] sm:$0xff]  }
 0x1dc   : > { %v1287_v5 = vmul.f32 %v8062_v6, %v11064_v14  ;;  %v8015_v60 = vsel %vm736_vm12, 1.0, %v10285_v50  ;;  %v8016_v13 = vsel %vm737_vm13, 1.0, %v10285_v50  ;;  %vm760_vm14 = vcmp.ge.f32.partialorder %v9989_v37, 1.4 }
 0x1dd   : > { %v11073_v11 = vsub.f32 %v1286_v17, %v1294_v19  ;;  %v11080_v12 = vpack.c.bf16 %v1493_v53, %v1492_v61  ;;  %vm761_vm15 = vcmp.ge.f32.partialorder %v9990_v33, 1.4  ;;  %v8023_v3 = vsel %vm760_vm14, 1.0, %v10285_v50 }
 0x1de   : > { %v11082_v18 = vsub.f32 %v1287_v5, %v1295_v40  ;;  %v8024_v44 = vsel %vm761_vm15, 1.0, %v10285_v50  ;;  %vm784_vm1 = vcmp.ge.f32.partialorder %v9989_v37, 1.8  ;;  %vm785_vm2 = vcmp.ge.f32.partialorder %v9990_v33, 1.8  ;;  %9140 = vmatpush3.bf16.msra.mxu0 %v9721_v49 }
 0x1df   : > { %v1502_v19 = vmul.f32 %v8061_v35, %v11073_v11  ;;  %v11089_v55 = vsel %vm784_vm1, 1.0, %v10285_v50  ;;  %v11092_v56 = vsel %vm785_vm2, 1.0, %v10285_v50  ;;  %v888_v25 = vsub.f32 %v10366_v16, %v8015_v60  ;;  %9141 = vmatprep.subr.bf16.mxu0 %v9722_v24 }
 0x1e0   : > { %v1503_v62 = vmul.f32 %v8062_v6, %v11082_v18  ;;  %16448 = vst [vmem:[#allocation59_spill] sm:$0xff] %v11089_v55  ;;  %16449 = vst [vmem:[#allocation60_spill] sm:$0xff] %v11092_v56  ;;  %v889_v59 = vsub.f32 %v10369_v36, %v8016_v13  ;;  %v896_v40 = vsub.f32 %v8015_v60, %v8023_v3  ;;  %v11102_v6 = vld [vmem:[%s16041_s3 + $0x200] sm:$0xff]   ;;  %v11110_v17 = vadd.f32 -1.0, %v9989_v37 }
 0x1e1   : > { %v1518_v35 = vsub.f32 %v1502_v19, %v1510_v29  ;;  %v897_v4 = vsub.f32 %v8016_v13, %v8024_v44  ;;  %v11105_v57 = vsub.f32 %v8023_v3, %v11089_v55  ;;  %v11108_v16 = vsub.f32 %v8024_v44, %v11092_v56  ;;  %v11122_v3 = vld [vmem:[#allocation2 + $0x10] sm:$0xff]  ;;  %v16451_v56 = vld [vmem:[#allocation10_spill] sm:$0xff] }
 0x1e2   : > { %v1519_v30 = vsub.f32 %v1503_v62, %v1511_v43  ;;  %v11112_v29 = vadd.f32 -1.0, %v9990_v33  ;;  %v11114_v36 = vadd.f32 -1.4, %v9989_v37  ;;  %v11116_v61 = vadd.f32 -1.4, %v9990_v33  ;;  %9142 = vmatpush3.bf16.msra.mxu0 %v9723_v42 }
 0x1e3   : > { %v1160_v53 = vmul.f32 %v10386_v32, %v10374_v46  ;;  %v9905_v5 = vpop.eup %9904  ;;  %v8127_v43 = vadd.f32 -1.8, %v9989_v37  ;;  %v8128_v60 = vadd.f32 -1.8, %v9990_v33  ;;  %v1161_v13 = vmul.f32 %v10391_v63, %v10377_v48  ;;  %9563 = vmatprep.subr.bf16.mxu0 %v11102_v6  ;;  %v11129_v46 = vld [vmem:[#allocation2 + $0x18] sm:$0xff]  ;;  %v16452_v48 = vld [vmem:[#allocation11_spill] sm:$0xff] }
 0x1e4   : > { %16450 = vst [vmem:[#allocation61_spill] sm:$0xff] %v11112_v29  ;;  %v1675_v49 = vpack.c.bf16 %v1519_v30, %v1518_v35  ;;  %v9907_v24 = vpop.eup %9906  ;;  %v525_v19 = vmul.f32 %v11122_v3, %v9905_v5  ;;  %v1168_v44 = vmul.f32 %v11110_v17, %v888_v25  ;;  %v1169_v62 = vmul.f32 %v11112_v29, %v889_v59 }
 0x1e5   : > { %v1184_v55 = vmul.f32 %v16451_v56, %v888_v25  ;;  %v527_v37 = vmul.f32 %v11129_v46, %v9907_v24  ;;  %v1185_v33 = vmul.f32 %v16452_v48, %v889_v59  ;;  %v1192_v42 = vmul.f32 %v11114_v36, %v896_v40 }
 0x1e6   : > { %2462 = vmatmul.mubr.bf16.gmra.mrb[12].mxu1 %v1675_v49  ;;  %v1193_v35 = vmul.f32 %v11116_v61, %v897_v4  ;;  %v1176_v30 = vsub.f32 %v1160_v53, %v1168_v44  ;;  %v1177_v5 = vsub.f32 %v1161_v13, %v1169_v62  ;;  %v1208_v23 = vmul.f32 %v11110_v17, %v896_v40 }
 0x1e7   : > { %v1209_v9 = vmul.f32 %v11112_v29, %v897_v4  ;;  %v537_v25 = vpack.c.bf16 %v527_v37, %v525_v19  ;;  %v1200_v7 = vsub.f32 %v1184_v55, %v1192_v42  ;;  %v1216_v38 = vmul.f32 %v8127_v43, %v11105_v57 }
 0x1e8   : > { %v1201_v27 = vsub.f32 %v1185_v33, %v1193_v35  ;;  %v1217_v24 = vmul.f32 %v8128_v60, %v11108_v16  ;;  %v1384_v49 = vmul.f32 %v11110_v17, %v1176_v30  ;;  %v1385_v59 = vmul.f32 %v11112_v29, %v1177_v5 }
 0x1e9   : > { %v1400_v8 = vmul.f32 %v10386_v32, %v1176_v30  ;;  %2381 = vmatmul.mubr.bf16.gmra.mrb[4].mxu0 %v537_v25  ;;  %v11142_v53 = vsub.f32 %v1208_v23, %v1216_v38  ;;  %v1401_v40 = vmul.f32 %v10391_v63, %v1177_v5  ;;  %v1408_v4 = vmul.f32 %v11114_v36, %v1200_v7 }
 0x1ea   : > { %v1409_v55 = vmul.f32 %v11116_v61, %v1201_v27  ;;  %2388 = vmatprep.mubr.bf16.mxu0 %v11080_v12  ;;  %v11148_v13 = vsub.f32 %v1209_v9, %v1217_v24  ;;  %v1424_v19 = vmul.f32 %v16451_v56, %v1200_v7  ;;  %v1425_v44 = vmul.f32 %v16452_v48, %v1201_v27 }
 0x1eb   : > { %v492_v62 = vsub.f32 0.0, %v10620_v10  ;;  %v1416_v37 = vsub.f32 %v1400_v8, %v1408_v4  ;;  %v1432_v38 = vmul.f32 %v8127_v43, %v11142_v53  ;;  %v493_v23 = vsub.f32 0.0, %v10628_v51 }
 0x1ec   : > { %16453 = vst [vmem:[#allocation62_spill] sm:$0xff] %v11148_v13  ;;  %v1417_v33 = vsub.f32 %v1401_v40, %v1409_v55  ;;  %v1433_v42 = vmul.f32 %v8128_v60, %v11148_v13  ;;  %vm550_vm3 = vcmp.ge.f32.partialorder %v10824_v0, -2.2  ;;  %vm551_vm4 = vcmp.ge.f32.partialorder %v10833_v21, -2.2 }
 0x1ed   : > { %v504_v35 = vmul.f32 1.442695, %v492_v62  ;;  %v11158_v9 = vsub.f32 %v1424_v19, %v1432_v38  ;;  %v11161_v7 = vmul.f32 %v11114_v36, %v1416_v37  ;;  %v1616_v8 = vmul.f32 %v10386_v32, %v1416_v37  ;;  %v16456_v38 = vld [vmem:[#allocation12_spill] sm:$0xff] }
 0x1ee   : > { %v11164_v10 = vmul.f32 %v11116_v61, %v1417_v33  ;;  %v11167_v27 = vsub.f32 %v1425_v44, %v1433_v42  ;;  %v1617_v51 = vmul.f32 %v10391_v63, %v1417_v33  ;;  %v506_v12 = vmul.f32 1.442695, %v493_v23  ;;  %v16459_v42 = vld [vmem:[#allocation9_spill] sm:$0xff] }
 0x1ef   : > { %16454 = vst [vmem:[#allocation63_spill] sm:$0xff] %v11158_v9  ;;  %9908 = vpow2.f32 %v504_v35  ;;  %v1624_v30 = vmul.f32 %v8127_v43, %v11158_v9  ;;  %v7957_v5 = vsel %vm550_vm3, 1.0, %v10285_v50  ;;  %v7958_v25 = vsel %vm551_vm4, 1.0, %v10285_v50 }
 0x1f0   : > { %16455 = vst [vmem:[#allocation64_spill] sm:$0xff] %v11167_v27  ;;  %v8053_v24 = vadd.f32 2.2, %v10824_v0  ;;  %v1625_v40 = vmul.f32 %v8128_v60, %v11167_v27  ;;  %9910 = vpow2.f32 %v506_v12  ;;  %v838_v4 = vsub.f32 %v7957_v5, %v11023_v54  ;;  %v11282_v27 = vld [vmem:[#allocation2 + $0x28] sm:$0xff] }
 0x1f1   : > { %v839_v32 = vsub.f32 %v7958_v25, %v11029_v39  ;;  %v1632_v55 = vsub.f32 %v1616_v8, %v1624_v30  ;;  %v8054_v63 = vadd.f32 2.2, %v10833_v21  ;;  %v1030_v19 = vmul.f32 %v10899_v52, %v11033_v1  ;;  %v16457_v52 = vld [vmem:[#allocation8_spill] sm:$0xff] }
 0x1f2   : > { %v1031_v43 = vmul.f32 %v10902_v15, %v11041_v2  ;;  %v1633_v44 = vsub.f32 %v1617_v51, %v1625_v40  ;;  %v1022_v62 = vmul.f32 %v8053_v24, %v838_v4  ;;  %v1270_v37 = vmul.f32 %v10905_v45, %v11055_v34  ;;  %v16458_v2 = vld [vmem:[#allocation13_spill] sm:$0xff] }
 0x1f3   : > { %v1271_v60 = vmul.f32 %v10908_v26, %v11064_v14  ;;  %v1023_v54 = vmul.f32 %v8054_v63, %v839_v32  ;;  %v1486_v39 = vmul.f32 %v10911_v47, %v11073_v11  ;;  %v1487_v33 = vmul.f32 %v10914_v31, %v11082_v18 }
 0x1f4   : > { %v1376_v1 = vmul.f32 %v16457_v52, %v16456_v38  ;;  %v1712_v23 = vpack.c.bf16 %v1633_v44, %v1632_v55  ;;  %v1038_v15 = vsub.f32 %v1022_v62, %v1030_v19  ;;  %v1377_v35 = vmul.f32 %v16459_v42, %v16458_v2 }
 0x1f5   : > { %vm714_vm5 = vcmp.ge.f32.partialorder %v11122_v3, 0.6  ;;  %v1039_v34 = vsub.f32 %v1023_v54, %v1031_v43  ;;  %vm715_vm6 = vcmp.ge.f32.partialorder %v11129_v46, 0.6  ;;  %vm738_vm7 = vcmp.ge.f32.partialorder %v11122_v3, 1.0 }
 0x1f6   : > { %v11195_v8 = vsub.f32 %v1376_v1, %v1384_v49  ;;  %v8009_v14 = vsel %vm714_vm5, 1.0, %v10285_v50  ;;  %2567 = vmatprep.mubr.bf16.mxu1 %v1712_v23  ;;  %v1262_v11 = vmul.f32 %v8053_v24, %v1038_v15  ;;  %v11199_v18 = vsub.f32 %v1377_v35, %v1385_v59  ;;  %v16464_v23 = vld [vmem:[#allocation21_spill] sm:$0xff] }
 0x1f7   : > { %v8010_v51 = vsel %vm715_vm6, 1.0, %v10285_v50  ;;  %v1263_v12 = vmul.f32 %v8054_v63, %v1039_v34  ;;  %vm739_vm8 = vcmp.ge.f32.partialorder %v11129_v46, 1.0  ;;  %v8017_v49 = vsel %vm738_vm7, 1.0, %v10285_v50 }
 0x1f8   : > { %v1592_v30 = vmul.f32 %v16457_v52, %v11195_v8  ;;  %v1278_v25 = vsub.f32 %v1262_v11, %v1270_v37  ;;  %v1593_v40 = vmul.f32 %v16459_v42, %v11199_v18  ;;  %v8018_v59 = vsel %vm739_vm8, 1.0, %v10285_v50 }
 0x1f9   : > { %v9909_v5 = vpop.eup %9908  ;;  %vm762_vm9 = vcmp.ge.f32.partialorder %v11122_v3, 1.4  ;;  %v1279_v32 = vsub.f32 %v1263_v12, %v1271_v60  ;;  %vm763_vm10 = vcmp.ge.f32.partialorder %v11129_v46, 1.4  ;;  %vm786_vm11 = vcmp.ge.f32.partialorder %v11122_v3, 1.8 }
 0x1fa   : > { %v516_v4 = vadd.f32 1.0, %v9909_v5  ;;  %v1608_v55 = vsub.f32 %v1592_v30, %v11161_v7  ;;  %v9911_v19 = vpop.eup %9910  ;;  %v1478_v43 = vmul.f32 %v8053_v24, %v1278_v25  ;;  %v1609_v44 = vsub.f32 %v1593_v40, %v11164_v10  ;;  %v16463_v60 = vld [vmem:[#allocation20_spill] sm:$0xff] }
 0x1fb   : > { %v8025_v62 = vsel %vm762_vm9, 1.0, %v10285_v50  ;;  %v8026_v37 = vsel %vm763_vm10, 1.0, %v10285_v50  ;;  %v517_v54 = vadd.f32 1.0, %v9911_v19  ;;  %v1479_v38 = vmul.f32 %v8054_v63, %v1279_v32  ;;  %v16466_v19 = vld [vmem:[#allocation30_spill] sm:$0xff] }
 0x1fc   : > { %9912 = vrcp.f32 %v516_v4  ;;  %v1494_v52 = vsub.f32 %v1478_v43, %v1486_v39  ;;  %v1704_v1 = vpack.c.bf16 %v1609_v44, %v1608_v55  ;;  %vm787_vm12 = vcmp.ge.f32.partialorder %v11129_v46, 1.8  ;;  %v16467_v44 = vld [vmem:[#allocation31_spill] sm:$0xff]  ;;  %16470 = vst [vmem:[#allocation30_spill] sm:$0xff] %v11282_v27 }
 0x1fd   : > { %v11219_v7 = vsel %vm786_vm11, 1.0, %v10285_v50  ;;  %9914 = vrcp.f32 %v517_v54  ;;  %v1495_v24 = vsub.f32 %v1479_v38, %v1487_v33  ;;  %v11222_v10 = vsel %vm787_vm12, 1.0, %v10285_v50 }
 0x1fe   : > { %16460 = vst [vmem:[#allocation12_spill] sm:$0xff] %v11219_v7  ;;  %16461 = vst [vmem:[#allocation8_spill] sm:$0xff] %v11222_v10  ;;  %vm810_vm13 = vcmp.ge.f32.partialorder %v11122_v3, 2.2  ;;  %2568 = vmatmul.mubr.bf16.vlgmr.msra.gmra.mrb[16].mxu1 %v1704_v1  ;;  %vm811_vm14 = vcmp.ge.f32.partialorder %v11129_v46, 2.2  ;;  %v11230_v39 = vsub.f32 %v16463_v60, %v8009_v14  ;;  %v11233_v15 = vsub.f32 %v16464_v23, %v8010_v51 }
 0x1ff   : > { %v11227_v63 = vsel %vm810_vm13, 1.0, %v10285_v50  ;;  %v1667_v2 = vpack.c.bf16 %v1495_v24, %v1494_v52  ;;  %v11236_v33 = vsel %vm811_vm14, 1.0, %v10285_v50  ;;  %v890_v42 = vsub.f32 %v8009_v14, %v8017_v49  ;;  %v11276_v23 = vld [vmem:[#allocation2 + $0x20] sm:$0xff] }
 0x200   : > { %16462 = vst [vmem:[#allocation13_spill] sm:$0xff] %v11227_v63  ;;  %16465 = vst [vmem:[#allocation9_spill] sm:$0xff] %v11236_v33  ;;  %v891_v35 = vsub.f32 %v8010_v51, %v8018_v59  ;;  %v898_v34 = vsub.f32 %v8017_v49, %v8025_v62  ;;  %v899_v11 = vsub.f32 %v8018_v59, %v8026_v37  ;;  %v11245_v40 = vadd.f32 -0.6, %v11122_v3 }
 0x201   : > { %v906_v12 = vsub.f32 %v8025_v62, %v11219_v7  ;;  %v907_v30 = vsub.f32 %v8026_v37, %v11222_v10  ;;  %v11248_v4 = vadd.f32 -0.6, %v11129_v46  ;;  %v11251_v14 = vadd.f32 -1.0, %v11122_v3  ;;  %16468 = vst [vmem:[#allocation20_spill] sm:$0xff] %v11276_v23 }
 0x202   : > { %v11254_v51 = vadd.f32 -1.0, %v11129_v46  ;;  %v11257_v49 = vadd.f32 -1.4, %v11122_v3  ;;  %v11260_v59 = vadd.f32 -1.4, %v11129_v46  ;;  %v1162_v43 = vmul.f32 %v16466_v19, %v11230_v39 }
 0x203   : > { %v8129_v32 = vadd.f32 -1.8, %v11122_v3  ;;  %v8130_v55 = vadd.f32 -1.8, %v11129_v46  ;;  %v1163_v62 = vmul.f32 %v16467_v44, %v11233_v15  ;;  %v1170_v37 = vmul.f32 %v11251_v14, %v890_v42 }
 0x204   : > { %v1171_v54 = vmul.f32 %v11254_v51, %v891_v35  ;;  %v1186_v38 = vmul.f32 %v11245_v40, %v890_v42  ;;  %v1187_v52 = vmul.f32 %v11248_v4, %v891_v35  ;;  %v1194_v24 = vmul.f32 %v11257_v49, %v898_v34 }
 0x205   : > { %v1195_v3 = vmul.f32 %v11260_v59, %v899_v11  ;;  %v1210_v46 = vmul.f32 %v11251_v14, %v898_v34  ;;  %v1211_v60 = vmul.f32 %v11254_v51, %v899_v11  ;;  %v1178_v5 = vsub.f32 %v1162_v43, %v1170_v37 }
 0x206   : > { %v9913_v1 = vpop.eup %9912  ;;  %v1179_v33 = vsub.f32 %v1163_v62, %v1171_v54  ;;  %v1218_v10 = vmul.f32 %v8129_v32, %v906_v12  ;;  %v1202_v42 = vsub.f32 %v1186_v38, %v1194_v24  ;;  %v1219_v35 = vmul.f32 %v8130_v55, %v907_v30 }
 0x207   : > { %v529_v25 = vmul.f32 %v11276_v23, %v9913_v1  ;;  %v9915_v63 = vpop.eup %9914  ;;  %v1203_v7 = vsub.f32 %v1187_v52, %v1195_v3  ;;  %v11280_v48 = vmul.f32 %v11257_v49, %v906_v12  ;;  %v11286_v11 = vmul.f32 %v11260_v59, %v907_v30 }
 0x208   : > { %v531_v34 = vmul.f32 %v11282_v27, %v9915_v63  ;;  %v1226_v56 = vsub.f32 %v1210_v46, %v1218_v10  ;;  %v1402_v1 = vmul.f32 %v16466_v19, %v1178_v5  ;;  %v1227_v43 = vsub.f32 %v1211_v60, %v1219_v35 }
 0x209   : > { %16469 = vst [vmem:[#allocation21_spill] sm:$0xff] %v11280_v48  ;;  %16471 = vst [vmem:[#allocation31_spill] sm:$0xff] %v11286_v11  ;;  %v1403_v62 = vmul.f32 %v16467_v44, %v1179_v33  ;;  %v1410_v37 = vmul.f32 %v11257_v49, %v1202_v42  ;;  %v1411_v54 = vmul.f32 %v11260_v59, %v1203_v7  ;;  %v494_v35 = vsub.f32 0.0, %v10824_v0 }
 0x20a   : > { %v538_v38 = vpack.c.bf16 %v531_v34, %v529_v25  ;;  %v1426_v12 = vmul.f32 %v11245_v40, %v1202_v42  ;;  %v1427_v52 = vmul.f32 %v11248_v4, %v1203_v7  ;;  %v1434_v24 = vmul.f32 %v8129_v32, %v1226_v56 }
 0x20b   : > { %v1418_v63 = vsub.f32 %v1402_v1, %v1410_v37  ;;  %v1419_v10 = vsub.f32 %v1403_v62, %v1411_v54  ;;  %v1435_v3 = vmul.f32 %v8130_v55, %v1227_v43  ;;  %v11295_v30 = vmul.f32 %v11251_v14, %v1226_v56  ;;  %v16474_v1 = vld [vmem:[#allocation14_spill] sm:$0xff] }
 0x20c   : > { %2389 = vmatmul.mubr.bf16.gmra.mrb[8].mxu0 %v538_v38  ;;  %v1442_v46 = vsub.f32 %v1426_v12, %v1434_v24  ;;  %v11298_v60 = vmul.f32 %v11254_v51, %v1227_v43  ;;  %v495_v25 = vsub.f32 0.0, %v10833_v21  ;;  %v16475_v62 = vld [vmem:[#allocation6_spill] sm:$0xff]  ;;  %v508_v38 = vmul.f32 1.442695, %v494_v35  ;;  %v16478_v21 = vld [vmem:[#allocation15_spill] sm:$0xff] }
 0x20d   : > { %16472 = vst [vmem:[#allocation65_spill] sm:$0xff] %v11295_v30  ;;  %2396 = vmatprep.mubr.bf16.mxu0 %v1667_v2  ;;  %v1443_v42 = vsub.f32 %v1427_v52, %v1435_v3  ;;  %v1618_v7 = vmul.f32 %v16466_v19, %v1418_v63  ;;  %v1619_v34 = vmul.f32 %v16467_v44, %v1419_v10  ;;  %v16479_v2 = vld [vmem:[#allocation7_spill] sm:$0xff]  ;;  %v16480_v24 = vld [vmem:[#allocation22_spill] sm:$0xff]  ;;  %v16481_v3 = vld [vmem:[#allocation28_spill] sm:$0xff]  ;;  %vm716_vm15 = vcmp.ge.f32.partialorder %v11276_v23, 0.6 }
 0x20e   : > { %16473 = vst [vmem:[#allocation66_spill] sm:$0xff] %v11298_v60  ;;  %v1568_v37 = vmul.f32 %v16475_v62, %v16474_v1  ;;  %v1626_v56 = vmul.f32 %v8129_v32, %v1442_v46  ;;  %v11307_v54 = vmul.f32 %v11245_v40, %v1442_v46  ;;  %v510_v43 = vmul.f32 1.442695, %v495_v25  ;;  %v16482_v25 = vld [vmem:[#allocation23_spill] sm:$0xff] }
 0x20f   : > { %v1627_v12 = vmul.f32 %v8130_v55, %v1443_v42  ;;  %v11310_v0 = vmul.f32 %v11248_v4, %v1443_v42  ;;  %v1569_v52 = vmul.f32 %v16479_v2, %v16478_v21  ;;  %v1576_v19 = vmul.f32 %v11110_v17, %v11195_v8  ;;  %v16483_v42 = vld [vmem:[#allocation29_spill] sm:$0xff] }
 0x210   : > { %16476 = vst [vmem:[#allocation14_spill] sm:$0xff] %v11307_v54  ;;  %v1634_v44 = vsub.f32 %v1618_v7, %v1626_v56  ;;  %9916 = vpow2.f32 %v508_v38  ;;  %v1577_v32 = vmul.f32 %v11112_v29, %v11199_v18  ;;  %v1138_v46 = vmul.f32 %v16481_v3, %v16480_v24  ;;  %v16496_v29 = vld [vmem:[#allocation17_spill] sm:$0xff] }
 0x211   : > { %16477 = vst [vmem:[#allocation6_spill] sm:$0xff] %v11310_v0  ;;  %v1635_v35 = vsub.f32 %v1619_v34, %v1627_v12  ;;  %9918 = vpow2.f32 %v510_v43  ;;  %v1584_v55 = vsub.f32 %v1568_v37, %v1576_v19  ;;  %v1139_v1 = vmul.f32 %v16483_v42, %v16482_v25 }
 0x212   : > { %v1585_v62 = vsub.f32 %v1569_v52, %v1577_v32  ;;  %v1146_v21 = vmul.f32 %v11245_v40, %v11230_v39  ;;  %v1147_v8 = vmul.f32 %v11248_v4, %v11233_v15  ;;  %v1386_v7 = vmul.f32 %v11251_v14, %v1178_v5  ;;  %v16485_v32 = vld [vmem:[#allocation37_spill] sm:$0xff] }
 0x213   : > { %v1713_v56 = vpack.c.bf16 %v1635_v35, %v1634_v44  ;;  %v1387_v18 = vmul.f32 %v11254_v51, %v1179_v33  ;;  %v1602_v38 = vmul.f32 %v11257_v49, %v1418_v63  ;;  %v1603_v34 = vmul.f32 %v11260_v59, %v1419_v10  ;;  %v16484_v63 = vld [vmem:[#allocation36_spill] sm:$0xff] }
 0x214   : > { %v11330_v37 = vpack.c.bf16 %v1585_v62, %v1584_v55  ;;  %v11332_v43 = vsub.f32 %v1138_v46, %v1146_v21  ;;  %v11334_v12 = vsub.f32 %v1139_v1, %v1147_v8  ;;  %vm717_vm1 = vcmp.ge.f32.partialorder %v11282_v27, 0.6 }
 0x215   : > { %2575 = vmatprep.mubr.bf16.mxu1 %v1713_v56  ;;  %v8011_v39 = vsel %vm716_vm15, 1.0, %v10285_v50  ;;  %vm740_vm2 = vcmp.ge.f32.partialorder %v11276_v23, 1.0  ;;  %vm741_vm3 = vcmp.ge.f32.partialorder %v11282_v27, 1.0  ;;  %v8012_v5 = vsel %vm717_vm1, 1.0, %v10285_v50 }
 0x216   : > { %v1378_v15 = vmul.f32 %v16481_v3, %v11332_v43  ;;  %v1379_v33 = vmul.f32 %v16483_v42, %v11334_v12  ;;  %v8019_v49 = vsel %vm740_vm2, 1.0, %v10285_v50  ;;  %v8020_v59 = vsel %vm741_vm3, 1.0, %v10285_v50 }
 0x217   : > { %vm764_vm4 = vcmp.ge.f32.partialorder %v11276_v23, 1.4  ;;  %vm765_vm5 = vcmp.ge.f32.partialorder %v11282_v27, 1.4  ;;  %v11351_v10 = vsub.f32 %v16484_v63, %v8011_v39  ;;  %vm788_vm6 = vcmp.ge.f32.partialorder %v11276_v23, 1.8 }
 0x218   : > { %v11353_v2 = vsub.f32 %v1378_v15, %v1386_v7  ;;  %v11355_v52 = vsub.f32 %v1379_v33, %v1387_v18  ;;  %v8027_v19 = vsel %vm764_vm4, 1.0, %v10285_v50  ;;  %v8028_v44 = vsel %vm765_vm5, 1.0, %v10285_v50 }
 0x219   : > { %vm789_vm7 = vcmp.ge.f32.partialorder %v11282_v27, 1.8  ;;  %v11362_v24 = vsub.f32 %v16485_v32, %v8012_v5  ;;  %v892_v46 = vsub.f32 %v8011_v39, %v8019_v49  ;;  %v11369_v1 = vsel %vm788_vm6, 1.0, %v10285_v50 }
 0x21a   : > { %v9917_v35 = vpop.eup %9916  ;;  %v1594_v55 = vmul.f32 %v16481_v3, %v11353_v2  ;;  %v1595_v25 = vmul.f32 %v16483_v42, %v11355_v52  ;;  %16486 = vst [vmem:[#allocation15_spill] sm:$0xff] %v11369_v1  ;;  %v11372_v62 = vsel %vm789_vm7, 1.0, %v10285_v50  ;;  %v893_v7 = vsub.f32 %v8012_v5, %v8020_v59 }
 0x21b   : > { %16487 = vst [vmem:[#allocation7_spill] sm:$0xff] %v11372_v62  ;;  %v9919_v21 = vpop.eup %9918  ;;  %v518_v8 = vadd.f32 1.0, %v9917_v35  ;;  %v900_v56 = vsub.f32 %v8019_v49, %v8027_v19  ;;  %v901_v18 = vsub.f32 %v8020_v59, %v8028_v44  ;;  %v11375_v63 = vsub.f32 %v8027_v19, %v11369_v1 }
 0x21c   : > { %v519_v15 = vadd.f32 1.0, %v9919_v21  ;;  %v1610_v39 = vsub.f32 %v1594_v55, %v1602_v38  ;;  %v1611_v33 = vsub.f32 %v1595_v25, %v1603_v34  ;;  %v11378_v3 = vsub.f32 %v8028_v44, %v11372_v62  ;;  %v16492_v55 = vld [vmem:[#allocation44_spill] sm:$0xff] }
 0x21d   : > { %16488 = vst [vmem:[#allocation22_spill] sm:$0xff] %v11375_v63  ;;  %9920 = vrcp.f32 %v518_v8  ;;  %v11381_v42 = vadd.f32 -0.6, %v11276_v23  ;;  %v11384_v32 = vadd.f32 -0.6, %v11282_v27  ;;  %v11387_v49 = vadd.f32 -1.0, %v11276_v23 }
 0x21e   : > { %16489 = vst [vmem:[#allocation28_spill] sm:$0xff] %v11378_v3  ;;  %9922 = vrcp.f32 %v519_v15  ;;  %v1705_v5 = vpack.c.bf16 %v1611_v33, %v1610_v39  ;;  %v11390_v38 = vadd.f32 -1.0, %v11282_v27  ;;  %v11393_v34 = vadd.f32 -1.4, %v11276_v23 }
 0x21f   : > { %v11396_v59 = vadd.f32 -1.4, %v11282_v27  ;;  %v8131_v19 = vadd.f32 -1.8, %v11276_v23  ;;  %v1164_v44 = vmul.f32 %v10732_v22, %v11351_v10  ;;  %v8132_v35 = vadd.f32 -1.8, %v11282_v27 }
 0x220   : > { %16490 = vst [vmem:[#allocation23_spill] sm:$0xff] %v11393_v34  ;;  %2576 = vmatmul.mubr.bf16.gmra.mrb[20].mxu1 %v1705_v5  ;;  %v1165_v25 = vmul.f32 %v16492_v55, %v11362_v24  ;;  %v1172_v21 = vmul.f32 %v11387_v49, %v892_v46  ;;  %v1173_v8 = vmul.f32 %v11390_v38, %v893_v7  ;;  %v16493_v27 = vld [vmem:[#allocation16_spill] sm:$0xff]  ;;  %v16494_v23 = vld [vmem:[#allocation18_spill] sm:$0xff] }
 0x221   : > { %16491 = vst [vmem:[#allocation29_spill] sm:$0xff] %v11396_v59  ;;  %v1188_v15 = vmul.f32 %v11381_v42, %v892_v46  ;;  %v1189_v39 = vmul.f32 %v11384_v32, %v893_v7  ;;  %v1196_v33 = vmul.f32 %v11393_v34, %v900_v56  ;;  %v1197_v0 = vmul.f32 %v11396_v59, %v901_v18 }
 0x222   : > { %v1180_v54 = vsub.f32 %v1164_v44, %v1172_v21  ;;  %v1181_v60 = vsub.f32 %v1165_v25, %v1173_v8  ;;  %v1212_v5 = vmul.f32 %v11387_v49, %v900_v56  ;;  %v1213_v30 = vmul.f32 %v11390_v38, %v901_v18  ;;  %v16497_v44 = vld [vmem:[#allocation19_spill] sm:$0xff]  ;;  %v16499_v56 = vld [vmem:[#allocation32_spill] sm:$0xff]  ;;  %v16500_v18 = vld [vmem:[#allocation26_spill] sm:$0xff] }
 0x223   : > { %v1204_v11 = vsub.f32 %v1188_v15, %v1196_v33  ;;  %v1205_v48 = vsub.f32 %v1189_v39, %v1197_v0  ;;  %v1220_v62 = vmul.f32 %v8131_v19, %v11375_v63  ;;  %v1221_v1 = vmul.f32 %v8132_v35, %v11378_v3  ;;  %v16504_v63 = vld [vmem:[#allocation27_spill] sm:$0xff] }
 0x224   : > { %v1404_v46 = vmul.f32 %v10732_v22, %v1180_v54  ;;  %v1405_v7 = vmul.f32 %v16492_v55, %v1181_v60  ;;  %v16495_v9 = vsub.f32 %v16493_v27, %v16494_v23  ;;  %v16498_v25 = vsub.f32 %v16496_v29, %v16497_v44  ;;  %v16503_v23 = vld [vmem:[#allocation33_spill] sm:$0xff] }
 0x225   : > { %v1354_v8 = vmul.f32 %v16500_v18, %v16499_v56  ;;  %v11426_v0 = vsub.f32 %v1212_v5, %v1220_v62  ;;  %v11428_v15 = vsub.f32 %v1213_v30, %v1221_v1  ;;  %v1412_v39 = vmul.f32 %v11393_v34, %v1204_v11  ;;  %v11440_v56 = vld [vmem:[#allocation2 + $0x30] sm:$0xff] }
 0x226   : > { %v11422_v21 = vpack.c.bf16 %v16498_v25, %v16495_v9  ;;  %v1413_v33 = vmul.f32 %v11396_v59, %v1205_v48  ;;  %v1428_v3 = vmul.f32 %v11381_v42, %v1204_v11  ;;  %v1429_v27 = vmul.f32 %v11384_v32, %v1205_v48  ;;  %16505 = vst [vmem:[#allocation44_spill] sm:$0xff] %v11440_v56 }
 0x227   : > { %16501 = vst [vmem:[#allocation36_spill] sm:$0xff] %v11426_v0  ;;  %16502 = vst [vmem:[#allocation37_spill] sm:$0xff] %v11428_v15  ;;  %v1355_v29 = vmul.f32 %v16504_v63, %v16503_v23  ;;  %v1362_v9 = vmul.f32 %v11245_v40, %v11332_v43  ;;  %v9921_v44 = vpop.eup %9920  ;;  %v1420_v25 = vsub.f32 %v1404_v46, %v1412_v39  ;;  %v11449_v23 = vld [vmem:[#allocation2 + $0x38] sm:$0xff]  ;;  %vm718_vm8 = vcmp.ge.f32.partialorder %v11440_v56, 0.6 }
 0x228   : > { %v1421_v62 = vsub.f32 %v1405_v7, %v1413_v33  ;;  %v1436_v30 = vmul.f32 %v8131_v19, %v11426_v0  ;;  %v1437_v1 = vmul.f32 %v8132_v35, %v11428_v15  ;;  %v9923_v5 = vpop.eup %9922  ;;  %v533_v11 = vmul.f32 %v11440_v56, %v9921_v44  ;;  %16506 = vst [vmem:[#allocation16_spill] sm:$0xff] %v11449_v23  ;;  %v16519_v0 = vld [vmem:[#allocation24_spill] sm:$0xff] }
 0x229   : > { %v1363_v48 = vmul.f32 %v11248_v4, %v11334_v12  ;;  %v11445_v13 = vsub.f32 %v1354_v8, %v1362_v9  ;;  %v1578_v43 = vmul.f32 %v11251_v14, %v11353_v2  ;;  %v535_v46 = vmul.f32 %v11449_v23, %v9923_v5  ;;  %v16509_v9 = vld [vmem:[#allocation38_spill] sm:$0xff] }
 0x22a   : > { %v11452_v7 = vsub.f32 %v1428_v3, %v1436_v30  ;;  %v11454_v39 = vsub.f32 %v1429_v27, %v1437_v1  ;;  %v1620_v33 = vmul.f32 %v10732_v22, %v1420_v25  ;;  %v1621_v44 = vmul.f32 %v16492_v55, %v1421_v62  ;;  %v16510_v27 = vld [vmem:[#allocation42_spill] sm:$0xff]  ;;  %v16512_v1 = vld [vmem:[#allocation43_spill] sm:$0xff] }
 0x22b   : > { %v11458_v15 = vsub.f32 %v1355_v29, %v1363_v48  ;;  %v1570_v12 = vmul.f32 %v16500_v18, %v11445_v13  ;;  %v1579_v14 = vmul.f32 %v11254_v51, %v11355_v52  ;;  %v539_v2 = vpack.c.bf16 %v535_v46, %v533_v11  ;;  %v16511_v29 = vld [vmem:[#allocation39_spill] sm:$0xff] }
 0x22c   : > { %16507 = vst [vmem:[#allocation18_spill] sm:$0xff] %v11452_v7  ;;  %16508 = vst [vmem:[#allocation17_spill] sm:$0xff] %v11454_v39  ;;  %v1628_v8 = vmul.f32 %v8131_v19, %v11452_v7  ;;  %v1629_v3 = vmul.f32 %v8132_v35, %v11454_v39  ;;  %v1140_v30 = vmul.f32 %v16510_v27, %v16509_v9  ;;  %vm719_vm9 = vcmp.ge.f32.partialorder %v11449_v23, 0.6  ;;  %v16518_v7 = vld [vmem:[#allocation34_spill] sm:$0xff] }
 0x22d   : > { %v1571_v22 = vmul.f32 %v16504_v63, %v11458_v15  ;;  %v1586_v55 = vsub.f32 %v1570_v12, %v1578_v43  ;;  %v1141_v5 = vmul.f32 %v16512_v1, %v16511_v29  ;;  %v1148_v18 = vmul.f32 %v11381_v42, %v11351_v10  ;;  %2397 = vmatmul.mubr.bf16.gmra.mrb[12].mxu0 %v539_v2  ;;  %v9725_v2 = vld [vmem:[%s16041_s3 + $0x208] sm:$0xff]   ;;  %v16515_v29 = vld [vmem:[#allocation49_spill] sm:$0xff] }
 0x22e   : > { %v1636_v51 = vsub.f32 %v1620_v33, %v1628_v8  ;;  %v1637_v52 = vsub.f32 %v1621_v44, %v1629_v3  ;;  %v1149_v19 = vmul.f32 %v11384_v32, %v11362_v24  ;;  %v1388_v35 = vmul.f32 %v11387_v49, %v1180_v54  ;;  %2502 = vmatprep.mubr.bf16.mxu0 %v11330_v37 }
 0x22f   : > { %v1587_v11 = vsub.f32 %v1571_v22, %v1579_v14  ;;  %v11478_v48 = vsub.f32 %v1140_v30, %v1148_v18  ;;  %v1389_v63 = vmul.f32 %v11390_v38, %v1181_v60  ;;  %v1604_v43 = vmul.f32 %v11393_v34, %v1420_v25  ;;  %v16516_v18 = vld [vmem:[#allocation50_spill] sm:$0xff] }
 0x230   : > { %v1714_v46 = vpack.c.bf16 %v1637_v52, %v1636_v51  ;;  %v11482_v12 = vsub.f32 %v1141_v5, %v1149_v19  ;;  %v1605_v10 = vmul.f32 %v11396_v59, %v1421_v62  ;;  %v8013_v37 = vsel %vm718_vm8, 1.0, %v10285_v50 }
 0x231   : > { %v1697_v33 = vpack.c.bf16 %v1587_v11, %v1586_v55  ;;  %v1380_v54 = vmul.f32 %v16510_v27, %v11478_v48  ;;  %v8014_v24 = vsel %vm719_vm9, 1.0, %v10285_v50  ;;  %vm742_vm10 = vcmp.ge.f32.partialorder %v11440_v56, 1.0 }
 0x232   : > { %2583 = vmatprep.mubr.bf16.mxu1 %v1714_v46  ;;  %v1381_v60 = vmul.f32 %v16512_v1, %v11482_v12  ;;  %vm743_vm11 = vcmp.ge.f32.partialorder %v11449_v23, 1.0  ;;  %v8021_v62 = vsel %vm742_vm10, 1.0, %v10285_v50  ;;  %vm766_vm12 = vcmp.ge.f32.partialorder %v11440_v56, 1.4 }
 0x233   : > { %v11495_v25 = vsub.f32 %v1380_v54, %v1388_v35  ;;  %v8022_v44 = vsel %vm743_vm11, 1.0, %v10285_v50  ;;  %vm767_vm13 = vcmp.ge.f32.partialorder %v11449_v23, 1.4  ;;  %v8029_v8 = vsel %vm766_vm12, 1.0, %v10285_v50 }
 0x234   : > { %v11500_v14 = vsub.f32 %v1381_v60, %v1389_v63  ;;  %vm790_vm14 = vcmp.ge.f32.partialorder %v11440_v56, 1.8  ;;  %v8030_v9 = vsel %vm767_vm13, 1.0, %v10285_v50  ;;  %vm791_vm15 = vcmp.ge.f32.partialorder %v11449_v23, 1.8 }
 0x235   : > { %v1596_v3 = vmul.f32 %v16510_v27, %v11495_v25  ;;  %v11513_v30 = vsel %vm790_vm14, 1.0, %v10285_v50  ;;  %2503 = vmatmul.mubr.bf16.vlgmr.msra.gmra.mrb[16].mxu0 %v11422_v21  ;;  %v11519_v55 = vsel %vm791_vm15, 1.0, %v10285_v50  ;;  %v11522_v5 = vsub.f32 %v16515_v29, %v8013_v37 }
 0x236   : > { %16513 = vst [vmem:[#allocation19_spill] sm:$0xff] %v11513_v30  ;;  %v1597_v22 = vmul.f32 %v16512_v1, %v11500_v14  ;;  %16514 = vst [vmem:[#allocation32_spill] sm:$0xff] %v11519_v55  ;;  %v11525_v27 = vsub.f32 %v16516_v18, %v8014_v24  ;;  %9564 = vmatpush3.bf16.msra.mxu0 %v11102_v6  ;;  %2510 = vmatprep.mubr.bf16.mxu0 %v1697_v33  ;;  %v11529_v21 = vadd.f32 -0.6, %v11440_v56 }
 0x237   : > { %v1612_v51 = vsub.f32 %v1596_v3, %v1604_v43  ;;  %v894_v52 = vsub.f32 %v8013_v37, %v8021_v62  ;;  %v895_v19 = vsub.f32 %v8014_v24, %v8022_v44  ;;  %9565 = vmatprep.subr.bf16.mxu0 %v9725_v2  ;;  %v902_v1 = vsub.f32 %v8021_v62, %v8029_v8 }
 0x238   : > { %v1613_v35 = vsub.f32 %v1597_v22, %v1605_v10  ;;  %v903_v11 = vsub.f32 %v8022_v44, %v8030_v9  ;;  %v11532_v63 = vsub.f32 %v8029_v8, %v11513_v30  ;;  %v11535_v46 = vsub.f32 %v8030_v9, %v11519_v55  ;;  %v9726_v10 = vld [vmem:[%s16041_s3 + $0x210] sm:$0xff]  }
 0x239   : > { %v11538_v54 = vadd.f32 -0.6, %v11449_v23  ;;  %v11541_v6 = vadd.f32 -1.0, %v11440_v56  ;;  %v11544_v43 = vadd.f32 -1.0, %v11449_v23  ;;  %v11550_v37 = vadd.f32 -1.4, %v11440_v56 }
 0x23a   : > { %16517 = vst [vmem:[#allocation26_spill] sm:$0xff] %v11535_v46  ;;  %v1706_v33 = vpack.c.bf16 %v1613_v35, %v1612_v51  ;;  %v11553_v60 = vadd.f32 -1.4, %v11449_v23  ;;  %v8133_v24 = vadd.f32 -1.8, %v11440_v56  ;;  %v1166_v44 = vmul.f32 %v10923_v20, %v11522_v5  ;;  %9566 = vmatpush3.bf16.msra.mxu0 %v9725_v2  ;;  %v9727_v51 = vld [vmem:[%s16041_s3 + $0x218] sm:$0xff]  }
 0x23b   : > { %v8134_v62 = vadd.f32 -1.8, %v11449_v23  ;;  %v1167_v8 = vmul.f32 %v10926_v41, %v11525_v27  ;;  %v1174_v3 = vmul.f32 %v11541_v6, %v894_v52  ;;  %v1175_v9 = vmul.f32 %v11544_v43, %v895_v19  ;;  %9567 = vmatprep.subr.bf16.mxu0 %v9726_v10 }
 0x23c   : > { %2584 = vmatmul.mubr.bf16.gmra.mrb[24].mxu1 %v1706_v33  ;;  %v1190_v22 = vmul.f32 %v11529_v21, %v894_v52  ;;  %v1191_v29 = vmul.f32 %v11538_v54, %v895_v19  ;;  %v1198_v18 = vmul.f32 %v11550_v37, %v902_v1  ;;  %v1199_v55 = vmul.f32 %v11553_v60, %v903_v11 }
 0x23d   : > { %v1182_v35 = vsub.f32 %v1166_v44, %v1174_v3  ;;  %v1214_v30 = vmul.f32 %v11541_v6, %v902_v1  ;;  %v1215_v2 = vmul.f32 %v11544_v43, %v903_v11  ;;  %v1183_v33 = vsub.f32 %v1167_v8, %v1175_v9  ;;  %v16520_v44 = vld [vmem:[#allocation35_spill] sm:$0xff]  ;;  %v16521_v3 = vld [vmem:[#allocation25_spill] sm:$0xff] }
 0x23e   : > { %v1206_v23 = vsub.f32 %v1190_v22, %v1198_v18  ;;  %v1222_v52 = vmul.f32 %v8133_v24, %v11532_v63  ;;  %v1223_v19 = vmul.f32 %v8134_v62, %v11535_v46  ;;  %v1207_v56 = vsub.f32 %v1191_v29, %v1199_v55  ;;  %9568 = vmatpush3.bf16.msra.mxu0 %v9726_v10  ;;  %v9728_v55 = vld [vmem:[%s16041_s3 + $0x220] sm:$0xff]   ;;  %v16523_v46 = vld [vmem:[#allocation46_spill] sm:$0xff] }
 0x23f   : > { %v1406_v39 = vmul.f32 %v10923_v20, %v1182_v35  ;;  %v1546_v59 = vmul.f32 %v16519_v0, %v16518_v7  ;;  %v1547_v34 = vmul.f32 %v16521_v3, %v16520_v44  ;;  %v1407_v8 = vmul.f32 %v10926_v41, %v1183_v33  ;;  %9569 = vmatprep.subr.bf16.mxu0 %v9727_v51  ;;  %v16522_v44 = vld [vmem:[#allocation45_spill] sm:$0xff] }
 0x240   : > { %v11579_v1 = vsub.f32 %v1214_v30, %v1222_v52  ;;  %v11581_v11 = vsub.f32 %v1215_v2, %v1223_v19  ;;  %v1414_v9 = vmul.f32 %v11550_v37, %v1206_v23  ;;  %v1415_v22 = vmul.f32 %v11553_v60, %v1207_v56 }
 0x241   : > { %v1430_v0 = vmul.f32 %v11529_v21, %v1206_v23  ;;  %v1431_v7 = vmul.f32 %v11538_v54, %v1207_v56  ;;  %v1554_v30 = vmul.f32 %v11245_v40, %v11445_v13  ;;  %v1555_v2 = vmul.f32 %v11248_v4, %v11458_v15 }
 0x242   : > { %v1422_v10 = vsub.f32 %v1406_v39, %v1414_v9  ;;  %v1438_v29 = vmul.f32 %v8133_v24, %v11579_v1  ;;  %v1439_v18 = vmul.f32 %v8134_v62, %v11581_v11  ;;  %v1423_v52 = vsub.f32 %v1407_v8, %v1415_v22  ;;  %9570 = vmatpush3.bf16.msra.mxu0 %v9727_v51  ;;  %v16524_v22 = vld [vmem:[#allocation51_spill] sm:$0xff] }
 0x243   : > { %v1562_v19 = vsub.f32 %v1546_v59, %v1554_v30  ;;  %v1356_v3 = vmul.f32 %v10719_v28, %v16522_v44  ;;  %v1357_v23 = vmul.f32 %v10722_v58, %v16523_v46  ;;  %v1563_v39 = vsub.f32 %v1547_v34, %v1555_v2  ;;  %9571 = vmatprep.subr.bf16.mxu0 %v9728_v55  ;;  %v9729_v46 = vld [vmem:[%s16041_s3 + $0x228] sm:$0xff]  }
 0x244   : > { %v11601_v56 = vsub.f32 %v1430_v0, %v1438_v29  ;;  %v11603_v13 = vsub.f32 %v1431_v7, %v1439_v18  ;;  %v1622_v40 = vmul.f32 %v10923_v20, %v1422_v10  ;;  %v1623_v9 = vmul.f32 %v10926_v41, %v1423_v52  ;;  %v16525_v0 = vld [vmem:[#allocation53_spill] sm:$0xff]  ;;  %v16526_v7 = vld [vmem:[#allocation52_spill] sm:$0xff]  ;;  %v16527_v30 = vld [vmem:[#allocation54_spill] sm:$0xff] }
 0x245   : > { %v1364_v4 = vmul.f32 %v11381_v42, %v11478_v48  ;;  %v1365_v59 = vmul.f32 %v11384_v32, %v11482_v12  ;;  %v1580_v15 = vmul.f32 %v11387_v49, %v11495_v25  ;;  %v1689_v34 = vpack.c.bf16 %v1563_v39, %v1562_v19 }
 0x246   : > { %v1630_v51 = vmul.f32 %v8133_v24, %v11601_v56  ;;  %v1631_v20 = vmul.f32 %v8134_v62, %v11603_v13  ;;  %v1581_v41 = vmul.f32 %v11390_v38, %v11500_v14  ;;  %v1142_v12 = vmul.f32 %v16525_v0, %v16524_v22  ;;  %9572 = vmatpush3.bf16.msra.mxu0 %v9728_v55  ;;  %v9730_v55 = vld [vmem:[%s16041_s3 + $0x230] sm:$0xff]  }
 0x247   : > { %v1372_v8 = vsub.f32 %v1356_v3, %v1364_v4  ;;  %v1373_v48 = vsub.f32 %v1357_v23, %v1365_v59  ;;  %v1143_v25 = vmul.f32 %v16527_v30, %v16526_v7  ;;  %2511 = vmatmul.mubr.bf16.gmra.mrb[20].mxu0 %v1689_v34  ;;  %v1150_v24 = vmul.f32 %v11529_v21, %v11522_v5  ;;  %v16530_v59 = vld [vmem:[#allocation48_spill] sm:$0xff] }
 0x248   : > { %v1638_v29 = vsub.f32 %v1622_v40, %v1630_v51  ;;  %v1639_v18 = vsub.f32 %v1623_v9, %v1631_v20  ;;  %v1151_v62 = vmul.f32 %v11538_v54, %v11525_v27  ;;  %v1390_v19 = vmul.f32 %v11541_v6, %v1182_v35  ;;  %9573 = vmatprep.subr.bf16.mxu0 %v9729_v46  ;;  %v16528_v9 = vld [vmem:[#allocation47_spill] sm:$0xff]  ;;  %v16531_v51 = vld [vmem:[#allocation41_spill] sm:$0xff] }
 0x249   : > { %v1572_v14 = vmul.f32 %v10719_v28, %v1372_v8  ;;  %v1573_v2 = vmul.f32 %v10722_v58, %v1373_v48  ;;  %v1391_v44 = vmul.f32 %v11544_v43, %v1183_v33  ;;  %v1158_v23 = vsub.f32 %v1142_v12, %v1150_v24  ;;  %v16529_v58 = vld [vmem:[#allocation40_spill] sm:$0xff]  ;;  %v16534_v24 = vld [vmem:[#allocation57_spill] sm:$0xff] }
 0x24a   : > { %v1715_v3 = vpack.c.bf16 %v1639_v18, %v1638_v29  ;;  %v1159_v40 = vsub.f32 %v1143_v25, %v1151_v62  ;;  %v1606_v5 = vmul.f32 %v11550_v37, %v1422_v10  ;;  %v1607_v28 = vmul.f32 %v11553_v60, %v1423_v52  ;;  %9574 = vmatpush3.bf16.msra.mxu0 %v9729_v46  ;;  %v9731_v46 = vld [vmem:[%s16041_s3 + $0x238] sm:$0xff]  }
 0x24b   : > { %v1588_v39 = vsub.f32 %v1572_v14, %v1580_v15  ;;  %v1589_v27 = vsub.f32 %v1573_v2, %v1581_v41  ;;  %v1548_v4 = vmul.f32 %v16529_v58, %v16528_v9  ;;  %v1382_v35 = vmul.f32 %v16525_v0, %v1158_v23  ;;  %v16532_v15 = vld [vmem:[#allocation55_spill] sm:$0xff]  ;;  %v16533_v41 = vld [vmem:[#allocation56_spill] sm:$0xff]  ;;  %9575 = vmatprep.subr.bf16.mxu0 %v9730_v55  ;;  %v16535_v14 = vld [vmem:[#allocation58_spill] sm:$0xff] }
 0x24c   : > { %2591 = vmatprep.mubr.bf16.mxu1 %v1715_v3  ;;  %v1383_v33 = vmul.f32 %v16527_v30, %v1159_v40  ;;  %v1549_v20 = vmul.f32 %v16531_v51, %v16530_v59  ;;  %v1556_v34 = vmul.f32 %v11381_v42, %v1372_v8  ;;  %v1557_v10 = vmul.f32 %v11384_v32, %v1373_v48  ;;  %v9997_v58 = vld [vmem:[#allocation2] sm:$0xff] }
 0x24d   : > { %v1698_v22 = vpack.c.bf16 %v1589_v27, %v1588_v39  ;;  %v1358_v52 = vmul.f32 %v10911_v47, %v16532_v15  ;;  %v1359_v12 = vmul.f32 %v10914_v31, %v16533_v41  ;;  %v1398_v7 = vsub.f32 %v1382_v35, %v1390_v19  ;;  %v9998_v35 = vld [vmem:[#allocation2 + $0x8] sm:$0xff] }
 0x24e   : > { %v1399_v25 = vsub.f32 %v1383_v33, %v1391_v44  ;;  %v1564_v29 = vsub.f32 %v1548_v4, %v1556_v34  ;;  %v1366_v18 = vmul.f32 %v11529_v21, %v1158_v23  ;;  %v1565_v8 = vsub.f32 %v1549_v20, %v1557_v10  ;;  %9576 = vmatpush3.bf16.msra.mxu0 %v9730_v55 }
 0x24f   : > { %2518 = vmatprep.mubr.bf16.mxu0 %v1698_v22  ;;  %v1367_v48 = vmul.f32 %v11538_v54, %v1159_v40  ;;  %v1550_v62 = vmul.f32 %v10905_v45, %v16534_v24  ;;  %v1551_v2 = vmul.f32 %v10908_v26, %v16535_v14  ;;  %v1598_v3 = vmul.f32 %v16525_v0, %v1398_v7  ;;  %v16537_v22 = vld [vmem:[#allocation60_spill] sm:$0xff] }
 0x250   : > { %v1599_v39 = vmul.f32 %v16527_v30, %v1399_v25  ;;  %v1374_v27 = vsub.f32 %v1358_v52, %v1366_v18  ;;  %v1582_v19 = vmul.f32 %v11541_v6, %v1398_v7  ;;  %v1690_v44 = vpack.c.bf16 %v1565_v8, %v1564_v29  ;;  %9577 = vmatprep.subr.bf16.mxu0 %v9731_v46  ;;  %v16538_v18 = vld [vmem:[#allocation62_spill] sm:$0xff]  ;;  %v16539_v8 = vld [vmem:[#allocation61_spill] sm:$0xff] }
 0x251   : > { %v1375_v23 = vsub.f32 %v1359_v12, %v1367_v48  ;;  %v1583_v9 = vmul.f32 %v11544_v43, %v1399_v25  ;;  %vm808_vm1 = vcmp.ge.f32.partialorder %v9997_v58, 2.2  ;;  %v1614_v40 = vsub.f32 %v1598_v3, %v1606_v5  ;;  %v16541_v3 = vld [vmem:[#allocation10_spill] sm:$0xff] }
 0x252   : > { %v1615_v45 = vsub.f32 %v1599_v39, %v1607_v28  ;;  %v1574_v4 = vmul.f32 %v10911_v47, %v1374_v27  ;;  %v1558_v26 = vmul.f32 %v11529_v21, %v1374_v27  ;;  %2519 = vmatmul.mubr.bf16.gmra.mrb[24].mxu0 %v1690_v44  ;;  %vm809_vm2 = vcmp.ge.f32.partialorder %v9998_v35, 2.2  ;;  %v16536_v47 = vld [vmem:[#allocation59_spill] sm:$0xff]  ;;  %v10000_v44 = vld [vmem:[#allocation2 + $0x18] sm:$0xff] }
 0x253   : > { %v1575_v0 = vmul.f32 %v10914_v31, %v1375_v23  ;;  %v1559_v30 = vmul.f32 %v11538_v54, %v1375_v23  ;;  %v8039_v55 = vsel %vm808_vm1, 1.0, %v10285_v50  ;;  %v8040_v20 = vsel %vm809_vm2, 1.0, %v10285_v50  ;;  %9578 = vmatpush3.bf16.msra.mxu0 %v9731_v46  ;;  %v11670_v15 = vpop.f32.mrb[0].mxu1  ;;  %v16543_v39 = vld [vmem:[#allocation11_spill] sm:$0xff]  ;;  %v16545_v23 = vld [vmem:[#allocation22_spill] sm:$0xff] }
 0x254   : > { %v1707_v33 = vpack.c.bf16 %v1615_v45, %v1614_v40  ;;  %v1590_v59 = vsub.f32 %v1574_v4, %v1582_v19  ;;  %v1566_v51 = vsub.f32 %v1550_v62, %v1558_v26  ;;  %v912_v34 = vsub.f32 %v16536_v47, %v8039_v55  ;;  %v11676_v7 = vpop.f32.mrb[1].mxu1  ;;  %v9999_v27 = vld [vmem:[#allocation2 + $0x10] sm:$0xff]  ;;  %v16547_v4 = vld [vmem:[#allocation30_spill] sm:$0xff] }
 0x255   : > { %v1591_v5 = vsub.f32 %v1575_v0, %v1583_v9  ;;  %v1567_v28 = vsub.f32 %v1551_v2, %v1559_v30  ;;  %v913_v10 = vsub.f32 %v16537_v22, %v8040_v20  ;;  %v8135_v31 = vadd.f32 -2.2, %v9997_v58  ;;  %v11682_v24 = vpop.f32.mrb[2].mxu1  ;;  %v16540_v2 = vld [vmem:[#allocation63_spill] sm:$0xff]  ;;  %v16548_v0 = vld [vmem:[#allocation12_spill] sm:$0xff]  ;;  %v16549_v30 = vld [vmem:[#allocation13_spill] sm:$0xff] }
 0x256   : > { %2592 = vmatmul.mubr.bf16.gmra.mrb[28].mxu1 %v1707_v33  ;;  %v8136_v52 = vadd.f32 -2.2, %v9998_v35  ;;  %v1232_v41 = vmul.f32 %v11114_v36, %v11105_v57  ;;  %v1233_v12 = vmul.f32 %v11116_v61, %v11108_v16  ;;  %v1448_v29 = vmul.f32 %v11110_v17, %v11142_v53  ;;  %v16542_v36 = vld [vmem:[#allocation64_spill] sm:$0xff]  ;;  %v11688_v61 = vpop.f32.mrb[3].mxu1  ;;  %v16546_v9 = vld [vmem:[#allocation23_spill] sm:$0xff] }
 0x257   : > { %v1699_v46 = vpack.c.bf16 %v1591_v5, %v1590_v59  ;;  %v1691_v25 = vpack.c.bf16 %v1567_v28, %v1566_v51  ;;  %v1449_v48 = vmul.f32 %v16539_v8, %v16538_v18  ;;  %v1240_v62 = vmul.f32 %v8135_v31, %v912_v34  ;;  %v16544_v53 = vld [vmem:[#allocation20_spill] sm:$0xff]  ;;  %v16552_v59 = vld [vmem:[#allocation9_spill] sm:$0xff]  ;;  %v16554_v28 = vld [vmem:[#allocation15_spill] sm:$0xff] }
 0x258   : > { %v1241_v14 = vmul.f32 %v8136_v52, %v913_v10  ;;  %v1640_v57 = vmul.f32 %v16541_v3, %v16540_v2  ;;  %v1641_v16 = vmul.f32 %v16543_v39, %v16542_v36  ;;  %v8137_v19 = vadd.f32 -2.2, %v9999_v27  ;;  %v16551_v33 = vld [vmem:[#allocation8_spill] sm:$0xff]  ;;  %v16555_v10 = vld [vmem:[#allocation7_spill] sm:$0xff]  ;;  %v16559_v2 = vld [vmem:[#allocation29_spill] sm:$0xff] }
 0x259   : > { %2526 = vmatprep.mubr.bf16.mxu0 %v1699_v46  ;;  %v8138_v17 = vadd.f32 -2.2, %v10000_v44  ;;  %vm812_vm3 = vcmp.ge.f32.partialorder %v16544_v53, 2.2  ;;  %v1236_v58 = vmul.f32 %v16546_v9, %v16545_v23  ;;  %v1248_v40 = vsub.f32 %v1232_v41, %v1240_v62  ;;  %v16556_v46 = vld [vmem:[#allocation21_spill] sm:$0xff]  ;;  %v16557_v18 = vld [vmem:[#allocation31_spill] sm:$0xff] }
 0x25a   : > { %v1249_v45 = vsub.f32 %v1233_v12, %v1241_v14  ;;  %vm813_vm4 = vcmp.ge.f32.partialorder %v16547_v4, 2.2  ;;  %v8043_v26 = vsel %vm812_vm3, 1.0, %v10285_v50  ;;  %2527 = vmatmul.mubr.bf16.gmra.mrb[28].mxu0 %v1691_v25  ;;  %v16550_v35 = vsub.f32 %v16548_v0, %v16549_v30  ;;  %v16558_v14 = vld [vmem:[#allocation28_spill] sm:$0xff] }
 0x25b   : > { %v16553_v51 = vsub.f32 %v16551_v33, %v16552_v59  ;;  %v8044_v5 = vsel %vm813_vm4, 1.0, %v10285_v50  ;;  %v916_v47 = vsub.f32 %v16554_v28, %v8043_v26  ;;  %v1456_v34 = vmul.f32 %v8135_v31, %v1248_v40  ;;  %v16560_v44 = vld [vmem:[#allocation36_spill] sm:$0xff]  ;;  %v16561_v26 = vld [vmem:[#allocation37_spill] sm:$0xff] }
 0x25c   : > { %v1242_v55 = vmul.f32 %v8137_v19, %v16550_v35  ;;  %v1457_v22 = vmul.f32 %v8136_v52, %v1249_v45  ;;  %v917_v41 = vsub.f32 %v16555_v10, %v8044_v5  ;;  %v8139_v12 = vadd.f32 -2.2, %v16544_v53  ;;  %v16563_v33 = vld [vmem:[#allocation65_spill] sm:$0xff] }
 0x25d   : > { %v1243_v20 = vmul.f32 %v8138_v17, %v16553_v51  ;;  %v8140_v62 = vadd.f32 -2.2, %v16547_v4  ;;  %v1237_v3 = vmul.f32 %v16559_v2, %v16558_v14  ;;  %v1464_v36 = vsub.f32 %v1448_v29, %v1456_v34  ;;  %v16564_v29 = vld [vmem:[#allocation66_spill] sm:$0xff]  ;;  %v16566_v34 = vld [vmem:[#allocation44_spill] sm:$0xff] }
 0x25e   : > { %v1250_v25 = vsub.f32 %v16556_v46, %v1242_v55  ;;  %v1465_v39 = vsub.f32 %v1449_v48, %v1457_v22  ;;  %v1244_v27 = vmul.f32 %v8139_v12, %v916_v47  ;;  %v1452_v23 = vmul.f32 %v11387_v49, %v16560_v44  ;;  %v16562_v55 = vld [vmem:[#allocation18_spill] sm:$0xff] }
 0x25f   : > { %v1251_v8 = vsub.f32 %v16557_v18, %v1243_v20  ;;  %v1245_v45 = vmul.f32 %v8140_v62, %v917_v41  ;;  %v1453_v53 = vmul.f32 %v11390_v38, %v16561_v26  ;;  %v1648_v0 = vmul.f32 %v8135_v31, %v1464_v36  ;;  %v16565_v20 = vld [vmem:[#allocation17_spill] sm:$0xff]  ;;  %v16568_v46 = vld [vmem:[#allocation14_spill] sm:$0xff] }
 0x260   : > { %v1458_v9 = vmul.f32 %v8137_v19, %v1250_v25  ;;  %v1649_v30 = vmul.f32 %v8136_v52, %v1465_v39  ;;  %v1252_v35 = vsub.f32 %v1236_v58, %v1244_v27  ;;  %v1644_v4 = vmul.f32 %v11381_v42, %v16562_v55  ;;  %v16567_v58 = vld [vmem:[#allocation16_spill] sm:$0xff]  ;;  %v16569_v18 = vld [vmem:[#allocation6_spill] sm:$0xff] }
 0x261   : > { %v1459_v40 = vmul.f32 %v8138_v17, %v1251_v8  ;;  %v1253_v51 = vsub.f32 %v1237_v3, %v1245_v45  ;;  %v1645_v49 = vmul.f32 %v11384_v32, %v16565_v20  ;;  %v1656_v5 = vsub.f32 %v1640_v57, %v1648_v0  ;;  %v16572_v44 = vld [vmem:[#allocation26_spill] sm:$0xff] }
 0x262   : > { %v1466_v59 = vsub.f32 %v16563_v33, %v1458_v9  ;;  %v1657_v28 = vsub.f32 %v1641_v16, %v1649_v30  ;;  %v1460_v47 = vmul.f32 %v8139_v12, %v1252_v35  ;;  %vm814_vm5 = vcmp.ge.f32.partialorder %v16566_v34, 2.2  ;;  %v16570_v16 = vld [vmem:[#allocation19_spill] sm:$0xff] }
 0x263   : > { %v1467_v48 = vsub.f32 %v16564_v29, %v1459_v40  ;;  %v1461_v52 = vmul.f32 %v8140_v62, %v1253_v51  ;;  %vm815_vm6 = vcmp.ge.f32.partialorder %v16567_v58, 2.2  ;;  %v8045_v10 = vsel %vm814_vm5, 1.0, %v10285_v50 }
 0x264   : > { %v1650_v38 = vmul.f32 %v8137_v19, %v1466_v59  ;;  %v1720_v22 = vpack.c.bf16 %v1657_v28, %v1656_v5  ;;  %v1468_v42 = vsub.f32 %v1452_v23, %v1460_v47  ;;  %v8046_v41 = vsel %vm815_vm6, 1.0, %v10285_v50  ;;  %v16571_v19 = vld [vmem:[#allocation32_spill] sm:$0xff] }
 0x265   : > { %v1651_v31 = vmul.f32 %v8138_v17, %v1467_v48  ;;  %v1469_v57 = vsub.f32 %v1453_v53, %v1461_v52  ;;  %v918_v8 = vsub.f32 %v16570_v16, %v8045_v10  ;;  %v919_v17 = vsub.f32 %v16571_v19, %v8046_v41 }
 0x266   : > { %v1658_v25 = vsub.f32 %v16568_v46, %v1650_v38  ;;  %9579 = vmatprep.mubr.bf16.mxu0 %v1720_v22  ;;  %v1652_v14 = vmul.f32 %v8139_v12, %v1468_v42  ;;  %v8141_v2 = vadd.f32 -2.2, %v16566_v34  ;;  %v8142_v3 = vadd.f32 -2.2, %v16567_v58 }
 0x267   : > { %v1659_v32 = vsub.f32 %v16569_v18, %v1651_v31  ;;  %v1653_v39 = vmul.f32 %v8140_v62, %v1469_v57  ;;  %v1238_v27 = vmul.f32 %v11550_v37, %v11532_v63  ;;  %v1239_v23 = vmul.f32 %v11553_v60, %v16572_v44 }
 0x268   : > { %v1660_v9 = vsub.f32 %v1644_v4, %v1652_v14  ;;  %v1246_v40 = vmul.f32 %v8141_v2, %v918_v8  ;;  %v1247_v45 = vmul.f32 %v8142_v3, %v919_v17  ;;  %v1454_v12 = vmul.f32 %v11541_v6, %v11579_v1 }
 0x269   : > { %v1721_v36 = vpack.c.bf16 %v1659_v32, %v1658_v25  ;;  %v1661_v26 = vsub.f32 %v1645_v49, %v1653_v39  ;;  %v1455_v53 = vmul.f32 %v11544_v43, %v11581_v11  ;;  %v9105_v62 = vadd.f32 %v11676_v7, %v11670_v15 }
 0x26a   : > { %v1254_v0 = vsub.f32 %v1238_v27, %v1246_v40  ;;  %v1255_v30 = vsub.f32 %v1239_v23, %v1247_v45  ;;  %v9108_v63 = vadd.f32 %v11688_v61, %v11682_v24  ;;  %v1646_v6 = vmul.f32 %v11529_v21, %v11601_v56 }
 0x26b   : > { %9580 = vmatmul.mubr.bf16.vlgmr.msra.gmra.mrb[32].mxu0 %v1721_v36  ;;  %v1722_v37 = vpack.c.bf16 %v1661_v26, %v1660_v9  ;;  %v1647_v43 = vmul.f32 %v11538_v54, %v11603_v13 }
 0x26c   : > { %v1462_v60 = vmul.f32 %v8141_v2, %v1254_v0  ;;  %v1463_v35 = vmul.f32 %v8142_v3, %v1255_v30  ;;  %v9732_v30 = vld [vmem:[%s16041_s3 + $0x300] sm:$0xff]  }
 0x26d   : > { %9583 = vmatprep.mubr.bf16.mxu0 %v1722_v37  ;;  %9259 = vmatprep.subr.bf16.mxu0 %v9732_v30  ;;  %v9738_v37 = vld [vmem:[%s16041_s3 + $0x280] sm:$0xff]  }
 0x26e   : > { %v1470_v55 = vsub.f32 %v1454_v12, %v1462_v60  ;;  %v1471_v4 = vsub.f32 %v1455_v53, %v1463_v35  ;;  %v9740_v60 = vld [vmem:[%s16041_s3 + $0x240] sm:$0xff]   ;;  %v9735_v35 = vld [vmem:[%s16041_s3 + $0x2c8] sm:$0xff]   ;;  %9219 = vmatprep.subr.bf16.mxu1 %v9738_v37 }
 0x26f   : > { %9220 = vmatpush3.bf16.msra.mxu1 %v9740_v60 }
 0x270   : > { %v1654_v1 = vmul.f32 %v8141_v2, %v1470_v55  ;;  %v1655_v11 = vmul.f32 %v8142_v3, %v1471_v4  ;;  %v9742_v55 = vld [vmem:[%s16041_s3 + $0x288] sm:$0xff]  }
 0x271   : > { %9221 = vmatprep.subr.bf16.mxu1 %v9742_v55 }
 0x272   : > { %v1662_v33 = vsub.f32 %v1646_v6, %v1654_v1  ;;  %v1663_v59 = vsub.f32 %v1647_v43, %v1655_v11  ;;  %v9109_v7 = vpop.f32.mrb[4].mxu1  ;;  %v9736_v6 = vld [vmem:[%s16041_s3 + $0x310] sm:$0xff]   ;;  %v9744_v1 = vld [vmem:[%s16041_s3 + $0x248] sm:$0xff]  }
 0x273   : > { %v9110_v29 = vpop.f32.mrb[5].mxu1  ;;  %9222 = vmatpush3.bf16.msra.mxu1 %v9744_v1 }
 0x274   : > { %v1723_v15 = vpack.c.bf16 %v1663_v59, %v1662_v33  ;;  %v9111_v24 = vadd.f32 %v9110_v29, %v9109_v7  ;;  %v9112_v61 = vpop.f32.mrb[6].mxu1  ;;  %v9746_v59 = vld [vmem:[%s16041_s3 + $0x290] sm:$0xff]  }
 0x275   : > { %v9113_v48 = vpop.f32.mrb[7].mxu1  ;;  %v9737_v7 = vld [vmem:[%s16041_s3 + $0x2d0] sm:$0xff]   ;;  %9223 = vmatprep.subr.bf16.mxu1 %v9746_v59 }
 0x276   : > { %9584 = vmatmul.mubr.bf16.gmra.mrb[36].mxu0 %v1723_v15  ;;  %v9114_v51 = vadd.f32 %v9113_v48, %v9112_v61  ;;  %v9748_v61 = vld [vmem:[%s16041_s3 + $0x250] sm:$0xff]   ;;  %v9750_v48 = vld [vmem:[%s16041_s3 + $0x298] sm:$0xff]  }
 0x277   : > { %9224 = vmatpush3.bf16.msra.mxu1 %v9748_v61 }
 0x278   : > { %9225 = vmatprep.subr.bf16.mxu1 %v9750_v48 }
 0x295   : > { %v9115_v20 = vpop.f32.mrb[8].mxu1 }
 0x296   : > { %v9116_v49 = vpop.f32.mrb[9].mxu1 }
 0x297   : > { %v9117_v28 = vadd.f32 %v9116_v49, %v9115_v20  ;;  %v9118_v21 = vpop.f32.mrb[10].mxu1  ;;  %v9743_v20 = vld [vmem:[%s16041_s3 + $0x320] sm:$0xff]   ;;  %v9752_v49 = vld [vmem:[%s16041_s3 + $0x258] sm:$0xff]  }
 0x298   : > { %v9063_v5 = vpop.f32.mrb[0].mxu0  ;;  %v9119_v47 = vpop.f32.mrb[11].mxu1  ;;  %9226 = vmatpush3.bf16.msra.mxu1 %v9752_v49 }
 0x299   : > { %v9064_v56 = vpop.f32.mrb[1].mxu0  ;;  %v9120_v34 = vadd.f32 %v9119_v47, %v9118_v21  ;;  %v9747_v21 = vld [vmem:[%s16041_s3 + $0x328] sm:$0xff]   ;;  %v9756_v47 = vld [vmem:[%s16041_s3 + $0x260] sm:$0xff]  }
 0x29a   : > { %v9065_v54 = vadd.f32 %v9064_v56, %v9063_v5  ;;  %v9066_v13 = vpop.f32.mrb[2].mxu0  ;;  %v9754_v5 = vld [vmem:[%s16041_s3 + $0x2a0] sm:$0xff]  }
 0x29b   : > { %v9067_v38 = vpop.f32.mrb[3].mxu0  ;;  %9227 = vmatprep.subr.bf16.mxu1 %v9754_v5 }
 0x29c   : > { %v11746_v31 = vadd.f32 %v9105_v62, %v9065_v54  ;;  %v9068_v52 = vadd.f32 %v9067_v38, %v9066_v13  ;;  %v9733_v62 = vld [vmem:[%s16041_s3 + $0x2c0] sm:$0xff]   ;;  %v9749_v38 = vld [vmem:[%s16041_s3 + $0x2e8] sm:$0xff]   ;;  %9228 = vmatpush3.bf16.msra.mxu1 %v9756_v47  ;;  %v9762_v47 = vld [vmem:[%s16041_s3 + $0x2b0] sm:$0xff]  }
 0x29d   : > { %9260 = vmatpush3.bf16.msra.mxu0 %v9733_v62 }
 0x29e   : > { %v11748_v58 = vadd.f32 %v9108_v63, %v9068_v52  ;;  %v9734_v63 = vld [vmem:[%s16041_s3 + $0x308] sm:$0xff]  }
 0x29f   : > { %9261 = vmatprep.subr.bf16.mxu0 %v9734_v63 }
 0x2a1   : > { %9262 = vmatpush3.bf16.msra.mxu0 %v9735_v35 }
 0x2a2   : > { %9263 = vmatprep.subr.bf16.mxu0 %v9736_v6 }
 0x2a5   : > { %9264 = vmatpush3.bf16.msra.mxu0 %v9737_v7 }
 0x2b9   : > { %v9121_v22 = vpop.f32.mrb[12].mxu1 }
 0x2ba   : > { %v9122_v42 = vpop.f32.mrb[13].mxu1 }
 0x2bb   : > { %v11750_v10 = vadd.f32 %v9122_v42, %v9121_v22  ;;  %v9124_v41 = vpop.f32.mrb[14].mxu1  ;;  %v9751_v22 = vld [vmem:[%s16041_s3 + $0x330] sm:$0xff]  }
 0x2bc   : > { %v9125_v46 = vpop.f32.mrb[15].mxu1  ;;  %v9069_v25 = vpop.f32.mrb[4].mxu0 }
 0x2bd   : > { %v11752_v18 = vadd.f32 %v9125_v46, %v9124_v41  ;;  %v9070_v32 = vpop.f32.mrb[5].mxu0 }
 0x2be   : > { %v9071_v57 = vadd.f32 %v9070_v32, %v9069_v25  ;;  %v9072_v16 = vpop.f32.mrb[6].mxu0  ;;  %v9753_v25 = vld [vmem:[%s16041_s3 + $0x2f0] sm:$0xff]   ;;  %v9755_v32 = vld [vmem:[%s16041_s3 + $0x338] sm:$0xff]  }
 0x2bf   : > { %v9073_v8 = vpop.f32.mrb[7].mxu0 }
 0x2c0   : > { %v11754_v14 = vadd.f32 %v9111_v24, %v9071_v57  ;;  %v9074_v19 = vadd.f32 %v9073_v8, %v9072_v16  ;;  %v9739_v24 = vld [vmem:[%s16041_s3 + $0x318] sm:$0xff]  }
 0x2c1   : > { %9265 = vmatprep.subr.bf16.mxu0 %v9739_v24 }
 0x2c2   : > { %v11756_v17 = vadd.f32 %v9114_v51, %v9074_v19  ;;  %v9741_v51 = vld [vmem:[%s16041_s3 + $0x2d8] sm:$0xff]  }
 0x2c3   : > { %9266 = vmatpush3.bf16.msra.mxu0 %v9741_v51 }
 0x2c4   : > { %9267 = vmatprep.subr.bf16.mxu0 %v9743_v20 }
 0x2d1   : > { %v9183_v2 = vpop.f32.mrb[16].mxu1 }
 0x2d2   : > { %v9184_v3 = vpop.f32.mrb[17].mxu1 }
 0x2d3   : > { %v11758_v36 = vadd.f32 %v9184_v3, %v9183_v2  ;;  %v9186_v39 = vpop.f32.mrb[18].mxu1 }
 0x2d4   : > { %v9187_v27 = vpop.f32.mrb[19].mxu1 }
 0x2d5   : > { %v11760_v44 = vadd.f32 %v9187_v27, %v9186_v39 }
 0x2df   : > { %v9075_v23 = vpop.f32.mrb[8].mxu0 }
 0x2e0   : > { %v9076_v9 = vpop.f32.mrb[9].mxu0 }
 0x2e1   : > { %v9077_v40 = vadd.f32 %v9076_v9, %v9075_v23  ;;  %v9078_v45 = vpop.f32.mrb[10].mxu0 }
 0x2e2   : > { %v9079_v26 = vpop.f32.mrb[11].mxu0 }
 0x2e3   : > { %v11762_v12 = vadd.f32 %v9117_v28, %v9077_v40  ;;  %v9080_v53 = vadd.f32 %v9079_v26, %v9078_v45  ;;  %v9745_v28 = vld [vmem:[%s16041_s3 + $0x2e0] sm:$0xff]  }
 0x2e4   : > { %9268 = vmatpush3.bf16.msra.mxu0 %v9745_v28  ;;  %v2673_v28 = vld [vmem:[%s16042_s4] sm:$0xff] }
 0x2e5   : > { %v11764_v0 = vadd.f32 %v9120_v34, %v9080_v53  ;;  %9269 = vmatprep.subr.bf16.mxu0 %v9747_v21 }
 0x2e8   : > { %9270 = vmatpush3.bf16.msra.mxu0 %v9749_v38 }
 0x2e9   : > { %9271 = vmatprep.subr.bf16.mxu0 %v9751_v22  ;;  %v9764_v22 = vld [vmem:[%s16041_s3 + $0x270] sm:$0xff]  }
 0x2ec   : > { %9272 = vmatpush3.bf16.msra.mxu0 %v9753_v25 }
 0x2ed   : > { %9273 = vmatprep.subr.bf16.mxu0 %v9755_v32 }
 0x2f3   : > { %v9189_v4 = vpop.f32.mrb[20].mxu1 }
 0x2f4   : > { %v9190_v43 = vpop.f32.mrb[21].mxu1 }
 0x2f5   : > { %v11793_v11 = vadd.f32 %v9190_v43, %v9189_v4  ;;  %v9192_v33 = vpop.f32.mrb[22].mxu1  ;;  %v413_v43 = vlaneseq }
 0x2f6   : > { %v9193_v15 = vpop.f32.mrb[23].mxu1 }
 0x2f7   : > { %v11801_v29 = vadd.f32 %v9193_v15, %v9192_v33  ;;  %v11879_v59 = vshrl.u32 %v413_v43, 7 }
 0x2f9   : > { %16573 = vst [vmem:[#allocation33_spill] sm:$0xff] %v11879_v59  ;;  %v11886_v20 = vsub.s32 0, %v11879_v59  ;;  %v11895_v21 = vsub.s32 6, %v11879_v59  ;;  %v11911_v38 = vsub.s32 2, %v11879_v59  ;;  %v420_v43 = vadd.s32 48, %v11879_v59 }
 0x2fb   : > { %16574 = vst [vmem:[#allocation27_spill] sm:$0xff] %v11886_v20  ;;  %16576 = vst [vmem:[#allocation42_spill] sm:$0xff] %v11895_v21 }
 0x2fc   : > { %16580 = vst [vmem:[#allocation50_spill] sm:$0xff] %v11911_v38 }
 0x300   : > { %v9081_v56 = vpop.f32.mrb[12].mxu0 }
 0x301   : > { %v9082_v54 = vpop.f32.mrb[13].mxu0 }
 0x302   : > { %v9083_v13 = vadd.f32 %v9082_v54, %v9081_v56  ;;  %v9084_v34 = vpop.f32.mrb[14].mxu0  ;;  %v11898_v56 = vsub.s32 1, %v11879_v59 }
 0x303   : > { %v9085_v52 = vpop.f32.mrb[15].mxu0 }
 0x304   : > { %v11840_v42 = vadd.f32 %v11750_v10, %v9083_v13  ;;  %v9086_v41 = vadd.f32 %v9085_v52, %v9084_v34  ;;  %16577 = vst [vmem:[#allocation39_spill] sm:$0xff] %v11898_v56  ;;  %v11908_v34 = vsub.s32 7, %v11879_v59 }
 0x306   : > { %v11843_v46 = vadd.f32 %v11752_v18, %v9086_v41  ;;  %v9757_v18 = vld [vmem:[%s16041_s3 + $0x2f8] sm:$0xff]   ;;  %16579 = vst [vmem:[#allocation49_spill] sm:$0xff] %v11908_v34 }
 0x307   : > { %9274 = vmatpush3.bf16.msra.mxu0 %v9757_v18  ;;  %v9766_v41 = vld [vmem:[%s16041_s3 + $0x2b8] sm:$0xff]  }
 0x308   : > { %v9143_v57 = vpop.f32.mrb[16].mxu0 }
 0x309   : > { %v9144_v16 = vpop.f32.mrb[17].mxu0 }
 0x30a   : > { %v9145_v8 = vadd.f32 %v9144_v16, %v9143_v57  ;;  %v9146_v10 = vpop.f32.mrb[18].mxu0  ;;  %v416_v57 = vadd.s32 16, %v11879_v59 }
 0x30b   : > { %v9147_v19 = vpop.f32.mrb[19].mxu0 }
 0x30c   : > { %v2505_v2 = vadd.f32 %v9145_v8, %v11746_v31  ;;  %v9148_v3 = vadd.f32 %v9147_v19, %v9146_v10  ;;  %v9758_v31 = vld [vmem:[%s16041_s3 + $0x2a8] sm:$0xff]   ;;  %v11925_v8 = vrot.slane %v2673_v28, %v11886_v20 }
 0x30d   : > { %9229 = vmatprep.subr.bf16.mxu1 %v9758_v31  ;;  %v11949_v31 = vsub.s32 5, %v11879_v59 }
 0x30e   : > { %v2508_v39 = vadd.f32 %v9148_v3, %v11748_v58  ;;  %v11857_v23 = vadd.f32 %v11758_v36, %v2505_v2  ;;  %v9759_v58 = vld [vmem:[%s16041_s3 + $0x400] sm:$0xff]   ;;  %v9760_v36 = vld [vmem:[%s16041_s3 + $0x268] sm:$0xff]   ;;  %v11933_v2 = vrot.slane %v2673_v28, %v11895_v21  ;;  %v11936_v3 = vrot.slane %v2673_v28, %v11898_v56 }
 0x30f   : > { %v9195_v27 = vpop.f32.mrb[24].mxu1  ;;  %9339 = vmatprep.subr.bf16.mxu0 %v9759_v58  ;;  %9230 = vmatpush3.bf16.msra.mxu1 %v9760_v36  ;;  %16581 = vst [vmem:[#allocation34_spill] sm:$0xff] %v11949_v31 }
 0x310   : > { %v9196_v9 = vpop.f32.mrb[25].mxu1  ;;  %v11860_v26 = vadd.f32 %v11760_v44, %v2508_v39  ;;  %9231 = vmatprep.subr.bf16.mxu1 %v9762_v47  ;;  %v421_v39 = vadd.s32 56, %v11879_v59 }
 0x311   : > { %v9197_v40 = vadd.f32 %v9196_v9, %v9195_v27  ;;  %v9198_v45 = vpop.f32.mrb[26].mxu1 }
 0x312   : > { %v9199_v53 = vpop.f32.mrb[27].mxu1 }
 0x313   : > { %v9200_v30 = vadd.f32 %v9199_v53, %v9198_v45  ;;  %9232 = vmatpush3.bf16.msra.mxu1 %v9764_v22  ;;  %v11943_v45 = vrot.slane %v2673_v28, %v11908_v34  ;;  %v11946_v53 = vrot.slane %v2673_v28, %v11911_v38 }
 0x314   : > { %9233 = vmatprep.subr.bf16.mxu1 %v9766_v41 }
 0x31a   : > { %v9149_v62 = vpop.f32.mrb[20].mxu0 }
 0x31b   : > { %v9150_v44 = vpop.f32.mrb[21].mxu0 }
 0x31c   : > { %v9151_v63 = vadd.f32 %v9150_v44, %v9149_v62  ;;  %v9152_v37 = vpop.f32.mrb[22].mxu0  ;;  %v424_v62 = vand.u32 7, %v416_v57 }
 0x31d   : > { %v9153_v60 = vpop.f32.mrb[23].mxu0 }
 0x31e   : > { %v2513_v35 = vadd.f32 %v9151_v63, %v11754_v14  ;;  %v9154_v55 = vadd.f32 %v9153_v60, %v9152_v37  ;;  %v11882_v14 = vadd.s32 24, %v11879_v59  ;;  %v418_v37 = vadd.s32 32, %v11879_v59 }
 0x31f   : > { %v419_v60 = vadd.s32 40, %v11879_v59  ;;  %vm432_vm10 = vcmp.ne.s32.totalorder %v424_v62, 0  ;;  %vm456_vm14 = vcmp.ne.s32.totalorder %v424_v62, 7 }
 0x320   : > { %v2516_v4 = vadd.f32 %v9154_v55, %v11756_v17  ;;  %v11874_v6 = vadd.f32 %v11793_v11, %v2513_v35  ;;  %v425_v32 = vand.u32 7, %v11882_v14  ;;  %v11959_v35 = vmul.f32 0.0, %v11925_v8 }
 0x321   : > { %v422_v55 = vand.u32 7, %v11879_v59  ;;  %v426_v14 = vand.u32 7, %v418_v37  ;;  %v12018_v57 = vsel %vm456_vm14, 1.0, %v10285_v50 }
 0x322   : > { %v11877_v1 = vadd.f32 %v11801_v29, %v2516_v4  ;;  %v11889_v29 = vsub.s32 3, %v11879_v59  ;;  %vm11951_vm7 = vcmp.ne.s32.totalorder %v425_v32, 0  ;;  %v429_v4 = vand.u32 7, %v421_v39  ;;  %16591 = vst [vmem:[#allocation52_spill] sm:$0xff] %v12018_v57 }
 0x323   : > { %vm430_vm8 = vcmp.ne.s32.totalorder %v422_v55, 0  ;;  %vm454_vm12 = vcmp.ne.s32.totalorder %v422_v55, 7  ;;  %vm434_vm1 = vcmp.ne.s32.totalorder %v426_v14, 0  ;;  %vm457_vm3 = vcmp.ne.s32.totalorder %v425_v32, 7 }
 0x324   : > { %16575 = vst [vmem:[#allocation38_spill] sm:$0xff] %v11889_v29  ;;  %v11930_v19 = vrot.slane %v2673_v28, %v11889_v29  ;;  %vm437_vm11 = vcmp.ne.s32.totalorder %v429_v4, 0  ;;  %vm461_vm15 = vcmp.ne.s32.totalorder %v429_v4, 7  ;;  %v12012_v41 = vsel %vm454_vm12, 1.0, %v10285_v50 }
 0x325   : > { %v9155_v33 = vpop.f32.mrb[24].mxu0  ;;  %v12009_v22 = vsel %vm437_vm11, 1.0, %v10285_v50  ;;  %16589 = vst [vmem:[#allocation51_spill] sm:$0xff] %v12012_v41  ;;  %vm458_vm5 = vcmp.ne.s32.totalorder %v426_v14, 7  ;;  %v12025_v39 = vsel %vm434_vm1, 1.0, %v10285_v50 }
 0x326   : > { %v9156_v15 = vpop.f32.mrb[25].mxu0  ;;  %16588 = vst [vmem:[#allocation46_spill] sm:$0xff] %v12009_v22  ;;  %16593 = vst [vmem:[#allocation47_spill] sm:$0xff] %v12025_v39  ;;  %v12038_v62 = vsel %vm458_vm5, 1.0, %v10285_v50 }
 0x327   : > { %v9157_v7 = vadd.f32 %v9156_v15, %v9155_v33  ;;  %v9158_v24 = vpop.f32.mrb[26].mxu0  ;;  %v9768_v33 = vld [vmem:[%s16041_s3 + $0x278] sm:$0xff]   ;;  %16597 = vst [vmem:[#allocation55_spill] sm:$0xff] %v12038_v62 }
 0x328   : > { %v9159_v48 = vpop.f32.mrb[27].mxu0  ;;  %9234 = vmatpush3.bf16.msra.mxu1 %v9768_v33 }
 0x329   : > { %v9201_v61 = vpop.f32.mrb[28].mxu1  ;;  %v2521_v17 = vadd.f32 %v9157_v7, %v11762_v12  ;;  %v9160_v11 = vadd.f32 %v9159_v48, %v9158_v24  ;;  %v11901_v12 = vsub.s32 4, %v11879_v59  ;;  %v11971_v7 = vmul.f32 0.0, %v11946_v53 }
 0x32a   : > { %v9202_v51 = vpop.f32.mrb[29].mxu1  ;;  %v11981_v48 = vsel %vm11951_vm7, 1.0, %v10285_v50 }
 0x32b   : > { %v9203_v49 = vadd.f32 %v9202_v51, %v9201_v61  ;;  %v9204_v5 = vpop.f32.mrb[30].mxu1  ;;  %16578 = vst [vmem:[#allocation43_spill] sm:$0xff] %v11901_v12  ;;  %v2524_v13 = vadd.f32 %v9160_v11, %v11764_v0  ;;  %v11913_v52 = vadd.f32 %v9197_v40, %v2521_v17  ;;  %v415_v0 = vadd.s32 8, %v11879_v59  ;;  %16584 = vst [vmem:[#allocation24_spill] sm:$0xff] %v11981_v48  ;;  %v11988_v17 = vld [vmem:[%s16042_s4 + $0x8] ss:$0 sm:$0xff] }
 0x32c   : > { %v9205_v54 = vpop.f32.mrb[31].mxu1  ;;  %v11940_v40 = vrot.slane %v2673_v28, %v11901_v12  ;;  %v11976_v61 = vrot.slane %v2673_v28, %v11949_v31  ;;  %v427_v51 = vand.u32 7, %v419_v60  ;;  %v11991_v11 = vmul.f32 0.0, %v11933_v2 }
 0x32d   : > { %v9206_v25 = vadd.f32 %v9205_v54, %v9204_v5  ;;  %v9161_v16 = vpop.f32.mrb[28].mxu0  ;;  %v11927_v10 = vadd.f32 %v9200_v30, %v2524_v13  ;;  %v423_v36 = vand.u32 7, %v415_v0  ;;  %v428_v5 = vand.u32 7, %v420_v43 }
 0x32e   : > { %v9162_v18 = vpop.f32.mrb[29].mxu0  ;;  %v11997_v28 = vsel %vm430_vm8, 1.0, %v10285_v50  ;;  %v12000_v47 = vmul.f32 0.0, %v11988_v17  ;;  %v12006_v13 = vsel %vm432_vm10, 1.0, %v10285_v50  ;;  %vm435_vm2 = vcmp.ne.s32.totalorder %v427_v51, 0 }
 0x32f   : > { %v9163_v27 = vadd.f32 %v9162_v18, %v9161_v16  ;;  %v9164_v9 = vpop.f32.mrb[30].mxu0  ;;  %vm431_vm9 = vcmp.ne.s32.totalorder %v423_v36, 0  ;;  %16585 = vst [vmem:[#allocation35_spill] sm:$0xff] %v11997_v28  ;;  %vm455_vm13 = vcmp.ne.s32.totalorder %v423_v36, 7  ;;  %16587 = vst [vmem:[#allocation45_spill] sm:$0xff] %v12006_v13  ;;  %vm436_vm4 = vcmp.ne.s32.totalorder %v428_v5, 0 }
 0x330   : > { %v9165_v30 = vpop.f32.mrb[31].mxu0  ;;  %v12003_v54 = vsel %vm431_vm9, 1.0, %v10285_v50  ;;  %vm459_vm6 = vcmp.ne.s32.totalorder %v427_v51, 7  ;;  %v12015_v0 = vsel %vm455_vm13, 1.0, %v10285_v50  ;;  %v12021_v16 = vsel %vm461_vm15, 1.0, %v10285_v50 }
 0x331   : > { %v2529_v44 = vadd.f32 %v9163_v27, %v11840_v42  ;;  %v9166_v63 = vadd.f32 %v9165_v30, %v9164_v9  ;;  %v11968_v42 = vmul.f32 0.0, %v11936_v3  ;;  %16586 = vst [vmem:[#allocation25_spill] sm:$0xff] %v12003_v54  ;;  %16590 = vst [vmem:[#allocation53_spill] sm:$0xff] %v12015_v0  ;;  %vm460_vm7 = vcmp.ne.s32.totalorder %v428_v5, 7 }
 0x332   : > { %16592 = vst [vmem:[#allocation54_spill] sm:$0xff] %v12021_v16  ;;  %v12028_v27 = vsel %vm435_vm2, 1.0, %v10285_v50  ;;  %v12031_v9 = vsel %vm457_vm3, 1.0, %v10285_v50  ;;  %v12035_v36 = vsel %vm436_vm4, 1.0, %v10285_v50  ;;  %v12047_v55 = vsel %vm460_vm7, 1.0, %v10285_v50 }
 0x333   : > { %v2532_v15 = vadd.f32 %v9166_v63, %v11843_v46  ;;  %v11973_v24 = vadd.f32 %v9203_v49, %v2529_v44  ;;  %v11994_v49 = vmul.f32 0.0, %v11943_v45  ;;  %16594 = vst [vmem:[#allocation40_spill] sm:$0xff] %v12028_v27  ;;  %16595 = vst [vmem:[#allocation48_spill] sm:$0xff] %v12031_v9  ;;  %vm2904_vm8 = vcmp.lt.s32.totalorder %v11879_v59, 1 }
 0x334   : > { %16596 = vst [vmem:[#allocation41_spill] sm:$0xff] %v12035_v36  ;;  %16599 = vst [vmem:[#allocation57_spill] sm:$0xff] %v12047_v55  ;;  %vm2871_vm9 = vcmp.lt.s32.totalorder %v11879_v59, 7 }
 0x335   : > { %v11983_v46 = vadd.f32 %v9206_v25, %v2532_v15 }
 0x33e   : > { %v9581_v25 = vpop.f32.mrb[32].mxu0 }
 0x33f   : > { %v2643_v18 = vadd.f32 %v9581_v25, %v11874_v6  ;;  %v2634_v32 = vpop.f32.mrb[33].mxu0  ;;  %v12041_v6 = vsel %vm459_vm6, 1.0, %v10285_v50 }
 0x340   : > { %v2635_v30 = vadd.f32 %v2634_v32, %v11857_v23  ;;  %v9582_v58 = vpop.f32.mrb[34].mxu0  ;;  %16598 = vst [vmem:[#allocation56_spill] sm:$0xff] %v12041_v6 }
 0x341   : > { %v2699_v44 = vmul.f32 %v11925_v8, %v2643_v18  ;;  %v2710_v63 = vmul.f32 %v11930_v19, %v2643_v18  ;;  %v2729_v37 = vmul.f32 %v11933_v2, %v2643_v18  ;;  %v2637_v60 = vpop.f32.mrb[35].mxu0  ;;  %v2751_v23 = vmul.f32 %v11936_v3, %v2643_v18 }
 0x342   : > { %v2762_v4 = vmul.f32 %v11940_v40, %v2643_v18  ;;  %v2781_v43 = vmul.f32 %v11943_v45, %v2643_v18  ;;  %v2803_v33 = vmul.f32 %v11946_v53, %v2643_v18  ;;  %v2814_v15 = vmul.f32 %v11976_v61, %v2643_v18 }
 0x343   : > { %v2697_v14 = vmul.f32 %v11925_v8, %v2635_v30  ;;  %v2708_v51 = vmul.f32 %v11930_v19, %v2635_v30  ;;  %v2760_v5 = vmul.f32 %v11940_v40, %v2635_v30  ;;  %v2749_v25 = vmul.f32 %v11936_v3, %v2635_v30 }
 0x344   : > { %v2812_v32 = vmul.f32 %v11976_v61, %v2635_v30  ;;  %v12060_v31 = vadd.f32 %v9582_v58, %v11877_v1  ;;  %v12063_v34 = vadd.f32 %v2637_v60, %v11860_v26  ;;  %v12070_v29 = vmul.f32 %v11946_v53, %v2635_v30  ;;  %v9770_v58 = vld [vmem:[%s16041_s3 + $0x380] sm:$0xff]  }
 0x345   : > { %v2716_v12 = vadd.f32 %v2708_v51, %v11959_v35  ;;  %v12067_v21 = vadd.f32 %v2760_v5, %v11968_v42  ;;  %v12073_v38 = vmul.f32 %v11988_v17, %v2643_v18  ;;  %9299 = vmatprep.subr.bf16.mxu1 %v9770_v58 }
 0x346   : > { %v12076_v56 = vadd.f32 %v2812_v32, %v11971_v7  ;;  %v2700_v1 = vmul.f32 %v11925_v8, %v12060_v31  ;;  %v2711_v26 = vmul.f32 %v11930_v19, %v12060_v31  ;;  %v2730_v35 = vmul.f32 %v11933_v2, %v12060_v31 }
 0x347   : > { %v2752_v42 = vmul.f32 %v11936_v3, %v12060_v31  ;;  %v2763_v30 = vmul.f32 %v11940_v40, %v12060_v31  ;;  %v2782_v18 = vmul.f32 %v11943_v45, %v12060_v31  ;;  %v2804_v7 = vmul.f32 %v11946_v53, %v12060_v31 }
 0x348   : > { %v2719_v60 = vadd.f32 %v2711_v26, %v2699_v44  ;;  %v2815_v51 = vmul.f32 %v11976_v61, %v12060_v31  ;;  %v2698_v5 = vmul.f32 %v11925_v8, %v12063_v34  ;;  %v2709_v32 = vmul.f32 %v11930_v19, %v12063_v34 }
 0x349   : > { %v2771_v20 = vadd.f32 %v2763_v30, %v2751_v23  ;;  %v2750_v50 = vmul.f32 %v11936_v3, %v12063_v34  ;;  %v2761_v22 = vmul.f32 %v11940_v40, %v12063_v34  ;;  %v2802_v36 = vmul.f32 %v11946_v53, %v12063_v34  ;;  %v9585_v30 = vpop.f32.mrb[36].mxu0 }
 0x34a   : > { %v12107_v44 = vadd.f32 %v2815_v51, %v2803_v33  ;;  %v2717_v26 = vadd.f32 %v2709_v32, %v2697_v14  ;;  %v2718_v55 = vadd.f32 %v2710_v63, %v2698_v5  ;;  %v2813_v6 = vmul.f32 %v11976_v61, %v12063_v34  ;;  %v2650_v28 = vpop.f32.mrb[37].mxu0 }
 0x34b   : > { %v2769_v62 = vadd.f32 %v2761_v22, %v2749_v25  ;;  %v2770_v9 = vadd.f32 %v2762_v4, %v2750_v50  ;;  %v2822_v23 = vadd.f32 %v2814_v15, %v2802_v36  ;;  %v2728_v27 = vmul.f32 %v11933_v2, %v12063_v34  ;;  %v9586_v50 = vpop.f32.mrb[38].mxu0 }
 0x34c   : > { %v12113_v39 = vadd.f32 %v2730_v35, %v2718_v55  ;;  %v2659_v13 = vadd.f32 %v9585_v30, %v11973_v24  ;;  %v12116_v58 = vadd.f32 %v2729_v37, %v2717_v26  ;;  %v2780_v63 = vmul.f32 %v11943_v45, %v12063_v34 }
 0x34d   : > { %v2789_v33 = vadd.f32 %v2781_v43, %v2769_v62  ;;  %v2790_v14 = vadd.f32 %v2782_v18, %v2770_v9  ;;  %v2651_v22 = vadd.f32 %v2650_v28, %v11913_v52  ;;  %v12122_v36 = vadd.f32 %v2728_v27, %v2716_v12  ;;  %v2653_v62 = vpop.f32.mrb[39].mxu0 }
 0x34e   : > { %v12126_v4 = vmul.f32 %v11930_v19, %v2659_v13  ;;  %v12129_v24 = vmul.f32 %v11933_v2, %v2659_v13  ;;  %v12132_v37 = vmul.f32 %v11940_v40, %v2659_v13  ;;  %v12135_v9 = vmul.f32 %v11943_v45, %v2659_v13 }
 0x34f   : > { %v12138_v52 = vmul.f32 %v11976_v61, %v2659_v13  ;;  %v12141_v12 = vmul.f32 %v11925_v8, %v2651_v22  ;;  %v2712_v28 = vmul.f32 %v11930_v19, %v2651_v22  ;;  %v2731_v27 = vmul.f32 %v11933_v2, %v2651_v22 }
 0x350   : > { %v12146_v43 = vmul.f32 %v11936_v3, %v2651_v22  ;;  %v2764_v15 = vmul.f32 %v11940_v40, %v2651_v22  ;;  %v2783_v25 = vmul.f32 %v11943_v45, %v2651_v22  ;;  %v12153_v18 = vmul.f32 %v11946_v53, %v2651_v22 }
 0x351   : > { %16600 = vst [vmem:[#allocation58_spill] sm:$0xff] %v12138_v52  ;;  %v12150_v35 = vadd.f32 %v2712_v28, %v2700_v1  ;;  %v2816_v51 = vmul.f32 %v11976_v61, %v2651_v22  ;;  %v2662_v5 = vadd.f32 %v9586_v50, %v11983_v46  ;;  %v12157_v32 = vadd.f32 %v2731_v27, %v2719_v60 }
 0x352   : > { %16601 = vst [vmem:[#allocation59_spill] sm:$0xff] %v12153_v18  ;;  %v12159_v26 = vadd.f32 %v2764_v15, %v2752_v42  ;;  %v2791_v30 = vadd.f32 %v2783_v25, %v2771_v20  ;;  %v2703_v55 = vmul.f32 %v11925_v8, %v2659_v13  ;;  %v2755_v18 = vmul.f32 %v11936_v3, %v2659_v13 }
 0x353   : > { %v12163_v52 = vadd.f32 %v2816_v51, %v2804_v7  ;;  %v2715_v1 = vmul.f32 %v11930_v19, %v2662_v5  ;;  %v12167_v28 = vmul.f32 %v11933_v2, %v2662_v5  ;;  %v2899_v46 = vrot.slane %v12157_v32, 7 }
 0x354   : > { %v2767_v60 = vmul.f32 %v11940_v40, %v2662_v5  ;;  %v12173_v42 = vmul.f32 %v11943_v45, %v2662_v5  ;;  %v2788_v20 = vadd.f32 %v2780_v63, %v12067_v21  ;;  %v2807_v7 = vmul.f32 %v11946_v53, %v2659_v13 }
 0x355   : > { %16602 = vst [vmem:[#allocation60_spill] sm:$0xff] %v12163_v52  ;;  %v2723_v50 = vadd.f32 %v2715_v1, %v2703_v55  ;;  %v2819_v27 = vmul.f32 %v11976_v61, %v2662_v5  ;;  %v2821_v15 = vadd.f32 %v2813_v6, %v12070_v29  ;;  %v16604_v25 = vrot.slane %v12113_v39, 7  ;;  %v12199_v1 = vld [vmem:[%s16043_s5] ss:$0 sm:$0xff] }
 0x356   : > { %16603 = vst [vmem:[#allocation62_spill] sm:$0xff] %v12173_v42  ;;  %v2775_v52 = vadd.f32 %v2767_v60, %v2755_v18  ;;  %v2832_v42 = vmul.f32 %v11988_v17, %v12063_v34  ;;  %v2834_v21 = vmul.f32 %v11988_v17, %v12060_v31  ;;  %v2835_v6 = vmul.f32 %v11988_v17, %v2651_v22 }
 0x357   : > { %v2909_v51 = vsel %vm2904_vm8, %v16604_v25, %v2899_v46  ;;  %v12193_v55 = vadd.f32 %v11991_v11, %v2723_v50  ;;  %v2827_v29 = vadd.f32 %v2819_v27, %v2807_v7  ;;  %v12203_v34 = vmul.f32 %v11988_v17, %v2659_v13 }
 0x358   : > { %v12190_v63 = vmul.f32 %v11981_v48, %v2909_v51  ;;  %v2795_v18 = vadd.f32 %v11994_v49, %v2775_v52  ;;  %v12206_v31 = vmul.f32 %v11988_v17, %v2662_v5  ;;  %v2840_v60 = vadd.f32 %v2832_v42, %v12076_v56 }
 0x359   : > { %v2841_v11 = vadd.f32 %v12073_v38, %v2821_v15  ;;  %v2842_v50 = vadd.f32 %v2834_v21, %v2822_v23  ;;  %v12211_v22 = vadd.f32 %v2835_v6, %v12107_v44  ;;  %v12214_v7 = vadd.f32 %v12000_v47, %v2827_v29 }
 0x35a   : > { %v2855_v27 = vadd.f32 %v12199_v1, %v2788_v20  ;;  %v2856_v49 = vadd.f32 %v12199_v1, %v2789_v33  ;;  %v2857_v13 = vadd.f32 %v12199_v1, %v2790_v14  ;;  %v12220_v52 = vadd.f32 %v12199_v1, %v2791_v30 }
 0x35b   : > { %v2862_v56 = vadd.f32 %v12199_v1, %v2795_v18  ;;  %v2863_v5 = vrot.slane %v2840_v60, 1  ;;  %v2864_v38 = vrot.slane %v2841_v11, 1  ;;  %v2865_v23 = vrot.slane %v2842_v50, 1 }
 0x35c   : > { %v2866_v44 = vrot.slane %v12211_v22, 1  ;;  %v2870_v42 = vrot.slane %v12214_v7, 1  ;;  %v2896_v47 = vrot.slane %v12122_v36, 7  ;;  %v2897_v20 = vrot.slane %v12116_v58, 7 }
 0x35d   : > { %v2877_v33 = vsel %vm2871_vm9, %v2864_v38, %v2865_v23  ;;  %v2878_v14 = vsel %vm2871_vm9, %v2863_v5, %v2864_v38  ;;  %v2903_v30 = vrot.slane %v12193_v55, 7  ;;  %v2654_v15 = vadd.f32 %v2653_v62, %v11927_v10  ;;  %v16606_v38 = vld [vmem:[#allocation35_spill] sm:$0xff] }
 0x35e   : > { %v2876_v25 = vsel %vm2871_vm9, %v2865_v23, %v2866_v44  ;;  %v2879_v58 = vsel %vm2871_vm9, %v2870_v42, %v2863_v5  ;;  %v2880_v36 = vmul.f32 %v12012_v41, %v2878_v14  ;;  %v2881_v51 = vmul.f32 %v12015_v0, %v2877_v33  ;;  %v16607_v33 = vld [vmem:[#allocation45_spill] sm:$0xff] }
 0x35f   : > { %v2882_v21 = vmul.f32 %v12018_v57, %v2876_v25  ;;  %v2887_v55 = vmul.f32 %v12021_v16, %v2879_v58  ;;  %v16605_v10 = vrot.slane %v12113_v39, 7  ;;  %v2911_v29 = vsel %vm2904_vm8, %v2896_v47, %v2897_v20 }
 0x360   : > { %v2888_v6 = vadd.f32 %v2880_v36, %v2855_v27  ;;  %v2889_v18 = vadd.f32 %v2881_v51, %v2856_v49  ;;  %v2912_v60 = vsel %vm2904_vm8, %v2903_v30, %v2896_v47  ;;  %v2914_v11 = vmul.f32 %v12003_v54, %v2911_v29  ;;  %v16613_v29 = vld [vmem:[#allocation58_spill] sm:$0xff] }
 0x361   : > { %v2910_v62 = vsel %vm2904_vm8, %v2897_v20, %v16605_v10  ;;  %v2890_v50 = vadd.f32 %v2882_v21, %v2857_v13  ;;  %v12254_v5 = vadd.f32 %v2887_v55, %v2862_v56  ;;  %v2913_v23 = vmul.f32 %v16606_v38, %v2912_v60  ;;  %v16611_v10 = vld [vmem:[#allocation62_spill] sm:$0xff]  ;;  %v9769_v38 = vld [vmem:[%s16041_s3 + $0x3d0] sm:$0xff]  }
 0x362   : > { %v2915_v39 = vmul.f32 %v16607_v33, %v2910_v62  ;;  %v12258_v14 = vadd.f32 %v2914_v11, %v2889_v18  ;;  %v2702_v25 = vmul.f32 %v11925_v8, %v2654_v15  ;;  %v2713_v20 = vmul.f32 %v11930_v19, %v2654_v15  ;;  %v16612_v62 = vld [vmem:[#allocation59_spill] sm:$0xff] }
 0x363   : > { %v2732_v27 = vmul.f32 %v11933_v2, %v2654_v15  ;;  %v12263_v49 = vadd.f32 %v2913_v23, %v2888_v6  ;;  %v2754_v13 = vmul.f32 %v11936_v3, %v2654_v15  ;;  %v2765_v56 = vmul.f32 %v11940_v40, %v2654_v15  ;;  %v16614_v6 = vld [vmem:[#allocation60_spill] sm:$0xff] }
 0x364   : > { %16608 = vst [vmem:[#allocation61_spill] sm:$0xff] %v12258_v14  ;;  %v12265_v47 = vadd.f32 %v2915_v39, %v2890_v50  ;;  %v2721_v58 = vadd.f32 %v2713_v20, %v12141_v12  ;;  %v2722_v36 = vadd.f32 %v12126_v4, %v2702_v25  ;;  %v2784_v8 = vmul.f32 %v11943_v45, %v2654_v15  ;;  %v16615_v25 = vld [vmem:[#allocation47_spill] sm:$0xff]  ;;  %v16616_v20 = vld [vmem:[#allocation40_spill] sm:$0xff] }
 0x365   : > { %16609 = vst [vmem:[#allocation63_spill] sm:$0xff] %v12263_v49  ;;  %v2740_v51 = vadd.f32 %v2732_v27, %v12150_v35  ;;  %v2773_v19 = vadd.f32 %v2765_v56, %v12146_v43  ;;  %v2774_v2 = vadd.f32 %v12132_v37, %v2754_v13  ;;  %v2806_v21 = vmul.f32 %v11946_v53, %v2654_v15 }
 0x366   : > { %16610 = vst [vmem:[#allocation10_spill] sm:$0xff] %v12265_v47  ;;  %v2817_v55 = vmul.f32 %v11976_v61, %v2654_v15  ;;  %v2741_v3 = vadd.f32 %v12129_v24, %v2721_v58  ;;  %v2742_v40 = vadd.f32 %v12167_v28, %v2722_v36  ;;  %v2792_v12 = vadd.f32 %v2784_v8, %v12159_v26  ;;  %v16618_v58 = vld [vmem:[#allocation55_spill] sm:$0xff]  ;;  %v16619_v36 = vld [vmem:[#allocation56_spill] sm:$0xff]  ;;  %v16620_v8 = vld [vmem:[#allocation57_spill] sm:$0xff] }
 0x367   : > { %v2836_v4 = vmul.f32 %v11988_v17, %v2654_v15  ;;  %v2793_v35 = vadd.f32 %v12135_v9, %v2773_v19  ;;  %v2794_v45 = vadd.f32 %v16611_v10, %v2774_v2  ;;  %v2826_v37 = vadd.f32 %v16613_v29, %v2806_v21  ;;  %v16621_v2 = vld [vmem:[#allocation41_spill] sm:$0xff] }
 0x368   : > { %v2825_v43 = vadd.f32 %v2817_v55, %v16612_v62  ;;  %v2859_v61 = vadd.f32 %v12199_v1, %v2792_v12  ;;  %v2900_v18 = vrot.slane %v2740_v51, 7  ;;  %v2901_v24 = vrot.slane %v2741_v3, 7  ;;  %v16622_v55 = vld [vmem:[#allocation46_spill] sm:$0xff]  ;;  %v16623_v3 = vld [vmem:[#allocation5_spill] sm:$0xff] }
 0x369   : > { %v2844_v53 = vadd.f32 %v2836_v4, %v16614_v6  ;;  %v2846_v26 = vadd.f32 %v12206_v31, %v2826_v37  ;;  %v2860_v17 = vadd.f32 %v12199_v1, %v2793_v35  ;;  %v2861_v9 = vadd.f32 %v12199_v1, %v2794_v45 }
 0x36a   : > { %v2845_v28 = vadd.f32 %v12203_v34, %v2825_v43  ;;  %v2902_v60 = vrot.slane %v2742_v40, 7  ;;  %v2907_v11 = vsel %vm2904_vm8, %v2900_v18, %v2901_v24  ;;  %v2908_v50 = vsel %vm2904_vm8, %v2899_v46, %v2900_v18 }
 0x36b   : > { %v2867_v15 = vrot.slane %v2844_v53, 1  ;;  %v2869_v39 = vrot.slane %v2846_v26, 1  ;;  %v2917_v34 = vmul.f32 %v16615_v25, %v2908_v50  ;;  %v2918_v31 = vmul.f32 %v16616_v20, %v2907_v11 }
 0x36c   : > { %v2868_v23 = vrot.slane %v2845_v28, 1  ;;  %v2905_v27 = vsel %vm2904_vm8, %v2902_v60, %v2903_v30  ;;  %v2906_v32 = vsel %vm2904_vm8, %v2901_v24, %v2902_v60  ;;  %vm3001_vm10 = vcmp.ge.f32.partialorder %v12263_v49, -2.2 }
 0x36d   : > { %v2875_v1 = vsel %vm2871_vm9, %v2866_v44, %v2867_v15  ;;  %v2872_v46 = vsel %vm2871_vm9, %v2869_v39, %v2870_v42  ;;  %v16617_v44 = vld [vmem:[#allocation48_spill] sm:$0xff]  ;;  %v2919_v21 = vmul.f32 %v16621_v2, %v2906_v32  ;;  %v2920_v42 = vmul.f32 %v16622_v55, %v2905_v27 }
 0x36e   : > { %v2873_v13 = vsel %vm2871_vm9, %v2868_v23, %v2869_v39  ;;  %v2874_v22 = vsel %vm2871_vm9, %v2867_v15, %v2868_v23  ;;  %v2883_v56 = vmul.f32 %v16617_v44, %v2875_v1  ;;  %v2886_v19 = vmul.f32 %v16620_v8, %v2872_v46 }
 0x36f   : > { %v2884_v30 = vmul.f32 %v16618_v58, %v2874_v22  ;;  %v2885_v51 = vmul.f32 %v16619_v36, %v2873_v13  ;;  %vm3002_vm11 = vcmp.ge.f32.partialorder %v12258_v14, -2.2  ;;  %v8217_v40 = vsel %vm3001_vm10, 1.0, %v16623_v3 }
 0x370   : > { %v2891_v7 = vadd.f32 %v2883_v56, %v12220_v52  ;;  %v2894_v35 = vadd.f32 %v2886_v19, %v2861_v9  ;;  %v8218_v10 = vsel %vm3002_vm11, 1.0, %v16623_v3  ;;  %v12330_v62 = vadd.f32 %v2920_v42, %v12254_v5 }
 0x371   : > { %v2892_v12 = vadd.f32 %v2884_v30, %v2859_v61  ;;  %v2893_v4 = vadd.f32 %v2885_v51, %v2860_v17  ;;  %vm3025_vm12 = vcmp.ge.f32.partialorder %v12263_v49, -1.8  ;;  %vm3026_vm13 = vcmp.ge.f32.partialorder %v12258_v14, -1.8 }
 0x372   : > { %v12327_v45 = vadd.f32 %v12190_v63, %v2891_v7  ;;  %16625 = vst [vmem:[#allocation11_spill] sm:$0xff] %v12330_v62  ;;  %v12338_v29 = vadd.f32 %v2919_v21, %v2894_v35  ;;  %v8225_v37 = vsel %vm3025_vm12, 1.0, %v16623_v3  ;;  %v8226_v6 = vsel %vm3026_vm13, 1.0, %v16623_v3 }
 0x373   : > { %v12334_v52 = vadd.f32 %v2917_v34, %v2892_v12  ;;  %v12336_v43 = vadd.f32 %v2918_v31, %v2893_v4  ;;  %vm3049_vm14 = vcmp.ge.f32.partialorder %v12263_v49, -1.4  ;;  %vm3050_vm15 = vcmp.ge.f32.partialorder %v12258_v14, -1.4 }
 0x374   : > { %16624 = vst [vmem:[#allocation64_spill] sm:$0xff] %v12327_v45  ;;  %16628 = vst [vmem:[#allocation23_spill] sm:$0xff] %v12338_v29  ;;  %vm3073_vm1 = vcmp.ge.f32.partialorder %v12263_v49, -1.0  ;;  %v8233_v63 = vsel %vm3049_vm14, 1.0, %v16623_v3  ;;  %v8234_v5 = vsel %vm3050_vm15, 1.0, %v16623_v3  ;;  %vm3074_vm2 = vcmp.ge.f32.partialorder %v12258_v14, -1.0 }
 0x375   : > { %16626 = vst [vmem:[#allocation20_spill] sm:$0xff] %v12334_v52  ;;  %16627 = vst [vmem:[#allocation22_spill] sm:$0xff] %v12336_v43  ;;  %v8241_v53 = vsel %vm3073_vm1, 1.0, %v16623_v3  ;;  %v8242_v61 = vsel %vm3074_vm2, 1.0, %v16623_v3  ;;  %vm3097_vm3 = vcmp.ge.f32.partialorder %v12263_v49, -0.6  ;;  %v3289_v28 = vsub.f32 %v8217_v40, %v8225_v37 }
 0x376   : > { %vm3098_vm4 = vcmp.ge.f32.partialorder %v12258_v14, -0.6  ;;  %v8249_v18 = vsel %vm3097_vm3, 1.0, %v16623_v3  ;;  %v3290_v26 = vsub.f32 %v8218_v10, %v8226_v6  ;;  %v3297_v17 = vsub.f32 %v8225_v37, %v8233_v63 }
 0x377   : > { %v8250_v24 = vsel %vm3098_vm4, 1.0, %v16623_v3  ;;  %v3298_v9 = vsub.f32 %v8226_v6, %v8234_v5  ;;  %v3305_v15 = vsub.f32 %v8233_v63, %v8241_v53  ;;  %v3306_v60 = vsub.f32 %v8234_v5, %v8242_v61 }
 0x378   : > { %v12354_v11 = vsub.f32 %v8241_v53, %v8249_v18  ;;  %v8313_v50 = vadd.f32 2.2, %v12263_v49  ;;  %v8314_v23 = vadd.f32 2.2, %v12258_v14  ;;  %v8321_v39 = vadd.f32 1.8, %v12263_v49 }
 0x379   : > { %v12359_v34 = vsub.f32 %v8242_v61, %v8250_v24  ;;  %v8322_v31 = vadd.f32 1.8, %v12258_v14  ;;  %v12363_v1 = vadd.f32 1.4, %v12263_v49  ;;  %v12366_v27 = vadd.f32 1.4, %v12258_v14 }
 0x37a   : > { %v12369_v32 = vadd.f32 1.0, %v12263_v49  ;;  %v12372_v46 = vadd.f32 1.0, %v12258_v14  ;;  %v12375_v13 = vadd.f32 0.6, %v12263_v49  ;;  %v12378_v22 = vadd.f32 0.6, %v12258_v14 }
 0x37b   : > { %v3473_v56 = vmul.f32 %v8313_v50, %v3289_v28  ;;  %v3474_v30 = vmul.f32 %v8314_v23, %v3290_v26  ;;  %v3481_v51 = vmul.f32 %v12363_v1, %v3297_v17  ;;  %v3482_v19 = vmul.f32 %v12366_v27, %v3298_v9 }
 0x37c   : > { %16629 = vst [vmem:[#allocation30_spill] sm:$0xff] %v12375_v13  ;;  %16630 = vst [vmem:[#allocation12_spill] sm:$0xff] %v12378_v22  ;;  %v3497_v21 = vmul.f32 %v8321_v39, %v3297_v17  ;;  %v3498_v7 = vmul.f32 %v8322_v31, %v3298_v9  ;;  %v3505_v42 = vmul.f32 %v12369_v32, %v3305_v15  ;;  %vm3121_vm5 = vcmp.ge.f32.partialorder %v12263_v49, -0.2 }
 0x37d   : > { %v3506_v40 = vmul.f32 %v12372_v46, %v3306_v60  ;;  %v3489_v12 = vsub.f32 %v3473_v56, %v3481_v51  ;;  %v3490_v4 = vsub.f32 %v3474_v30, %v3482_v19  ;;  %v3521_v35 = vmul.f32 %v12363_v1, %v3305_v15 }
 0x37e   : > { %v3522_v10 = vmul.f32 %v12366_v27, %v3306_v60  ;;  %v3513_v37 = vsub.f32 %v3497_v21, %v3505_v42  ;;  %v3529_v63 = vmul.f32 %v12375_v13, %v12354_v11  ;;  %v3530_v5 = vmul.f32 %v12378_v22, %v12359_v34 }
 0x37f   : > { %v3514_v6 = vsub.f32 %v3498_v7, %v3506_v40  ;;  %v3713_v53 = vmul.f32 %v8313_v50, %v3489_v12  ;;  %v3714_v61 = vmul.f32 %v8314_v23, %v3490_v4  ;;  %vm3122_vm6 = vcmp.ge.f32.partialorder %v12258_v14, -0.2 }
 0x380   : > { %v3537_v28 = vsub.f32 %v3521_v35, %v3529_v63  ;;  %v3538_v26 = vsub.f32 %v3522_v10, %v3530_v5  ;;  %v3721_v17 = vmul.f32 %v12369_v32, %v3513_v37  ;;  %v3737_v15 = vmul.f32 %v8321_v39, %v3513_v37 }
 0x381   : > { %v3722_v9 = vmul.f32 %v12372_v46, %v3514_v6  ;;  %v3738_v60 = vmul.f32 %v8322_v31, %v3514_v6  ;;  %v8257_v56 = vsel %vm3121_vm5, 1.0, %v16623_v3  ;;  %v8258_v30 = vsel %vm3122_vm6, 1.0, %v16623_v3 }
 0x382   : > { %v3729_v51 = vsub.f32 %v3713_v53, %v3721_v17  ;;  %v3745_v21 = vmul.f32 %v12375_v13, %v3537_v28  ;;  %v3746_v7 = vmul.f32 %v12378_v22, %v3538_v26  ;;  %vm3145_vm7 = vcmp.ge.f32.partialorder %v12263_v49, 0.2 }
 0x383   : > { %v3730_v19 = vsub.f32 %v3714_v61, %v3722_v9  ;;  %vm3146_vm10 = vcmp.ge.f32.partialorder %v12258_v14, 0.2  ;;  %v3321_v42 = vsub.f32 %v8249_v18, %v8257_v56  ;;  %v3322_v40 = vsub.f32 %v8250_v24, %v8258_v30 }
 0x384   : > { %v3753_v12 = vsub.f32 %v3737_v15, %v3745_v21  ;;  %v3754_v4 = vsub.f32 %v3738_v60, %v3746_v7  ;;  %v3929_v35 = vmul.f32 %v8313_v50, %v3729_v51  ;;  %v12401_v37 = vsel %vm3145_vm7, 1.0, %v16623_v3 }
 0x385   : > { %v3930_v10 = vmul.f32 %v8314_v23, %v3730_v19  ;;  %v12404_v6 = vsel %vm3146_vm10, 1.0, %v16623_v3  ;;  %v12407_v63 = vadd.f32 0.2, %v12263_v49  ;;  %v12410_v5 = vadd.f32 0.2, %v12258_v14 }
 0x386   : > { %v3937_v53 = vmul.f32 %v12375_v13, %v3753_v12  ;;  %v3938_v18 = vmul.f32 %v12378_v22, %v3754_v4  ;;  %v3953_v24 = vmul.f32 %v8321_v39, %v3753_v12  ;;  %v3954_v61 = vmul.f32 %v8322_v31, %v3754_v4 }
 0x387   : > { %16631 = vst [vmem:[#allocation13_spill] sm:$0xff] %v12407_v63  ;;  %16632 = vst [vmem:[#allocation8_spill] sm:$0xff] %v12410_v5  ;;  %v3329_v50 = vsub.f32 %v8257_v56, %v12401_v37  ;;  %v3330_v23 = vsub.f32 %v8258_v30, %v12404_v6  ;;  %v12417_v17 = vadd.f32 -0.2, %v12263_v49  ;;  %v12420_v9 = vadd.f32 -0.2, %v12258_v14 }
 0x388   : > { %v3945_v15 = vsub.f32 %v3929_v35, %v3937_v53  ;;  %v3946_v60 = vsub.f32 %v3930_v10, %v3938_v18  ;;  %v3545_v51 = vmul.f32 %v12369_v32, %v12354_v11  ;;  %v3546_v19 = vmul.f32 %v12372_v46, %v12359_v34 }
 0x389   : > { %v3553_v39 = vmul.f32 %v12407_v63, %v3321_v42  ;;  %v3554_v31 = vmul.f32 %v12410_v5, %v3322_v40  ;;  %v3569_v56 = vmul.f32 %v12375_v13, %v3321_v42  ;;  %v3570_v30 = vmul.f32 %v12378_v22, %v3322_v40 }
 0x38a   : > { %v4121_v21 = vpack.c.bf16 %v3946_v60, %v3945_v15  ;;  %v3577_v7 = vmul.f32 %v12417_v17, %v3329_v50  ;;  %v3578_v12 = vmul.f32 %v12420_v9, %v3330_v23  ;;  %v12433_v4 = vmul.f32 %v12407_v63, %v3329_v50 }
 0x38b   : > { %v3561_v11 = vsub.f32 %v3545_v51, %v3553_v39  ;;  %v3562_v35 = vsub.f32 %v3546_v19, %v3554_v31  ;;  %v12436_v34 = vmul.f32 %v12410_v5, %v3330_v23  ;;  %v3761_v10 = vmul.f32 %v12363_v1, %v3537_v28 }
 0x38c   : > { %16633 = vst [vmem:[#allocation9_spill] sm:$0xff] %v12433_v4  ;;  %4830 = vmatprep.mubr.bf16.mxu1 %v4121_v21  ;;  %v12439_v53 = vsub.f32 %v3569_v56, %v3577_v7  ;;  %v12441_v42 = vsub.f32 %v3570_v30, %v3578_v12  ;;  %v3762_v40 = vmul.f32 %v12366_v27, %v3538_v26  ;;  %vm3051_vm11 = vcmp.ge.f32.partialorder %v12265_v47, -1.4 }
 0x38d   : > { %16634 = vst [vmem:[#allocation15_spill] sm:$0xff] %v12436_v34  ;;  %v3769_v18 = vmul.f32 %v12407_v63, %v3561_v11  ;;  %v3770_v50 = vmul.f32 %v12410_v5, %v3562_v35  ;;  %v3785_v15 = vmul.f32 %v12369_v32, %v3561_v11  ;;  %v3786_v23 = vmul.f32 %v12372_v46, %v3562_v35 }
 0x38e   : > { %16635 = vst [vmem:[#allocation7_spill] sm:$0xff] %v12439_v53  ;;  %16636 = vst [vmem:[#allocation21_spill] sm:$0xff] %v12441_v42  ;;  %v3793_v28 = vmul.f32 %v12417_v17, %v12439_v53  ;;  %v3794_v60 = vmul.f32 %v12420_v9, %v12441_v42  ;;  %vm3052_vm12 = vcmp.ge.f32.partialorder %v12327_v45, -1.4  ;;  %v12455_v26 = vsel %vm3051_vm11, 1.0, %v16623_v3 }
 0x38f   : > { %v3777_v51 = vsub.f32 %v3761_v10, %v3769_v18  ;;  %v3778_v19 = vsub.f32 %v3762_v40, %v3770_v50  ;;  %v12458_v39 = vsel %vm3052_vm12, 1.0, %v16623_v3  ;;  %vm3075_vm13 = vcmp.ge.f32.partialorder %v12265_v47, -1.0 }
 0x390   : > { %v3801_v31 = vsub.f32 %v3785_v15, %v3793_v28  ;;  %v3802_v56 = vsub.f32 %v3786_v23, %v3794_v60  ;;  %vm3076_vm14 = vcmp.ge.f32.partialorder %v12327_v45, -1.0  ;;  %v8243_v30 = vsel %vm3075_vm13, 1.0, %v16623_v3 }
 0x391   : > { %v3961_v21 = vmul.f32 %v12407_v63, %v3777_v51  ;;  %v3962_v7 = vmul.f32 %v12410_v5, %v3778_v19  ;;  %v3977_v12 = vmul.f32 %v12363_v1, %v3777_v51  ;;  %v3978_v11 = vmul.f32 %v12366_v27, %v3778_v19 }
 0x392   : > { %v3985_v35 = vmul.f32 %v12417_v17, %v3801_v31  ;;  %v3986_v10 = vmul.f32 %v12420_v9, %v3802_v56  ;;  %v12470_v40 = vmul.f32 %v12369_v32, %v3801_v31  ;;  %v12473_v18 = vmul.f32 %v12372_v46, %v3802_v56 }
 0x393   : > { %v3969_v50 = vsub.f32 %v3953_v24, %v3961_v21  ;;  %v3970_v15 = vsub.f32 %v3954_v61, %v3962_v7  ;;  %v8244_v23 = vsel %vm3076_vm14, 1.0, %v16623_v3  ;;  %vm3099_vm15 = vcmp.ge.f32.partialorder %v12265_v47, -0.6  ;;  %v9761_v61 = vld [vmem:[%s16041_s3 + $0x3c0] sm:$0xff]   ;;  %v9763_v21 = vld [vmem:[%s16041_s3 + $0x408] sm:$0xff]  }
 0x394   : > { %16637 = vst [vmem:[#allocation31_spill] sm:$0xff] %v12470_v40  ;;  %16638 = vst [vmem:[#allocation28_spill] sm:$0xff] %v12473_v18  ;;  %v3993_v28 = vsub.f32 %v3977_v12, %v3985_v35  ;;  %v3994_v1 = vsub.f32 %v3978_v11, %v3986_v10  ;;  %vm3100_vm1 = vcmp.ge.f32.partialorder %v12327_v45, -0.6  ;;  %v8251_v27 = vsel %vm3099_vm15, 1.0, %v16623_v3 }
 0x395   : > { %v4129_v60 = vpack.c.bf16 %v3970_v15, %v3969_v50  ;;  %v8252_v51 = vsel %vm3100_vm1, 1.0, %v16623_v3  ;;  %vm3123_vm2 = vcmp.ge.f32.partialorder %v12265_v47, -0.2  ;;  %vm3124_vm3 = vcmp.ge.f32.partialorder %v12327_v45, -0.2 }
 0x396   : > { %v4137_v32 = vpack.c.bf16 %v3994_v1, %v3993_v28  ;;  %v8259_v46 = vsel %vm3123_vm2, 1.0, %v16623_v3  ;;  %v8260_v24 = vsel %vm3124_vm3, 1.0, %v16623_v3  ;;  %vm3147_vm4 = vcmp.ge.f32.partialorder %v12265_v47, 0.2  ;;  %v9765_v1 = vld [vmem:[%s16041_s3 + $0x3c8] sm:$0xff]  }
 0x397   : > { %vm3148_vm5 = vcmp.ge.f32.partialorder %v12327_v45, 0.2  ;;  %v12490_v19 = vsel %vm3147_vm4, 1.0, %v16623_v3  ;;  %v12493_v31 = vsub.f32 %v12455_v26, %v8243_v30  ;;  %v12496_v56 = vsub.f32 %v12458_v39, %v8244_v23 }
 0x398   : > { %16639 = vst [vmem:[#allocation29_spill] sm:$0xff] %v12490_v19  ;;  %4895 = vmatprep.mubr.bf16.mxu0 %v4137_v32  ;;  %v12502_v7 = vsel %vm3148_vm5, 1.0, %v16623_v3  ;;  %v3315_v12 = vsub.f32 %v8243_v30, %v8251_v27  ;;  %v3316_v11 = vsub.f32 %v8244_v23, %v8252_v51  ;;  %v3323_v35 = vsub.f32 %v8251_v27, %v8259_v46  ;;  %v9767_v30 = vld [vmem:[%s16041_s3 + $0x410] sm:$0xff]  }
 0x399   : > { %16640 = vst [vmem:[#allocation36_spill] sm:$0xff] %v12502_v7  ;;  %4896 = vmatmul.mubr.bf16.vlgmr.msra.gmra.mrb[40].mxu0 %v4129_v60  ;;  %v3324_v10 = vsub.f32 %v8252_v51, %v8260_v24  ;;  %v12505_v50 = vsub.f32 %v8259_v46, %v12490_v19  ;;  %v12508_v15 = vsub.f32 %v8260_v24, %v12502_v7  ;;  %v12511_v28 = vadd.f32 1.4, %v12265_v47 }
 0x39a   : > { %v12520_v23 = vadd.f32 1.4, %v12327_v45  ;;  %v12523_v27 = vadd.f32 1.0, %v12265_v47  ;;  %v12526_v60 = vadd.f32 1.0, %v12327_v45  ;;  %v12529_v51 = vadd.f32 0.6, %v12265_v47  ;;  %9340 = vmatpush3.bf16.msra.mxu0 %v9761_v61 }
 0x39b   : > { %16641 = vst [vmem:[#allocation37_spill] sm:$0xff] %v12505_v50  ;;  %16642 = vst [vmem:[#allocation18_spill] sm:$0xff] %v12508_v15  ;;  %v12532_v32 = vadd.f32 0.6, %v12327_v45  ;;  %v12535_v46 = vadd.f32 0.2, %v12265_v47  ;;  %v3523_v55 = vmul.f32 %v12511_v28, %v12493_v31  ;;  %9341 = vmatprep.subr.bf16.mxu0 %v9763_v21 }
 0x39c   : > { %16643 = vst [vmem:[#allocation65_spill] sm:$0xff] %v12523_v27  ;;  %16644 = vst [vmem:[#allocation66_spill] sm:$0xff] %v12526_v60  ;;  %v12538_v24 = vadd.f32 0.2, %v12327_v45  ;;  %v12543_v58 = vadd.f32 -0.2, %v12265_v47  ;;  %v3524_v61 = vmul.f32 %v12520_v23, %v12496_v56  ;;  %v3531_v8 = vmul.f32 %v12529_v51, %v3315_v12 }
 0x39d   : > { %16645 = vst [vmem:[#allocation17_spill] sm:$0xff] %v12529_v51  ;;  %16646 = vst [vmem:[#allocation44_spill] sm:$0xff] %v12532_v32  ;;  %v12546_v44 = vadd.f32 -0.2, %v12327_v45  ;;  %v3532_v36 = vmul.f32 %v12532_v32, %v3316_v11  ;;  %v3547_v2 = vmul.f32 %v12523_v27, %v3315_v12  ;;  %v3548_v20 = vmul.f32 %v12526_v60, %v3316_v11 }
 0x39e   : > { %16647 = vst [vmem:[#allocation16_spill] sm:$0xff] %v12535_v46  ;;  %16648 = vst [vmem:[#allocation14_spill] sm:$0xff] %v12538_v24  ;;  %v3555_v25 = vmul.f32 %v12535_v46, %v3323_v35  ;;  %v3539_v21 = vsub.f32 %v3523_v55, %v3531_v8  ;;  %v3556_v48 = vmul.f32 %v12538_v24, %v3324_v10  ;;  %9342 = vmatpush3.bf16.msra.mxu0 %v9765_v1  ;;  %v9771_v8 = vld [vmem:[%s16041_s3 + $0x418] sm:$0xff]  }
 0x39f   : > { %16649 = vst [vmem:[#allocation6_spill] sm:$0xff] %v12543_v58  ;;  %16650 = vst [vmem:[#allocation19_spill] sm:$0xff] %v12546_v44  ;;  %v3571_v33 = vmul.f32 %v12529_v51, %v3323_v35  ;;  %v3572_v54 = vmul.f32 %v12532_v32, %v3324_v10  ;;  %v3540_v16 = vsub.f32 %v3524_v61, %v3532_v36  ;;  %9343 = vmatprep.subr.bf16.mxu0 %v9767_v30 }
 0x3a0   : > { %v3563_v57 = vsub.f32 %v3547_v2, %v3555_v25  ;;  %v3579_v12 = vmul.f32 %v12543_v58, %v12505_v50  ;;  %v3580_v11 = vmul.f32 %v12546_v44, %v12508_v15  ;;  %v3564_v55 = vsub.f32 %v3548_v20, %v3556_v48 }
 0x3a1   : > { %v3763_v35 = vmul.f32 %v12511_v28, %v3539_v21  ;;  %vm3027_vm6 = vcmp.ge.f32.partialorder %v12265_v47, -1.8  ;;  %vm3028_vm7 = vcmp.ge.f32.partialorder %v12327_v45, -1.8  ;;  %v3764_v2 = vmul.f32 %v12520_v23, %v3540_v16 }
 0x3a2   : > { %v12571_v36 = vsub.f32 %v3571_v33, %v3579_v12  ;;  %v12573_v25 = vsub.f32 %v3572_v54, %v3580_v11  ;;  %v3771_v10 = vmul.f32 %v12535_v46, %v3563_v57  ;;  %v3772_v1 = vmul.f32 %v12538_v24, %v3564_v55  ;;  %9344 = vmatpush3.bf16.msra.mxu0 %v9769_v38  ;;  %v9773_v33 = vld [vmem:[%s16041_s3 + $0x3d8] sm:$0xff]  }
 0x3a3   : > { %v3787_v30 = vmul.f32 %v12523_v27, %v3563_v57  ;;  %v3788_v48 = vmul.f32 %v12526_v60, %v3564_v55  ;;  %v12581_v20 = vsel %vm3027_vm6, 1.0, %v16623_v3  ;;  %v12591_v11 = vsel %vm3028_vm7, 1.0, %v16623_v3  ;;  %9345 = vmatprep.subr.bf16.mxu0 %v9771_v8  ;;  %v9775_v57 = vld [vmem:[%s16041_s3 + $0x420] sm:$0xff]  }
 0x3a4   : > { %16651 = vst [vmem:[#allocation32_spill] sm:$0xff] %v12571_v36  ;;  %16652 = vst [vmem:[#allocation26_spill] sm:$0xff] %v12573_v25  ;;  %v3779_v54 = vsub.f32 %v3763_v35, %v3771_v10  ;;  %v3795_v61 = vmul.f32 %v12543_v58, %v12571_v36  ;;  %v3796_v12 = vmul.f32 %v12546_v44, %v12573_v25  ;;  %v8323_v10 = vadd.f32 1.8, %v12265_v47 }
 0x3a5   : > { %v3780_v38 = vsub.f32 %v3764_v2, %v3772_v1  ;;  %v12598_v55 = vsub.f32 %v12581_v20, %v12455_v26  ;;  %v12602_v35 = vsub.f32 %v12591_v11, %v12458_v39  ;;  %v8324_v59 = vadd.f32 1.8, %v12327_v45 }
 0x3a6   : > { %v12605_v0 = vsub.f32 %v3787_v30, %v3795_v61  ;;  %v12607_v41 = vsub.f32 %v3788_v48, %v3796_v12  ;;  %v3979_v8 = vmul.f32 %v12511_v28, %v3779_v54  ;;  %v3507_v26 = vmul.f32 %v12523_v27, %v12493_v31  ;;  %9346 = vmatpush3.bf16.msra.mxu0 %v9773_v33  ;;  %v9777_v30 = vld [vmem:[%s16041_s3 + $0x3e0] sm:$0xff]   ;;  %v9779_v31 = vld [vmem:[%s16041_s3 + $0x428] sm:$0xff]  }
 0x3a7   : > { %v3980_v2 = vmul.f32 %v12520_v23, %v3780_v38  ;;  %v3499_v1 = vmul.f32 %v8323_v10, %v12598_v55  ;;  %v3508_v39 = vmul.f32 %v12526_v60, %v12496_v56  ;;  %v3500_v12 = vmul.f32 %v8324_v59, %v12602_v35  ;;  %9347 = vmatprep.subr.bf16.mxu0 %v9775_v57 }
 0x3a8   : > { %16653 = vst [vmem:[#allocation62_spill] sm:$0xff] %v12605_v0  ;;  %16654 = vst [vmem:[#allocation59_spill] sm:$0xff] %v12607_v41  ;;  %v3987_v48 = vmul.f32 %v12543_v58, %v12605_v0  ;;  %v3988_v61 = vmul.f32 %v12546_v44, %v12607_v41  ;;  %v3747_v25 = vmul.f32 %v12529_v51, %v3539_v21  ;;  %vm3053_vm10 = vcmp.ge.f32.partialorder %v12334_v52, -1.4 }
 0x3a9   : > { %v12629_v56 = vsub.f32 %v3499_v1, %v3507_v26  ;;  %v3748_v33 = vmul.f32 %v12532_v32, %v3540_v16  ;;  %v3963_v36 = vmul.f32 %v12535_v46, %v3779_v54  ;;  %v3964_v0 = vmul.f32 %v12538_v24, %v3780_v38  ;;  %v9781_v16 = vld [vmem:[%s16041_s3 + $0x3e8] sm:$0xff]  }
 0x3aa   : > { %v3995_v18 = vsub.f32 %v3979_v8, %v3987_v48  ;;  %v3996_v40 = vsub.f32 %v3980_v2, %v3988_v61  ;;  %v12634_v41 = vsub.f32 %v3500_v12, %v3508_v39  ;;  %vm3054_vm11 = vcmp.ge.f32.partialorder %v12336_v43, -1.4  ;;  %9348 = vmatpush3.bf16.msra.mxu0 %v9777_v30  ;;  %v9783_v2 = vld [vmem:[%s16041_s3 + $0x430] sm:$0xff]  }
 0x3ab   : > { %v3739_v21 = vmul.f32 %v8323_v10, %v12629_v56  ;;  %v12640_v57 = vsel %vm3053_vm10, 1.0, %v16623_v3  ;;  %vm3077_vm12 = vcmp.ge.f32.partialorder %v12334_v52, -1.0  ;;  %v12648_v8 = vsel %vm3054_vm11, 1.0, %v16623_v3  ;;  %9349 = vmatprep.subr.bf16.mxu0 %v9779_v31  ;;  %v9785_v61 = vld [vmem:[%s16041_s3 + $0x3f0] sm:$0xff]  }
 0x3ac   : > { %v4138_v54 = vpack.c.bf16 %v3996_v40, %v3995_v18  ;;  %v3740_v38 = vmul.f32 %v8324_v59, %v12634_v41  ;;  %vm3078_vm13 = vcmp.ge.f32.partialorder %v12336_v43, -1.0  ;;  %v8245_v26 = vsel %vm3077_vm12, 1.0, %v16623_v3 }
 0x3ad   : > { %v12654_v1 = vsub.f32 %v3739_v21, %v3747_v25  ;;  %v8246_v39 = vsel %vm3078_vm13, 1.0, %v16623_v3  ;;  %vm3101_vm14 = vcmp.ge.f32.partialorder %v12334_v52, -0.6  ;;  %vm3102_vm15 = vcmp.ge.f32.partialorder %v12336_v43, -0.6 }
 0x3ae   : > { %4903 = vmatprep.mubr.bf16.mxu0 %v4138_v54  ;;  %v12659_v40 = vsub.f32 %v3740_v38, %v3748_v33  ;;  %v8253_v18 = vsel %vm3101_vm14, 1.0, %v16623_v3  ;;  %vm3125_vm1 = vcmp.ge.f32.partialorder %v12334_v52, -0.2  ;;  %v8254_v25 = vsel %vm3102_vm15, 1.0, %v16623_v3  ;;  %9350 = vmatpush3.bf16.msra.mxu0 %v9781_v16 }
 0x3af   : > { %v3955_v30 = vmul.f32 %v8323_v10, %v12654_v1  ;;  %vm3126_vm2 = vcmp.ge.f32.partialorder %v12336_v43, -0.2  ;;  %v8261_v48 = vsel %vm3125_vm1, 1.0, %v16623_v3  ;;  %vm3149_vm3 = vcmp.ge.f32.partialorder %v12334_v52, 0.2  ;;  %9351 = vmatprep.subr.bf16.mxu0 %v9783_v2  ;;  %v9787_v10 = vld [vmem:[%s16041_s3 + $0x438] sm:$0xff]  }
 0x3b0   : > { %v3956_v12 = vmul.f32 %v8324_v59, %v12659_v40  ;;  %v8262_v31 = vsel %vm3126_vm2, 1.0, %v16623_v3  ;;  %vm3150_vm4 = vcmp.ge.f32.partialorder %v12336_v43, 0.2  ;;  %v12679_v21 = vsel %vm3149_vm3, 1.0, %v16623_v3 }
 0x3b1   : > { %v3971_v33 = vsub.f32 %v3955_v30, %v3963_v36  ;;  %16655 = vst [vmem:[#allocation58_spill] sm:$0xff] %v12679_v21  ;;  %v12682_v16 = vsel %vm3150_vm4, 1.0, %v16623_v3  ;;  %v12685_v59 = vsub.f32 %v12640_v57, %v8245_v26  ;;  %v12688_v38 = vsub.f32 %v12648_v8, %v8246_v39  ;;  %v9789_v30 = vld [vmem:[%s16041_s3 + $0x3f8] sm:$0xff]  }
 0x3b2   : > { %16656 = vst [vmem:[#allocation60_spill] sm:$0xff] %v12682_v16  ;;  %v3972_v54 = vsub.f32 %v3956_v12, %v3964_v0  ;;  %v3317_v24 = vsub.f32 %v8245_v26, %v8253_v18  ;;  %v3318_v2 = vsub.f32 %v8246_v39, %v8254_v25  ;;  %v3325_v15 = vsub.f32 %v8253_v18, %v8261_v48 }
 0x3b3   : > { %v3326_v46 = vsub.f32 %v8254_v25, %v8262_v31  ;;  %v12691_v50 = vsub.f32 %v8261_v48, %v12679_v21  ;;  %v12694_v36 = vsub.f32 %v8262_v31, %v12682_v16  ;;  %9352 = vmatpush3.bf16.msra.mxu0 %v9785_v61  ;;  %v12700_v0 = vadd.f32 1.4, %v12334_v52 }
 0x3b4   : > { %v4130_v22 = vpack.c.bf16 %v3972_v54, %v3971_v33  ;;  %v12703_v26 = vadd.f32 1.4, %v12336_v43  ;;  %v12706_v39 = vadd.f32 1.0, %v12334_v52  ;;  %9353 = vmatprep.subr.bf16.mxu0 %v9787_v10  ;;  %v12709_v18 = vadd.f32 1.0, %v12336_v43 }
 0x3b5   : > { %16657 = vst [vmem:[#allocation5_spill] sm:$0xff] %v12691_v50  ;;  %16658 = vst [vmem:[#allocation67_spill] sm:$0xff] %v12694_v36  ;;  %v12712_v25 = vadd.f32 0.6, %v12334_v52  ;;  %v12715_v48 = vadd.f32 0.6, %v12336_v43  ;;  %v3525_v33 = vmul.f32 %v12700_v0, %v12685_v59 }
 0x3b6   : > { %16659 = vst [vmem:[#allocation68_spill] sm:$0xff] %v12706_v39  ;;  %16660 = vst [vmem:[#allocation69_spill] sm:$0xff] %v12709_v18  ;;  %v2945_v61 = vsub.f32 0.0, %v12263_v49  ;;  %4904 = vmatmul.mubr.bf16.gmra.mrb[44].mxu0 %v4130_v22  ;;  %v12719_v12 = vadd.f32 0.2, %v12334_v52  ;;  %v3526_v16 = vmul.f32 %v12703_v26, %v12688_v38  ;;  %v3549_v42 = vmul.f32 %v12706_v39, %v3317_v24 }
 0x3b7   : > { %v12722_v31 = vadd.f32 0.2, %v12336_v43  ;;  %v12725_v10 = vadd.f32 -0.2, %v12334_v52  ;;  %v12730_v54 = vadd.f32 -0.2, %v12336_v43  ;;  %v3533_v22 = vmul.f32 %v12712_v25, %v3317_v24  ;;  %9354 = vmatpush3.bf16.msra.mxu0 %v9789_v30 }
 0x3b8   : > { %16661 = vst [vmem:[#allocation70_spill] sm:$0xff] %v12719_v12  ;;  %v3534_v21 = vmul.f32 %v12715_v48, %v3318_v2  ;;  %v3550_v13 = vmul.f32 %v12709_v18, %v3318_v2  ;;  %v3557_v53 = vmul.f32 %v12719_v12, %v3325_v15  ;;  %v3573_v19 = vmul.f32 %v12712_v25, %v3325_v15 }
 0x3b9   : > { %16662 = vst [vmem:[#allocation71_spill] sm:$0xff] %v12722_v31  ;;  %16663 = vst [vmem:[#allocation72_spill] sm:$0xff] %v12725_v10  ;;  %v3558_v44 = vmul.f32 %v12722_v31, %v3326_v46  ;;  %v12740_v58 = vsub.f32 %v3525_v33, %v3533_v22  ;;  %v3574_v5 = vmul.f32 %v12715_v48, %v3326_v46  ;;  %vm3003_vm5 = vcmp.ge.f32.partialorder %v12265_v47, -2.2 }
 0x3ba   : > { %16664 = vst [vmem:[#allocation73_spill] sm:$0xff] %v12730_v54  ;;  %v12742_v7 = vsub.f32 %v3526_v16, %v3534_v21  ;;  %v3565_v63 = vsub.f32 %v3549_v42, %v3557_v53  ;;  %v3581_v30 = vmul.f32 %v12725_v10, %v12691_v50  ;;  %v3582_v24 = vmul.f32 %v12730_v54, %v12694_v36 }
 0x3bb   : > { %v3566_v34 = vsub.f32 %v3550_v13, %v3558_v44  ;;  %v3765_v2 = vmul.f32 %v12700_v0, %v12740_v58  ;;  %v2946_v21 = vsub.f32 0.0, %v12258_v14  ;;  %v2953_v16 = vmul.f32 1.442695, %v2945_v61 }
 0x3bc   : > { %v3766_v33 = vmul.f32 %v12703_v26, %v12742_v7  ;;  %v12755_v15 = vsub.f32 %v3573_v19, %v3581_v30  ;;  %v12757_v46 = vsub.f32 %v3574_v5, %v3582_v24  ;;  %v3773_v44 = vmul.f32 %v12719_v12, %v3565_v63 }
 0x3bd   : > { %v3774_v13 = vmul.f32 %v12722_v31, %v3566_v34  ;;  %v3789_v53 = vmul.f32 %v12706_v39, %v3565_v63  ;;  %v3790_v42 = vmul.f32 %v12709_v18, %v3566_v34  ;;  %9924 = vpow2.f32 %v2953_v16 }
 0x3be   : > { %16665 = vst [vmem:[#allocation74_spill] sm:$0xff] %v12755_v15  ;;  %16666 = vst [vmem:[#allocation75_spill] sm:$0xff] %v12757_v46  ;;  %v2955_v22 = vmul.f32 1.442695, %v2946_v21  ;;  %v3781_v36 = vsub.f32 %v3765_v2, %v3773_v44  ;;  %v3797_v4 = vmul.f32 %v12725_v10, %v12755_v15  ;;  %v3798_v19 = vmul.f32 %v12730_v54, %v12757_v46 }
 0x3bf   : > { %v3782_v50 = vsub.f32 %v3766_v33, %v3774_v13  ;;  %vm3004_vm6 = vcmp.ge.f32.partialorder %v12327_v45, -2.2  ;;  %v8315_v5 = vadd.f32 2.2, %v12265_v47  ;;  %v8219_v24 = vsel %vm3003_vm5, 1.0, %v16623_v3 }
 0x3c0   : > { %9926 = vpow2.f32 %v2955_v22  ;;  %v12770_v63 = vsub.f32 %v3789_v53, %v3797_v4  ;;  %v12772_v34 = vsub.f32 %v3790_v42, %v3798_v19  ;;  %v3981_v61 = vmul.f32 %v12700_v0, %v3781_v36 }
 0x3c1   : > { %v3982_v30 = vmul.f32 %v12703_v26, %v3782_v50  ;;  %v8220_v2 = vsel %vm3004_vm6, 1.0, %v16623_v3  ;;  %v8316_v33 = vadd.f32 2.2, %v12327_v45  ;;  %v3483_v21 = vmul.f32 %v12511_v28, %v12598_v55 }
 0x3c2   : > { %16667 = vst [vmem:[#allocation76_spill] sm:$0xff] %v12770_v63  ;;  %16668 = vst [vmem:[#allocation77_spill] sm:$0xff] %v12772_v34  ;;  %v3989_v16 = vmul.f32 %v12725_v10, %v12770_v63  ;;  %v3990_v4 = vmul.f32 %v12730_v54, %v12772_v34  ;;  %v3291_v44 = vsub.f32 %v8219_v24, %v12581_v20  ;;  %vm3029_vm7 = vcmp.ge.f32.partialorder %v12334_v52, -1.8 }
 0x3c3   : > { %v3292_v13 = vsub.f32 %v8220_v2, %v12591_v11  ;;  %v3484_v53 = vmul.f32 %v12520_v23, %v12602_v35  ;;  %v3723_v42 = vmul.f32 %v12523_v27, %v12629_v56  ;;  %v3724_v22 = vmul.f32 %v12526_v60, %v12634_v41 }
 0x3c4   : > { %v3939_v28 = vmul.f32 %v12529_v51, %v12654_v1  ;;  %v3997_v55 = vsub.f32 %v3981_v61, %v3989_v16  ;;  %v3998_v19 = vsub.f32 %v3982_v30, %v3990_v4  ;;  %v3475_v63 = vmul.f32 %v8315_v5, %v3291_v44 }
 0x3c5   : > { %v3476_v34 = vmul.f32 %v8316_v33, %v3292_v13  ;;  %v3940_v20 = vmul.f32 %v12532_v32, %v12659_v40  ;;  %vm3030_vm10 = vcmp.ge.f32.partialorder %v12336_v43, -1.8  ;;  %v8325_v23 = vadd.f32 1.8, %v12334_v52 }
 0x3c6   : > { %v4139_v11 = vpack.c.bf16 %v3998_v19, %v3997_v55  ;;  %v3491_v35 = vsub.f32 %v3475_v63, %v3483_v21  ;;  %v12801_v41 = vsel %vm3029_vm7, 1.0, %v16623_v3  ;;  %v12804_v61 = vsel %vm3030_vm10, 1.0, %v16623_v3 }
 0x3c7   : > { %v3492_v56 = vsub.f32 %v3476_v34, %v3484_v53  ;;  %v9925_v1 = vpop.eup %9924  ;;  %v12808_v30 = vsub.f32 %v12801_v41, %v12640_v57  ;;  %v8326_v40 = vadd.f32 1.8, %v12336_v43  ;;  %v3509_v24 = vmul.f32 %v12706_v39, %v12685_v59 }
 0x3c8   : > { %4911 = vmatprep.mubr.bf16.mxu0 %v4139_v11  ;;  %v2969_v2 = vadd.f32 1.0, %v9925_v1  ;;  %v3715_v63 = vmul.f32 %v8315_v5, %v3491_v35  ;;  %v12815_v21 = vsub.f32 %v12804_v61, %v12648_v8  ;;  %v3510_v57 = vmul.f32 %v12709_v18, %v12688_v38 }
 0x3c9   : > { %v3716_v34 = vmul.f32 %v8316_v33, %v3492_v56  ;;  %v3501_v4 = vmul.f32 %v8325_v23, %v12808_v30  ;;  %v3749_v44 = vmul.f32 %v12712_v25, %v12740_v58  ;;  %v3750_v59 = vmul.f32 %v12715_v48, %v12742_v7 }
 0x3ca   : > { %v9927_v16 = vpop.eup %9926  ;;  %9928 = vrcp.f32 %v2969_v2  ;;  %v3731_v53 = vsub.f32 %v3715_v63, %v3723_v42  ;;  %v3502_v19 = vmul.f32 %v8326_v40, %v12815_v21  ;;  %v3965_v11 = vmul.f32 %v12719_v12, %v3781_v36 }
 0x3cb   : > { %v2970_v13 = vadd.f32 1.0, %v9927_v16  ;;  %v3732_v55 = vsub.f32 %v3716_v34, %v3724_v22  ;;  %v12825_v8 = vsub.f32 %v3501_v4, %v3509_v24  ;;  %v3966_v35 = vmul.f32 %v12722_v31, %v3782_v50 }
 0x3cc   : > { %v3931_v38 = vmul.f32 %v8315_v5, %v3731_v53  ;;  %vm3055_vm11 = vcmp.ge.f32.partialorder %v12338_v29, -1.4  ;;  %v12830_v58 = vsub.f32 %v3502_v19, %v3510_v57  ;;  %vm3056_vm12 = vcmp.ge.f32.partialorder %v12330_v62, -1.4 }
 0x3cd   : > { %9930 = vrcp.f32 %v2970_v13  ;;  %v3932_v56 = vmul.f32 %v8316_v33, %v3732_v55  ;;  %v3741_v7 = vmul.f32 %v8325_v23, %v12825_v8  ;;  %v12835_v42 = vsel %vm3055_vm11, 1.0, %v16623_v3 }
 0x3ce   : > { %v3947_v22 = vsub.f32 %v3931_v38, %v3939_v28  ;;  %v12838_v36 = vsel %vm3056_vm12, 1.0, %v16623_v3  ;;  %vm3079_vm13 = vcmp.ge.f32.partialorder %v12338_v29, -1.0  ;;  %v3742_v50 = vmul.f32 %v8326_v40, %v12830_v58 }
 0x3cf   : > { %v3948_v1 = vsub.f32 %v3932_v56, %v3940_v20  ;;  %v12842_v5 = vsub.f32 %v3741_v7, %v3749_v44  ;;  %vm3080_vm14 = vcmp.ge.f32.partialorder %v12330_v62, -1.0  ;;  %v8247_v33 = vsel %vm3079_vm13, 1.0, %v16623_v3 }
 0x3d0   : > { %v8248_v2 = vsel %vm3080_vm14, 1.0, %v16623_v3  ;;  %vm3103_vm15 = vcmp.ge.f32.partialorder %v12338_v29, -0.6  ;;  %vm3104_vm1 = vcmp.ge.f32.partialorder %v12330_v62, -0.6  ;;  %v12849_v28 = vsub.f32 %v3742_v50, %v3750_v59 }
 0x3d1   : > { %v4122_v24 = vpack.c.bf16 %v3948_v1, %v3947_v22  ;;  %v3957_v20 = vmul.f32 %v8325_v23, %v12842_v5  ;;  %v8255_v63 = vsel %vm3103_vm15, 1.0, %v16623_v3  ;;  %v8256_v34 = vsel %vm3104_vm1, 1.0, %v16623_v3 }
 0x3d2   : > { %vm3127_vm2 = vcmp.ge.f32.partialorder %v12338_v29, -0.2  ;;  %vm3128_vm3 = vcmp.ge.f32.partialorder %v12330_v62, -0.2  ;;  %vm3151_vm4 = vcmp.ge.f32.partialorder %v12338_v29, 0.2  ;;  %v12858_v16 = vsub.f32 %v12835_v42, %v8247_v33 }
 0x3d3   : > { %v3958_v4 = vmul.f32 %v8326_v40, %v12849_v28  ;;  %v3973_v57 = vsub.f32 %v3957_v20, %v3965_v11  ;;  %v8263_v44 = vsel %vm3127_vm2, 1.0, %v16623_v3  ;;  %v8264_v23 = vsel %vm3128_vm3, 1.0, %v16623_v3 }
 0x3d4   : > { %v9929_v59 = vpop.eup %9928  ;;  %vm3152_vm5 = vcmp.ge.f32.partialorder %v12330_v62, 0.2  ;;  %v12865_v13 = vsel %vm3151_vm4, 1.0, %v16623_v3  ;;  %v12868_v53 = vsub.f32 %v12838_v36, %v8248_v2  ;;  %v3319_v55 = vsub.f32 %v8247_v33, %v8255_v63  ;;  %v9772_v33 = vld [vmem:[%s16041_s3 + $0x340] sm:$0xff]  }
 0x3d5   : > { %16669 = vst [vmem:[#allocation78_spill] sm:$0xff] %v12865_v13  ;;  %v2978_v19 = vmul.f32 %v9929_v59, %v12263_v49  ;;  %v3974_v38 = vsub.f32 %v3958_v4, %v3966_v35  ;;  %v12872_v40 = vsel %vm3152_vm5, 1.0, %v16623_v3  ;;  %v3320_v11 = vsub.f32 %v8248_v2, %v8256_v34  ;;  %v9774_v2 = vld [vmem:[%s16041_s3 + $0x388] sm:$0xff]  }
 0x3d6   : > { %16670 = vst [vmem:[#allocation79_spill] sm:$0xff] %v12872_v40  ;;  %v3327_v7 = vsub.f32 %v8255_v63, %v8263_v44  ;;  %v3328_v22 = vsub.f32 %v8256_v34, %v8264_v23  ;;  %v12875_v1 = vsub.f32 %v8263_v44, %v12865_v13  ;;  %v12878_v50 = vsub.f32 %v8264_v23, %v12872_v40 }
 0x3d7   : > { %v9931_v56 = vpop.eup %9930  ;;  %v4131_v35 = vpack.c.bf16 %v3974_v38, %v3973_v57  ;;  %v12888_v63 = vadd.f32 1.4, %v12338_v29  ;;  %v12891_v34 = vadd.f32 1.4, %v12330_v62  ;;  %v12894_v4 = vadd.f32 1.0, %v12338_v29 }
 0x3d8   : > { %16671 = vst [vmem:[#allocation80_spill] sm:$0xff] %v12875_v1  ;;  %16672 = vst [vmem:[#allocation81_spill] sm:$0xff] %v12878_v50  ;;  %v2980_v20 = vmul.f32 %v9931_v56, %v12258_v14  ;;  %v12897_v44 = vadd.f32 1.0, %v12330_v62  ;;  %v12900_v23 = vadd.f32 0.6, %v12338_v29  ;;  %v2947_v51 = vsub.f32 0.0, %v12265_v47 }
 0x3d9   : > { %v12903_v57 = vadd.f32 0.6, %v12330_v62  ;;  %4912 = vmatmul.mubr.bf16.gmra.mrb[48].mxu0 %v4131_v35  ;;  %v12906_v38 = vadd.f32 0.2, %v12338_v29  ;;  %v12909_v56 = vadd.f32 0.2, %v12330_v62  ;;  %v3527_v60 = vmul.f32 %v12888_v63, %v12858_v16 }
 0x3da   : > { %v2993_v59 = vpack.c.bf16 %v2980_v20, %v2978_v19  ;;  %v12912_v46 = vadd.f32 -0.2, %v12338_v29  ;;  %v12915_v15 = vadd.f32 -0.2, %v12330_v62  ;;  %v3528_v27 = vmul.f32 %v12891_v34, %v12868_v53 }
 0x3db   : > { %16673 = vst [vmem:[#allocation82_spill] sm:$0xff] %v12909_v56  ;;  %v3535_v19 = vmul.f32 %v12900_v23, %v3319_v55  ;;  %v3536_v20 = vmul.f32 %v12903_v57, %v3320_v11  ;;  %v3551_v35 = vmul.f32 %v12894_v4, %v3319_v55  ;;  %v3552_v40 = vmul.f32 %v12897_v44, %v3320_v11 }
 0x3dc   : > { %4831 = vmatmul.mubr.bf16.vlgmr.msra.gmra.mrb[32].mxu1 %v2993_v59  ;;  %v3559_v13 = vmul.f32 %v12906_v38, %v3327_v7  ;;  %v3560_v12 = vmul.f32 %v12909_v56, %v3328_v22  ;;  %v3575_v32 = vmul.f32 %v12900_v23, %v3327_v7  ;;  %v9776_v59 = vld [vmem:[%s16041_s3 + $0x348] sm:$0xff]   ;;  %v3576_v54 = vmul.f32 %v12903_v57, %v3328_v22 }
 0x3dd   : > { %9300 = vmatpush3.bf16.msra.mxu1 %v9772_v33  ;;  %4838 = vmatprep.mubr.bf16.mxu1 %v4122_v24  ;;  %v12926_v31 = vsub.f32 %v3527_v60, %v3535_v19  ;;  %v12934_v55 = vsub.f32 %v3528_v27, %v3536_v20  ;;  %v3583_v60 = vmul.f32 %v12912_v46, %v12875_v1  ;;  %v9778_v24 = vld [vmem:[%s16041_s3 + $0x390] sm:$0xff]   ;;  %v2948_v27 = vsub.f32 0.0, %v12327_v45 }
 0x3de   : > { %9301 = vmatprep.subr.bf16.mxu1 %v9774_v2  ;;  %v3567_v11 = vsub.f32 %v3551_v35, %v3559_v13  ;;  %v3568_v7 = vsub.f32 %v3552_v40, %v3560_v12  ;;  %v3584_v33 = vmul.f32 %v12915_v15, %v12878_v50  ;;  %v2957_v50 = vmul.f32 1.442695, %v2947_v51 }
 0x3df   : > { %v3767_v19 = vmul.f32 %v12888_v63, %v12926_v31  ;;  %v12947_v2 = vsub.f32 %v3575_v32, %v3583_v60  ;;  %v3768_v13 = vmul.f32 %v12891_v34, %v12934_v55  ;;  %v9780_v32 = vld [vmem:[%s16041_s3 + $0x350] sm:$0xff]   ;;  %v2959_v10 = vmul.f32 1.442695, %v2948_v27 }
 0x3e0   : > { %v3775_v22 = vmul.f32 %v12906_v38, %v3567_v11  ;;  %v3791_v20 = vmul.f32 %v12894_v4, %v3567_v11  ;;  %v12953_v35 = vsub.f32 %v3576_v54, %v3584_v33  ;;  %v3776_v12 = vmul.f32 %v12909_v56, %v3568_v7  ;;  %v9782_v54 = vld [vmem:[%s16041_s3 + $0x398] sm:$0xff]  }
 0x3e1   : > { %16674 = vst [vmem:[#allocation83_spill] sm:$0xff] %v12947_v2  ;;  %v3792_v40 = vmul.f32 %v12897_v44, %v3568_v7  ;;  %9302 = vmatpush3.bf16.msra.mxu1 %v9776_v59  ;;  %v3799_v1 = vmul.f32 %v12912_v46, %v12947_v2  ;;  %vm3005_vm6 = vcmp.ge.f32.partialorder %v12334_v52, -2.2  ;;  %9932 = vpow2.f32 %v2957_v50 }
 0x3e2   : > { %16675 = vst [vmem:[#allocation84_spill] sm:$0xff] %v12953_v35  ;;  %v12960_v60 = vsub.f32 %v3767_v19, %v3775_v22  ;;  %9303 = vmatprep.subr.bf16.mxu1 %v9778_v24  ;;  %v12968_v11 = vsub.f32 %v3768_v13, %v3776_v12  ;;  %v3800_v51 = vmul.f32 %v12915_v15, %v12953_v35  ;;  %vm3006_vm7 = vcmp.ge.f32.partialorder %v12336_v43, -2.2  ;;  %v9786_v12 = vld [vmem:[%s16041_s3 + $0x3a0] sm:$0xff]  }
 0x3e3   : > { %v12973_v59 = vsub.f32 %v3791_v20, %v3799_v1  ;;  %9934 = vpow2.f32 %v2959_v10  ;;  %v8221_v7 = vsel %vm3005_vm6, 1.0, %v16623_v3  ;;  %v8222_v27 = vsel %vm3006_vm7, 1.0, %v16623_v3  ;;  %v9784_v1 = vld [vmem:[%s16041_s3 + $0x358] sm:$0xff]  }
 0x3e4   : > { %v3983_v24 = vmul.f32 %v12888_v63, %v12960_v60  ;;  %v12978_v33 = vsub.f32 %v3792_v40, %v3800_v51  ;;  %v3984_v19 = vmul.f32 %v12891_v34, %v12968_v11  ;;  %v3293_v50 = vsub.f32 %v8221_v7, %v12801_v41 }
 0x3e5   : > { %16676 = vst [vmem:[#allocation85_spill] sm:$0xff] %v12973_v59  ;;  %9304 = vmatpush3.bf16.msra.mxu1 %v9780_v32  ;;  %v3991_v13 = vmul.f32 %v12912_v46, %v12973_v59  ;;  %v3294_v10 = vsub.f32 %v8222_v27, %v12804_v61  ;;  %v8317_v22 = vadd.f32 2.2, %v12334_v52  ;;  %v8318_v20 = vadd.f32 2.2, %v12336_v43 }
 0x3e6   : > { %16677 = vst [vmem:[#allocation86_spill] sm:$0xff] %v12978_v33  ;;  %9305 = vmatprep.subr.bf16.mxu1 %v9782_v54  ;;  %v3992_v41 = vmul.f32 %v12915_v15, %v12978_v33  ;;  %v3485_v40 = vmul.f32 %v12700_v0, %v12808_v30  ;;  %v3486_v32 = vmul.f32 %v12703_v26, %v12815_v21  ;;  %vm3031_vm10 = vcmp.ge.f32.partialorder %v12338_v29, -1.8  ;;  %v9788_v21 = vld [vmem:[%s16041_s3 + $0x360] sm:$0xff]  }
 0x3e7   : > { %v3725_v61 = vmul.f32 %v12706_v39, %v12825_v8  ;;  %v3999_v51 = vsub.f32 %v3983_v24, %v3991_v13  ;;  %v3477_v7 = vmul.f32 %v8317_v22, %v3293_v50  ;;  %v3478_v27 = vmul.f32 %v8318_v20, %v3294_v10  ;;  %v9790_v24 = vld [vmem:[%s16041_s3 + $0x3a8] sm:$0xff]  }
 0x3e8   : > { %v3726_v54 = vmul.f32 %v12709_v18, %v12830_v58  ;;  %v4000_v59 = vsub.f32 %v3984_v19, %v3992_v41  ;;  %v3941_v35 = vmul.f32 %v12712_v25, %v12842_v5  ;;  %v3942_v33 = vmul.f32 %v12715_v48, %v12849_v28 }
 0x3e9   : > { %9306 = vmatpush3.bf16.msra.mxu1 %v9784_v1  ;;  %v3493_v0 = vsub.f32 %v3477_v7, %v3485_v40  ;;  %v3494_v26 = vsub.f32 %v3478_v27, %v3486_v32  ;;  %vm3032_vm11 = vcmp.ge.f32.partialorder %v12330_v62, -1.8  ;;  %v13012_v30 = vsel %vm3031_vm10, 1.0, %v16623_v3  ;;  %v9791_v27 = vld [vmem:[%s16041_s3 + $0x368] sm:$0xff]  }
 0x3ea   : > { %9307 = vmatprep.subr.bf16.mxu1 %v9786_v12  ;;  %v4140_v8 = vpack.c.bf16 %v4000_v59, %v3999_v51  ;;  %v13018_v58 = vsel %vm3032_vm11, 1.0, %v16623_v3  ;;  %v13022_v5 = vsub.f32 %v13012_v30, %v12835_v42  ;;  %v8327_v28 = vadd.f32 1.8, %v12338_v29 }
 0x3eb   : > { %v3717_v19 = vmul.f32 %v8317_v22, %v3493_v0  ;;  %v3718_v50 = vmul.f32 %v8318_v20, %v3494_v26  ;;  %v13030_v1 = vsub.f32 %v13018_v58, %v12838_v36  ;;  %v8328_v59 = vadd.f32 1.8, %v12330_v62  ;;  %v9933_v13 = vpop.eup %9932 }
 0x3ec   : > { %4919 = vmatprep.mubr.bf16.mxu0 %v4140_v8  ;;  %v3503_v10 = vmul.f32 %v8327_v28, %v13022_v5  ;;  %v3511_v42 = vmul.f32 %v12894_v4, %v12858_v16  ;;  %v3512_v12 = vmul.f32 %v12897_v44, %v12868_v53  ;;  %v3751_v41 = vmul.f32 %v12900_v23, %v12926_v31  ;;  %v9792_v53 = vld [vmem:[%s16041_s3 + $0x3b0] sm:$0xff]  }
 0x3ed   : > { %v9935_v40 = vpop.eup %9934  ;;  %v2971_v32 = vadd.f32 1.0, %v9933_v13  ;;  %v3733_v51 = vsub.f32 %v3717_v19, %v3725_v61  ;;  %v3734_v36 = vsub.f32 %v3718_v50, %v3726_v54  ;;  %v3504_v7 = vmul.f32 %v8328_v59, %v13030_v1  ;;  %9308 = vmatpush3.bf16.msra.mxu1 %v9788_v21 }
 0x3ee   : > { %v2972_v0 = vadd.f32 1.0, %v9935_v40  ;;  %v13044_v26 = vsub.f32 %v3503_v10, %v3511_v42  ;;  %v3752_v16 = vmul.f32 %v12903_v57, %v12934_v55  ;;  %v3967_v31 = vmul.f32 %v12906_v38, %v12960_v60  ;;  %9309 = vmatprep.subr.bf16.mxu1 %v9790_v24 }
 0x3ef   : > { %9936 = vrcp.f32 %v2971_v32  ;;  %v3933_v61 = vmul.f32 %v8317_v22, %v3733_v51  ;;  %v3934_v54 = vmul.f32 %v8318_v20, %v3734_v36  ;;  %v13053_v21 = vsub.f32 %v3504_v7, %v3512_v12  ;;  %v9793_v22 = vld [vmem:[%s16041_s3 + $0x370] sm:$0xff]   ;;  %v9795_v51 = vld [vmem:[%s16041_s3 + $0x378] sm:$0xff]  }
 0x3f0   : > { %9938 = vrcp.f32 %v2972_v0  ;;  %v3743_v8 = vmul.f32 %v8327_v28, %v13044_v26  ;;  %v3968_v19 = vmul.f32 %v12909_v56, %v12968_v11  ;;  %vm3169_vm12 = vcmp.ge.f32.partialorder %v12263_v49, 0.6 }
 0x3f1   : > { %v3949_v55 = vsub.f32 %v3933_v61, %v3941_v35  ;;  %v3950_v60 = vsub.f32 %v3934_v54, %v3942_v33  ;;  %v3744_v24 = vmul.f32 %v8328_v59, %v13053_v21  ;;  %vm3170_vm13 = vcmp.ge.f32.partialorder %v12258_v14, 0.6  ;;  %9310 = vmatpush3.bf16.msra.mxu1 %v9791_v27  ;;  %v9794_v35 = vld [vmem:[%s16041_s3 + $0x3b8] sm:$0xff]  }
 0x3f2   : > { %v13064_v20 = vsub.f32 %v3743_v8, %v3751_v41  ;;  %v8273_v50 = vsel %vm3169_vm12, 1.0, %v16623_v3  ;;  %v8274_v13 = vsel %vm3170_vm13, 1.0, %v16623_v3  ;;  %vm3193_vm14 = vcmp.ge.f32.partialorder %v12263_v49, 1.0  ;;  %9311 = vmatprep.subr.bf16.mxu1 %v9792_v53 }
 0x3f3   : > { %v4123_v11 = vpack.c.bf16 %v3950_v60, %v3949_v55  ;;  %v13072_v33 = vsub.f32 %v3744_v24, %v3752_v16  ;;  %vm3194_vm15 = vcmp.ge.f32.partialorder %v12258_v14, 1.0  ;;  %v8281_v10 = vsel %vm3193_vm14, 1.0, %v16623_v3 }
 0x3f4   : > { %v3959_v42 = vmul.f32 %v8327_v28, %v13064_v20  ;;  %v8282_v12 = vsel %vm3194_vm15, 1.0, %v16623_v3  ;;  %vm3217_vm1 = vcmp.ge.f32.partialorder %v12263_v49, 1.4  ;;  %vm3218_vm2 = vcmp.ge.f32.partialorder %v12258_v14, 1.4 }
 0x3f5   : > { %v3960_v41 = vmul.f32 %v8328_v59, %v13072_v33  ;;  %v8289_v40 = vsel %vm3217_vm1, 1.0, %v16623_v3  ;;  %v8290_v32 = vsel %vm3218_vm2, 1.0, %v16623_v3  ;;  %vm3241_vm3 = vcmp.ge.f32.partialorder %v12263_v49, 1.8  ;;  %9312 = vmatpush3.bf16.msra.mxu1 %v9793_v22  ;;  %v13095_v59 = vld [vmem:[%s16041_s3 + $0x440] sm:$0xff]  }
 0x3f6   : > { %v3975_v28 = vsub.f32 %v3959_v42, %v3967_v31  ;;  %vm3242_vm4 = vcmp.ge.f32.partialorder %v12258_v14, 1.8  ;;  %v13089_v36 = vsel %vm3241_vm3, 1.0, %v16623_v3  ;;  %v3337_v7 = vsub.f32 %v12401_v37, %v8273_v50  ;;  %9313 = vmatprep.subr.bf16.mxu1 %v9794_v35 }
 0x3f7   : > { %16678 = vst [vmem:[#allocation87_spill] sm:$0xff] %v13089_v36  ;;  %v3976_v27 = vsub.f32 %v3960_v41, %v3968_v19  ;;  %v13098_v0 = vsel %vm3242_vm4, 1.0, %v16623_v3  ;;  %v3338_v16 = vsub.f32 %v12404_v6, %v8274_v13  ;;  %v3345_v31 = vsub.f32 %v8273_v50, %v8281_v10 }
 0x3f8   : > { %16679 = vst [vmem:[#allocation88_spill] sm:$0xff] %v13098_v0  ;;  %v3346_v53 = vsub.f32 %v8274_v13, %v8282_v12  ;;  %v3353_v61 = vsub.f32 %v8281_v10, %v8289_v40  ;;  %v3354_v54 = vsub.f32 %v8282_v12, %v8290_v32  ;;  %v13102_v8 = vsub.f32 %v8289_v40, %v13089_v36 }
 0x3f9   : > { %v9937_v37 = vpop.eup %9936  ;;  %v4132_v55 = vpack.c.bf16 %v3976_v27, %v3975_v28  ;;  %v13105_v60 = vsub.f32 %v8290_v32, %v13098_v0  ;;  %v13108_v24 = vadd.f32 -0.6, %v12263_v49  ;;  %v13111_v19 = vadd.f32 -0.6, %v12258_v14  ;;  %9314 = vmatpush3.bf16.msra.mxu1 %v9795_v51 }
 0x3fa   : > { %v9939_v6 = vpop.eup %9938  ;;  %v2982_v22 = vmul.f32 %v9937_v37, %v12265_v47  ;;  %v13115_v50 = vadd.f32 -1.0, %v12263_v49  ;;  %v13118_v13 = vadd.f32 -1.0, %v12258_v14  ;;  %v13121_v35 = vadd.f32 -1.4, %v12263_v49  ;;  %9587 = vmatprep.subr.bf16.mxu1 %v13095_v59 }
 0x3fb   : > { %16680 = vst [vmem:[#allocation89_spill] sm:$0xff] %v13105_v60  ;;  %16681 = vst [vmem:[#allocation90_spill] sm:$0xff] %v13108_v24  ;;  %v2984_v10 = vmul.f32 %v9939_v6, %v12327_v45  ;;  %4920 = vmatmul.mubr.bf16.gmra.mrb[52].mxu0 %v4132_v55  ;;  %v13126_v42 = vadd.f32 -1.4, %v12258_v14  ;;  %v8393_v12 = vadd.f32 -1.8, %v12263_v49  ;;  %v13131_v40 = vmul.f32 %v13108_v24, %v3337_v7 }
 0x3fc   : > { %16682 = vst [vmem:[#allocation91_spill] sm:$0xff] %v13111_v19  ;;  %16683 = vst [vmem:[#allocation92_spill] sm:$0xff] %v13115_v50  ;;  %v8394_v41 = vadd.f32 -1.8, %v12258_v14  ;;  %v13134_v32 = vmul.f32 %v13111_v19, %v3338_v16  ;;  %v3617_v51 = vmul.f32 %v12417_v17, %v3337_v7  ;;  %v3618_v28 = vmul.f32 %v12420_v9, %v3338_v16 }
 0x3fd   : > { %16684 = vst [vmem:[#allocation93_spill] sm:$0xff] %v13118_v13  ;;  %16685 = vst [vmem:[#allocation94_spill] sm:$0xff] %v13121_v35  ;;  %v2994_v27 = vpack.c.bf16 %v2984_v10, %v2982_v22  ;;  %v3625_v37 = vmul.f32 %v13115_v50, %v3345_v31  ;;  %v3626_v55 = vmul.f32 %v13118_v13, %v3346_v53  ;;  %vm3007_vm5 = vcmp.ge.f32.partialorder %v12338_v29, -2.2 }
 0x3fe   : > { %16686 = vst [vmem:[#allocation95_spill] sm:$0xff] %v13126_v42  ;;  %v3641_v6 = vmul.f32 %v13108_v24, %v3345_v31  ;;  %v3642_v0 = vmul.f32 %v13111_v19, %v3346_v53  ;;  %v3649_v36 = vmul.f32 %v13121_v35, %v3353_v61  ;;  %v3650_v14 = vmul.f32 %v13126_v42, %v3354_v54 }
 0x3ff   : > { %v3665_v49 = vmul.f32 %v13115_v50, %v3353_v61  ;;  %4839 = vmatmul.mubr.bf16.gmra.mrb[36].mxu1 %v2994_v27  ;;  %v3633_v2 = vsub.f32 %v3617_v51, %v3625_v37  ;;  %v3634_v7 = vsub.f32 %v3618_v28, %v3626_v55  ;;  %v3666_v16 = vmul.f32 %v13118_v13, %v3354_v54 }
 0x400   : > { %v3673_v22 = vmul.f32 %v8393_v12, %v13102_v8  ;;  %4846 = vmatprep.mubr.bf16.mxu1 %v4123_v11  ;;  %v3657_v10 = vsub.f32 %v3641_v6, %v3649_v36  ;;  %v3658_v18 = vsub.f32 %v3642_v0, %v3650_v14  ;;  %v3674_v31 = vmul.f32 %v8394_v41, %v13105_v60 }
 0x401   : > { %v2949_v53 = vsub.f32 0.0, %v12334_v52  ;;  %v3841_v56 = vmul.f32 %v13115_v50, %v3633_v2  ;;  %v3842_v61 = vmul.f32 %v13118_v13, %v3634_v7  ;;  %v3857_v51 = vmul.f32 %v12417_v17, %v3633_v2 }
 0x402   : > { %v13149_v39 = vsub.f32 %v3665_v49, %v3673_v22  ;;  %v13154_v28 = vsub.f32 %v3666_v16, %v3674_v31  ;;  %v3858_v54 = vmul.f32 %v12420_v9, %v3634_v7  ;;  %v3865_v11 = vmul.f32 %v13121_v35, %v3657_v10 }
 0x403   : > { %v3866_v14 = vmul.f32 %v13126_v42, %v3658_v18  ;;  %v3881_v36 = vmul.f32 %v13108_v24, %v3657_v10  ;;  %v3882_v0 = vmul.f32 %v13111_v19, %v3658_v18  ;;  %v2950_v27 = vsub.f32 0.0, %v12336_v43 }
 0x404   : > { %16687 = vst [vmem:[#allocation96_spill] sm:$0xff] %v13149_v39  ;;  %16688 = vst [vmem:[#allocation97_spill] sm:$0xff] %v13154_v28  ;;  %v3889_v49 = vmul.f32 %v8393_v12, %v13149_v39  ;;  %v3873_v37 = vsub.f32 %v3857_v51, %v3865_v11  ;;  %v3890_v2 = vmul.f32 %v8394_v41, %v13154_v28  ;;  %v2961_v6 = vmul.f32 1.442695, %v2949_v53 }
 0x405   : > { %v3874_v55 = vsub.f32 %v3858_v54, %v3866_v14  ;;  %v2963_v7 = vmul.f32 1.442695, %v2950_v27  ;;  %vm3008_vm6 = vcmp.ge.f32.partialorder %v12330_v62, -2.2  ;;  %v8223_v54 = vsel %vm3007_vm5, 1.0, %v16623_v3 }
 0x406   : > { %v13164_v16 = vsub.f32 %v3881_v36, %v3889_v49  ;;  %v13168_v22 = vsub.f32 %v3882_v0, %v3890_v2  ;;  %v13171_v18 = vmul.f32 %v13121_v35, %v3873_v37  ;;  %v4073_v31 = vmul.f32 %v12417_v17, %v3873_v37 }
 0x407   : > { %v13174_v10 = vmul.f32 %v13126_v42, %v3874_v55  ;;  %v4074_v51 = vmul.f32 %v12420_v9, %v3874_v55  ;;  %9940 = vpow2.f32 %v2961_v6  ;;  %v8224_v14 = vsel %vm3008_vm6, 1.0, %v16623_v3 }
 0x408   : > { %16689 = vst [vmem:[#allocation98_spill] sm:$0xff] %v13164_v16  ;;  %16690 = vst [vmem:[#allocation99_spill] sm:$0xff] %v13168_v22  ;;  %v4081_v53 = vmul.f32 %v8393_v12, %v13164_v16  ;;  %v4082_v11 = vmul.f32 %v8394_v41, %v13168_v22  ;;  %9942 = vpow2.f32 %v2963_v7  ;;  %v3295_v36 = vsub.f32 %v8223_v54, %v13012_v30 }
 0x409   : > { %v3296_v49 = vsub.f32 %v8224_v14, %v13018_v58  ;;  %v8319_v27 = vadd.f32 2.2, %v12338_v29  ;;  %v8320_v17 = vadd.f32 2.2, %v12330_v62  ;;  %v3487_v12 = vmul.f32 %v12888_v63, %v13022_v5  ;;  %v16691_v63 = vld [vmem:[#allocation9_spill] sm:$0xff] }
 0x40a   : > { %v4089_v0 = vsub.f32 %v4073_v31, %v4081_v53  ;;  %v4090_v9 = vsub.f32 %v4074_v51, %v4082_v11  ;;  %v3488_v37 = vmul.f32 %v12891_v34, %v13030_v1  ;;  %v3727_v41 = vmul.f32 %v12894_v4, %v13044_v26  ;;  %v16692_v34 = vld [vmem:[#allocation15_spill] sm:$0xff] }
 0x40b   : > { %v3479_v55 = vmul.f32 %v8319_v27, %v3295_v36  ;;  %v3480_v2 = vmul.f32 %v8320_v17, %v3296_v49  ;;  %v3728_v30 = vmul.f32 %v12897_v44, %v13053_v21  ;;  %v3943_v58 = vmul.f32 %v12900_v23, %v13064_v20  ;;  %v16693_v21 = vld [vmem:[#allocation13_spill] sm:$0xff] }
 0x40c   : > { %v4169_v6 = vpack.c.bf16 %v4090_v9, %v4089_v0  ;;  %v3944_v7 = vmul.f32 %v12903_v57, %v13072_v33  ;;  %v13200_v5 = vsub.f32 %v16691_v63, %v13131_v40  ;;  %v13204_v1 = vsub.f32 %v16692_v34, %v13134_v32  ;;  %v16694_v33 = vld [vmem:[#allocation8_spill] sm:$0xff] }
 0x40d   : > { %v3495_v26 = vsub.f32 %v3479_v55, %v3487_v12  ;;  %v3496_v31 = vsub.f32 %v3480_v2, %v3488_v37  ;;  %vm3171_vm7 = vcmp.ge.f32.partialorder %v12265_v47, 0.6  ;;  %vm3172_vm10 = vcmp.ge.f32.partialorder %v12327_v45, 0.6 }
 0x40e   : > { %5025 = vmatprep.mubr.bf16.mxu0 %v4169_v6  ;;  %v3833_v20 = vmul.f32 %v16693_v21, %v13200_v5  ;;  %v3834_v51 = vmul.f32 %v16694_v33, %v13204_v1  ;;  %v8275_v40 = vsel %vm3171_vm7, 1.0, %v16623_v3  ;;  %v8276_v53 = vsel %vm3172_vm10, 1.0, %v16623_v3 }
 0x40f   : > { %v3719_v54 = vmul.f32 %v8319_v27, %v3495_v26  ;;  %v3720_v32 = vmul.f32 %v8320_v17, %v3496_v31  ;;  %vm3195_vm11 = vcmp.ge.f32.partialorder %v12265_v47, 1.0  ;;  %vm3196_vm12 = vcmp.ge.f32.partialorder %v12327_v45, 1.0 }
 0x410   : > { %v13216_v11 = vsub.f32 %v3833_v20, %v3841_v56  ;;  %v13218_v14 = vsub.f32 %v3834_v51, %v3842_v61  ;;  %v8283_v36 = vsel %vm3195_vm11, 1.0, %v16623_v3  ;;  %v8284_v0 = vsel %vm3196_vm12, 1.0, %v16623_v3  ;;  %v16700_v51 = vld [vmem:[#allocation36_spill] sm:$0xff] }
 0x411   : > { %v9941_v49 = vpop.eup %9940  ;;  %v3735_v9 = vsub.f32 %v3719_v54, %v3727_v41  ;;  %v3736_v12 = vsub.f32 %v3720_v32, %v3728_v30  ;;  %vm3219_vm13 = vcmp.ge.f32.partialorder %v12265_v47, 1.4  ;;  %vm3220_vm14 = vcmp.ge.f32.partialorder %v12327_v45, 1.4 }
 0x412   : > { %v9943_v37 = vpop.eup %9942  ;;  %v2973_v55 = vadd.f32 1.0, %v9941_v49  ;;  %v4049_v2 = vmul.f32 %v16693_v21, %v13216_v11  ;;  %v4050_v56 = vmul.f32 %v16694_v33, %v13218_v14  ;;  %v8291_v61 = vsel %vm3219_vm13, 1.0, %v16623_v3 }
 0x413   : > { %v2974_v6 = vadd.f32 1.0, %v9943_v37  ;;  %v3935_v63 = vmul.f32 %v8319_v27, %v3735_v9  ;;  %v3936_v34 = vmul.f32 %v8320_v17, %v3736_v12  ;;  %v8292_v41 = vsel %vm3220_vm14, 1.0, %v16623_v3 }
 0x414   : > { %9944 = vrcp.f32 %v2973_v55  ;;  %v4065_v30 = vsub.f32 %v4049_v2, %v13171_v18  ;;  %v4066_v26 = vsub.f32 %v4050_v56, %v13174_v10  ;;  %vm3243_vm15 = vcmp.ge.f32.partialorder %v12265_v47, 1.8  ;;  %v16698_v10 = vld [vmem:[#allocation29_spill] sm:$0xff] }
 0x415   : > { %9946 = vrcp.f32 %v2974_v6  ;;  %v3951_v31 = vsub.f32 %v3935_v63, %v3943_v58  ;;  %v3952_v21 = vsub.f32 %v3936_v34, %v3944_v7  ;;  %vm3244_vm1 = vcmp.ge.f32.partialorder %v12327_v45, 1.8 }
 0x416   : > { %v4161_v20 = vpack.c.bf16 %v4066_v26, %v4065_v30  ;;  %v13235_v33 = vsel %vm3243_vm15, 1.0, %v16623_v3  ;;  %v13238_v27 = vsel %vm3244_vm1, 1.0, %v16623_v3  ;;  %vm3267_vm2 = vcmp.ge.f32.partialorder %v12265_v47, 2.2  ;;  %v16702_v26 = vld [vmem:[#allocation19_spill] sm:$0xff] }
 0x417   : > { %16695 = vst [vmem:[#allocation9_spill] sm:$0xff] %v13235_v33  ;;  %16696 = vst [vmem:[#allocation15_spill] sm:$0xff] %v13238_v27  ;;  %v4124_v17 = vpack.c.bf16 %v3952_v21, %v3951_v31  ;;  %vm3268_vm3 = vcmp.ge.f32.partialorder %v12327_v45, 2.2  ;;  %v13243_v18 = vsel %vm3267_vm2, 1.0, %v16623_v3  ;;  %v13246_v58 = vsub.f32 %v16698_v10, %v8275_v40 }
 0x418   : > { %16697 = vst [vmem:[#allocation13_spill] sm:$0xff] %v13243_v18  ;;  %5026 = vmatmul.mubr.bf16.vlgmr.msra.gmra.mrb[56].mxu0 %v4161_v20  ;;  %v13249_v7 = vsel %vm3268_vm3, 1.0, %v16623_v3  ;;  %v13252_v54 = vsub.f32 %v16700_v51, %v8276_v53  ;;  %v3347_v32 = vsub.f32 %v8275_v40, %v8283_v36  ;;  %v3348_v49 = vsub.f32 %v8276_v53, %v8284_v0 }
 0x419   : > { %16699 = vst [vmem:[#allocation8_spill] sm:$0xff] %v13249_v7  ;;  %v3355_v9 = vsub.f32 %v8283_v36, %v8291_v61  ;;  %v3356_v12 = vsub.f32 %v8284_v0, %v8292_v41  ;;  %v3363_v37 = vsub.f32 %v8291_v61, %v13235_v33  ;;  %v3364_v55 = vsub.f32 %v8292_v41, %v13238_v27  ;;  %v16701_v41 = vld [vmem:[#allocation6_spill] sm:$0xff] }
 0x41a   : > { %v13261_v6 = vadd.f32 -0.6, %v12265_v47  ;;  %v13264_v63 = vadd.f32 -0.6, %v12327_v45  ;;  %v13267_v40 = vadd.f32 -1.0, %v12265_v47  ;;  %v13270_v53 = vadd.f32 -1.0, %v12327_v45 }
 0x41b   : > { %v13273_v36 = vadd.f32 -1.4, %v12265_v47  ;;  %v13276_v0 = vadd.f32 -1.4, %v12327_v45  ;;  %v8395_v61 = vadd.f32 -1.8, %v12265_v47  ;;  %v3619_v30 = vmul.f32 %v16701_v41, %v13246_v58 }
 0x41c   : > { %v8396_v34 = vadd.f32 -1.8, %v12327_v45  ;;  %v3620_v31 = vmul.f32 %v16702_v26, %v13252_v54  ;;  %v3627_v21 = vmul.f32 %v13267_v40, %v3347_v32  ;;  %v3628_v20 = vmul.f32 %v13270_v53, %v3348_v49 }
 0x41d   : > { %v3643_v10 = vmul.f32 %v13261_v6, %v3347_v32  ;;  %v3644_v51 = vmul.f32 %v13264_v63, %v3348_v49  ;;  %v3651_v2 = vmul.f32 %v13273_v36, %v3355_v9  ;;  %v3652_v7 = vmul.f32 %v13276_v0, %v3356_v12 }
 0x41e   : > { %v9945_v56 = vpop.eup %9944  ;;  %v3667_v27 = vmul.f32 %v13267_v40, %v3355_v9  ;;  %v3668_v18 = vmul.f32 %v13270_v53, %v3356_v12  ;;  %v3635_v47 = vsub.f32 %v3619_v30, %v3627_v21  ;;  %v13293_v22 = vsub.f32 %v3620_v31, %v3628_v20 }
 0x41f   : > { %v9947_v33 = vpop.eup %9946  ;;  %v2986_v45 = vmul.f32 %v9945_v56, %v12334_v52  ;;  %v3675_v16 = vmul.f32 %v8395_v61, %v3363_v37  ;;  %v3659_v28 = vsub.f32 %v3643_v10, %v3651_v2  ;;  %v3660_v49 = vsub.f32 %v3644_v51, %v3652_v7  ;;  %v16707_v51 = vld [vmem:[#allocation7_spill] sm:$0xff] }
 0x420   : > { %v2988_v32 = vmul.f32 %v9947_v33, %v12336_v43  ;;  %v3676_v39 = vmul.f32 %v8396_v34, %v3364_v55  ;;  %v13297_v60 = vmul.f32 %v13273_v36, %v3363_v37  ;;  %v13300_v9 = vmul.f32 %v13276_v0, %v3364_v55 }
 0x421   : > { %v3683_v42 = vsub.f32 %v3667_v27, %v3675_v16  ;;  %v3859_v12 = vmul.f32 %v16701_v41, %v3635_v47  ;;  %v3860_v30 = vmul.f32 %v16702_v26, %v13293_v22  ;;  %v3867_v31 = vmul.f32 %v13273_v36, %v3659_v28 }
 0x422   : > { %16703 = vst [vmem:[#allocation29_spill] sm:$0xff] %v13297_v60  ;;  %16704 = vst [vmem:[#allocation36_spill] sm:$0xff] %v13300_v9  ;;  %v2995_v35 = vpack.c.bf16 %v2988_v32, %v2986_v45  ;;  %v3684_v56 = vsub.f32 %v3668_v18, %v3676_v39  ;;  %v3868_v33 = vmul.f32 %v13276_v0, %v3660_v49  ;;  %v2951_v21 = vsub.f32 0.0, %v12338_v29 }
 0x423   : > { %v3883_v7 = vmul.f32 %v13261_v6, %v3659_v28  ;;  %v3884_v16 = vmul.f32 %v13264_v63, %v3660_v49  ;;  %v3891_v27 = vmul.f32 %v8395_v61, %v3683_v42  ;;  %v3875_v37 = vsub.f32 %v3859_v12, %v3867_v31  ;;  %v16709_v49 = vld [vmem:[#allocation21_spill] sm:$0xff]  ;;  %v16710_v12 = vld [vmem:[#allocation12_spill] sm:$0xff] }
 0x424   : > { %4847 = vmatmul.mubr.bf16.gmra.mrb[40].mxu1 %v2995_v35  ;;  %v3892_v55 = vmul.f32 %v8396_v34, %v3684_v56  ;;  %v13310_v2 = vmul.f32 %v13267_v40, %v3683_v42  ;;  %v13313_v45 = vmul.f32 %v13270_v53, %v3684_v56  ;;  %v3876_v39 = vsub.f32 %v3860_v30, %v3868_v33  ;;  %v16708_v35 = vld [vmem:[#allocation30_spill] sm:$0xff] }
 0x425   : > { %4854 = vmatprep.mubr.bf16.mxu1 %v4124_v17  ;;  %v3899_v18 = vsub.f32 %v3883_v7, %v3891_v27  ;;  %v2952_v20 = vsub.f32 0.0, %v12330_v62  ;;  %v4075_v10 = vmul.f32 %v16701_v41, %v3875_v37  ;;  %v3809_v32 = vmul.f32 %v16708_v35, %v16707_v51 }
 0x426   : > { %16705 = vst [vmem:[#allocation6_spill] sm:$0xff] %v13310_v2  ;;  %16706 = vst [vmem:[#allocation19_spill] sm:$0xff] %v13313_v45  ;;  %v3900_v28 = vsub.f32 %v3884_v16, %v3892_v55  ;;  %v3810_v42 = vmul.f32 %v16710_v12, %v16709_v49  ;;  %v4076_v31 = vmul.f32 %v16702_v26, %v3876_v39  ;;  %v2965_v30 = vmul.f32 1.442695, %v2951_v21  ;;  %v16715_v49 = vld [vmem:[#allocation18_spill] sm:$0xff] }
 0x427   : > { %v4083_v56 = vmul.f32 %v8395_v61, %v3899_v18  ;;  %v13324_v17 = vmul.f32 %v13261_v6, %v3899_v18  ;;  %v2967_v16 = vmul.f32 1.442695, %v2952_v20  ;;  %v3817_v41 = vmul.f32 %v13108_v24, %v13200_v5  ;;  %v16714_v20 = vld [vmem:[#allocation16_spill] sm:$0xff]  ;;  %v16716_v5 = vld [vmem:[#allocation14_spill] sm:$0xff] }
 0x428   : > { %v4084_v33 = vmul.f32 %v8396_v34, %v3900_v28  ;;  %v13327_v7 = vmul.f32 %v13264_v63, %v3900_v28  ;;  %9948 = vpow2.f32 %v2965_v30  ;;  %v3818_v55 = vmul.f32 %v13111_v19, %v13204_v1  ;;  %v16713_v28 = vld [vmem:[#allocation37_spill] sm:$0xff] }
 0x429   : > { %16711 = vst [vmem:[#allocation7_spill] sm:$0xff] %v13324_v17  ;;  %v4091_v27 = vsub.f32 %v4075_v10, %v4083_v56  ;;  %v4033_v61 = vmul.f32 %v13115_v50, %v13216_v11  ;;  %9950 = vpow2.f32 %v2967_v16  ;;  %v3825_v18 = vsub.f32 %v3809_v32, %v3817_v41 }
 0x42a   : > { %16712 = vst [vmem:[#allocation30_spill] sm:$0xff] %v13327_v7  ;;  %v4092_v26 = vsub.f32 %v4076_v31, %v4084_v33  ;;  %v4034_v34 = vmul.f32 %v13118_v13, %v13218_v14  ;;  %v3826_v21 = vsub.f32 %v3810_v42, %v3818_v55  ;;  %v3595_v51 = vmul.f32 %v16714_v20, %v16713_v28  ;;  %v16730_v13 = vld [vmem:[#allocation44_spill] sm:$0xff] }
 0x42b   : > { %v3596_v10 = vmul.f32 %v16716_v5, %v16715_v49  ;;  %v3603_v56 = vmul.f32 %v13261_v6, %v13246_v58  ;;  %v13344_v30 = vmul.f32 %v13108_v24, %v3825_v18  ;;  %v4025_v11 = vmul.f32 %v16708_v35, %v3825_v18  ;;  %v16729_v24 = vld [vmem:[#allocation26_spill] sm:$0xff] }
 0x42c   : > { %v4170_v1 = vpack.c.bf16 %v4092_v26, %v4091_v27  ;;  %v3604_v32 = vmul.f32 %v13264_v63, %v13252_v54  ;;  %v13350_v14 = vmul.f32 %v13111_v19, %v3826_v21  ;;  %v4026_v42 = vmul.f32 %v16710_v12, %v3826_v21 }
 0x42d   : > { %v13353_v31 = vsub.f32 %v3595_v51, %v3603_v56  ;;  %v3843_v33 = vmul.f32 %v13267_v40, %v3635_v47  ;;  %v4041_v58 = vsub.f32 %v4025_v11, %v4033_v61  ;;  %v3844_v41 = vmul.f32 %v13270_v53, %v13293_v22 }
 0x42e   : > { %5033 = vmatprep.mubr.bf16.mxu0 %v4170_v1  ;;  %v13356_v16 = vsub.f32 %v3596_v10, %v3604_v32  ;;  %v4059_v35 = vmul.f32 %v13273_v36, %v3875_v37  ;;  %v4042_v27 = vsub.f32 %v4026_v42, %v4034_v34  ;;  %v4060_v55 = vmul.f32 %v13276_v0, %v3876_v39  ;;  %v16719_v32 = vld [vmem:[#allocation58_spill] sm:$0xff] }
 0x42f   : > { %v3835_v54 = vmul.f32 %v16714_v20, %v13353_v31  ;;  %vm3173_vm4 = vcmp.ge.f32.partialorder %v12334_v52, 0.6  ;;  %vm3174_vm5 = vcmp.ge.f32.partialorder %v12336_v43, 0.6  ;;  %vm3197_vm6 = vcmp.ge.f32.partialorder %v12334_v52, 1.0 }
 0x430   : > { %v3836_v47 = vmul.f32 %v16716_v5, %v13356_v16  ;;  %v8277_v12 = vsel %vm3173_vm4, 1.0, %v16623_v3  ;;  %v13370_v22 = vpack.c.bf16 %v4042_v27, %v4041_v58  ;;  %v8278_v37 = vsel %vm3174_vm5, 1.0, %v16623_v3 }
 0x431   : > { %v13372_v36 = vsub.f32 %v3835_v54, %v3843_v33  ;;  %vm3198_vm7 = vcmp.ge.f32.partialorder %v12336_v43, 1.0  ;;  %v8285_v39 = vsel %vm3197_vm6, 1.0, %v16623_v3  ;;  %vm3221_vm10 = vcmp.ge.f32.partialorder %v12334_v52, 1.4  ;;  %v16720_v33 = vld [vmem:[#allocation60_spill] sm:$0xff] }
 0x432   : > { %v13376_v0 = vsub.f32 %v3836_v47, %v3844_v41  ;;  %v8286_v61 = vsel %vm3198_vm7, 1.0, %v16623_v3  ;;  %v9949_v26 = vpop.eup %9948  ;;  %vm3222_vm11 = vcmp.ge.f32.partialorder %v12336_v43, 1.4  ;;  %v8293_v34 = vsel %vm3221_vm10, 1.0, %v16623_v3 }
 0x433   : > { %v4051_v18 = vmul.f32 %v16714_v20, %v13372_v36  ;;  %vm3245_vm12 = vcmp.ge.f32.partialorder %v12334_v52, 1.8  ;;  %v9951_v21 = vpop.eup %9950  ;;  %v2975_v28 = vadd.f32 1.0, %v9949_v26  ;;  %v8294_v49 = vsel %vm3222_vm11, 1.0, %v16623_v3 }
 0x434   : > { %v4052_v51 = vmul.f32 %v16716_v5, %v13376_v0  ;;  %vm3246_vm13 = vcmp.ge.f32.partialorder %v12336_v43, 1.8  ;;  %v2976_v10 = vadd.f32 1.0, %v9951_v21  ;;  %v13391_v1 = vsel %vm3245_vm12, 1.0, %v16623_v3 }
 0x435   : > { %v4067_v56 = vsub.f32 %v4051_v18, %v4059_v35  ;;  %16717 = vst [vmem:[#allocation21_spill] sm:$0xff] %v13391_v1  ;;  %v13394_v20 = vsel %vm3246_vm13, 1.0, %v16623_v3  ;;  %9952 = vrcp.f32 %v2975_v28  ;;  %v13397_v42 = vsub.f32 %v16719_v32, %v8277_v12 }
 0x436   : > { %16718 = vst [vmem:[#allocation12_spill] sm:$0xff] %v13394_v20  ;;  %v4068_v11 = vsub.f32 %v4052_v51, %v4060_v55  ;;  %v13400_v58 = vsub.f32 %v16720_v33, %v8278_v37  ;;  %9954 = vrcp.f32 %v2976_v10  ;;  %v3349_v5 = vsub.f32 %v8277_v12, %v8285_v39 }
 0x437   : > { %v3350_v41 = vsub.f32 %v8278_v37, %v8286_v61  ;;  %v3357_v27 = vsub.f32 %v8285_v39, %v8293_v34  ;;  %v3358_v35 = vsub.f32 %v8286_v61, %v8294_v49  ;;  %v13403_v47 = vsub.f32 %v8293_v34, %v13391_v1  ;;  %v16723_v34 = vld [vmem:[#allocation72_spill] sm:$0xff] }
 0x438   : > { %v4162_v54 = vpack.c.bf16 %v4068_v11, %v4067_v56  ;;  %v13406_v26 = vsub.f32 %v8294_v49, %v13394_v20  ;;  %v13409_v55 = vadd.f32 -0.6, %v12334_v52  ;;  %v13412_v18 = vadd.f32 -0.6, %v12336_v43  ;;  %v16724_v49 = vld [vmem:[#allocation73_spill] sm:$0xff] }
 0x439   : > { %16721 = vst [vmem:[#allocation37_spill] sm:$0xff] %v13403_v47  ;;  %v13415_v21 = vadd.f32 -1.0, %v12334_v52  ;;  %v13418_v12 = vadd.f32 -1.0, %v12336_v43  ;;  %v13421_v37 = vadd.f32 -1.4, %v12334_v52  ;;  %v3621_v28 = vmul.f32 %v16723_v34, %v13397_v42 }
 0x43a   : > { %16722 = vst [vmem:[#allocation16_spill] sm:$0xff] %v13406_v26  ;;  %5034 = vmatmul.mubr.bf16.gmra.mrb[60].mxu0 %v4162_v54  ;;  %v13424_v39 = vadd.f32 -1.4, %v12336_v43  ;;  %v8397_v61 = vadd.f32 -1.8, %v12334_v52  ;;  %v3622_v10 = vmul.f32 %v16724_v49, %v13400_v58  ;;  %v3645_v32 = vmul.f32 %v13409_v55, %v3349_v5  ;;  %v16725_v52 = vld [vmem:[#allocation31_spill] sm:$0xff] }
 0x43b   : > { %v8398_v51 = vadd.f32 -1.8, %v12336_v43  ;;  %v3629_v56 = vmul.f32 %v13415_v21, %v3349_v5  ;;  %v3630_v11 = vmul.f32 %v13418_v12, %v3350_v41  ;;  %v3646_v33 = vmul.f32 %v13412_v18, %v3350_v41 }
 0x43c   : > { %v3653_v54 = vmul.f32 %v13421_v37, %v3357_v27  ;;  %v3654_v7 = vmul.f32 %v13424_v39, %v3358_v35  ;;  %v3669_v2 = vmul.f32 %v13415_v21, %v3357_v27  ;;  %v3670_v9 = vmul.f32 %v13418_v12, %v3358_v35 }
 0x43d   : > { %v3637_v17 = vsub.f32 %v3621_v28, %v3629_v56  ;;  %v3638_v45 = vsub.f32 %v3622_v10, %v3630_v11  ;;  %v3677_v1 = vmul.f32 %v8397_v61, %v13403_v47  ;;  %v3678_v43 = vmul.f32 %v8398_v51, %v13406_v26  ;;  %v16726_v28 = vld [vmem:[#allocation28_spill] sm:$0xff] }
 0x43e   : > { %v3661_v60 = vsub.f32 %v3645_v32, %v3653_v54  ;;  %v3662_v20 = vsub.f32 %v3646_v33, %v3654_v7  ;;  %v4017_v19 = vsub.f32 %v16725_v52, %v13344_v30  ;;  %v4018_v10 = vsub.f32 %v16726_v28, %v13350_v14 }
 0x43f   : > { %v3861_v5 = vmul.f32 %v16723_v34, %v3637_v17  ;;  %v3862_v41 = vmul.f32 %v16724_v49, %v3638_v45  ;;  %v9953_v56 = vpop.eup %9952  ;;  %v13448_v27 = vsub.f32 %v3669_v2, %v3677_v1  ;;  %v13450_v35 = vsub.f32 %v3670_v9, %v3678_v43  ;;  %v16727_v9 = vld [vmem:[#allocation32_spill] sm:$0xff]  ;;  %v16728_v1 = vld [vmem:[#allocation17_spill] sm:$0xff] }
 0x440   : > { %v3869_v7 = vmul.f32 %v13421_v37, %v3661_v60  ;;  %v3870_v11 = vmul.f32 %v13424_v39, %v3662_v20  ;;  %v9955_v32 = vpop.eup %9954  ;;  %v2990_v33 = vmul.f32 %v9953_v56, %v12338_v29  ;;  %v3885_v54 = vmul.f32 %v13409_v55, %v3661_v60 }
 0x441   : > { %v3886_v26 = vmul.f32 %v13412_v18, %v3662_v20  ;;  %v4145_v52 = vpack.c.bf16 %v4018_v10, %v4017_v19  ;;  %v2992_v30 = vmul.f32 %v9955_v32, %v12330_v62  ;;  %v3893_v2 = vmul.f32 %v8397_v61, %v13448_v27  ;;  %v16732_v32 = vld [vmem:[#allocation5_spill] sm:$0xff] }
 0x442   : > { %v3877_v14 = vsub.f32 %v3861_v5, %v3869_v7  ;;  %v3878_v28 = vsub.f32 %v3862_v41, %v3870_v11  ;;  %v3894_v43 = vmul.f32 %v8398_v51, %v13450_v35  ;;  %v3811_v47 = vmul.f32 %v16728_v1, %v16727_v9 }
 0x443   : > { %v3812_v50 = vmul.f32 %v16730_v13, %v16729_v24  ;;  %v3819_v60 = vmul.f32 %v13261_v6, %v13353_v31  ;;  %v2996_v56 = vpack.c.bf16 %v2992_v30, %v2990_v33  ;;  %v13466_v20 = vsub.f32 %v3885_v54, %v3893_v2 }
 0x444   : > { %v4077_v19 = vmul.f32 %v16723_v34, %v3877_v14  ;;  %v4078_v5 = vmul.f32 %v16724_v49, %v3878_v28  ;;  %v13470_v41 = vsub.f32 %v3886_v26, %v3894_v43  ;;  %v3820_v10 = vmul.f32 %v13264_v63, %v13356_v16  ;;  %v16733_v34 = vld [vmem:[#allocation70_spill] sm:$0xff]  ;;  %v16734_v49 = vld [vmem:[#allocation67_spill] sm:$0xff] }
 0x445   : > { %v13474_v7 = vsub.f32 %v3811_v47, %v3819_v60  ;;  %v4035_v24 = vmul.f32 %v13267_v40, %v13372_v36  ;;  %4855 = vmatmul.mubr.bf16.gmra.mrb[44].mxu1 %v2996_v56  ;;  %v4085_v31 = vmul.f32 %v8397_v61, %v13466_v20  ;;  %v4036_v11 = vmul.f32 %v13270_v53, %v13376_v0  ;;  %v16735_v26 = vld [vmem:[#allocation71_spill] sm:$0xff] }
 0x446   : > { %16731 = vst [vmem:[#allocation18_spill] sm:$0xff] %v13470_v41  ;;  %v3597_v33 = vmul.f32 %v16733_v34, %v16732_v32  ;;  %v3598_v54 = vmul.f32 %v16735_v26, %v16734_v49  ;;  %4960 = vmatprep.mubr.bf16.mxu1 %v13370_v22  ;;  %v4086_v16 = vmul.f32 %v8398_v51, %v13470_v41  ;;  %vm3175_vm14 = vcmp.ge.f32.partialorder %v12338_v29, 0.6 }
 0x447   : > { %v13487_v47 = vsub.f32 %v3812_v50, %v3820_v10  ;;  %v4027_v40 = vmul.f32 %v16728_v1, %v13474_v7  ;;  %v3605_v36 = vmul.f32 %v13409_v55, %v13397_v42  ;;  %v4093_v61 = vsub.f32 %v4077_v19, %v4085_v31 }
 0x448   : > { %v3606_v53 = vmul.f32 %v13412_v18, %v13400_v58  ;;  %v3845_v0 = vmul.f32 %v13415_v21, %v3637_v17  ;;  %v3846_v30 = vmul.f32 %v13418_v12, %v3638_v45  ;;  %v4094_v2 = vsub.f32 %v4078_v5, %v4086_v16  ;;  %v9797_v17 = vld [vmem:[%s16041_s3 + $0x448] sm:$0xff]   ;;  %v16739_v16 = vld [vmem:[#allocation79_spill] sm:$0xff] }
 0x449   : > { %v4028_v22 = vmul.f32 %v16730_v13, %v13487_v47  ;;  %v4043_v50 = vsub.f32 %v4027_v40, %v4035_v24  ;;  %v13499_v51 = vsub.f32 %v3597_v33, %v3605_v36  ;;  %v4061_v9 = vmul.f32 %v13421_v37, %v3877_v14 }
 0x44a   : > { %v13501_v43 = vsub.f32 %v3598_v54, %v3606_v53  ;;  %v4062_v42 = vmul.f32 %v13424_v39, %v3878_v28  ;;  %v4171_v58 = vpack.c.bf16 %v4094_v2, %v4093_v61  ;;  %vm3176_vm15 = vcmp.ge.f32.partialorder %v12330_v62, 0.6 }
 0x44b   : > { %v4044_v1 = vsub.f32 %v4028_v22, %v4036_v11  ;;  %v3837_v45 = vmul.f32 %v16733_v34, %v13499_v51  ;;  %v8279_v14 = vsel %vm3175_vm14, 1.0, %v16623_v3  ;;  %v8280_v28 = vsel %vm3176_vm15, 1.0, %v16623_v3 }
 0x44c   : > { %v3838_v13 = vmul.f32 %v16735_v26, %v13501_v43  ;;  %vm3199_vm1 = vcmp.ge.f32.partialorder %v12338_v29, 1.0  ;;  %5041 = vmatprep.mubr.bf16.mxu0 %v4171_v58  ;;  %vm3200_vm2 = vcmp.ge.f32.partialorder %v12330_v62, 1.0  ;;  %vm3223_vm3 = vcmp.ge.f32.partialorder %v12338_v29, 1.4 }
 0x44d   : > { %v4154_v60 = vpack.c.bf16 %v4044_v1, %v4043_v50  ;;  %v13517_v56 = vsub.f32 %v3837_v45, %v3845_v0  ;;  %v8287_v19 = vsel %vm3199_vm1, 1.0, %v16623_v3  ;;  %4961 = vmatmul.mubr.bf16.vlgmr.msra.gmra.mrb[48].mxu1 %v4145_v52  ;;  %v8288_v10 = vsel %vm3200_vm2, 1.0, %v16623_v3  ;;  %v9799_v45 = vld [vmem:[%s16041_s3 + $0x458] sm:$0xff]  }
 0x44e   : > { %v13521_v5 = vsub.f32 %v3838_v13, %v3846_v30  ;;  %vm3224_vm4 = vcmp.ge.f32.partialorder %v12330_v62, 1.4  ;;  %9588 = vmatpush3.bf16.msra.mxu1 %v13095_v59  ;;  %v8295_v31 = vsel %vm3223_vm3, 1.0, %v16623_v3  ;;  %vm3247_vm5 = vcmp.ge.f32.partialorder %v12338_v29, 1.8  ;;  %v16737_v59 = vld [vmem:[#allocation78_spill] sm:$0xff] }
 0x44f   : > { %4968 = vmatprep.mubr.bf16.mxu1 %v4154_v60  ;;  %v4053_v24 = vmul.f32 %v16733_v34, %v13517_v56  ;;  %v8296_v11 = vsel %vm3224_vm4, 1.0, %v16623_v3  ;;  %9589 = vmatprep.subr.bf16.mxu1 %v9797_v17  ;;  %vm3248_vm6 = vcmp.ge.f32.partialorder %v12330_v62, 1.8  ;;  %v13536_v32 = vsel %vm3247_vm5, 1.0, %v16623_v3  ;;  %v9798_v34 = vld [vmem:[%s16041_s3 + $0x450] sm:$0xff]  }
 0x450   : > { %v4054_v52 = vmul.f32 %v16735_v26, %v13521_v5  ;;  %16736 = vst [vmem:[#allocation14_spill] sm:$0xff] %v13536_v32  ;;  %v13539_v33 = vsub.f32 %v16737_v59, %v8279_v14  ;;  %v13545_v54 = vsel %vm3248_vm6, 1.0, %v16623_v3  ;;  %v13548_v40 = vsub.f32 %v16739_v16, %v8280_v28 }
 0x451   : > { %v4069_v49 = vsub.f32 %v4053_v24, %v4061_v9  ;;  %16738 = vst [vmem:[#allocation58_spill] sm:$0xff] %v13545_v54  ;;  %v3351_v26 = vsub.f32 %v8279_v14, %v8287_v19  ;;  %v3352_v61 = vsub.f32 %v8280_v28, %v8288_v10  ;;  %v3359_v53 = vsub.f32 %v8287_v19, %v8295_v31 }
 0x452   : > { %v4070_v36 = vsub.f32 %v4054_v52, %v4062_v42  ;;  %v3360_v0 = vsub.f32 %v8288_v10, %v8296_v11  ;;  %v13551_v30 = vsub.f32 %v8295_v31, %v13536_v32  ;;  %v13554_v2 = vsub.f32 %v8296_v11, %v13545_v54  ;;  %9590 = vmatpush3.bf16.msra.mxu1 %v9797_v17 }
 0x453   : > { %v13557_v22 = vadd.f32 -0.6, %v12338_v29  ;;  %v13560_v50 = vadd.f32 -0.6, %v12330_v62  ;;  %v13563_v58 = vadd.f32 -1.0, %v12338_v29  ;;  %v13566_v42 = vadd.f32 -1.0, %v12330_v62  ;;  %9591 = vmatprep.subr.bf16.mxu1 %v9798_v34 }
 0x454   : > { %16740 = vst [vmem:[#allocation60_spill] sm:$0xff] %v13551_v30  ;;  %v4163_v9 = vpack.c.bf16 %v4070_v36, %v4069_v49  ;;  %v13569_v1 = vadd.f32 -1.4, %v12338_v29  ;;  %v13575_v13 = vadd.f32 -1.4, %v12330_v62  ;;  %v3623_v28 = vmul.f32 %v12912_v46, %v13539_v33 }
 0x455   : > { %v8399_v17 = vadd.f32 -1.8, %v12338_v29  ;;  %v8400_v14 = vadd.f32 -1.8, %v12330_v62  ;;  %v3624_v60 = vmul.f32 %v12915_v15, %v13548_v40  ;;  %v3631_v19 = vmul.f32 %v13563_v58, %v3351_v26  ;;  %v16741_v62 = vld [vmem:[#allocation62_spill] sm:$0xff]  ;;  %v16742_v29 = vld [vmem:[#allocation65_spill] sm:$0xff] }
 0x456   : > { %5042 = vmatmul.mubr.bf16.gmra.mrb[64].mxu0 %v4163_v9  ;;  %v3632_v10 = vmul.f32 %v13566_v42, %v3352_v61  ;;  %v3647_v24 = vmul.f32 %v13557_v22, %v3351_v26  ;;  %v3648_v31 = vmul.f32 %v13560_v50, %v3352_v61  ;;  %v3655_v11 = vmul.f32 %v13569_v1, %v3359_v53  ;;  %v9800_v26 = vld [vmem:[%s16041_s3 + $0x460] sm:$0xff]  }
 0x457   : > { %v3656_v52 = vmul.f32 %v13575_v13, %v3360_v0  ;;  %v3671_v59 = vmul.f32 %v13563_v58, %v3359_v53  ;;  %9592 = vmatpush3.bf16.msra.mxu1 %v9798_v34  ;;  %v3639_v49 = vsub.f32 %v3623_v28, %v3631_v19  ;;  %v3672_v36 = vmul.f32 %v13566_v42, %v3360_v0  ;;  %v16744_v28 = vld [vmem:[#allocation59_spill] sm:$0xff] }
 0x458   : > { %v3640_v16 = vsub.f32 %v3624_v60, %v3632_v10  ;;  %v3679_v9 = vmul.f32 %v8399_v17, %v13551_v30  ;;  %9593 = vmatprep.subr.bf16.mxu1 %v9799_v45  ;;  %v3663_v54 = vsub.f32 %v3647_v24, %v3655_v11  ;;  %v3680_v32 = vmul.f32 %v8400_v14, %v13554_v2  ;;  %v16745_v60 = vld [vmem:[#allocation66_spill] sm:$0xff] }
 0x459   : > { %v3664_v61 = vsub.f32 %v3648_v31, %v3656_v52  ;;  %v4003_v41 = vmul.f32 %v16742_v29, %v16741_v62  ;;  %v3863_v34 = vmul.f32 %v12912_v46, %v3639_v49  ;;  %v4004_v19 = vmul.f32 %v16745_v60, %v16744_v28 }
 0x45a   : > { %v13598_v53 = vsub.f32 %v3671_v59, %v3679_v9  ;;  %v3864_v0 = vmul.f32 %v12915_v15, %v3640_v16  ;;  %v13604_v10 = vsub.f32 %v3672_v36, %v3680_v32  ;;  %v3871_v30 = vmul.f32 %v13569_v1, %v3663_v54  ;;  %v9801_v32 = vld [vmem:[%s16041_s3 + $0x468] sm:$0xff]  }
 0x45b   : > { %v3872_v24 = vmul.f32 %v13575_v13, %v3664_v61  ;;  %v3887_v31 = vmul.f32 %v13557_v22, %v3663_v54  ;;  %9594 = vmatpush3.bf16.msra.mxu1 %v9799_v45  ;;  %v3888_v62 = vmul.f32 %v13560_v50, %v3664_v61  ;;  %v4011_v11 = vmul.f32 %v13261_v6, %v13474_v7  ;;  %v16746_v45 = vld [vmem:[#allocation74_spill] sm:$0xff]  ;;  %v16747_v6 = vld [vmem:[#allocation75_spill] sm:$0xff] }
 0x45c   : > { %16743 = vst [vmem:[#allocation72_spill] sm:$0xff] %v13598_v53  ;;  %v3895_v29 = vmul.f32 %v8399_v17, %v13598_v53  ;;  %v4012_v52 = vmul.f32 %v13264_v63, %v13487_v47  ;;  %9595 = vmatprep.subr.bf16.mxu1 %v9800_v26  ;;  %v3879_v59 = vsub.f32 %v3863_v34, %v3871_v30 }
 0x45d   : > { %v3880_v36 = vsub.f32 %v3864_v0, %v3872_v24  ;;  %v3896_v54 = vmul.f32 %v8400_v14, %v13604_v10  ;;  %v3813_v9 = vmul.f32 %v12712_v25, %v16746_v45  ;;  %v4019_v28 = vsub.f32 %v4003_v41, %v4011_v11 }
 0x45e   : > { %v13621_v61 = vsub.f32 %v3887_v31, %v3895_v29  ;;  %v4020_v60 = vsub.f32 %v4004_v19, %v4012_v52  ;;  %v3814_v7 = vmul.f32 %v12715_v48, %v16747_v6  ;;  %v4079_v47 = vmul.f32 %v12912_v46, %v3879_v59  ;;  %v9802_v46 = vld [vmem:[%s16041_s3 + $0x470] sm:$0xff]   ;;  %v16750_v29 = vld [vmem:[#allocation82_spill] sm:$0xff] }
 0x45f   : > { %v13625_v63 = vsub.f32 %v3888_v62, %v3896_v54  ;;  %v4080_v53 = vmul.f32 %v12915_v15, %v3880_v36  ;;  %v3821_v30 = vmul.f32 %v13409_v55, %v13499_v51  ;;  %9596 = vmatpush3.bf16.msra.mxu1 %v9800_v26  ;;  %v3822_v41 = vmul.f32 %v13412_v18, %v13501_v43  ;;  %v16748_v26 = vld [vmem:[#allocation80_spill] sm:$0xff]  ;;  %v16749_v62 = vld [vmem:[#allocation81_spill] sm:$0xff] }
 0x460   : > { %v4087_v34 = vmul.f32 %v8399_v17, %v13621_v61  ;;  %v4146_v0 = vpack.c.bf16 %v4020_v60, %v4019_v28  ;;  %v4037_v19 = vmul.f32 %v13415_v21, %v13517_v56  ;;  %9597 = vmatprep.subr.bf16.mxu1 %v9801_v32  ;;  %v4038_v51 = vmul.f32 %v13418_v12, %v13521_v5 }
 0x461   : > { %v4088_v15 = vmul.f32 %v8400_v14, %v13625_v63  ;;  %v3829_v24 = vsub.f32 %v3813_v9, %v3821_v30  ;;  %v3599_v17 = vmul.f32 %v12906_v38, %v16748_v26  ;;  %v3830_v43 = vsub.f32 %v3814_v7, %v3822_v41  ;;  %v16753_v30 = vld [vmem:[#allocation77_spill] sm:$0xff]  ;;  %v16755_v41 = vld [vmem:[#allocation83_spill] sm:$0xff]  ;;  %v16756_v26 = vld [vmem:[#allocation84_spill] sm:$0xff] }
 0x462   : > { %v4095_v31 = vsub.f32 %v4079_v47, %v4087_v34  ;;  %4969 = vmatmul.mubr.bf16.gmra.mrb[52].mxu1 %v4146_v0  ;;  %v3600_v56 = vmul.f32 %v16750_v29, %v16749_v62  ;;  %v3607_v11 = vmul.f32 %v13557_v22, %v13539_v33  ;;  %v3608_v14 = vmul.f32 %v13560_v50, %v13548_v40 }
 0x463   : > { %v4096_v52 = vsub.f32 %v4080_v53, %v4088_v15  ;;  %v4029_v54 = vmul.f32 %v12712_v25, %v3829_v24  ;;  %v3847_v5 = vmul.f32 %v13563_v58, %v3639_v49  ;;  %9598 = vmatpush3.bf16.msra.mxu1 %v9801_v32  ;;  %v4030_v45 = vmul.f32 %v12715_v48, %v3830_v43  ;;  %v9803_v25 = vld [vmem:[%s16041_s3 + $0x478] sm:$0xff]  }
 0x464   : > { %v3615_v9 = vsub.f32 %v3599_v17, %v3607_v11  ;;  %v3848_v28 = vmul.f32 %v13566_v42, %v3640_v16  ;;  %v4063_v60 = vmul.f32 %v13569_v1, %v3879_v59  ;;  %9599 = vmatprep.subr.bf16.mxu1 %v9802_v46  ;;  %v3616_v33 = vsub.f32 %v3600_v56, %v3608_v14  ;;  %v16751_v32 = vld [vmem:[#allocation76_spill] sm:$0xff]  ;;  %v16754_v16 = vld [vmem:[#allocation69_spill] sm:$0xff] }
 0x465   : > { %v4172_v6 = vpack.c.bf16 %v4096_v52, %v4095_v31  ;;  %v4045_v7 = vsub.f32 %v4029_v54, %v4037_v19  ;;  %v4064_v53 = vmul.f32 %v13575_v13, %v3880_v36  ;;  %v4046_v40 = vsub.f32 %v4030_v45, %v4038_v51  ;;  %v16752_v48 = vld [vmem:[#allocation68_spill] sm:$0xff]  ;;  %v16757_v14 = vld [vmem:[#allocation85_spill] sm:$0xff] }
 0x466   : > { %v3839_v49 = vmul.f32 %v12906_v38, %v3615_v9  ;;  %v4005_v47 = vmul.f32 %v16752_v48, %v16751_v32  ;;  %v4006_v34 = vmul.f32 %v16754_v16, %v16753_v30  ;;  %v3840_v59 = vmul.f32 %v16750_v29, %v3616_v33  ;;  %v16760_v30 = vld [vmem:[#allocation61_spill] sm:$0xff] }
 0x467   : > { %5049 = vmatprep.mubr.bf16.mxu0 %v4172_v6  ;;  %v4013_v0 = vmul.f32 %v13409_v55, %v3829_v24  ;;  %v4014_v36 = vmul.f32 %v13412_v18, %v3830_v43  ;;  %v3815_v19 = vmul.f32 %v12900_v23, %v16755_v41  ;;  %v4155_v15 = vpack.c.bf16 %v4046_v40, %v4045_v7 }
 0x468   : > { %v3855_v51 = vsub.f32 %v3839_v49, %v3847_v5  ;;  %v3816_v17 = vmul.f32 %v12903_v57, %v16756_v26  ;;  %v3823_v31 = vmul.f32 %v13557_v22, %v3615_v9  ;;  %9600 = vmatpush3.bf16.msra.mxu1 %v9802_v46  ;;  %v3856_v62 = vsub.f32 %v3840_v59, %v3848_v28  ;;  %v16761_v59 = vld [vmem:[#allocation87_spill] sm:$0xff] }
 0x469   : > { %v4021_v56 = vsub.f32 %v4005_v47, %v4013_v0  ;;  %v4022_v11 = vsub.f32 %v4006_v34, %v4014_v36  ;;  %v3824_v52 = vmul.f32 %v13560_v50, %v3616_v33  ;;  %9601 = vmatprep.subr.bf16.mxu1 %v9803_v25  ;;  %4976 = vmatprep.mubr.bf16.mxu1 %v4155_v15  ;;  %v16758_v33 = vld [vmem:[#allocation86_spill] sm:$0xff]  ;;  %vm3266_vm10 = vcmp.ge.f32.partialorder %v16760_v30, 2.2  ;;  %v16762_v36 = vld [vmem:[#allocation88_spill] sm:$0xff] }
 0x46a   : > { %v4055_v24 = vmul.f32 %v12906_v38, %v3855_v51  ;;  %v3831_v43 = vsub.f32 %v3815_v19, %v3823_v31  ;;  %v4039_v54 = vmul.f32 %v13563_v58, %v3855_v51  ;;  %v4007_v5 = vmul.f32 %v12894_v4, %v16757_v14  ;;  %v16763_v31 = vld [vmem:[#allocation94_spill] sm:$0xff]  ;;  %v16767_v14 = vld [vmem:[#allocation92_spill] sm:$0xff] }
 0x46b   : > { %v4056_v45 = vmul.f32 %v16750_v29, %v3856_v62  ;;  %v4147_v6 = vpack.c.bf16 %v4022_v11, %v4021_v56  ;;  %v3832_v9 = vsub.f32 %v3816_v17, %v3824_v52  ;;  %v4040_v46 = vmul.f32 %v13566_v42, %v3856_v62  ;;  %v16759_v29 = vld [vmem:[#allocation63_spill] sm:$0xff]  ;;  %v16764_v56 = vld [vmem:[#allocation89_spill] sm:$0xff] }
 0x46c   : > { %v4071_v28 = vsub.f32 %v4055_v24, %v4063_v60  ;;  %v4031_v7 = vmul.f32 %v12900_v23, %v3831_v43  ;;  %v4008_v40 = vmul.f32 %v12897_v44, %v16758_v33  ;;  %v4015_v38 = vmul.f32 %v13557_v22, %v3831_v43  ;;  %9602 = vmatpush3.bf16.msra.mxu1 %v9803_v25  ;;  %v13686_v48 = vpop.f32.mrb[40].mxu0  ;;  %v16765_v11 = vld [vmem:[#allocation95_spill] sm:$0xff] }
 0x46d   : > { %v4072_v49 = vsub.f32 %v4056_v45, %v4064_v53  ;;  %4977 = vmatmul.mubr.bf16.gmra.mrb[56].mxu1 %v4147_v6  ;;  %v4032_v32 = vmul.f32 %v12903_v57, %v3832_v9  ;;  %v4016_v4 = vmul.f32 %v13560_v50, %v3832_v9  ;;  %vm3265_vm7 = vcmp.ge.f32.partialorder %v16759_v29, 2.2  ;;  %v13690_v44 = vpop.f32.mrb[41].mxu0  ;;  %v16768_v45 = vld [vmem:[#allocation97_spill] sm:$0xff]  ;;  %v16772_v33 = vld [vmem:[#allocation99_spill] sm:$0xff] }
 0x46e   : > { %v4047_v47 = vsub.f32 %v4031_v7, %v4039_v54  ;;  %v4023_v60 = vsub.f32 %v4007_v5, %v4015_v38  ;;  %v8305_v23 = vsel %vm3265_vm7, 1.0, %v16623_v3  ;;  %v8306_v34 = vsel %vm3266_vm10, 1.0, %v16623_v3  ;;  %v13693_v57 = vpop.f32.mrb[42].mxu0  ;;  %v16766_v54 = vld [vmem:[#allocation96_spill] sm:$0xff]  ;;  %v16769_v6 = vld [vmem:[#allocation93_spill] sm:$0xff] }
 0x46f   : > { %v4164_v16 = vpack.c.bf16 %v4072_v49, %v4071_v28  ;;  %v4048_v25 = vsub.f32 %v4032_v32, %v4040_v46  ;;  %v4024_v53 = vsub.f32 %v4008_v40, %v4016_v4  ;;  %v3369_v0 = vsub.f32 %v16761_v59, %v8305_v23  ;;  %v13699_v51 = vpop.f32.mrb[43].mxu0  ;;  %v16770_v46 = vld [vmem:[#allocation98_spill] sm:$0xff]  ;;  %v16773_v40 = vld [vmem:[#allocation91_spill] sm:$0xff]  ;;  %v16775_v32 = vld [vmem:[#allocation64_spill] sm:$0xff] }
 0x470   : > { %v3370_v41 = vsub.f32 %v16762_v36, %v8306_v34  ;;  %v8401_v19 = vadd.f32 -2.2, %v16759_v29  ;;  %v8402_v15 = vadd.f32 -2.2, %v16760_v30  ;;  %v3689_v62 = vmul.f32 %v16763_v31, %v13102_v8  ;;  %v16771_v28 = vld [vmem:[#allocation90_spill] sm:$0xff]  ;;  %v16778_v23 = vld [vmem:[#allocation9_spill] sm:$0xff] }
 0x471   : > { %5050 = vmatmul.mubr.bf16.gmra.mrb[68].mxu0 %v4164_v16  ;;  %v4156_v26 = vpack.c.bf16 %v4048_v25, %v4047_v47  ;;  %v4148_v17 = vpack.c.bf16 %v4024_v53, %v4023_v60  ;;  %v3690_v52 = vmul.f32 %v16765_v11, %v16764_v56  ;;  %v3905_v5 = vmul.f32 %v16767_v14, %v16766_v54  ;;  %v16774_v49 = vld [vmem:[#allocation10_spill] sm:$0xff]  ;;  %v16776_v60 = vld [vmem:[#allocation20_spill] sm:$0xff]  ;;  %v16779_v16 = vld [vmem:[#allocation13_spill] sm:$0xff] }
 0x472   : > { %v3697_v24 = vmul.f32 %v8401_v19, %v3369_v0  ;;  %v3698_v43 = vmul.f32 %v8402_v15, %v3370_v41  ;;  %v3906_v9 = vmul.f32 %v16769_v6, %v16768_v45  ;;  %v4097_v7 = vmul.f32 %v16771_v28, %v16770_v46  ;;  %v16777_v30 = vld [vmem:[#allocation22_spill] sm:$0xff]  ;;  %v16781_v34 = vld [vmem:[#allocation15_spill] sm:$0xff]  ;;  %v16782_v59 = vld [vmem:[#allocation8_spill] sm:$0xff] }
 0x473   : > { %4984 = vmatprep.mubr.bf16.mxu1 %v4156_v26  ;;  %v4098_v38 = vmul.f32 %v16773_v40, %v16772_v33  ;;  %v8403_v8 = vadd.f32 -2.2, %v16774_v49  ;;  %v8404_v4 = vadd.f32 -2.2, %v16775_v32  ;;  %vm3269_vm11 = vcmp.ge.f32.partialorder %v16776_v60, 2.2 }
 0x474   : > { %v3705_v29 = vsub.f32 %v3689_v62, %v3697_v24  ;;  %v3706_v47 = vsub.f32 %v3690_v52, %v3698_v43  ;;  %vm3270_vm12 = vcmp.ge.f32.partialorder %v16777_v30, 2.2  ;;  %v16780_v25 = vsub.f32 %v16778_v23, %v16779_v16  ;;  %v16784_v56 = vld [vmem:[#allocation21_spill] sm:$0xff]  ;;  %v16785_v52 = vld [vmem:[#allocation12_spill] sm:$0xff] }
 0x475   : > { %4985 = vmatmul.mubr.bf16.gmra.mrb[60].mxu1 %v4148_v17  ;;  %v16783_v0 = vsub.f32 %v16781_v34, %v16782_v59  ;;  %v8309_v41 = vsel %vm3269_vm11, 1.0, %v16623_v3  ;;  %v8310_v26 = vsel %vm3270_vm12, 1.0, %v16623_v3  ;;  %v16786_v43 = vld [vmem:[#allocation29_spill] sm:$0xff]  ;;  %v16787_v54 = vld [vmem:[#allocation36_spill] sm:$0xff]  ;;  %v8405_v45 = vadd.f32 -2.2, %v16776_v60 }
 0x476   : > { %v3699_v53 = vmul.f32 %v8403_v8, %v16780_v25  ;;  %v3913_v31 = vmul.f32 %v8401_v19, %v3705_v29  ;;  %v3914_v62 = vmul.f32 %v8402_v15, %v3706_v47  ;;  %v3373_v11 = vsub.f32 %v16784_v56, %v8309_v41  ;;  %v16788_v33 = vld [vmem:[#allocation37_spill] sm:$0xff]  ;;  %v16789_v49 = vld [vmem:[#allocation16_spill] sm:$0xff]  ;;  %v16795_v56 = vld [vmem:[#allocation7_spill] sm:$0xff] }
 0x477   : > { %v3700_v36 = vmul.f32 %v8404_v4, %v16783_v0  ;;  %v3374_v24 = vsub.f32 %v16785_v52, %v8310_v26  ;;  %v8406_v6 = vadd.f32 -2.2, %v16777_v30  ;;  %v3693_v40 = vmul.f32 %v13421_v37, %v16788_v33  ;;  %v16791_v30 = vld [vmem:[#allocation19_spill] sm:$0xff]  ;;  %v16796_v52 = vld [vmem:[#allocation30_spill] sm:$0xff] }
 0x478   : > { %v3707_v17 = vsub.f32 %v16786_v43, %v3699_v53  ;;  %v3921_v46 = vsub.f32 %v3905_v5, %v3913_v31  ;;  %v3922_v28 = vsub.f32 %v3906_v9, %v3914_v62  ;;  %v3694_v32 = vmul.f32 %v13424_v39, %v16789_v49  ;;  %v16790_v5 = vld [vmem:[#allocation6_spill] sm:$0xff] }
 0x479   : > { %v3708_v14 = vsub.f32 %v16787_v54, %v3700_v36  ;;  %v3701_v23 = vmul.f32 %v8405_v45, %v3373_v11  ;;  %v3702_v16 = vmul.f32 %v8406_v6, %v3374_v24  ;;  %v3909_v34 = vmul.f32 %v13415_v21, %v13448_v27  ;;  %v16792_v21 = vld [vmem:[#allocation18_spill] sm:$0xff] }
 0x47a   : > { %v3915_v29 = vmul.f32 %v8403_v8, %v3707_v17  ;;  %v4105_v25 = vmul.f32 %v8401_v19, %v3921_v46  ;;  %v4106_v53 = vmul.f32 %v8402_v15, %v3922_v28  ;;  %v3910_v60 = vmul.f32 %v13418_v12, %v13450_v35  ;;  %v16793_v12 = vld [vmem:[#allocation23_spill] sm:$0xff]  ;;  %v16799_v28 = vld [vmem:[#allocation58_spill] sm:$0xff] }
 0x47b   : > { %v3916_v47 = vmul.f32 %v8404_v4, %v3708_v14  ;;  %v3709_v37 = vsub.f32 %v3693_v40, %v3701_v23  ;;  %v3710_v0 = vsub.f32 %v3694_v32, %v3702_v16  ;;  %v4101_v41 = vmul.f32 %v13409_v55, %v13466_v20  ;;  %v16794_v35 = vld [vmem:[#allocation11_spill] sm:$0xff]  ;;  %v16798_v14 = vld [vmem:[#allocation14_spill] sm:$0xff] }
 0x47c   : > { %v3923_v9 = vsub.f32 %v16790_v5, %v3915_v29  ;;  %v4113_v36 = vsub.f32 %v4097_v7, %v4105_v25  ;;  %v4114_v39 = vsub.f32 %v4098_v38, %v4106_v53  ;;  %v4102_v27 = vmul.f32 %v13412_v18, %v16792_v21  ;;  %v16800_v25 = vld [vmem:[#allocation72_spill] sm:$0xff] }
 0x47d   : > { %v3924_v59 = vsub.f32 %v16791_v30, %v3916_v47  ;;  %v3917_v15 = vmul.f32 %v8405_v45, %v3709_v37  ;;  %v3918_v31 = vmul.f32 %v8406_v6, %v3710_v0  ;;  %vm3271_vm13 = vcmp.ge.f32.partialorder %v16793_v12, 2.2 }
 0x47e   : > { %v4107_v26 = vmul.f32 %v8403_v8, %v3923_v9  ;;  %v4177_v62 = vpack.c.bf16 %v4114_v39, %v4113_v36  ;;  %vm3272_vm14 = vcmp.ge.f32.partialorder %v16794_v35, 2.2  ;;  %v8311_v55 = vsel %vm3271_vm13, 1.0, %v16623_v3 }
 0x47f   : > { %v4108_v19 = vmul.f32 %v8404_v4, %v3924_v59  ;;  %v3925_v38 = vsub.f32 %v3909_v34, %v3917_v15  ;;  %v3926_v24 = vsub.f32 %v3910_v60, %v3918_v31  ;;  %v8312_v20 = vsel %vm3272_vm14, 1.0, %v16623_v3  ;;  %v16797_v4 = vld [vmem:[#allocation60_spill] sm:$0xff] }
 0x480   : > { %v4115_v11 = vsub.f32 %v16795_v56, %v4107_v26  ;;  %9603 = vmatprep.mubr.bf16.mxu1 %v4177_v62  ;;  %v8407_v8 = vadd.f32 -2.2, %v16793_v12  ;;  %v3695_v18 = vmul.f32 %v13569_v1, %v16797_v4  ;;  %v3375_v46 = vsub.f32 %v16798_v14, %v8311_v55 }
 0x481   : > { %v4116_v7 = vsub.f32 %v16796_v52, %v4108_v19  ;;  %v4109_v17 = vmul.f32 %v8405_v45, %v3925_v38  ;;  %v4110_v54 = vmul.f32 %v8406_v6, %v3926_v24  ;;  %v3376_v33 = vsub.f32 %v16799_v28, %v8312_v20 }
 0x482   : > { %v8408_v40 = vadd.f32 -2.2, %v16794_v35  ;;  %v3696_v49 = vmul.f32 %v13575_v13, %v13554_v2  ;;  %v3703_v47 = vmul.f32 %v8407_v8, %v3375_v46  ;;  %v9277_v1 = vadd.f32 %v13690_v44, %v13686_v48 }
 0x483   : > { %v4178_v43 = vpack.c.bf16 %v4116_v7, %v4115_v11  ;;  %v4117_v32 = vsub.f32 %v4101_v41, %v4109_v17  ;;  %v4118_v29 = vsub.f32 %v4102_v27, %v4110_v54  ;;  %v9280_v45 = vadd.f32 %v13699_v51, %v13693_v57 }
 0x484   : > { %v3704_v23 = vmul.f32 %v8408_v40, %v3376_v33  ;;  %v3711_v16 = vsub.f32 %v3695_v18, %v3703_v47  ;;  %v3911_v53 = vmul.f32 %v13563_v58, %v16800_v25  ;;  %v3912_v2 = vmul.f32 %v13566_v42, %v13604_v10 }
 0x485   : > { %9604 = vmatmul.mubr.bf16.vlgmr.msra.gmra.mrb[64].mxu1 %v4178_v43  ;;  %v4179_v6 = vpack.c.bf16 %v4118_v29, %v4117_v32  ;;  %v4103_v9 = vmul.f32 %v13557_v22, %v13621_v61  ;;  %v4104_v57 = vmul.f32 %v13560_v50, %v13625_v63 }
 0x486   : > { %v3712_v34 = vsub.f32 %v3696_v49, %v3704_v23  ;;  %v3919_v13 = vmul.f32 %v8407_v8, %v3711_v16 }
 0x487   : > { %9607 = vmatprep.mubr.bf16.mxu1 %v4179_v6 }
 0x488   : > { %v3920_v60 = vmul.f32 %v8408_v40, %v3712_v34  ;;  %v3927_v5 = vsub.f32 %v3911_v53, %v3919_v13  ;;  %v9804_v53 = vld [vmem:[%s16041_s3 + $0x540] sm:$0xff]  }
 0x489   : > { %v9281_v48 = vpop.f32.mrb[44].mxu0  ;;  %v9805_v34 = vld [vmem:[%s16041_s3 + $0x500] sm:$0xff]   ;;  %9431 = vmatprep.subr.bf16.mxu1 %v9804_v53 }
 0x48a   : > { %v3928_v44 = vsub.f32 %v3912_v2, %v3920_v60  ;;  %v9282_v51 = vpop.f32.mrb[45].mxu0  ;;  %v4111_v30 = vmul.f32 %v8407_v8, %v3927_v5  ;;  %v9806_v2 = vld [vmem:[%s16041_s3 + $0x548] sm:$0xff]   ;;  %9432 = vmatpush3.bf16.msra.mxu1 %v9805_v34 }
 0x48b   : > { %v9283_v59 = vadd.f32 %v9282_v51, %v9281_v48  ;;  %v9284_v58 = vpop.f32.mrb[46].mxu0  ;;  %v9812_v48 = vld [vmem:[%s16041_s3 + $0x480] sm:$0xff]   ;;  %v9814_v51 = vld [vmem:[%s16041_s3 + $0x4c8] sm:$0xff]   ;;  %9433 = vmatprep.subr.bf16.mxu1 %v9806_v2 }
 0x48c   : > { %v4112_v37 = vmul.f32 %v8408_v40, %v3928_v44  ;;  %v9285_v0 = vpop.f32.mrb[47].mxu0  ;;  %v4119_v36 = vsub.f32 %v4103_v9, %v4111_v30  ;;  %v9810_v9 = vld [vmem:[%s16041_s3 + $0x4c0] sm:$0xff]  }
 0x48d   : > { %v9286_v42 = vadd.f32 %v9285_v0, %v9284_v58  ;;  %9391 = vmatprep.subr.bf16.mxu0 %v9810_v9  ;;  %v9816_v58 = vld [vmem:[%s16041_s3 + $0x488] sm:$0xff]   ;;  %v9809_v0 = vld [vmem:[%s16041_s3 + $0x510] sm:$0xff]  }
 0x48e   : > { %v4120_v10 = vsub.f32 %v4104_v57, %v4112_v37  ;;  %v9807_v57 = vld [vmem:[%s16041_s3 + $0x508] sm:$0xff]   ;;  %9392 = vmatpush3.bf16.msra.mxu0 %v9812_v48  ;;  %v9818_v37 = vld [vmem:[%s16041_s3 + $0x4d0] sm:$0xff]  }
 0x48f   : > { %9393 = vmatprep.subr.bf16.mxu0 %v9814_v51  ;;  %9434 = vmatpush3.bf16.msra.mxu1 %v9807_v57 }
 0x490   : > { %v4180_v39 = vpack.c.bf16 %v4120_v10, %v4119_v36  ;;  %v9811_v36 = vld [vmem:[%s16041_s3 + $0x558] sm:$0xff]  }
 0x491   : > { %v9822_v10 = vld [vmem:[%s16041_s3 + $0x4d8] sm:$0xff]  }
 0x492   : > { %9608 = vmatmul.mubr.bf16.gmra.mrb[68].mxu1 %v4180_v39  ;;  %9394 = vmatpush3.bf16.msra.mxu0 %v9816_v58  ;;  %v9813_v39 = vld [vmem:[%s16041_s3 + $0x518] sm:$0xff]  }
 0x493   : > { %9395 = vmatprep.subr.bf16.mxu0 %v9818_v37 }
 0x4ac   : > { %v9287_v41 = vpop.f32.mrb[48].mxu0 }
 0x4ad   : > { %v9288_v26 = vpop.f32.mrb[49].mxu0 }
 0x4ae   : > { %v9289_v22 = vadd.f32 %v9288_v26, %v9287_v41  ;;  %v9290_v61 = vpop.f32.mrb[50].mxu0  ;;  %v9815_v26 = vld [vmem:[%s16041_s3 + $0x560] sm:$0xff]  }
 0x4af   : > { %v9235_v19 = vpop.f32.mrb[32].mxu1  ;;  %v9291_v31 = vpop.f32.mrb[51].mxu0 }
 0x4b0   : > { %v9236_v15 = vpop.f32.mrb[33].mxu1  ;;  %v9292_v63 = vadd.f32 %v9291_v31, %v9290_v61  ;;  %v9826_v31 = vld [vmem:[%s16041_s3 + $0x4e0] sm:$0xff]  }
 0x4b1   : > { %v9237_v62 = vadd.f32 %v9236_v15, %v9235_v19  ;;  %v9238_v50 = vpop.f32.mrb[34].mxu1 }
 0x4b2   : > { %v9239_v21 = vpop.f32.mrb[35].mxu1 }
 0x4b3   : > { %v13771_v27 = vadd.f32 %v9277_v1, %v9237_v62  ;;  %v9240_v12 = vadd.f32 %v9239_v21, %v9238_v50  ;;  %v9817_v50 = vld [vmem:[%s16041_s3 + $0x520] sm:$0xff]  }
 0x4b5   : > { %v13773_v35 = vadd.f32 %v9280_v45, %v9240_v12  ;;  %v9819_v12 = vld [vmem:[%s16041_s3 + $0x568] sm:$0xff]  }
 0x4ce   : > { %v9293_v56 = vpop.f32.mrb[52].mxu0 }
 0x4cf   : > { %v9294_v11 = vpop.f32.mrb[53].mxu0 }
 0x4d0   : > { %v13775_v52 = vadd.f32 %v9294_v11, %v9293_v56  ;;  %v9296_v7 = vpop.f32.mrb[54].mxu0  ;;  %v9828_v56 = vld [vmem:[%s16041_s3 + $0x4a0] sm:$0xff]  }
 0x4d1   : > { %v9297_v38 = vpop.f32.mrb[55].mxu0 }
 0x4d2   : > { %v9241_v24 = vpop.f32.mrb[36].mxu1  ;;  %v13777_v55 = vadd.f32 %v9297_v38, %v9296_v7  ;;  %v9823_v38 = vld [vmem:[%s16041_s3 + $0x570] sm:$0xff]  }
 0x4d3   : > { %v9242_v20 = vpop.f32.mrb[37].mxu1 }
 0x4d4   : > { %v9243_v8 = vadd.f32 %v9242_v20, %v9241_v24  ;;  %v9244_v4 = vpop.f32.mrb[38].mxu1 }
 0x4d5   : > { %v9245_v18 = vpop.f32.mrb[39].mxu1 }
 0x4d6   : > { %v13779_v43 = vadd.f32 %v9283_v59, %v9243_v8  ;;  %v9246_v17 = vadd.f32 %v9245_v18, %v9244_v4  ;;  %v9808_v59 = vld [vmem:[%s16041_s3 + $0x550] sm:$0xff]  }
 0x4d7   : > { %9435 = vmatprep.subr.bf16.mxu1 %v9808_v59 }
 0x4d8   : > { %v13781_v54 = vadd.f32 %v9286_v42, %v9246_v17  ;;  %v9820_v42 = vld [vmem:[%s16041_s3 + $0x490] sm:$0xff]   ;;  %9436 = vmatpush3.bf16.msra.mxu1 %v9809_v0 }
 0x4d9   : > { %9437 = vmatprep.subr.bf16.mxu1 %v9811_v36  ;;  %9396 = vmatpush3.bf16.msra.mxu0 %v9820_v42 }
 0x4da   : > { %9397 = vmatprep.subr.bf16.mxu0 %v9822_v10 }
 0x4dc   : > { %9438 = vmatpush3.bf16.msra.mxu1 %v9813_v39 }
 0x4dd   : > { %9439 = vmatprep.subr.bf16.mxu1 %v9815_v26 }
 0x4e0   : > { %9440 = vmatpush3.bf16.msra.mxu1 %v9817_v50 }
 0x4e1   : > { %9441 = vmatprep.subr.bf16.mxu1 %v9819_v12 }
 0x4eb   : > { %v9355_v14 = vpop.f32.mrb[56].mxu0 }
 0x4ec   : > { %v9356_v46 = vpop.f32.mrb[57].mxu0 }
 0x4ed   : > { %v13783_v28 = vadd.f32 %v9356_v46, %v9355_v14  ;;  %v9358_v33 = vpop.f32.mrb[58].mxu0  ;;  %v9827_v14 = vld [vmem:[%s16041_s3 + $0x578] sm:$0xff]  }
 0x4ee   : > { %v9359_v40 = vpop.f32.mrb[59].mxu0 }
 0x4ef   : > { %v13785_v49 = vadd.f32 %v9359_v40, %v9358_v33  ;;  %v9829_v40 = vld [vmem:[%s16041_s3 + $0x538] sm:$0xff]  }
 0x4f7   : > { %v9247_v32 = vpop.f32.mrb[40].mxu1 }
 0x4f8   : > { %v9248_v29 = vpop.f32.mrb[41].mxu1 }
 0x4f9   : > { %v9249_v47 = vadd.f32 %v9248_v29, %v9247_v32  ;;  %v9250_v23 = vpop.f32.mrb[42].mxu1 }
 0x4fa   : > { %v9251_v1 = vpop.f32.mrb[43].mxu1 }
 0x4fb   : > { %v13787_v45 = vadd.f32 %v9289_v22, %v9249_v47  ;;  %v9252_v6 = vadd.f32 %v9251_v1, %v9250_v23  ;;  %v9824_v22 = vld [vmem:[%s16041_s3 + $0x498] sm:$0xff]  }
 0x4fc   : > { %9398 = vmatpush3.bf16.msra.mxu0 %v9824_v22 }
 0x4fd   : > { %v13789_v16 = vadd.f32 %v9292_v63, %v9252_v6  ;;  %9399 = vmatprep.subr.bf16.mxu0 %v9826_v31 }
 0x500   : > { %9400 = vmatpush3.bf16.msra.mxu0 %v9828_v56 }
 0x50d   : > { %v9361_v25 = vpop.f32.mrb[60].mxu0 }
 0x50e   : > { %v9362_v13 = vpop.f32.mrb[61].mxu0 }
 0x50f   : > { %v13800_v60 = vadd.f32 %v9362_v13, %v9361_v25  ;;  %v9364_v5 = vpop.f32.mrb[62].mxu0 }
 0x510   : > { %v9365_v44 = vpop.f32.mrb[63].mxu0 }
 0x511   : > { %v13814_v30 = vadd.f32 %v9365_v44, %v9364_v5 }
 0x518   : > { %v9253_v41 = vpop.f32.mrb[44].mxu1 }
 0x519   : > { %v9254_v19 = vpop.f32.mrb[45].mxu1 }
 0x51a   : > { %v9255_v61 = vadd.f32 %v9254_v19, %v9253_v41  ;;  %v9256_v15 = vpop.f32.mrb[46].mxu1  ;;  %v9836_v19 = vld [vmem:[%s16041_s3 + $0x4b0] sm:$0xff]  }
 0x51b   : > { %v9257_v62 = vpop.f32.mrb[47].mxu1 }
 0x51c   : > { %v13853_v63 = vadd.f32 %v13775_v52, %v9255_v61  ;;  %v9258_v21 = vadd.f32 %v9257_v62, %v9256_v15  ;;  %v9821_v52 = vld [vmem:[%s16041_s3 + $0x528] sm:$0xff]  }
 0x51d   : > { %9442 = vmatpush3.bf16.msra.mxu1 %v9821_v52 }
 0x51e   : > { %v13862_v11 = vadd.f32 %v13777_v55, %v9258_v21  ;;  %v9825_v55 = vld [vmem:[%s16041_s3 + $0x530] sm:$0xff]   ;;  %9443 = vmatprep.subr.bf16.mxu1 %v9823_v38 }
 0x520   : > { %v9315_v7 = vpop.f32.mrb[48].mxu1 }
 0x521   : > { %v9316_v24 = vpop.f32.mrb[49].mxu1  ;;  %9444 = vmatpush3.bf16.msra.mxu1 %v9825_v55 }
 0x522   : > { %v9317_v20 = vadd.f32 %v9316_v24, %v9315_v7  ;;  %v9318_v8 = vpop.f32.mrb[50].mxu1  ;;  %9445 = vmatprep.subr.bf16.mxu1 %v9827_v14  ;;  %v9840_v7 = vld [vmem:[%s16041_s3 + $0x4b8] sm:$0xff]   ;;  %v8625_v24 = vld [vmem:[%s16042_s4 + $0x10] sm:$0xff] }
 0x523   : > { %v9319_v4 = vpop.f32.mrb[51].mxu1 }
 0x524   : > { %v4963_v18 = vadd.f32 %v9317_v20, %v13771_v27  ;;  %v9320_v17 = vadd.f32 %v9319_v4, %v9318_v8  ;;  %v16801_v20 = vld [vmem:[#allocation27_spill] sm:$0xff] }
 0x525   : > { %9446 = vmatpush3.bf16.msra.mxu1 %v9829_v40  ;;  %v13930_v8 = vrot.slane %v8625_v24, %v16801_v20 }
 0x526   : > { %v4966_v46 = vadd.f32 %v9320_v17, %v13773_v35  ;;  %v13879_v33 = vadd.f32 %v13783_v28, %v4963_v18  ;;  %v9830_v35 = vld [vmem:[%s16041_s3 + $0x4e8] sm:$0xff]   ;;  %v9831_v28 = vld [vmem:[%s16041_s3 + $0x640] sm:$0xff]  }
 0x527   : > { %9401 = vmatprep.subr.bf16.mxu0 %v9830_v35  ;;  %9511 = vmatprep.subr.bf16.mxu1 %v9831_v28  ;;  %v16804_v17 = vld [vmem:[#allocation38_spill] sm:$0xff] }
 0x528   : > { %v13885_v29 = vadd.f32 %v13785_v49, %v4966_v46  ;;  %v9832_v49 = vld [vmem:[%s16041_s3 + $0x4a8] sm:$0xff]   ;;  %v13939_v14 = vrot.slane %v8625_v24, %v16804_v17 }
 0x529   : > { %v9367_v32 = vpop.f32.mrb[64].mxu0  ;;  %9402 = vmatpush3.bf16.msra.mxu0 %v9832_v49  ;;  %v16805_v46 = vld [vmem:[#allocation42_spill] sm:$0xff] }
 0x52a   : > { %v9368_v27 = vpop.f32.mrb[65].mxu0  ;;  %v13942_v40 = vrot.slane %v8625_v24, %v16805_v46  ;;  %v16808_v35 = vld [vmem:[#allocation34_spill] sm:$0xff] }
 0x52b   : > { %v9369_v47 = vadd.f32 %v9368_v27, %v9367_v32  ;;  %v9370_v23 = vpop.f32.mrb[66].mxu0  ;;  %v16806_v27 = vld [vmem:[#allocation43_spill] sm:$0xff]  ;;  %v13951_v28 = vrot.slane %v8625_v24, %v16808_v35 }
 0x52c   : > { %v9371_v1 = vpop.f32.mrb[67].mxu0 }
 0x52d   : > { %v9372_v6 = vadd.f32 %v9371_v1, %v9370_v23  ;;  %v16807_v23 = vld [vmem:[#allocation49_spill] sm:$0xff] }
 0x52e   : > { %v13948_v1 = vrot.slane %v8625_v24, %v16807_v23 }
 0x535   : > { %v9321_v25 = vpop.f32.mrb[52].mxu1 }
 0x536   : > { %v9322_v53 = vpop.f32.mrb[53].mxu1 }
 0x537   : > { %v9323_v34 = vadd.f32 %v9322_v53, %v9321_v25  ;;  %v9324_v2 = vpop.f32.mrb[54].mxu1  ;;  %v5155_v25 = vmul.f32 0.0, %v13930_v8 }
 0x538   : > { %v9325_v13 = vpop.f32.mrb[55].mxu1 }
 0x539   : > { %v4971_v5 = vadd.f32 %v9323_v34, %v13779_v43  ;;  %v9326_v9 = vadd.f32 %v9325_v13, %v9324_v2  ;;  %v13959_v2 = vld [vmem:[%s16042_s4 + $0x18] ss:$0 sm:$0xff] }
 0x53b   : > { %v4974_v48 = vadd.f32 %v9326_v9, %v13781_v54  ;;  %v5036_v44 = vadd.f32 %v13800_v60, %v4971_v5  ;;  %v9834_v60 = vld [vmem:[%s16041_s3 + $0x4f0] sm:$0xff]   ;;  %v13963_v9 = vmul.f32 0.0, %v13942_v40 }
 0x53c   : > { %9403 = vmatprep.subr.bf16.mxu0 %v9834_v60 }
 0x53d   : > { %v13900_v57 = vadd.f32 %v13814_v30, %v4974_v48  ;;  %9404 = vmatpush3.bf16.msra.mxu0 %v9836_v19  ;;  %v13966_v48 = vmul.f32 0.0, %v13948_v1 }
 0x540   : > { %v9327_v51 = vpop.f32.mrb[56].mxu1 }
 0x541   : > { %v9328_v59 = vpop.f32.mrb[57].mxu1 }
 0x542   : > { %v9329_v58 = vadd.f32 %v9328_v59, %v9327_v51  ;;  %v9330_v37 = vpop.f32.mrb[58].mxu1 }
 0x543   : > { %v9331_v0 = vpop.f32.mrb[59].mxu1 }
 0x544   : > { %v9373_v36 = vpop.f32.mrb[68].mxu0  ;;  %v4979_v42 = vadd.f32 %v9329_v58, %v13787_v45  ;;  %v9332_v10 = vadd.f32 %v9331_v0, %v9330_v37  ;;  %v9838_v45 = vld [vmem:[%s16041_s3 + $0x4f8] sm:$0xff]  }
 0x545   : > { %v9374_v39 = vpop.f32.mrb[69].mxu0  ;;  %9405 = vmatprep.subr.bf16.mxu0 %v9838_v45 }
 0x546   : > { %v9375_v41 = vadd.f32 %v9374_v39, %v9373_v36  ;;  %v9376_v43 = vpop.f32.mrb[70].mxu0  ;;  %v4982_v26 = vadd.f32 %v9332_v10, %v13789_v16  ;;  %v13904_v54 = vadd.f32 %v9369_v47, %v4979_v42  ;;  %9406 = vmatpush3.bf16.msra.mxu0 %v9840_v7  ;;  %v13945_v47 = vrot.slane %v8625_v24, %v16806_v27  ;;  %v9842_v7 = vld [vmem:[%s16041_s3 + $0x5c0] sm:$0xff]  }
 0x547   : > { %v9377_v30 = vpop.f32.mrb[71].mxu0  ;;  %9471 = vmatprep.subr.bf16.mxu0 %v9842_v7 }
 0x548   : > { %v9378_v22 = vadd.f32 %v9377_v30, %v9376_v43  ;;  %v9333_v61 = vpop.f32.mrb[60].mxu1  ;;  %v13915_v15 = vadd.f32 %v9372_v6, %v4982_v26 }
 0x549   : > { %v9334_v16 = vpop.f32.mrb[61].mxu1 }
 0x54a   : > { %v9335_v31 = vadd.f32 %v9334_v16, %v9333_v61  ;;  %v9336_v62 = vpop.f32.mrb[62].mxu1 }
 0x54b   : > { %v9337_v50 = vpop.f32.mrb[63].mxu1 }
 0x54c   : > { %v4987_v21 = vadd.f32 %v9335_v31, %v13853_v63  ;;  %v9338_v12 = vadd.f32 %v9337_v50, %v9336_v62  ;;  %v16802_v63 = vld [vmem:[#allocation39_spill] sm:$0xff] }
 0x54d   : > { %v13933_v4 = vrot.slane %v8625_v24, %v16802_v63 }
 0x54e   : > { %v4990_v56 = vadd.f32 %v9338_v12, %v13862_v11  ;;  %v13919_v52 = vadd.f32 %v9375_v41, %v4987_v21  ;;  %v16803_v11 = vld [vmem:[#allocation50_spill] sm:$0xff] }
 0x54f   : > { %v13936_v55 = vrot.slane %v8625_v24, %v16803_v11  ;;  %v5207_v53 = vmul.f32 0.0, %v13933_v4 }
 0x550   : > { %v13924_v38 = vadd.f32 %v9378_v22, %v4990_v56 }
 0x551   : > { %v5259_v13 = vmul.f32 0.0, %v13936_v55 }
 0x558   : > { %v9605_v18 = vpop.f32.mrb[64].mxu1 }
 0x559   : > { %v5101_v32 = vadd.f32 %v9605_v18, %v5036_v44  ;;  %v5092_v6 = vpop.f32.mrb[65].mxu1 }
 0x55a   : > { %v5093_v49 = vadd.f32 %v5092_v6, %v13879_v33  ;;  %v9606_v34 = vpop.f32.mrb[66].mxu1  ;;  %v13969_v33 = vmul.f32 0.0, %v13959_v2 }
 0x55b   : > { %v5095_v5 = vpop.f32.mrb[67].mxu1  ;;  %v5158_v44 = vmul.f32 %v13930_v8, %v5101_v32  ;;  %v5169_v51 = vmul.f32 %v13939_v14, %v5101_v32  ;;  %v5188_v59 = vmul.f32 %v13942_v40, %v5101_v32  ;;  %v5210_v58 = vmul.f32 %v13933_v4, %v5101_v32 }
 0x55c   : > { %v5221_v37 = vmul.f32 %v13945_v47, %v5101_v32  ;;  %v5240_v0 = vmul.f32 %v13948_v1, %v5101_v32  ;;  %v5167_v36 = vmul.f32 %v13939_v14, %v5093_v49  ;;  %v5219_v42 = vmul.f32 %v13945_v47, %v5093_v49 }
 0x55d   : > { %v5262_v10 = vmul.f32 %v13936_v55, %v5101_v32  ;;  %v5271_v39 = vmul.f32 %v13951_v28, %v5093_v49  ;;  %v5104_v41 = vadd.f32 %v9606_v34, %v13900_v57  ;;  %v5096_v43 = vadd.f32 %v5095_v5, %v13885_v29 }
 0x55e   : > { %v5273_v26 = vmul.f32 %v13951_v28, %v5101_v32  ;;  %v5156_v60 = vmul.f32 %v13930_v8, %v5093_v49  ;;  %v5208_v30 = vmul.f32 %v13933_v4, %v5093_v49  ;;  %v5260_v19 = vmul.f32 %v13936_v55, %v5093_v49 }
 0x55f   : > { %v5175_v45 = vadd.f32 %v5167_v36, %v5155_v25  ;;  %v5227_v22 = vadd.f32 %v5219_v42, %v5207_v53  ;;  %v5170_v61 = vmul.f32 %v13939_v14, %v5104_v41  ;;  %v5292_v16 = vmul.f32 %v13959_v2, %v5101_v32 }
 0x560   : > { %v5279_v31 = vadd.f32 %v5271_v39, %v5259_v13  ;;  %v5189_v62 = vmul.f32 %v13942_v40, %v5104_v41  ;;  %v5222_v57 = vmul.f32 %v13945_v47, %v5104_v41  ;;  %v5241_v29 = vmul.f32 %v13948_v1, %v5104_v41 }
 0x561   : > { %v5178_v50 = vadd.f32 %v5170_v61, %v5158_v44  ;;  %v5274_v21 = vmul.f32 %v13951_v28, %v5104_v41  ;;  %v5157_v12 = vmul.f32 %v13930_v8, %v5096_v43  ;;  %v5168_v56 = vmul.f32 %v13939_v14, %v5096_v43 }
 0x562   : > { %v5230_v24 = vadd.f32 %v5222_v57, %v5210_v58  ;;  %v5209_v18 = vmul.f32 %v13933_v4, %v5096_v43  ;;  %v5220_v32 = vmul.f32 %v13945_v47, %v5096_v43  ;;  %v5261_v6 = vmul.f32 %v13936_v55, %v5096_v43 }
 0x563   : > { %v14001_v49 = vadd.f32 %v5274_v21, %v5262_v10  ;;  %v5176_v25 = vadd.f32 %v5168_v56, %v5156_v60  ;;  %v5177_v53 = vadd.f32 %v5169_v51, %v5157_v12  ;;  %v5272_v34 = vmul.f32 %v13951_v28, %v5096_v43 }
 0x564   : > { %v5228_v13 = vadd.f32 %v5220_v32, %v5208_v30  ;;  %v5229_v5 = vadd.f32 %v5221_v37, %v5209_v18  ;;  %v5281_v44 = vadd.f32 %v5273_v26, %v5261_v6  ;;  %v5187_v36 = vmul.f32 %v13942_v40, %v5096_v43 }
 0x565   : > { %v14005_v42 = vadd.f32 %v5189_v62, %v5177_v53  ;;  %v14007_v58 = vadd.f32 %v5188_v59, %v5176_v25  ;;  %v5239_v39 = vmul.f32 %v13948_v1, %v5096_v43  ;;  %v5280_v61 = vadd.f32 %v5272_v34, %v5260_v19  ;;  %v9609_v21 = vpop.f32.mrb[68].mxu1 }
 0x566   : > { %v5248_v57 = vadd.f32 %v5240_v0, %v5228_v13  ;;  %v5249_v10 = vadd.f32 %v5241_v29, %v5229_v5  ;;  %v14010_v60 = vadd.f32 %v5187_v36, %v5175_v45  ;;  %v5291_v51 = vmul.f32 %v13959_v2, %v5096_v43  ;;  %v5108_v62 = vpop.f32.mrb[69].mxu1  ;;  %v14021_v45 = vld [vmem:[%s16043_s5 + $0x1] ss:$0 sm:$0xff] }
 0x567   : > { %v5159_v30 = vmul.f32 %v13930_v8, %v5104_v41  ;;  %v5211_v37 = vmul.f32 %v13933_v4, %v5104_v41  ;;  %v5117_v26 = vadd.f32 %v9609_v21, %v13919_v52  ;;  %v5247_v12 = vadd.f32 %v5239_v39, %v5227_v22  ;;  %v9610_v19 = vpop.f32.mrb[70].mxu1 }
 0x568   : > { %v5263_v59 = vmul.f32 %v13936_v55, %v5104_v41  ;;  %v5109_v56 = vadd.f32 %v5108_v62, %v13904_v54  ;;  %v5299_v0 = vadd.f32 %v5291_v51, %v5279_v31  ;;  %v5300_v29 = vadd.f32 %v5292_v16, %v5280_v61  ;;  %v14031_v18 = vpop.f32.mrb[71].mxu1 }
 0x569   : > { %v5357_v43 = vrot.slane %v14005_v42, 7  ;;  %v14025_v7 = vmul.f32 %v13939_v14, %v5117_v26  ;;  %v5293_v52 = vmul.f32 %v13959_v2, %v5104_v41  ;;  %v14029_v22 = vadd.f32 %v14021_v45, %v5248_v57  ;;  %v16816_v42 = vld [vmem:[#allocation45_spill] sm:$0xff] }
 0x56a   : > { %v14034_v54 = vmul.f32 %v13942_v40, %v5117_v26  ;;  %v14037_v16 = vmul.f32 %v13945_v47, %v5117_v26  ;;  %v5171_v31 = vmul.f32 %v13939_v14, %v5109_v56  ;;  %v5190_v32 = vmul.f32 %v13942_v40, %v5109_v56 }
 0x56b   : > { %v14042_v6 = vmul.f32 %v13948_v1, %v5117_v26  ;;  %v14045_v41 = vmul.f32 %v13951_v28, %v5117_v26  ;;  %v5223_v25 = vmul.f32 %v13945_v47, %v5109_v56  ;;  %v5242_v53 = vmul.f32 %v13948_v1, %v5109_v56 }
 0x56c   : > { %v14049_v34 = vadd.f32 %v5171_v31, %v5159_v30  ;;  %v14051_v13 = vadd.f32 %v5190_v32, %v5178_v50  ;;  %v5275_v5 = vmul.f32 %v13951_v28, %v5109_v56  ;;  %v5120_v36 = vadd.f32 %v9610_v19, %v13924_v38 }
 0x56d   : > { %v14056_v39 = vmul.f32 %v13930_v8, %v5109_v56  ;;  %v14059_v61 = vmul.f32 %v13933_v4, %v5109_v56  ;;  %v14061_v57 = vadd.f32 %v5223_v25, %v5211_v37  ;;  %v5250_v21 = vadd.f32 %v5242_v53, %v5230_v24 }
 0x56e   : > { %v14063_v51 = vadd.f32 %v5275_v5, %v5263_v59  ;;  %v16288_v30 = vrot.slane %v14051_v13, 7  ;;  %v5162_v50 = vmul.f32 %v13930_v8, %v5117_v26  ;;  %v5174_v62 = vmul.f32 %v13939_v14, %v5120_v36 }
 0x56f   : > { %v5214_v31 = vmul.f32 %v13933_v4, %v5117_v26  ;;  %v5226_v38 = vmul.f32 %v13945_v47, %v5120_v36  ;;  %v5266_v19 = vmul.f32 %v13936_v55, %v5117_v26  ;;  %v5278_v32 = vmul.f32 %v13951_v28, %v5120_v36 }
 0x570   : > { %v14073_v37 = vmul.f32 %v13936_v55, %v5109_v56  ;;  %v5367_v59 = vsel %vm2904_vm8, %v5357_v43, %v16288_v30  ;;  %v5182_v25 = vadd.f32 %v5174_v62, %v5162_v50  ;;  %v5294_v53 = vmul.f32 %v13959_v2, %v5109_v56 }
 0x571   : > { %v14083_v5 = vmul.f32 %v13942_v40, %v5120_v36  ;;  %v5234_v11 = vadd.f32 %v5226_v38, %v5214_v31  ;;  %v14086_v20 = vmul.f32 %v13948_v1, %v5120_v36  ;;  %v5286_v35 = vadd.f32 %v5278_v32, %v5266_v19 }
 0x572   : > { %v14089_v23 = vadd.f32 %v13963_v9, %v5182_v25  ;;  %v14092_v27 = vmul.f32 %v13959_v2, %v5117_v26  ;;  %v5301_v63 = vadd.f32 %v5293_v52, %v5281_v44  ;;  %v14095_v30 = vadd.f32 %v5294_v53, %v14001_v49  ;;  %v16813_v25 = vld [vmem:[#allocation54_spill] sm:$0xff] }
 0x573   : > { %v5254_v56 = vadd.f32 %v13966_v48, %v5234_v11  ;;  %v14099_v50 = vadd.f32 %v13969_v33, %v5286_v35  ;;  %v5315_v62 = vadd.f32 %v14021_v45, %v5247_v12  ;;  %v5317_v31 = vadd.f32 %v14021_v45, %v5249_v10  ;;  %v16811_v12 = vld [vmem:[#allocation53_spill] sm:$0xff] }
 0x574   : > { %v5323_v38 = vrot.slane %v5299_v0, 1  ;;  %v5324_v19 = vrot.slane %v5300_v29, 1  ;;  %v5325_v9 = vrot.slane %v5301_v63, 1  ;;  %v16289_v32 = vrot.slane %v14095_v30, 1  ;;  %v16812_v29 = vld [vmem:[#allocation52_spill] sm:$0xff] }
 0x575   : > { %v5322_v26 = vadd.f32 %v14021_v45, %v5254_v56  ;;  %v16290_v44 = vrot.slane %v14099_v50, 1  ;;  %v5355_v49 = vrot.slane %v14010_v60, 7  ;;  %v5356_v11 = vrot.slane %v14007_v58, 7  ;;  %v16810_v60 = vld [vmem:[#allocation51_spill] sm:$0xff] }
 0x576   : > { %v5335_v35 = vsel %vm2871_vm9, %v5325_v9, %v16289_v32  ;;  %v5336_v48 = vsel %vm2871_vm9, %v5324_v19, %v5325_v9  ;;  %v5337_v63 = vsel %vm2871_vm9, %v5323_v38, %v5324_v19  ;;  %v5362_v33 = vrot.slane %v14089_v23, 7 }
 0x577   : > { %v5338_v10 = vsel %vm2871_vm9, %v16290_v44, %v5323_v38  ;;  %v5339_v58 = vmul.f32 %v16810_v60, %v5337_v63  ;;  %v5340_v0 = vmul.f32 %v16811_v12, %v5336_v48  ;;  %v5341_v52 = vmul.f32 %v16812_v29, %v5335_v35  ;;  %v16814_v48 = vld [vmem:[#allocation35_spill] sm:$0xff]  ;;  %v16817_v12 = vld [vmem:[#allocation24_spill] sm:$0xff] }
 0x578   : > { %v5346_v53 = vmul.f32 %v16813_v25, %v5338_v10  ;;  %v5368_v56 = vsel %vm2904_vm8, %v5356_v11, %v5357_v43  ;;  %v5369_v23 = vsel %vm2904_vm8, %v5355_v49, %v5356_v11  ;;  %v5370_v19 = vsel %vm2904_vm8, %v5362_v33, %v5355_v49  ;;  %v16815_v10 = vld [vmem:[#allocation25_spill] sm:$0xff] }
 0x579   : > { %v5347_v38 = vadd.f32 %v5339_v58, %v5315_v62  ;;  %v5348_v9 = vadd.f32 %v5340_v0, %v14029_v22  ;;  %v5349_v63 = vadd.f32 %v5341_v52, %v5317_v31  ;;  %v5371_v32 = vmul.f32 %v16814_v48, %v5370_v19 }
 0x57a   : > { %v14135_v35 = vadd.f32 %v5346_v53, %v5322_v26  ;;  %v5372_v44 = vmul.f32 %v16815_v10, %v5369_v23  ;;  %v5373_v29 = vmul.f32 %v16816_v42, %v5368_v56  ;;  %v5112_v43 = vadd.f32 %v14031_v18, %v13915_v15 }
 0x57b   : > { %v14142_v11 = vmul.f32 %v16817_v12, %v5367_v59  ;;  %v5297_v49 = vmul.f32 %v13959_v2, %v5120_v36  ;;  %v5318_v62 = vadd.f32 %v14021_v45, %v5250_v21  ;;  %v14146_v22 = vadd.f32 %v5371_v32, %v5347_v38  ;;  %v16819_v38 = vld [vmem:[#allocation47_spill] sm:$0xff] }
 0x57c   : > { %v14148_v31 = vadd.f32 %v5372_v44, %v5348_v9  ;;  %v14150_v26 = vadd.f32 %v5373_v29, %v5349_v63  ;;  %v5161_v58 = vmul.f32 %v13930_v8, %v5112_v43  ;;  %v5172_v0 = vmul.f32 %v13939_v14, %v5112_v43 }
 0x57d   : > { %5387 = vst [vmem:[#allocation2] sm:$0xff] %v14146_v22  ;;  %v5191_v15 = vmul.f32 %v13942_v40, %v5112_v43  ;;  %v5213_v18 = vmul.f32 %v13933_v4, %v5112_v43  ;;  %v5224_v36 = vmul.f32 %v13945_v47, %v5112_v43  ;;  %v5243_v21 = vmul.f32 %v13948_v1, %v5112_v43 }
 0x57e   : > { %5388 = vst [vmem:[#allocation2 + $0x8] sm:$0xff] %v14148_v31  ;;  %5389 = vst [vmem:[#allocation2 + $0x10] sm:$0xff] %v14150_v26  ;;  %v5180_v59 = vadd.f32 %v5172_v0, %v14056_v39  ;;  %v5181_v8 = vadd.f32 %v14025_v7, %v5161_v58  ;;  %v5265_v14 = vmul.f32 %v13936_v55, %v5112_v43  ;;  %v16820_v9 = vrot.slane %v14099_v50, 1  ;;  %v16822_v58 = vld [vmem:[#allocation41_spill] sm:$0xff] }
 0x57f   : > { %v5276_v32 = vmul.f32 %v13951_v28, %v5112_v43  ;;  %v5199_v40 = vadd.f32 %v5191_v15, %v14049_v34  ;;  %v5232_v4 = vadd.f32 %v5224_v36, %v14059_v61  ;;  %v5233_v47 = vadd.f32 %v14037_v16, %v5213_v18  ;;  %v16824_v36 = vld [vmem:[#allocation56_spill] sm:$0xff] }
 0x580   : > { %v5251_v1 = vadd.f32 %v5243_v21, %v14061_v57  ;;  %v5200_v44 = vadd.f32 %v14034_v54, %v5180_v59  ;;  %v5201_v29 = vadd.f32 %v14083_v5, %v5181_v8  ;;  %v5285_v7 = vadd.f32 %v14045_v41, %v5265_v14  ;;  %v16825_v21 = vld [vmem:[#allocation57_spill] sm:$0xff]  ;;  %v16826_v8 = vld [vmem:[#allocation48_spill] sm:$0xff] }
 0x581   : > { %v5284_v39 = vadd.f32 %v5276_v32, %v14073_v37  ;;  %v5252_v55 = vadd.f32 %v14042_v6, %v5232_v4  ;;  %v5253_v28 = vadd.f32 %v14086_v20, %v5233_v47  ;;  %v5295_v34 = vmul.f32 %v13959_v2, %v5112_v43  ;;  %v16821_v43 = vld [vmem:[#allocation40_spill] sm:$0xff]  ;;  %v16827_v32 = vld [vmem:[#allocation55_spill] sm:$0xff]  ;;  %v16828_v4 = vld [vmem:[#allocation46_spill] sm:$0xff] }
 0x582   : > { %v5319_v61 = vadd.f32 %v14021_v45, %v5251_v1  ;;  %v5305_v52 = vadd.f32 %v5297_v49, %v5285_v7  ;;  %v5359_v57 = vrot.slane %v5199_v40, 7  ;;  %v5360_v53 = vrot.slane %v5200_v44, 7 }
 0x583   : > { %v5304_v16 = vadd.f32 %v14092_v27, %v5284_v39  ;;  %v5303_v54 = vadd.f32 %v5295_v34, %v14063_v51  ;;  %v5320_v5 = vadd.f32 %v14021_v45, %v5252_v55  ;;  %v5321_v37 = vadd.f32 %v14021_v45, %v5253_v28 }
 0x584   : > { %v5361_v41 = vrot.slane %v5201_v29, 7  ;;  %v5329_v6 = vrot.slane %v5305_v52, 1  ;;  %v5365_v20 = vsel %vm2904_vm8, %v5359_v57, %v5360_v53  ;;  %v16818_v2 = vrot.slane %v14051_v13, 7 }
 0x585   : > { %v5328_v56 = vrot.slane %v5304_v16, 1  ;;  %v5327_v23 = vrot.slane %v5303_v54, 1  ;;  %v5376_v49 = vmul.f32 %v16821_v43, %v5365_v20  ;;  %v16823_v15 = vrot.slane %v14095_v30, 1 }
 0x586   : > { %v5366_v27 = vsel %vm2904_vm8, %v16818_v2, %v5359_v57  ;;  %v5363_v19 = vsel %vm2904_vm8, %v5361_v41, %v5362_v33  ;;  %v5364_v51 = vsel %vm2904_vm8, %v5360_v53, %v5361_v41  ;;  %v5331_v63 = vsel %vm2871_vm9, %v5329_v6, %v16820_v9 }
 0x587   : > { %v5375_v45 = vmul.f32 %v16819_v38, %v5366_v27  ;;  %v5332_v13 = vsel %vm2871_vm9, %v5328_v56, %v5329_v6  ;;  %v5377_v0 = vmul.f32 %v16822_v58, %v5364_v51  ;;  %v5333_v33 = vsel %vm2871_vm9, %v5327_v23, %v5328_v56 }
 0x588   : > { %v5334_v18 = vsel %vm2871_vm9, %v16823_v15, %v5327_v23  ;;  %v5344_v50 = vmul.f32 %v16824_v36, %v5332_v13  ;;  %v5345_v59 = vmul.f32 %v16825_v21, %v5331_v63  ;;  %v5343_v40 = vmul.f32 %v16827_v32, %v5333_v33  ;;  %v9841_v21 = vld [vmem:[%s16041_s3 + $0x610] sm:$0xff]  }
 0x589   : > { %v5342_v14 = vmul.f32 %v16826_v8, %v5334_v18  ;;  %v5378_v47 = vmul.f32 %v16828_v4, %v5363_v19  ;;  %vm5459_vm15 = vcmp.ge.f32.partialorder %v14146_v22, -2.2  ;;  %vm5460_vm1 = vcmp.ge.f32.partialorder %v14148_v31, -2.2 }
 0x58a   : > { %v5352_v1 = vadd.f32 %v5344_v50, %v5320_v5  ;;  %v5353_v44 = vadd.f32 %v5345_v59, %v5321_v37  ;;  %v8630_v30 = vsel %vm5459_vm15, 1.0, %v16623_v3  ;;  %v5351_v39 = vadd.f32 %v5343_v40, %v5319_v61 }
 0x58b   : > { %v5350_v29 = vadd.f32 %v5342_v14, %v5318_v62  ;;  %v14215_v7 = vadd.f32 %v5378_v47, %v14135_v35  ;;  %v8631_v55 = vsel %vm5460_vm1, 1.0, %v16623_v3  ;;  %vm5483_vm2 = vcmp.ge.f32.partialorder %v14146_v22, -1.8 }
 0x58c   : > { %v14218_v28 = vadd.f32 %v5376_v49, %v5352_v1  ;;  %v14220_v34 = vadd.f32 %v5377_v0, %v5353_v44  ;;  %vm5484_vm3 = vcmp.ge.f32.partialorder %v14148_v31, -1.8  ;;  %v14227_v52 = vadd.f32 %v5375_v45, %v5351_v39 }
 0x58d   : > { %v14225_v16 = vadd.f32 %v14142_v11, %v5350_v29  ;;  %5394 = vst [vmem:[#allocation2 + $0x38] sm:$0xff] %v14215_v7  ;;  %v8638_v35 = vsel %vm5483_vm2, 1.0, %v16623_v3  ;;  %v8639_v62 = vsel %vm5484_vm3, 1.0, %v16623_v3  ;;  %vm5507_vm4 = vcmp.ge.f32.partialorder %v14146_v22, -1.4 }
 0x58e   : > { %5392 = vst [vmem:[#allocation2 + $0x28] sm:$0xff] %v14218_v28  ;;  %5393 = vst [vmem:[#allocation2 + $0x30] sm:$0xff] %v14220_v34  ;;  %vm5508_vm5 = vcmp.ge.f32.partialorder %v14148_v31, -1.4  ;;  %vm5531_vm6 = vcmp.ge.f32.partialorder %v14146_v22, -1.0  ;;  %vm5532_vm7 = vcmp.ge.f32.partialorder %v14148_v31, -1.0  ;;  %v5747_v37 = vsub.f32 %v8630_v30, %v8638_v35 }
 0x58f   : > { %5390 = vst [vmem:[#allocation2 + $0x18] sm:$0xff] %v14225_v16  ;;  %5391 = vst [vmem:[#allocation2 + $0x20] sm:$0xff] %v14227_v52  ;;  %v8646_v11 = vsel %vm5507_vm4, 1.0, %v16623_v3  ;;  %v8647_v61 = vsel %vm5508_vm5, 1.0, %v16623_v3  ;;  %v8654_v57 = vsel %vm5531_vm6, 1.0, %v16623_v3  ;;  %v8655_v53 = vsel %vm5532_vm7, 1.0, %v16623_v3 }
 0x590   : > { %vm5555_vm10 = vcmp.ge.f32.partialorder %v14146_v22, -0.6  ;;  %vm5556_vm11 = vcmp.ge.f32.partialorder %v14148_v31, -0.6  ;;  %v5748_v41 = vsub.f32 %v8631_v55, %v8639_v62  ;;  %v5755_v56 = vsub.f32 %v8638_v35, %v8646_v11 }
 0x591   : > { %v8662_v54 = vsel %vm5555_vm10, 1.0, %v16623_v3  ;;  %v8663_v5 = vsel %vm5556_vm11, 1.0, %v16623_v3  ;;  %v5756_v6 = vsub.f32 %v8639_v62, %v8647_v61  ;;  %v5763_v20 = vsub.f32 %v8646_v11, %v8654_v57 }
 0x592   : > { %v5764_v2 = vsub.f32 %v8647_v61, %v8655_v53  ;;  %v14248_v27 = vsub.f32 %v8654_v57, %v8662_v54  ;;  %v8726_v23 = vadd.f32 2.2, %v14146_v22  ;;  %v8727_v19 = vadd.f32 2.2, %v14148_v31 }
 0x593   : > { %v14253_v51 = vadd.f32 1.8, %v14146_v22  ;;  %v5772_v45 = vsub.f32 %v8655_v53, %v8663_v5  ;;  %v14256_v9 = vadd.f32 1.8, %v14148_v31  ;;  %v14259_v63 = vadd.f32 1.4, %v14146_v22 }
 0x594   : > { %v14262_v13 = vadd.f32 1.4, %v14148_v31  ;;  %v14265_v49 = vadd.f32 1.0, %v14146_v22  ;;  %v14268_v0 = vadd.f32 1.0, %v14148_v31  ;;  %v14271_v33 = vadd.f32 0.6, %v14146_v22 }
 0x595   : > { %v14274_v15 = vadd.f32 0.6, %v14148_v31  ;;  %v5931_v18 = vmul.f32 %v8726_v23, %v5747_v37  ;;  %v5932_v50 = vmul.f32 %v8727_v19, %v5748_v41  ;;  %v5939_v59 = vmul.f32 %v14259_v63, %v5755_v56 }
 0x596   : > { %16829 = vst [vmem:[#allocation73_spill] sm:$0xff] %v14271_v33  ;;  %v5940_v14 = vmul.f32 %v14262_v13, %v5756_v6  ;;  %v5955_v40 = vmul.f32 %v14253_v51, %v5755_v56  ;;  %v5956_v47 = vmul.f32 %v14256_v9, %v5756_v6  ;;  %v5963_v1 = vmul.f32 %v14265_v49, %v5763_v20 }
 0x597   : > { %16830 = vst [vmem:[#allocation31_spill] sm:$0xff] %v14274_v15  ;;  %v5964_v44 = vmul.f32 %v14268_v0, %v5764_v2  ;;  %v5947_v30 = vsub.f32 %v5931_v18, %v5939_v59  ;;  %v5979_v39 = vmul.f32 %v14259_v63, %v5763_v20  ;;  %v5980_v55 = vmul.f32 %v14262_v13, %v5764_v2 }
 0x598   : > { %v5948_v29 = vsub.f32 %v5932_v50, %v5940_v14  ;;  %v5971_v35 = vsub.f32 %v5955_v40, %v5963_v1  ;;  %v5987_v11 = vmul.f32 %v14271_v33, %v14248_v27  ;;  %v5988_v61 = vmul.f32 %v14274_v15, %v5772_v45 }
 0x599   : > { %v5972_v62 = vsub.f32 %v5956_v47, %v5964_v44  ;;  %v6171_v57 = vmul.f32 %v8726_v23, %v5947_v30  ;;  %vm5579_vm12 = vcmp.ge.f32.partialorder %v14146_v22, -0.2  ;;  %vm5580_vm13 = vcmp.ge.f32.partialorder %v14148_v31, -0.2 }
 0x59a   : > { %v6172_v53 = vmul.f32 %v8727_v19, %v5948_v29  ;;  %v5995_v37 = vsub.f32 %v5979_v39, %v5987_v11  ;;  %v5996_v41 = vsub.f32 %v5980_v55, %v5988_v61  ;;  %v6179_v56 = vmul.f32 %v14265_v49, %v5971_v35 }
 0x59b   : > { %v6180_v6 = vmul.f32 %v14268_v0, %v5972_v62  ;;  %v6195_v20 = vmul.f32 %v14253_v51, %v5971_v35  ;;  %v6196_v2 = vmul.f32 %v14256_v9, %v5972_v62  ;;  %v8670_v18 = vsel %vm5579_vm12, 1.0, %v16623_v3 }
 0x59c   : > { %v8671_v50 = vsel %vm5580_vm13, 1.0, %v16623_v3  ;;  %v6187_v59 = vsub.f32 %v6171_v57, %v6179_v56  ;;  %v6203_v40 = vmul.f32 %v14271_v33, %v5995_v37  ;;  %v6204_v47 = vmul.f32 %v14274_v15, %v5996_v41 }
 0x59d   : > { %v6188_v14 = vsub.f32 %v6172_v53, %v6180_v6  ;;  %vm5603_vm14 = vcmp.ge.f32.partialorder %v14146_v22, 0.2  ;;  %vm5604_vm15 = vcmp.ge.f32.partialorder %v14148_v31, 0.2  ;;  %v5779_v35 = vsub.f32 %v8662_v54, %v8670_v18 }
 0x59e   : > { %v6211_v1 = vsub.f32 %v6195_v20, %v6203_v40  ;;  %v6212_v44 = vsub.f32 %v6196_v2, %v6204_v47  ;;  %v6387_v30 = vmul.f32 %v8726_v23, %v6187_v59  ;;  %v14300_v39 = vsel %vm5603_vm14, 1.0, %v16623_v3 }
 0x59f   : > { %v6388_v29 = vmul.f32 %v8727_v19, %v6188_v14  ;;  %v14303_v55 = vsel %vm5604_vm15, 1.0, %v16623_v3  ;;  %v5780_v62 = vsub.f32 %v8663_v5, %v8671_v50  ;;  %v14308_v57 = vadd.f32 0.2, %v14146_v22 }
 0x5a0   : > { %v6395_v11 = vmul.f32 %v14271_v33, %v6211_v1  ;;  %v6396_v61 = vmul.f32 %v14274_v15, %v6212_v44  ;;  %v14311_v53 = vadd.f32 0.2, %v14148_v31  ;;  %v14314_v23 = vsub.f32 %v8670_v18, %v14300_v39 }
 0x5a1   : > { %v14317_v19 = vsub.f32 %v8671_v50, %v14303_v55  ;;  %v14320_v56 = vadd.f32 -0.2, %v14146_v22  ;;  %v14323_v54 = vadd.f32 -0.2, %v14148_v31  ;;  %v6003_v20 = vmul.f32 %v14265_v49, %v14248_v27 }
 0x5a2   : > { %16831 = vst [vmem:[#allocation28_spill] sm:$0xff] %v14311_v53  ;;  %v6403_v5 = vsub.f32 %v6387_v30, %v6395_v11  ;;  %v6404_v6 = vsub.f32 %v6388_v29, %v6396_v61  ;;  %v6004_v2 = vmul.f32 %v14268_v0, %v5772_v45  ;;  %v6011_v59 = vmul.f32 %v14308_v57, %v5779_v35 }
 0x5a3   : > { %16832 = vst [vmem:[#allocation32_spill] sm:$0xff] %v14317_v19  ;;  %16833 = vst [vmem:[#allocation17_spill] sm:$0xff] %v14320_v56  ;;  %v6012_v18 = vmul.f32 %v14311_v53, %v5780_v62  ;;  %v6027_v50 = vmul.f32 %v14271_v33, %v5779_v35  ;;  %v6028_v14 = vmul.f32 %v14274_v15, %v5780_v62  ;;  %vm5509_vm1 = vcmp.ge.f32.partialorder %v14150_v26, -1.4 }
 0x5a4   : > { %16834 = vst [vmem:[#allocation26_spill] sm:$0xff] %v14323_v54  ;;  %v6411_v40 = vmul.f32 %v14253_v51, %v6211_v1  ;;  %v6579_v47 = vpack.c.bf16 %v6404_v6, %v6403_v5  ;;  %v6035_v30 = vmul.f32 %v14320_v56, %v14314_v23  ;;  %v6036_v29 = vmul.f32 %v14323_v54, %v14317_v19 }
 0x5a5   : > { %v6412_v27 = vmul.f32 %v14256_v9, %v6212_v44  ;;  %v6019_v45 = vsub.f32 %v6003_v20, %v6011_v59  ;;  %v6020_v11 = vsub.f32 %v6004_v2, %v6012_v18  ;;  %v6219_v61 = vmul.f32 %v14259_v63, %v5995_v37 }
 0x5a6   : > { %7288 = vmatprep.mubr.bf16.mxu0 %v6579_v47  ;;  %v14339_v42 = vsub.f32 %v6027_v50, %v6035_v30  ;;  %v14341_v35 = vsub.f32 %v6028_v14, %v6036_v29  ;;  %v6220_v51 = vmul.f32 %v14262_v13, %v5996_v41  ;;  %vm5510_vm2 = vcmp.ge.f32.partialorder %v14225_v16, -1.4 }
 0x5a7   : > { %v6227_v1 = vmul.f32 %v14308_v57, %v6019_v45  ;;  %v6228_v62 = vmul.f32 %v14311_v53, %v6020_v11  ;;  %v6243_v5 = vmul.f32 %v14265_v49, %v6019_v45  ;;  %v6244_v9 = vmul.f32 %v14268_v0, %v6020_v11 }
 0x5a8   : > { %16835 = vst [vmem:[#allocation44_spill] sm:$0xff] %v14339_v42  ;;  %16836 = vst [vmem:[#allocation5_spill] sm:$0xff] %v14341_v35  ;;  %v6251_v37 = vmul.f32 %v14320_v56, %v14339_v42  ;;  %v6252_v44 = vmul.f32 %v14323_v54, %v14341_v35  ;;  %v14355_v41 = vsel %vm5509_vm1, 1.0, %v16623_v3  ;;  %v14358_v2 = vsel %vm5510_vm2, 1.0, %v16623_v3 }
 0x5a9   : > { %v6235_v6 = vsub.f32 %v6219_v61, %v6227_v1  ;;  %v6236_v20 = vsub.f32 %v6220_v51, %v6228_v62  ;;  %vm5533_vm3 = vcmp.ge.f32.partialorder %v14150_v26, -1.0  ;;  %vm5534_vm4 = vcmp.ge.f32.partialorder %v14225_v16, -1.0 }
 0x5aa   : > { %v6259_v59 = vsub.f32 %v6243_v5, %v6251_v37  ;;  %v6260_v18 = vsub.f32 %v6244_v9, %v6252_v44  ;;  %v8656_v50 = vsel %vm5533_vm3, 1.0, %v16623_v3  ;;  %v8657_v5 = vsel %vm5534_vm4, 1.0, %v16623_v3 }
 0x5ab   : > { %v6419_v14 = vmul.f32 %v14308_v57, %v6235_v6  ;;  %v6420_v47 = vmul.f32 %v14311_v53, %v6236_v20  ;;  %v6435_v30 = vmul.f32 %v14259_v63, %v6235_v6  ;;  %v6436_v29 = vmul.f32 %v14262_v13, %v6236_v20 }
 0x5ac   : > { %v6443_v45 = vmul.f32 %v14320_v56, %v6259_v59  ;;  %v6444_v11 = vmul.f32 %v14323_v54, %v6260_v18  ;;  %v14370_v61 = vmul.f32 %v14265_v49, %v6259_v59  ;;  %v14373_v51 = vmul.f32 %v14268_v0, %v6260_v18  ;;  %v9835_v18 = vld [vmem:[%s16041_s3 + $0x648] sm:$0xff]  }
 0x5ad   : > { %v6427_v1 = vsub.f32 %v6411_v40, %v6419_v14  ;;  %v6428_v62 = vsub.f32 %v6412_v27, %v6420_v47  ;;  %vm5557_vm5 = vcmp.ge.f32.partialorder %v14150_v26, -0.6  ;;  %vm5558_vm6 = vcmp.ge.f32.partialorder %v14225_v16, -0.6  ;;  %v9833_v27 = vld [vmem:[%s16041_s3 + $0x600] sm:$0xff]  }
 0x5ae   : > { %16837 = vst [vmem:[#allocation70_spill] sm:$0xff] %v14370_v61  ;;  %16838 = vst [vmem:[#allocation67_spill] sm:$0xff] %v14373_v51  ;;  %v6451_v9 = vsub.f32 %v6435_v30, %v6443_v45  ;;  %v6452_v63 = vsub.f32 %v6436_v29, %v6444_v11  ;;  %v8664_v13 = vsel %vm5557_vm5, 1.0, %v16623_v3  ;;  %v8665_v44 = vsel %vm5558_vm6, 1.0, %v16623_v3 }
 0x5af   : > { %v6587_v37 = vpack.c.bf16 %v6428_v62, %v6427_v1  ;;  %vm5581_vm7 = vcmp.ge.f32.partialorder %v14150_v26, -0.2  ;;  %vm5582_vm10 = vcmp.ge.f32.partialorder %v14225_v16, -0.2  ;;  %vm5605_vm11 = vcmp.ge.f32.partialorder %v14150_v26, 0.2 }
 0x5b0   : > { %v6595_v49 = vpack.c.bf16 %v6452_v63, %v6451_v9  ;;  %v8672_v0 = vsel %vm5581_vm7, 1.0, %v16623_v3  ;;  %v8673_v40 = vsel %vm5582_vm10, 1.0, %v16623_v3  ;;  %vm5606_vm12 = vcmp.ge.f32.partialorder %v14225_v16, 0.2  ;;  %v9837_v9 = vld [vmem:[%s16041_s3 + $0x608] sm:$0xff]  }
 0x5b1   : > { %v14390_v6 = vsel %vm5605_vm11, 1.0, %v16623_v3  ;;  %v14393_v20 = vsub.f32 %v14355_v41, %v8656_v50  ;;  %v14396_v59 = vsub.f32 %v14358_v2, %v8657_v5  ;;  %v14402_v14 = vsel %vm5606_vm12, 1.0, %v16623_v3 }
 0x5b2   : > { %16839 = vst [vmem:[#allocation71_spill] sm:$0xff] %v14390_v6  ;;  %7353 = vmatprep.mubr.bf16.mxu1 %v6595_v49  ;;  %16840 = vst [vmem:[#allocation78_spill] sm:$0xff] %v14402_v14  ;;  %v5773_v47 = vsub.f32 %v8656_v50, %v8664_v13  ;;  %v5774_v30 = vsub.f32 %v8657_v5, %v8665_v44  ;;  %v5781_v29 = vsub.f32 %v8664_v13, %v8672_v0  ;;  %v9839_v50 = vld [vmem:[%s16041_s3 + $0x650] sm:$0xff]  }
 0x5b3   : > { %7354 = vmatmul.mubr.bf16.vlgmr.msra.gmra.mrb[72].mxu1 %v6587_v37  ;;  %v5782_v45 = vsub.f32 %v8665_v44, %v8673_v40  ;;  %v14405_v11 = vsub.f32 %v8672_v0, %v14390_v6  ;;  %v14408_v1 = vsub.f32 %v8673_v40, %v14402_v14  ;;  %v14411_v62 = vadd.f32 1.4, %v14150_v26 }
 0x5b4   : > { %v14420_v5 = vadd.f32 1.4, %v14225_v16  ;;  %v14423_v63 = vadd.f32 1.0, %v14150_v26  ;;  %v14426_v13 = vadd.f32 1.0, %v14225_v16  ;;  %v14429_v37 = vadd.f32 0.6, %v14150_v26  ;;  %9512 = vmatpush3.bf16.msra.mxu1 %v9833_v27 }
 0x5b5   : > { %16841 = vst [vmem:[#allocation79_spill] sm:$0xff] %v14405_v11  ;;  %16842 = vst [vmem:[#allocation62_spill] sm:$0xff] %v14408_v1  ;;  %v14432_v44 = vadd.f32 0.6, %v14225_v16  ;;  %v14435_v49 = vadd.f32 0.2, %v14150_v26  ;;  %v5981_v40 = vmul.f32 %v14411_v62, %v14393_v20  ;;  %9513 = vmatprep.subr.bf16.mxu1 %v9835_v18 }
 0x5b6   : > { %16843 = vst [vmem:[#allocation65_spill] sm:$0xff] %v14423_v63  ;;  %16844 = vst [vmem:[#allocation59_spill] sm:$0xff] %v14426_v13  ;;  %v14438_v0 = vadd.f32 0.2, %v14225_v16  ;;  %v14443_v12 = vadd.f32 -0.2, %v14150_v26  ;;  %v5982_v27 = vmul.f32 %v14420_v5, %v14396_v59  ;;  %v5989_v48 = vmul.f32 %v14429_v37, %v5773_v47 }
 0x5b7   : > { %16845 = vst [vmem:[#allocation66_spill] sm:$0xff] %v14429_v37  ;;  %16846 = vst [vmem:[#allocation74_spill] sm:$0xff] %v14432_v44  ;;  %v14446_v10 = vadd.f32 -0.2, %v14225_v16  ;;  %v5990_v60 = vmul.f32 %v14432_v44, %v5774_v30  ;;  %v6005_v25 = vmul.f32 %v14423_v63, %v5773_v47  ;;  %v6006_v4 = vmul.f32 %v14426_v13, %v5774_v30 }
 0x5b8   : > { %16847 = vst [vmem:[#allocation75_spill] sm:$0xff] %v14435_v49  ;;  %16848 = vst [vmem:[#allocation80_spill] sm:$0xff] %v14438_v0  ;;  %v6013_v8 = vmul.f32 %v14435_v49, %v5781_v29  ;;  %v5997_v18 = vsub.f32 %v5981_v40, %v5989_v48  ;;  %v6014_v32 = vmul.f32 %v14438_v0, %v5782_v45  ;;  %9514 = vmatpush3.bf16.msra.mxu1 %v9837_v9  ;;  %v9843_v48 = vld [vmem:[%s16041_s3 + $0x658] sm:$0xff]  }
 0x5b9   : > { %16849 = vst [vmem:[#allocation81_spill] sm:$0xff] %v14443_v12  ;;  %16850 = vst [vmem:[#allocation82_spill] sm:$0xff] %v14446_v10  ;;  %v6029_v38 = vmul.f32 %v14429_v37, %v5781_v29  ;;  %v6030_v43 = vmul.f32 %v14432_v44, %v5782_v45  ;;  %v5998_v36 = vsub.f32 %v5982_v27, %v5990_v60  ;;  %9515 = vmatprep.subr.bf16.mxu1 %v9839_v50 }
 0x5ba   : > { %v6021_v58 = vsub.f32 %v6005_v25, %v6013_v8  ;;  %v6037_v47 = vmul.f32 %v14443_v12, %v14405_v11  ;;  %v6038_v30 = vmul.f32 %v14446_v10, %v14408_v1  ;;  %v6022_v29 = vsub.f32 %v6006_v4, %v6014_v32 }
 0x5bb   : > { %v6221_v45 = vmul.f32 %v14411_v62, %v5997_v18  ;;  %vm5485_vm13 = vcmp.ge.f32.partialorder %v14150_v26, -1.8  ;;  %vm5486_vm14 = vcmp.ge.f32.partialorder %v14225_v16, -1.8  ;;  %v6222_v8 = vmul.f32 %v14420_v5, %v5998_v36 }
 0x5bc   : > { %v14471_v60 = vsub.f32 %v6029_v38, %v6037_v47  ;;  %v14473_v25 = vsub.f32 %v6030_v43, %v6038_v30  ;;  %v6229_v9 = vmul.f32 %v14435_v49, %v6021_v58  ;;  %v6230_v50 = vmul.f32 %v14438_v0, %v6022_v29  ;;  %9516 = vmatpush3.bf16.msra.mxu1 %v9841_v21  ;;  %v9845_v38 = vld [vmem:[%s16041_s3 + $0x618] sm:$0xff]  }
 0x5bd   : > { %v6245_v40 = vmul.f32 %v14423_v63, %v6021_v58  ;;  %v6246_v32 = vmul.f32 %v14426_v13, %v6022_v29  ;;  %v14481_v4 = vsel %vm5485_vm13, 1.0, %v16623_v3  ;;  %v14491_v30 = vsel %vm5486_vm14, 1.0, %v16623_v3  ;;  %9517 = vmatprep.subr.bf16.mxu1 %v9843_v48  ;;  %v9847_v58 = vld [vmem:[%s16041_s3 + $0x660] sm:$0xff]  }
 0x5be   : > { %16851 = vst [vmem:[#allocation76_spill] sm:$0xff] %v14471_v60  ;;  %16852 = vst [vmem:[#allocation68_spill] sm:$0xff] %v14473_v25  ;;  %v6237_v43 = vsub.f32 %v6221_v45, %v6229_v9  ;;  %v6253_v27 = vmul.f32 %v14443_v12, %v14471_v60  ;;  %v6254_v47 = vmul.f32 %v14446_v10, %v14473_v25  ;;  %v8736_v9 = vadd.f32 1.8, %v14150_v26 }
 0x5bf   : > { %v6238_v21 = vsub.f32 %v6222_v8, %v6230_v50  ;;  %v14498_v29 = vsub.f32 %v14481_v4, %v14355_v41  ;;  %v14502_v45 = vsub.f32 %v14491_v30, %v14358_v2  ;;  %v8737_v17 = vadd.f32 1.8, %v14225_v16 }
 0x5c0   : > { %v14505_v24 = vsub.f32 %v6245_v40, %v6253_v27  ;;  %v14507_v46 = vsub.f32 %v6246_v32, %v6254_v47  ;;  %v6437_v48 = vmul.f32 %v14411_v62, %v6237_v43  ;;  %v5965_v41 = vmul.f32 %v14423_v63, %v14393_v20  ;;  %9518 = vmatpush3.bf16.msra.mxu1 %v9845_v38  ;;  %v9849_v40 = vld [vmem:[%s16041_s3 + $0x620] sm:$0xff]   ;;  %v9851_v20 = vld [vmem:[%s16041_s3 + $0x668] sm:$0xff]  }
 0x5c1   : > { %v6438_v8 = vmul.f32 %v14420_v5, %v6238_v21  ;;  %v5957_v50 = vmul.f32 %v8736_v9, %v14498_v29  ;;  %v5966_v2 = vmul.f32 %v14426_v13, %v14396_v59  ;;  %v5958_v47 = vmul.f32 %v8737_v17, %v14502_v45  ;;  %9519 = vmatprep.subr.bf16.mxu1 %v9847_v58 }
 0x5c2   : > { %16853 = vst [vmem:[#allocation77_spill] sm:$0xff] %v14505_v24  ;;  %16854 = vst [vmem:[#allocation69_spill] sm:$0xff] %v14507_v46  ;;  %v6445_v32 = vmul.f32 %v14443_v12, %v14505_v24  ;;  %v6446_v27 = vmul.f32 %v14446_v10, %v14507_v46  ;;  %v6205_v25 = vmul.f32 %v14429_v37, %v5997_v18  ;;  %vm5511_vm15 = vcmp.ge.f32.partialorder %v14227_v52, -1.4 }
 0x5c3   : > { %v14529_v59 = vsub.f32 %v5957_v50, %v5965_v41  ;;  %v6206_v38 = vmul.f32 %v14432_v44, %v5998_v36  ;;  %v6421_v60 = vmul.f32 %v14435_v49, %v6237_v43  ;;  %v6422_v24 = vmul.f32 %v14438_v0, %v6238_v21  ;;  %v9853_v36 = vld [vmem:[%s16041_s3 + $0x628] sm:$0xff]  }
 0x5c4   : > { %v6453_v51 = vsub.f32 %v6437_v48, %v6445_v32  ;;  %v6454_v61 = vsub.f32 %v6438_v8, %v6446_v27  ;;  %v14534_v46 = vsub.f32 %v5958_v47, %v5966_v2  ;;  %vm5512_vm1 = vcmp.ge.f32.partialorder %v14218_v28, -1.4  ;;  %9520 = vmatpush3.bf16.msra.mxu1 %v9849_v40  ;;  %v9855_v8 = vld [vmem:[%s16041_s3 + $0x670] sm:$0xff]  }
 0x5c5   : > { %v6197_v18 = vmul.f32 %v8736_v9, %v14529_v59  ;;  %v14540_v58 = vsel %vm5511_vm15, 1.0, %v16623_v3  ;;  %vm5535_vm2 = vcmp.ge.f32.partialorder %v14227_v52, -1.0  ;;  %v14548_v48 = vsel %vm5512_vm1, 1.0, %v16623_v3  ;;  %9521 = vmatprep.subr.bf16.mxu1 %v9851_v20  ;;  %v9857_v27 = vld [vmem:[%s16041_s3 + $0x630] sm:$0xff]  }
 0x5c6   : > { %v6596_v43 = vpack.c.bf16 %v6454_v61, %v6453_v51  ;;  %v6198_v21 = vmul.f32 %v8737_v17, %v14534_v46  ;;  %vm5536_vm3 = vcmp.ge.f32.partialorder %v14218_v28, -1.0  ;;  %v8658_v41 = vsel %vm5535_vm2, 1.0, %v16623_v3 }
 0x5c7   : > { %v14554_v50 = vsub.f32 %v6197_v18, %v6205_v25  ;;  %v8659_v2 = vsel %vm5536_vm3, 1.0, %v16623_v3  ;;  %vm5559_vm4 = vcmp.ge.f32.partialorder %v14227_v52, -0.6  ;;  %vm5560_vm5 = vcmp.ge.f32.partialorder %v14218_v28, -0.6 }
 0x5c8   : > { %7361 = vmatprep.mubr.bf16.mxu1 %v6596_v43  ;;  %v14559_v61 = vsub.f32 %v6198_v21, %v6206_v38  ;;  %v8666_v51 = vsel %vm5559_vm4, 1.0, %v16623_v3  ;;  %vm5583_vm6 = vcmp.ge.f32.partialorder %v14227_v52, -0.2  ;;  %v8667_v25 = vsel %vm5560_vm5, 1.0, %v16623_v3  ;;  %9522 = vmatpush3.bf16.msra.mxu1 %v9853_v36 }
 0x5c9   : > { %v6413_v40 = vmul.f32 %v8736_v9, %v14554_v50  ;;  %vm5584_vm7 = vcmp.ge.f32.partialorder %v14218_v28, -0.2  ;;  %v8674_v32 = vsel %vm5583_vm6, 1.0, %v16623_v3  ;;  %vm5607_vm10 = vcmp.ge.f32.partialorder %v14227_v52, 0.2  ;;  %9523 = vmatprep.subr.bf16.mxu1 %v9855_v8  ;;  %v9859_v9 = vld [vmem:[%s16041_s3 + $0x678] sm:$0xff]  }
 0x5ca   : > { %v6414_v47 = vmul.f32 %v8737_v17, %v14559_v61  ;;  %v8675_v20 = vsel %vm5584_vm7, 1.0, %v16623_v3  ;;  %vm5608_vm11 = vcmp.ge.f32.partialorder %v14218_v28, 0.2  ;;  %v14579_v18 = vsel %vm5607_vm10, 1.0, %v16623_v3 }
 0x5cb   : > { %v6429_v38 = vsub.f32 %v6413_v40, %v6421_v60  ;;  %16855 = vst [vmem:[#allocation83_spill] sm:$0xff] %v14579_v18  ;;  %v14582_v36 = vsel %vm5608_vm11, 1.0, %v16623_v3  ;;  %v14585_v17 = vsub.f32 %v14540_v58, %v8658_v41  ;;  %v14588_v21 = vsub.f32 %v14548_v48, %v8659_v2  ;;  %v9861_v40 = vld [vmem:[%s16041_s3 + $0x638] sm:$0xff]  }
 0x5cc   : > { %16856 = vst [vmem:[#allocation84_spill] sm:$0xff] %v14582_v36  ;;  %v6430_v43 = vsub.f32 %v6414_v47, %v6422_v24  ;;  %v5775_v0 = vsub.f32 %v8658_v41, %v8666_v51  ;;  %v5776_v8 = vsub.f32 %v8659_v2, %v8667_v25  ;;  %v5783_v1 = vsub.f32 %v8666_v51, %v8674_v32  ;;  %v14611_v51 = vld [vmem:[%s16041_s3 + $0x680] sm:$0xff]  }
 0x5cd   : > { %v5784_v49 = vsub.f32 %v8667_v25, %v8675_v20  ;;  %v14591_v11 = vsub.f32 %v8674_v32, %v14579_v18  ;;  %v14594_v60 = vsub.f32 %v8675_v20, %v14582_v36  ;;  %9524 = vmatpush3.bf16.msra.mxu1 %v9857_v27  ;;  %v14600_v24 = vadd.f32 1.4, %v14227_v52  ;;  %16860 = vst [vmem:[#allocation61_spill] sm:$0xff] %v14611_v51 }
 0x5ce   : > { %v6588_v15 = vpack.c.bf16 %v6430_v43, %v6429_v38  ;;  %v14603_v41 = vadd.f32 1.4, %v14218_v28  ;;  %v14606_v2 = vadd.f32 1.0, %v14227_v52  ;;  %9525 = vmatprep.subr.bf16.mxu1 %v9859_v9  ;;  %v14614_v25 = vadd.f32 1.0, %v14218_v28 }
 0x5cf   : > { %16857 = vst [vmem:[#allocation85_spill] sm:$0xff] %v14591_v11  ;;  %16858 = vst [vmem:[#allocation86_spill] sm:$0xff] %v14594_v60  ;;  %v14617_v32 = vadd.f32 0.6, %v14227_v52  ;;  %v14620_v27 = vadd.f32 0.6, %v14218_v28  ;;  %v5983_v43 = vmul.f32 %v14600_v24, %v14585_v17 }
 0x5d0   : > { %16859 = vst [vmem:[#allocation63_spill] sm:$0xff] %v14606_v2  ;;  %16861 = vst [vmem:[#allocation87_spill] sm:$0xff] %v14614_v25  ;;  %v5403_v47 = vsub.f32 0.0, %v14146_v22  ;;  %7362 = vmatmul.mubr.bf16.gmra.mrb[76].mxu1 %v6588_v15  ;;  %v14624_v20 = vadd.f32 0.2, %v14227_v52  ;;  %v5984_v18 = vmul.f32 %v14603_v41, %v14588_v21  ;;  %v6007_v33 = vmul.f32 %v14606_v2, %v5775_v0 }
 0x5d1   : > { %16862 = vst [vmem:[#allocation88_spill] sm:$0xff] %v14617_v32  ;;  %16863 = vst [vmem:[#allocation94_spill] sm:$0xff] %v14620_v27  ;;  %v14627_v9 = vadd.f32 0.2, %v14218_v28  ;;  %v14630_v38 = vadd.f32 -0.2, %v14227_v52  ;;  %v5991_v15 = vmul.f32 %v14617_v32, %v5775_v0  ;;  %v5992_v35 = vmul.f32 %v14620_v27, %v5776_v8  ;;  %9526 = vmatpush3.bf16.msra.mxu1 %v9861_v40 }
 0x5d2   : > { %16864 = vst [vmem:[#allocation89_spill] sm:$0xff] %v14624_v20  ;;  %v14635_v36 = vadd.f32 -0.2, %v14218_v28  ;;  %v6008_v42 = vmul.f32 %v14614_v25, %v5776_v8  ;;  %v6015_v10 = vmul.f32 %v14624_v20, %v5783_v1  ;;  %9635 = vmatprep.subr.bf16.mxu1 %v14611_v51  ;;  %v6031_v53 = vmul.f32 %v14617_v32, %v5783_v1 }
 0x5d3   : > { %16865 = vst [vmem:[#allocation95_spill] sm:$0xff] %v14627_v9  ;;  %v6016_v12 = vmul.f32 %v14627_v9, %v5784_v49  ;;  %v14646_v14 = vsub.f32 %v5983_v43, %v5991_v15  ;;  %v14648_v6 = vsub.f32 %v5984_v18, %v5992_v35  ;;  %v6032_v19 = vmul.f32 %v14620_v27, %v5784_v49 }
 0x5d4   : > { %v6023_v54 = vsub.f32 %v6007_v33, %v6015_v10  ;;  %v6039_v0 = vmul.f32 %v14630_v38, %v14591_v11  ;;  %v6040_v8 = vmul.f32 %v14635_v36, %v14594_v60  ;;  %v5404_v35 = vsub.f32 0.0, %v14148_v31 }
 0x5d5   : > { %v6024_v40 = vsub.f32 %v6008_v42, %v6016_v12  ;;  %v6223_v56 = vmul.f32 %v14600_v24, %v14646_v14  ;;  %v6224_v43 = vmul.f32 %v14603_v41, %v14648_v6  ;;  %v5411_v18 = vmul.f32 1.442695, %v5403_v47 }
 0x5d6   : > { %v14661_v1 = vsub.f32 %v6031_v53, %v6039_v0  ;;  %v14663_v49 = vsub.f32 %v6032_v19, %v6040_v8  ;;  %v6231_v12 = vmul.f32 %v14624_v20, %v6023_v54  ;;  %v6247_v42 = vmul.f32 %v14606_v2, %v6023_v54 }
 0x5d7   : > { %v6232_v10 = vmul.f32 %v14627_v9, %v6024_v40  ;;  %v6248_v33 = vmul.f32 %v14614_v25, %v6024_v40  ;;  %9956 = vpow2.f32 %v5411_v18  ;;  %v5413_v15 = vmul.f32 1.442695, %v5404_v35 }
 0x5d8   : > { %16866 = vst [vmem:[#allocation96_spill] sm:$0xff] %v14661_v1  ;;  %16867 = vst [vmem:[#allocation92_spill] sm:$0xff] %v14663_v49  ;;  %v6239_v60 = vsub.f32 %v6223_v56, %v6231_v12  ;;  %v6255_v51 = vmul.f32 %v14630_v38, %v14661_v1  ;;  %v6256_v53 = vmul.f32 %v14635_v36, %v14663_v49  ;;  %vm5461_vm12 = vcmp.ge.f32.partialorder %v14150_v26, -2.2 }
 0x5d9   : > { %v6240_v11 = vsub.f32 %v6224_v43, %v6232_v10  ;;  %9958 = vpow2.f32 %v5413_v15  ;;  %vm5462_vm13 = vcmp.ge.f32.partialorder %v14225_v16, -2.2  ;;  %v8728_v19 = vadd.f32 2.2, %v14150_v26 }
 0x5da   : > { %v14676_v54 = vsub.f32 %v6247_v42, %v6255_v51  ;;  %v14678_v47 = vsub.f32 %v6248_v33, %v6256_v53  ;;  %v6439_v56 = vmul.f32 %v14600_v24, %v6239_v60  ;;  %v8632_v0 = vsel %vm5461_vm12, 1.0, %v16623_v3 }
 0x5db   : > { %v6440_v40 = vmul.f32 %v14603_v41, %v6240_v11  ;;  %v8633_v8 = vsel %vm5462_vm13, 1.0, %v16623_v3  ;;  %v8729_v43 = vadd.f32 2.2, %v14225_v16  ;;  %v5941_v35 = vmul.f32 %v14411_v62, %v14498_v29 }
 0x5dc   : > { %16868 = vst [vmem:[#allocation97_spill] sm:$0xff] %v14676_v54  ;;  %16869 = vst [vmem:[#allocation93_spill] sm:$0xff] %v14678_v47  ;;  %v6447_v26 = vmul.f32 %v14630_v38, %v14676_v54  ;;  %v6448_v51 = vmul.f32 %v14635_v36, %v14678_v47  ;;  %v5749_v18 = vsub.f32 %v8632_v0, %v14481_v4  ;;  %vm5487_vm14 = vcmp.ge.f32.partialorder %v14227_v52, -1.8 }
 0x5dd   : > { %v5750_v12 = vsub.f32 %v8633_v8, %v14491_v30  ;;  %v5942_v10 = vmul.f32 %v14420_v5, %v14502_v45  ;;  %v6181_v42 = vmul.f32 %v14423_v63, %v14529_v59  ;;  %v6182_v33 = vmul.f32 %v14426_v13, %v14534_v46 }
 0x5de   : > { %v6397_v62 = vmul.f32 %v14429_v37, %v14554_v50  ;;  %v6455_v29 = vsub.f32 %v6439_v56, %v6447_v26  ;;  %v6456_v15 = vsub.f32 %v6440_v40, %v6448_v51  ;;  %v5933_v53 = vmul.f32 %v8728_v19, %v5749_v18 }
 0x5df   : > { %v5934_v47 = vmul.f32 %v8729_v43, %v5750_v12  ;;  %v6398_v4 = vmul.f32 %v14432_v44, %v14559_v61  ;;  %vm5488_vm15 = vcmp.ge.f32.partialorder %v14218_v28, -1.8  ;;  %v8738_v5 = vadd.f32 1.8, %v14227_v52  ;;  %v16900_v44 = vld [vmem:[#allocation28_spill] sm:$0xff] }
 0x5e0   : > { %v6597_v30 = vpack.c.bf16 %v6456_v15, %v6455_v29  ;;  %v5949_v45 = vsub.f32 %v5933_v53, %v5941_v35  ;;  %v14707_v46 = vsel %vm5487_vm14, 1.0, %v16623_v3  ;;  %v14710_v56 = vsel %vm5488_vm15, 1.0, %v16623_v3 }
 0x5e1   : > { %v5950_v59 = vsub.f32 %v5934_v47, %v5942_v10  ;;  %v9957_v50 = vpop.eup %9956  ;;  %v14714_v40 = vsub.f32 %v14707_v46, %v14540_v58  ;;  %v8739_v61 = vadd.f32 1.8, %v14218_v28  ;;  %v5967_v0 = vmul.f32 %v14606_v2, %v14585_v17 }
 0x5e2   : > { %7369 = vmatprep.mubr.bf16.mxu1 %v6597_v30  ;;  %v5427_v8 = vadd.f32 1.0, %v9957_v50  ;;  %v6173_v35 = vmul.f32 %v8728_v19, %v5949_v45  ;;  %v14721_v26 = vsub.f32 %v14710_v56, %v14548_v48  ;;  %v5968_v58 = vmul.f32 %v14614_v25, %v14588_v21 }
 0x5e3   : > { %v6174_v47 = vmul.f32 %v8729_v43, %v5950_v59  ;;  %v9959_v51 = vpop.eup %9958  ;;  %v5959_v18 = vmul.f32 %v8738_v5, %v14714_v40  ;;  %v6207_v12 = vmul.f32 %v14617_v32, %v14646_v14  ;;  %v6208_v17 = vmul.f32 %v14620_v27, %v14648_v6 }
 0x5e4   : > { %v5428_v10 = vadd.f32 1.0, %v9959_v51  ;;  %9960 = vrcp.f32 %v5427_v8  ;;  %v6189_v29 = vsub.f32 %v6173_v35, %v6181_v42  ;;  %v5960_v53 = vmul.f32 %v8739_v61, %v14721_v26 }
 0x5e5   : > { %v6190_v15 = vsub.f32 %v6174_v47, %v6182_v33  ;;  %v14731_v48 = vsub.f32 %v5959_v18, %v5967_v0  ;;  %v6423_v30 = vmul.f32 %v14624_v20, %v6239_v60  ;;  %v6424_v45 = vmul.f32 %v14627_v9, %v6240_v11  ;;  %v16899_v20 = vld [vmem:[#allocation32_spill] sm:$0xff] }
 0x5e6   : > { %9962 = vrcp.f32 %v5428_v10  ;;  %v6389_v21 = vmul.f32 %v8728_v19, %v6189_v29  ;;  %vm5513_vm1 = vcmp.ge.f32.partialorder %v14220_v34, -1.4  ;;  %v14736_v14 = vsub.f32 %v5960_v53, %v5968_v58 }
 0x5e7   : > { %v6390_v59 = vmul.f32 %v8729_v43, %v6190_v15  ;;  %v6199_v6 = vmul.f32 %v8738_v5, %v14731_v48  ;;  %vm5514_vm2 = vcmp.ge.f32.partialorder %v14215_v7, -1.4  ;;  %v14741_v42 = vsel %vm5513_vm1, 1.0, %v16623_v3 }
 0x5e8   : > { %v6405_v33 = vsub.f32 %v6389_v21, %v6397_v62  ;;  %v14744_v60 = vsel %vm5514_vm2, 1.0, %v16623_v3  ;;  %vm5537_vm3 = vcmp.ge.f32.partialorder %v14220_v34, -1.0  ;;  %v6200_v11 = vmul.f32 %v8739_v61, %v14736_v14 }
 0x5e9   : > { %v6406_v50 = vsub.f32 %v6390_v59, %v6398_v4  ;;  %v14748_v19 = vsub.f32 %v6199_v6, %v6207_v12  ;;  %vm5538_vm4 = vcmp.ge.f32.partialorder %v14215_v7, -1.0  ;;  %v8660_v43 = vsel %vm5537_vm3, 1.0, %v16623_v3 }
 0x5ea   : > { %v8661_v8 = vsel %vm5538_vm4, 1.0, %v16623_v3  ;;  %vm5561_vm5 = vcmp.ge.f32.partialorder %v14220_v34, -0.6  ;;  %vm5562_vm6 = vcmp.ge.f32.partialorder %v14215_v7, -0.6  ;;  %v14755_v62 = vsub.f32 %v6200_v11, %v6208_v17 }
 0x5eb   : > { %v6580_v0 = vpack.c.bf16 %v6406_v50, %v6405_v33  ;;  %v6415_v4 = vmul.f32 %v8738_v5, %v14748_v19  ;;  %v8668_v35 = vsel %vm5561_vm5, 1.0, %v16623_v3  ;;  %v8669_v47 = vsel %vm5562_vm6, 1.0, %v16623_v3 }
 0x5ec   : > { %vm5585_vm7 = vcmp.ge.f32.partialorder %v14220_v34, -0.2  ;;  %vm5586_vm10 = vcmp.ge.f32.partialorder %v14215_v7, -0.2  ;;  %vm5609_vm11 = vcmp.ge.f32.partialorder %v14220_v34, 0.2  ;;  %v14764_v51 = vsub.f32 %v14741_v42, %v8660_v43 }
 0x5ed   : > { %v6416_v18 = vmul.f32 %v8739_v61, %v14755_v62  ;;  %v6431_v58 = vsub.f32 %v6415_v4, %v6423_v30  ;;  %v8676_v12 = vsel %vm5585_vm7, 1.0, %v16623_v3  ;;  %v8677_v5 = vsel %vm5586_vm10, 1.0, %v16623_v3 }
 0x5ee   : > { %v9961_v17 = vpop.eup %9960  ;;  %vm5610_vm12 = vcmp.ge.f32.partialorder %v14215_v7, 0.2  ;;  %v14771_v10 = vsel %vm5609_vm11, 1.0, %v16623_v3  ;;  %v14774_v29 = vsub.f32 %v14744_v60, %v8661_v8  ;;  %v5777_v15 = vsub.f32 %v8660_v43, %v8668_v35  ;;  %v9846_v43 = vld [vmem:[%s16041_s3 + $0x5c8] sm:$0xff]  }
 0x5ef   : > { %16870 = vst [vmem:[#allocation98_spill] sm:$0xff] %v14771_v10  ;;  %v5436_v53 = vmul.f32 %v9961_v17, %v14146_v22  ;;  %v6432_v21 = vsub.f32 %v6416_v18, %v6424_v45  ;;  %v14778_v61 = vsel %vm5610_vm12, 1.0, %v16623_v3  ;;  %v5778_v30 = vsub.f32 %v8661_v8, %v8669_v47  ;;  %v9844_v22 = vld [vmem:[%s16041_s3 + $0x580] sm:$0xff]  }
 0x5f0   : > { %16871 = vst [vmem:[#allocation90_spill] sm:$0xff] %v14778_v61  ;;  %v9963_v59 = vpop.eup %9962  ;;  %v5785_v6 = vsub.f32 %v8668_v35, %v8676_v12  ;;  %v5786_v33 = vsub.f32 %v8669_v47, %v8677_v5  ;;  %v14781_v50 = vsub.f32 %v8676_v12, %v14771_v10  ;;  %v14784_v11 = vsub.f32 %v8677_v5, %v14778_v61  ;;  %v14839_v61 = vld [vmem:[#allocation2 + $0x10] sm:$0xff] }
 0x5f1   : > { %v5438_v4 = vmul.f32 %v9963_v59, %v14148_v31  ;;  %v6589_v45 = vpack.c.bf16 %v6432_v21, %v6431_v58  ;;  %v14794_v8 = vadd.f32 1.4, %v14220_v34  ;;  %v14797_v35 = vadd.f32 1.4, %v14215_v7 }
 0x5f2   : > { %16872 = vst [vmem:[#allocation99_spill] sm:$0xff] %v14781_v50  ;;  %16873 = vst [vmem:[#allocation91_spill] sm:$0xff] %v14784_v11  ;;  %v14800_v47 = vadd.f32 1.0, %v14220_v34  ;;  %v14803_v31 = vadd.f32 1.0, %v14215_v7  ;;  %v14806_v18 = vadd.f32 0.6, %v14220_v34  ;;  %v6052_v37 = vmul.f32 %v16900_v44, %v16899_v20 }
 0x5f3   : > { %v14809_v58 = vadd.f32 0.6, %v14215_v7  ;;  %v5451_v12 = vpack.c.bf16 %v5438_v4, %v5436_v53  ;;  %7370 = vmatmul.mubr.bf16.gmra.mrb[80].mxu1 %v6589_v45  ;;  %v14812_v5 = vadd.f32 0.2, %v14220_v34  ;;  %v14815_v17 = vadd.f32 0.2, %v14215_v7 }
 0x5f4   : > { %16874 = vst [vmem:[#allocation10_spill] sm:$0xff] %v14800_v47  ;;  %16875 = vst [vmem:[#allocation64_spill] sm:$0xff] %v14803_v31  ;;  %v14818_v21 = vadd.f32 -0.2, %v14220_v34  ;;  %v14821_v59 = vadd.f32 -0.2, %v14215_v7  ;;  %v5985_v54 = vmul.f32 %v14794_v8, %v14764_v51  ;;  %v5986_v49 = vmul.f32 %v14797_v35, %v14774_v29 }
 0x5f5   : > { %16876 = vst [vmem:[#allocation20_spill] sm:$0xff] %v14806_v18  ;;  %16877 = vst [vmem:[#allocation22_spill] sm:$0xff] %v14809_v58  ;;  %v5993_v53 = vmul.f32 %v14806_v18, %v5777_v15  ;;  %7289 = vmatmul.mubr.bf16.vlgmr.msra.gmra.mrb[72].mxu0 %v5451_v12  ;;  %v5994_v4 = vmul.f32 %v14809_v58, %v5778_v30  ;;  %v6009_v45 = vmul.f32 %v14800_v47, %v5777_v15  ;;  %v9848_v12 = vld [vmem:[%s16041_s3 + $0x588] sm:$0xff]  }
 0x5f6   : > { %16878 = vst [vmem:[#allocation9_spill] sm:$0xff] %v14812_v5  ;;  %16879 = vst [vmem:[#allocation13_spill] sm:$0xff] %v14815_v17  ;;  %v6010_v1 = vmul.f32 %v14803_v31, %v5778_v30  ;;  %v6017_v34 = vmul.f32 %v14812_v5, %v5785_v6  ;;  %9472 = vmatpush3.bf16.msra.mxu0 %v9844_v22  ;;  %7296 = vmatprep.mubr.bf16.mxu0 %v6580_v0  ;;  %v5405_v15 = vsub.f32 0.0, %v14839_v61 }
 0x5f7   : > { %16880 = vst [vmem:[#allocation15_spill] sm:$0xff] %v14818_v21  ;;  %16881 = vst [vmem:[#allocation8_spill] sm:$0xff] %v14821_v59  ;;  %v14832_v7 = vsub.f32 %v5985_v54, %v5993_v53  ;;  %v6018_v13 = vmul.f32 %v14815_v17, %v5786_v33  ;;  %v6033_v63 = vmul.f32 %v14806_v18, %v5785_v6  ;;  %9473 = vmatprep.subr.bf16.mxu0 %v9846_v43  ;;  %v9850_v6 = vld [vmem:[%s16041_s3 + $0x5d0] sm:$0xff]  }
 0x5f8   : > { %v14842_v30 = vsub.f32 %v5986_v49, %v5994_v4  ;;  %v6025_v10 = vsub.f32 %v6009_v45, %v6017_v34  ;;  %v6034_v0 = vmul.f32 %v14809_v58, %v5786_v33  ;;  %v6041_v54 = vmul.f32 %v14818_v21, %v14781_v50 }
 0x5f9   : > { %v6026_v22 = vsub.f32 %v6010_v1, %v6018_v13  ;;  %v6042_v53 = vmul.f32 %v14821_v59, %v14784_v11  ;;  %v6225_v9 = vmul.f32 %v14794_v8, %v14832_v7  ;;  %v5406_v49 = vsub.f32 0.0, %v14225_v16  ;;  %v9852_v16 = vld [vmem:[%s16041_s3 + $0x590] sm:$0xff]  }
 0x5fa   : > { %v14855_v43 = vsub.f32 %v6033_v63, %v6041_v54  ;;  %v6226_v33 = vmul.f32 %v14797_v35, %v14842_v30  ;;  %v6233_v4 = vmul.f32 %v14812_v5, %v6025_v10  ;;  %v6249_v45 = vmul.f32 %v14800_v47, %v6025_v10  ;;  %9474 = vmatpush3.bf16.msra.mxu0 %v9848_v12  ;;  %v9854_v10 = vld [vmem:[%s16041_s3 + $0x5d8] sm:$0xff]  }
 0x5fb   : > { %v14861_v34 = vsub.f32 %v6034_v0, %v6042_v53  ;;  %v6234_v13 = vmul.f32 %v14815_v17, %v6026_v22  ;;  %v6250_v1 = vmul.f32 %v14803_v31, %v6026_v22  ;;  %v5415_v11 = vmul.f32 1.442695, %v5405_v15  ;;  %9475 = vmatprep.subr.bf16.mxu0 %v9850_v6 }
 0x5fc   : > { %16882 = vst [vmem:[#allocation21_spill] sm:$0xff] %v14855_v43  ;;  %v14868_v63 = vsub.f32 %v6225_v9, %v6233_v4  ;;  %v6257_v54 = vmul.f32 %v14818_v21, %v14855_v43  ;;  %v5417_v50 = vmul.f32 1.442695, %v5406_v49  ;;  %vm5463_vm13 = vcmp.ge.f32.partialorder %v14227_v52, -2.2 }
 0x5fd   : > { %16883 = vst [vmem:[#allocation12_spill] sm:$0xff] %v14861_v34  ;;  %v14876_v0 = vsub.f32 %v6226_v33, %v6234_v13  ;;  %v6258_v12 = vmul.f32 %v14821_v59, %v14861_v34  ;;  %9964 = vpow2.f32 %v5415_v11  ;;  %vm5464_vm14 = vcmp.ge.f32.partialorder %v14218_v28, -2.2  ;;  %v9856_v28 = vld [vmem:[%s16041_s3 + $0x598] sm:$0xff]  }
 0x5fe   : > { %v14881_v9 = vsub.f32 %v6249_v45, %v6257_v54  ;;  %v6441_v15 = vmul.f32 %v14794_v8, %v14868_v63  ;;  %9966 = vpow2.f32 %v5417_v50  ;;  %v8634_v6 = vsel %vm5463_vm13, 1.0, %v16623_v3  ;;  %9476 = vmatpush3.bf16.msra.mxu0 %v9852_v16  ;;  %v14899_v45 = vld [vmem:[#allocation2 + $0x28] sm:$0xff] }
 0x5ff   : > { %v14886_v22 = vsub.f32 %v6250_v1, %v6258_v12  ;;  %v6442_v53 = vmul.f32 %v14797_v35, %v14876_v0  ;;  %v8635_v49 = vsel %vm5464_vm14, 1.0, %v16623_v3  ;;  %v5751_v11 = vsub.f32 %v8634_v6, %v14707_v46  ;;  %9477 = vmatprep.subr.bf16.mxu0 %v9854_v10  ;;  %v9858_v46 = vld [vmem:[%s16041_s3 + $0x5e0] sm:$0xff]  }
 0x600   : > { %16884 = vst [vmem:[#allocation29_spill] sm:$0xff] %v14881_v9  ;;  %v6449_v33 = vmul.f32 %v14818_v21, %v14881_v9  ;;  %v5752_v50 = vsub.f32 %v8635_v49, %v14710_v56  ;;  %v8730_v4 = vadd.f32 2.2, %v14227_v52  ;;  %v8731_v13 = vadd.f32 2.2, %v14899_v45  ;;  %v15047_v21 = vld [vmem:[#allocation2 + $0x20] sm:$0xff] }
 0x601   : > { %16885 = vst [vmem:[#allocation36_spill] sm:$0xff] %v14886_v22  ;;  %v6450_v1 = vmul.f32 %v14821_v59, %v14886_v22  ;;  %v5943_v16 = vmul.f32 %v14600_v24, %v14714_v40  ;;  %v5944_v56 = vmul.f32 %v14603_v41, %v14721_v26  ;;  %v6183_v6 = vmul.f32 %v14606_v2, %v14731_v48  ;;  %v14919_v22 = vld [vmem:[#allocation2 + $0x30] sm:$0xff]  ;;  %v14922_v40 = vld [vmem:[#allocation2 + $0x38] sm:$0xff]  ;;  %v9860_v48 = vld [vmem:[%s16041_s3 + $0x5a0] sm:$0xff]  }
 0x602   : > { %v6457_v54 = vsub.f32 %v6441_v15, %v6449_v33  ;;  %v5935_v52 = vmul.f32 %v8730_v4, %v5751_v11  ;;  %v5936_v12 = vmul.f32 %v8731_v13, %v5752_v50  ;;  %v6184_v49 = vmul.f32 %v14614_v25, %v14736_v14  ;;  %9478 = vmatpush3.bf16.msra.mxu0 %v9856_v28  ;;  %v9862_v11 = vld [vmem:[%s16041_s3 + $0x5e8] sm:$0xff]  }
 0x603   : > { %v6458_v10 = vsub.f32 %v6442_v53, %v6450_v1  ;;  %v14917_v9 = vmul.f32 %v14617_v32, %v14748_v19  ;;  %vm5489_vm15 = vcmp.ge.f32.partialorder %v14919_v22, -1.8  ;;  %vm5490_vm1 = vcmp.ge.f32.partialorder %v14922_v40, -1.8  ;;  %9479 = vmatprep.subr.bf16.mxu0 %v9858_v46 }
 0x604   : > { %v5951_v24 = vsub.f32 %v5935_v52, %v5943_v16  ;;  %v5952_v41 = vsub.f32 %v5936_v12, %v5944_v56  ;;  %v14926_v26 = vsel %vm5489_vm15, 1.0, %v16623_v3  ;;  %v14932_v19 = vsel %vm5490_vm1, 1.0, %v16623_v3 }
 0x605   : > { %v6598_v14 = vpack.c.bf16 %v6458_v10, %v6457_v54  ;;  %v14936_v15 = vsub.f32 %v14926_v26, %v14741_v42  ;;  %v8740_v53 = vadd.f32 1.8, %v14919_v22  ;;  %v14944_v50 = vsub.f32 %v14932_v19, %v14744_v60 }
 0x606   : > { %v6175_v28 = vmul.f32 %v8730_v4, %v5951_v24  ;;  %v6176_v33 = vmul.f32 %v8731_v13, %v5952_v41  ;;  %v8741_v46 = vadd.f32 1.8, %v14922_v40  ;;  %v6400_v42 = vmul.f32 %v14620_v27, %v14755_v62  ;;  %9480 = vmatpush3.bf16.msra.mxu0 %v9860_v48  ;;  %v9864_v41 = vld [vmem:[%s16041_s3 + $0x5a8] sm:$0xff]  }
 0x607   : > { %v9965_v1 = vpop.eup %9964  ;;  %7377 = vmatprep.mubr.bf16.mxu1 %v6598_v14  ;;  %v5961_v16 = vmul.f32 %v8740_v53, %v14936_v15  ;;  %v5969_v56 = vmul.f32 %v14800_v47, %v14764_v51  ;;  %v5970_v54 = vmul.f32 %v14803_v31, %v14774_v29  ;;  %v6209_v51 = vmul.f32 %v14806_v18, %v14832_v7 }
 0x608   : > { %v9967_v52 = vpop.eup %9966  ;;  %v5429_v12 = vadd.f32 1.0, %v9965_v1  ;;  %v6191_v10 = vsub.f32 %v6175_v28, %v6183_v6  ;;  %v6192_v60 = vsub.f32 %v6176_v33, %v6184_v49  ;;  %v5962_v24 = vmul.f32 %v8741_v46, %v14944_v50  ;;  %9481 = vmatprep.subr.bf16.mxu0 %v9862_v11  ;;  %v9865_v6 = vld [vmem:[%s16041_s3 + $0x5f0] sm:$0xff]   ;;  %v10005_v1 = vld [vmem:[#allocation2] sm:$0xff] }
 0x609   : > { %v5430_v62 = vadd.f32 1.0, %v9967_v52  ;;  %v14958_v14 = vsub.f32 %v5961_v16, %v5969_v56  ;;  %v6210_v29 = vmul.f32 %v14809_v58, %v14842_v30  ;;  %v14971_v33 = vmul.f32 %v14308_v57, %v14314_v23  ;;  %v9867_v23 = vld [vmem:[%s16041_s3 + $0x5b0] sm:$0xff]  }
 0x60a   : > { %9968 = vrcp.f32 %v5429_v12  ;;  %v6391_v49 = vmul.f32 %v8730_v4, %v6191_v10  ;;  %v6392_v48 = vmul.f32 %v8731_v13, %v6192_v60  ;;  %v14967_v28 = vsub.f32 %v5962_v24, %v5970_v54  ;;  %v10006_v13 = vld [vmem:[#allocation2 + $0x8] sm:$0xff]  ;;  %9482 = vmatpush3.bf16.msra.mxu0 %v9864_v41  ;;  %v9870_v41 = vld [vmem:[%s16041_s3 + $0x5b8] sm:$0xff]  }
 0x60b   : > { %9970 = vrcp.f32 %v5430_v62  ;;  %v6201_v7 = vmul.f32 %v8740_v53, %v14958_v14  ;;  %vm5627_vm2 = vcmp.ge.f32.partialorder %v10005_v1, 0.6  ;;  %v6425_v11 = vmul.f32 %v14812_v5, %v14868_v63  ;;  %9483 = vmatprep.subr.bf16.mxu0 %v9865_v6  ;;  %v9868_v63 = vld [vmem:[%s16041_s3 + $0x5f8] sm:$0xff]  }
 0x60c   : > { %v6202_v30 = vmul.f32 %v8741_v46, %v14967_v28  ;;  %v6426_v4 = vmul.f32 %v14815_v17, %v14876_v0  ;;  %vm5628_vm3 = vcmp.ge.f32.partialorder %v10006_v13, 0.6  ;;  %v6407_v16 = vsub.f32 %v6391_v49, %v14917_v9 }
 0x60d   : > { %v6408_v56 = vsub.f32 %v6392_v48, %v6400_v42  ;;  %v14983_v54 = vsub.f32 %v6201_v7, %v6209_v51  ;;  %vm5651_vm4 = vcmp.ge.f32.partialorder %v10005_v1, 1.0  ;;  %v8686_v0 = vsel %vm5627_vm2, 1.0, %v16623_v3 }
 0x60e   : > { %v14988_v52 = vsub.f32 %v6202_v30, %v6210_v29  ;;  %v8687_v12 = vsel %vm5628_vm3, 1.0, %v16623_v3  ;;  %vm5652_vm5 = vcmp.ge.f32.partialorder %v10006_v13, 1.0  ;;  %v8694_v9 = vsel %vm5651_vm4, 1.0, %v16623_v3  ;;  %9484 = vmatpush3.bf16.msra.mxu0 %v9867_v23 }
 0x60f   : > { %v6417_v10 = vmul.f32 %v8740_v53, %v14983_v54  ;;  %vm5675_vm6 = vcmp.ge.f32.partialorder %v10005_v1, 1.4  ;;  %vm5676_vm7 = vcmp.ge.f32.partialorder %v10006_v13, 1.4  ;;  %v8695_v60 = vsel %vm5652_vm5, 1.0, %v16623_v3  ;;  %9485 = vmatprep.subr.bf16.mxu0 %v9868_v63 }
 0x610   : > { %v6418_v42 = vmul.f32 %v8741_v46, %v14988_v52  ;;  %v8702_v24 = vsel %vm5675_vm6, 1.0, %v16623_v3  ;;  %vm5699_vm10 = vcmp.ge.f32.partialorder %v10005_v1, 1.8  ;;  %v8703_v51 = vsel %vm5676_vm7, 1.0, %v16623_v3 }
 0x611   : > { %v6433_v62 = vsub.f32 %v6417_v10, %v6425_v11  ;;  %vm5700_vm11 = vcmp.ge.f32.partialorder %v10006_v13, 1.8  ;;  %v15002_v53 = vsel %vm5699_vm10, 1.0, %v16623_v3  ;;  %v6581_v29 = vpack.c.bf16 %v6408_v56, %v6407_v16 }
 0x612   : > { %16886 = vst [vmem:[#allocation37_spill] sm:$0xff] %v15002_v53  ;;  %v6434_v46 = vsub.f32 %v6418_v42, %v6426_v4  ;;  %v15005_v6 = vsel %vm5700_vm11, 1.0, %v16623_v3  ;;  %v5795_v49 = vsub.f32 %v14300_v39, %v8686_v0  ;;  %v15009_v48 = vsub.f32 %v14303_v55, %v8687_v12  ;;  %9486 = vmatpush3.bf16.msra.mxu0 %v9870_v41 }
 0x613   : > { %16887 = vst [vmem:[#allocation16_spill] sm:$0xff] %v15005_v6  ;;  %v5803_v7 = vsub.f32 %v8686_v0, %v8694_v9  ;;  %v5804_v30 = vsub.f32 %v8687_v12, %v8695_v60  ;;  %v5811_v11 = vsub.f32 %v8694_v9, %v8702_v24  ;;  %v5812_v34 = vsub.f32 %v8695_v60, %v8703_v51  ;;  %v16893_v0 = vld [vmem:[#allocation61_spill] sm:$0xff]  ;;  %v15025_v12 = vld [vmem:[#allocation2 + $0x18] sm:$0xff] }
 0x614   : > { %v9969_v23 = vpop.eup %9968  ;;  %v6590_v10 = vpack.c.bf16 %v6434_v46, %v6433_v62  ;;  %v15012_v43 = vsub.f32 %v8702_v24, %v15002_v53  ;;  %v15015_v16 = vsub.f32 %v8703_v51, %v15005_v6  ;;  %v15018_v39 = vadd.f32 -0.6, %v10005_v1  ;;  %9611 = vmatprep.subr.bf16.mxu0 %v16893_v0  ;;  %v16897_v51 = vld [vmem:[#allocation17_spill] sm:$0xff] }
 0x615   : > { %v9971_v4 = vpop.eup %9970  ;;  %v5440_v56 = vmul.f32 %v14839_v61, %v9969_v23  ;;  %v15020_v55 = vadd.f32 -0.6, %v10006_v13  ;;  %v15022_v63 = vadd.f32 -1.0, %v10005_v1  ;;  %v15028_v42 = vadd.f32 -1.0, %v10006_v13  ;;  %v16898_v23 = vld [vmem:[#allocation26_spill] sm:$0xff] }
 0x616   : > { %16888 = vst [vmem:[#allocation6_spill] sm:$0xff] %v15012_v43  ;;  %16889 = vst [vmem:[#allocation19_spill] sm:$0xff] %v15015_v16  ;;  %v5442_v9 = vmul.f32 %v15025_v12, %v9971_v4  ;;  %7378 = vmatmul.mubr.bf16.gmra.mrb[84].mxu1 %v6590_v10  ;;  %v15030_v60 = vadd.f32 -1.4, %v10005_v1  ;;  %v15032_v24 = vadd.f32 -1.4, %v10006_v13  ;;  %v6075_v46 = vmul.f32 %v16897_v51, %v5795_v49 }
 0x617   : > { %16890 = vst [vmem:[#allocation18_spill] sm:$0xff] %v15018_v39  ;;  %16891 = vst [vmem:[#allocation23_spill] sm:$0xff] %v15020_v55  ;;  %v8806_v41 = vadd.f32 -1.8, %v10005_v1  ;;  %v8807_v62 = vadd.f32 -1.8, %v10006_v13  ;;  %v6076_v6 = vmul.f32 %v16898_v23, %v15009_v48  ;;  %v6083_v25 = vmul.f32 %v15022_v63, %v5803_v7 }
 0x618   : > { %16892 = vst [vmem:[#allocation11_spill] sm:$0xff] %v15022_v63  ;;  %16894 = vst [vmem:[#allocation7_spill] sm:$0xff] %v15028_v42  ;;  %v5452_v53 = vpack.c.bf16 %v5442_v9, %v5440_v56  ;;  %v6084_v2 = vmul.f32 %v15028_v42, %v5804_v30  ;;  %v6099_v10 = vmul.f32 %v15018_v39, %v5803_v7  ;;  %vm5465_vm12 = vcmp.ge.f32.partialorder %v14919_v22, -2.2 }
 0x619   : > { %16895 = vst [vmem:[#allocation30_spill] sm:$0xff] %v15030_v60  ;;  %16896 = vst [vmem:[#allocation60_spill] sm:$0xff] %v15032_v24  ;;  %v6100_v4 = vmul.f32 %v15020_v55, %v5804_v30  ;;  %v6107_v17 = vmul.f32 %v15030_v60, %v5811_v11  ;;  %v6108_v5 = vmul.f32 %v15032_v24, %v5812_v34  ;;  %v5407_v30 = vsub.f32 0.0, %v15047_v21 }
 0x61a   : > { %v6123_v1 = vmul.f32 %v15022_v63, %v5811_v11  ;;  %7297 = vmatmul.mubr.bf16.gmra.mrb[76].mxu0 %v5452_v53  ;;  %v6091_v13 = vsub.f32 %v6075_v46, %v6083_v25  ;;  %v6092_v27 = vsub.f32 %v6076_v6, %v6084_v2  ;;  %v6124_v32 = vmul.f32 %v15028_v42, %v5812_v34 }
 0x61b   : > { %v6131_v56 = vmul.f32 %v8806_v41, %v15012_v43  ;;  %7304 = vmatprep.mubr.bf16.mxu0 %v6581_v29  ;;  %v6115_v9 = vsub.f32 %v6099_v10, %v6107_v17  ;;  %v6116_v59 = vsub.f32 %v6100_v4, %v6108_v5  ;;  %v6132_v7 = vmul.f32 %v8807_v62, %v15015_v16 }
 0x61c   : > { %v6059_v53 = vmul.f32 %v15018_v39, %v5795_v49  ;;  %v6315_v2 = vmul.f32 %v16897_v51, %v6091_v13  ;;  %v6316_v17 = vmul.f32 %v16898_v23, %v6092_v27  ;;  %v5408_v49 = vsub.f32 0.0, %v14899_v45 }
 0x61d   : > { %v15053_v25 = vsub.f32 %v6123_v1, %v6131_v56  ;;  %v15056_v34 = vsub.f32 %v6124_v32, %v6132_v7  ;;  %v6323_v5 = vmul.f32 %v15030_v60, %v6115_v9  ;;  %v6324_v29 = vmul.f32 %v15032_v24, %v6116_v59 }
 0x61e   : > { %v6339_v6 = vmul.f32 %v15018_v39, %v6115_v9  ;;  %v6340_v11 = vmul.f32 %v15020_v55, %v6116_v59  ;;  %v5419_v32 = vmul.f32 1.442695, %v5407_v30  ;;  %v5421_v56 = vmul.f32 1.442695, %v5408_v49 }
 0x61f   : > { %16901 = vst [vmem:[#allocation14_spill] sm:$0xff] %v15053_v25  ;;  %16902 = vst [vmem:[#allocation58_spill] sm:$0xff] %v15056_v34  ;;  %v6347_v20 = vmul.f32 %v8806_v41, %v15053_v25  ;;  %v6331_v46 = vsub.f32 %v6315_v2, %v6323_v5  ;;  %v6332_v10 = vsub.f32 %v6316_v17, %v6324_v29  ;;  %vm5466_vm13 = vcmp.ge.f32.partialorder %v14922_v40, -2.2 }
 0x620   : > { %v6348_v4 = vmul.f32 %v8807_v62, %v15056_v34  ;;  %v6060_v9 = vmul.f32 %v15020_v55, %v15009_v48  ;;  %v6299_v59 = vmul.f32 %v15022_v63, %v6091_v13  ;;  %9972 = vpow2.f32 %v5419_v32 }
 0x621   : > { %v15066_v1 = vsub.f32 %v6339_v6, %v6347_v20  ;;  %v6531_v2 = vmul.f32 %v16897_v51, %v6331_v46  ;;  %v6532_v17 = vmul.f32 %v16898_v23, %v6332_v10  ;;  %v8636_v5 = vsel %vm5465_vm12, 1.0, %v16623_v3 }
 0x622   : > { %v15073_v7 = vsub.f32 %v6340_v11, %v6348_v4  ;;  %9974 = vpow2.f32 %v5421_v56  ;;  %v8637_v6 = vsel %vm5466_vm13, 1.0, %v16623_v3  ;;  %v5753_v48 = vsub.f32 %v8636_v5, %v14926_v26 }
 0x623   : > { %16903 = vst [vmem:[#allocation72_spill] sm:$0xff] %v15066_v1  ;;  %v6539_v30 = vmul.f32 %v8806_v41, %v15066_v1  ;;  %v5754_v13 = vsub.f32 %v8637_v6, %v14932_v19  ;;  %v8732_v11 = vadd.f32 2.2, %v14919_v22  ;;  %v8733_v51 = vadd.f32 2.2, %v14922_v40 }
 0x624   : > { %16904 = vst [vmem:[#allocation61_spill] sm:$0xff] %v15073_v7  ;;  %v6540_v29 = vmul.f32 %v8807_v62, %v15073_v7  ;;  %v6300_v23 = vmul.f32 %v15028_v42, %v6092_v27  ;;  %v5945_v49 = vmul.f32 %v14794_v8, %v14936_v15  ;;  %v5946_v62 = vmul.f32 %v14797_v35, %v14944_v50 }
 0x625   : > { %v6547_v20 = vsub.f32 %v6531_v2, %v6539_v30  ;;  %v6515_v4 = vmul.f32 %v15030_v60, %v6331_v46  ;;  %v5937_v32 = vmul.f32 %v8732_v11, %v5753_v48  ;;  %v5938_v26 = vmul.f32 %v8733_v51, %v5754_v13  ;;  %v16931_v60 = vld [vmem:[#allocation70_spill] sm:$0xff] }
 0x626   : > { %v6548_v41 = vsub.f32 %v6532_v17, %v6540_v29  ;;  %v6185_v19 = vmul.f32 %v14800_v47, %v14958_v14  ;;  %v6186_v2 = vmul.f32 %v14803_v31, %v14967_v28  ;;  %v15096_v27 = vsub.f32 %v14971_v33, %v6059_v53 }
 0x627   : > { %v15098_v17 = vsub.f32 %v6052_v37, %v6060_v9  ;;  %v5953_v8 = vsub.f32 %v5937_v32, %v5945_v49  ;;  %v5954_v15 = vsub.f32 %v5938_v26, %v5946_v62  ;;  %vm5629_vm14 = vcmp.ge.f32.partialorder %v14839_v61, 0.6 }
 0x628   : > { %v6627_v56 = vpack.c.bf16 %v6548_v41, %v6547_v20  ;;  %vm5630_vm15 = vcmp.ge.f32.partialorder %v15025_v12, 0.6  ;;  %v6516_v35 = vmul.f32 %v15032_v24, %v6332_v10  ;;  %v6401_v50 = vmul.f32 %v14806_v18, %v14983_v54  ;;  %v16936_v18 = vld [vmem:[#allocation74_spill] sm:$0xff] }
 0x629   : > { %v6291_v14 = vmul.f32 %v14308_v57, %v15096_v27  ;;  %v6292_v28 = vmul.f32 %v16900_v44, %v15098_v17  ;;  %v6177_v37 = vmul.f32 %v8732_v11, %v5953_v8  ;;  %v6178_v33 = vmul.f32 %v8733_v51, %v5954_v15  ;;  %v16907_v8 = vld [vmem:[#allocation71_spill] sm:$0xff] }
 0x62a   : > { %7483 = vmatprep.mubr.bf16.mxu1 %v6627_v56  ;;  %v6402_v53 = vmul.f32 %v14809_v58, %v14988_v52  ;;  %vm5653_vm1 = vcmp.ge.f32.partialorder %v14839_v61, 1.0  ;;  %v8688_v9 = vsel %vm5629_vm14, 1.0, %v16623_v3  ;;  %v8689_v54 = vsel %vm5630_vm15, 1.0, %v16623_v3  ;;  %v9973_v30 = vpop.eup %9972  ;;  %v16935_v58 = vld [vmem:[#allocation68_spill] sm:$0xff] }
 0x62b   : > { %v15112_v46 = vsub.f32 %v6291_v14, %v6299_v59  ;;  %v15114_v10 = vsub.f32 %v6292_v28, %v6300_v23  ;;  %v6193_v5 = vsub.f32 %v6177_v37, %v6185_v19  ;;  %v6194_v29 = vsub.f32 %v6178_v33, %v6186_v2 }
 0x62c   : > { %vm5654_vm2 = vcmp.ge.f32.partialorder %v15025_v12, 1.0  ;;  %v8696_v6 = vsel %vm5653_vm1, 1.0, %v16623_v3  ;;  %v9975_v48 = vpop.eup %9974  ;;  %v5431_v20 = vadd.f32 1.0, %v9973_v30  ;;  %vm5677_vm3 = vcmp.ge.f32.partialorder %v14839_v61, 1.4 }
 0x62d   : > { %v6507_v52 = vmul.f32 %v14308_v57, %v15112_v46  ;;  %v6508_v59 = vmul.f32 %v16900_v44, %v15114_v10  ;;  %v5432_v13 = vadd.f32 1.0, %v9975_v48  ;;  %v6393_v23 = vmul.f32 %v8732_v11, %v6193_v5 }
 0x62e   : > { %v6394_v41 = vmul.f32 %v8733_v51, %v6194_v29  ;;  %vm5678_vm4 = vcmp.ge.f32.partialorder %v15025_v12, 1.4  ;;  %9976 = vrcp.f32 %v5431_v20  ;;  %vm5701_vm5 = vcmp.ge.f32.partialorder %v14839_v61, 1.8 }
 0x62f   : > { %v6523_v49 = vsub.f32 %v6507_v52, %v6515_v4  ;;  %v6524_v62 = vsub.f32 %v6508_v59, %v6516_v35  ;;  %9978 = vrcp.f32 %v5432_v13  ;;  %v6409_v32 = vsub.f32 %v6393_v23, %v6401_v50  ;;  %v15136_v4 = vld [vmem:[%s16041_s3 + $0x688] sm:$0xff]   ;;  %v16910_v59 = vld [vmem:[#allocation81_spill] sm:$0xff] }
 0x630   : > { %v6410_v26 = vsub.f32 %v6394_v41, %v6402_v53  ;;  %vm5702_vm6 = vcmp.ge.f32.partialorder %v15025_v12, 1.8  ;;  %v8697_v44 = vsel %vm5654_vm2, 1.0, %v16623_v3  ;;  %v8704_v11 = vsel %vm5677_vm3, 1.0, %v16623_v3  ;;  %v16908_v35 = vld [vmem:[#allocation78_spill] sm:$0xff] }
 0x631   : > { %v6619_v57 = vpack.c.bf16 %v6524_v62, %v6523_v49  ;;  %v8705_v51 = vsel %vm5678_vm4, 1.0, %v16623_v3  ;;  %v15139_v19 = vsel %vm5701_vm5, 1.0, %v16623_v3  ;;  %v15142_v56 = vsel %vm5702_vm6, 1.0, %v16623_v3  ;;  %v16911_v23 = vld [vmem:[#allocation82_spill] sm:$0xff] }
 0x632   : > { %16905 = vst [vmem:[#allocation17_spill] sm:$0xff] %v15139_v19  ;;  %16906 = vst [vmem:[#allocation26_spill] sm:$0xff] %v15142_v56  ;;  %v15144_v2 = vpack.c.bf16 %v6410_v26, %v6409_v32  ;;  %v15147_v15 = vsub.f32 %v16907_v8, %v8688_v9  ;;  %v15150_v50 = vsub.f32 %v16908_v35, %v8689_v54  ;;  %v15156_v5 = vadd.f32 -0.6, %v14839_v61  ;;  %v15200_v35 = vld [vmem:[%s16041_s3 + $0x698] sm:$0xff]  }
 0x633   : > { %7484 = vmatmul.mubr.bf16.vlgmr.msra.gmra.mrb[88].mxu1 %v6619_v57  ;;  %v5805_v14 = vsub.f32 %v8688_v9, %v8696_v6  ;;  %v5806_v28 = vsub.f32 %v8689_v54, %v8697_v44  ;;  %v5813_v37 = vsub.f32 %v8696_v6, %v8704_v11  ;;  %v5814_v33 = vsub.f32 %v8697_v44, %v8705_v51  ;;  %v15165_v9 = vld [vmem:[%s16041_s3 + $0x690] sm:$0xff]  }
 0x634   : > { %9643 = vmatpush3.bf16.msra.mxu1 %v16893_v0  ;;  %v5821_v53 = vsub.f32 %v8704_v11, %v15139_v19  ;;  %v5822_v30 = vsub.f32 %v8705_v51, %v15142_v56  ;;  %16909 = vst [vmem:[#allocation32_spill] sm:$0xff] %v15156_v5  ;;  %v15159_v29 = vadd.f32 -0.6, %v15025_v12  ;;  %vm5725_vm7 = vcmp.ge.f32.partialorder %v14839_v61, 2.2 }
 0x635   : > { %9636 = vmatprep.subr.bf16.mxu1 %v15136_v4  ;;  %v15169_v0 = vadd.f32 -1.0, %v14839_v61  ;;  %v15172_v54 = vadd.f32 -1.0, %v15025_v12  ;;  %v15175_v6 = vadd.f32 -1.4, %v14839_v61  ;;  %v15178_v48 = vadd.f32 -1.4, %v15025_v12 }
 0x636   : > { %v8808_v20 = vadd.f32 -1.8, %v14839_v61  ;;  %v8809_v52 = vadd.f32 -1.8, %v15025_v12  ;;  %v6077_v13 = vmul.f32 %v16910_v59, %v15147_v15  ;;  %v6078_v41 = vmul.f32 %v16911_v23, %v15150_v50 }
 0x637   : > { %vm5726_vm10 = vcmp.ge.f32.partialorder %v15025_v12, 2.2  ;;  %v6085_v49 = vmul.f32 %v15169_v0, %v5805_v14  ;;  %v6086_v62 = vmul.f32 %v15172_v54, %v5806_v28  ;;  %v6101_v32 = vmul.f32 %v15156_v5, %v5805_v14 }
 0x638   : > { %v6102_v26 = vmul.f32 %v15159_v29, %v5806_v28  ;;  %9644 = vmatpush3.bf16.msra.mxu1 %v15136_v4  ;;  %v9977_v57 = vpop.eup %9976  ;;  %v6109_v44 = vmul.f32 %v15175_v6, %v5813_v37  ;;  %v6110_v11 = vmul.f32 %v15178_v48, %v5814_v33  ;;  %v6125_v51 = vmul.f32 %v15169_v0, %v5813_v37 }
 0x639   : > { %v6126_v8 = vmul.f32 %v15172_v54, %v5814_v33  ;;  %9637 = vmatprep.subr.bf16.mxu1 %v15165_v9  ;;  %v9979_v14 = vpop.eup %9978  ;;  %v5444_v28 = vmul.f32 %v15047_v21, %v9977_v57  ;;  %v15203_v7 = vsub.f32 %v6077_v13, %v6085_v49  ;;  %v15205_v1 = vsub.f32 %v6078_v41, %v6086_v62 }
 0x63a   : > { %v6133_v34 = vmul.f32 %v8808_v20, %v5821_v53  ;;  %v5446_v25 = vmul.f32 %v14899_v45, %v9979_v14  ;;  %v6117_v37 = vsub.f32 %v6101_v32, %v6109_v44  ;;  %v6118_v24 = vsub.f32 %v6102_v26, %v6110_v11 }
 0x63b   : > { %v6134_v33 = vmul.f32 %v8809_v52, %v5822_v30  ;;  %v15209_v56 = vmul.f32 %v15175_v6, %v5821_v53  ;;  %v15212_v19 = vmul.f32 %v15178_v48, %v5822_v30  ;;  %v6317_v57 = vmul.f32 %v16910_v59, %v15203_v7 }
 0x63c   : > { %v6141_v16 = vsub.f32 %v6125_v51, %v6133_v34  ;;  %9645 = vmatpush3.bf16.msra.mxu1 %v15165_v9  ;;  %v5453_v13 = vpack.c.bf16 %v5446_v25, %v5444_v28  ;;  %v6318_v49 = vmul.f32 %v16911_v23, %v15205_v1  ;;  %v6325_v62 = vmul.f32 %v15175_v6, %v6117_v37  ;;  %v15224_v34 = vld [vmem:[%s16041_s3 + $0x6a0] sm:$0xff]  }
 0x63d   : > { %16912 = vst [vmem:[#allocation28_spill] sm:$0xff] %v15209_v56  ;;  %16913 = vst [vmem:[#allocation71_spill] sm:$0xff] %v15212_v19  ;;  %v6142_v41 = vsub.f32 %v6126_v8, %v6134_v33  ;;  %9638 = vmatprep.subr.bf16.mxu1 %v15200_v35  ;;  %v6326_v53 = vmul.f32 %v15178_v48, %v6118_v24  ;;  %v6341_v30 = vmul.f32 %v15156_v5, %v6117_v37 }
 0x63e   : > { %v6342_v32 = vmul.f32 %v15159_v29, %v6118_v24  ;;  %v6349_v25 = vmul.f32 %v8808_v20, %v6141_v16  ;;  %7305 = vmatmul.mubr.bf16.gmra.mrb[80].mxu0 %v5453_v13  ;;  %v6333_v26 = vsub.f32 %v6317_v57, %v6325_v62  ;;  %v15230_v11 = vmul.f32 %v15169_v0, %v6141_v16  ;;  %v16919_v57 = vld [vmem:[#allocation44_spill] sm:$0xff] }
 0x63f   : > { %v6350_v44 = vmul.f32 %v8809_v52, %v6142_v41  ;;  %v15233_v51 = vmul.f32 %v15172_v54, %v6142_v41  ;;  %7312 = vmatprep.mubr.bf16.mxu0 %v15144_v2  ;;  %v6334_v8 = vsub.f32 %v6318_v49, %v6326_v53  ;;  %v5409_v28 = vsub.f32 0.0, %v14919_v22  ;;  %v16920_v2 = vld [vmem:[#allocation73_spill] sm:$0xff]  ;;  %v15255_v41 = vld [vmem:[%s16041_s3 + $0x6a8] sm:$0xff]  }
 0x640   : > { %16914 = vst [vmem:[#allocation78_spill] sm:$0xff] %v15230_v11  ;;  %v15236_v14 = vsub.f32 %v6341_v30, %v6349_v25  ;;  %v5410_v37 = vsub.f32 0.0, %v14922_v40  ;;  %9646 = vmatpush3.bf16.msra.mxu1 %v15200_v35  ;;  %v15244_v24 = vsel %vm5725_vm7, 1.0, %v16623_v3  ;;  %v6533_v33 = vmul.f32 %v16910_v59, %v6333_v26  ;;  %v16921_v53 = vld [vmem:[#allocation5_spill] sm:$0xff]  ;;  %v16922_v30 = vld [vmem:[#allocation31_spill] sm:$0xff] }
 0x641   : > { %16915 = vst [vmem:[#allocation81_spill] sm:$0xff] %v15233_v51  ;;  %16917 = vst [vmem:[#allocation100_spill] sm:$0xff] %v15244_v24  ;;  %v15246_v16 = vsub.f32 %v6342_v32, %v6350_v44  ;;  %v6267_v13 = vmul.f32 %v16920_v2, %v16919_v57  ;;  %9639 = vmatprep.subr.bf16.mxu1 %v15224_v34  ;;  %v6534_v49 = vmul.f32 %v16911_v23, %v6334_v8 }
 0x642   : > { %16916 = vst [vmem:[#allocation82_spill] sm:$0xff] %v15236_v14  ;;  %v6541_v61 = vmul.f32 %v8808_v20, %v15236_v14  ;;  %v5423_v62 = vmul.f32 1.442695, %v5409_v28  ;;  %v6268_v32 = vmul.f32 %v16922_v30, %v16921_v53  ;;  %v15264_v59 = vsel %vm5726_vm10, 1.0, %v16623_v3  ;;  %v16927_v53 = vld [vmem:[#allocation80_spill] sm:$0xff] }
 0x643   : > { %16918 = vst [vmem:[#allocation101_spill] sm:$0xff] %v15246_v16  ;;  %16923 = vst [vmem:[#allocation44_spill] sm:$0xff] %v15264_v59  ;;  %v6542_v25 = vmul.f32 %v8809_v52, %v15246_v16  ;;  %v5425_v44 = vmul.f32 1.442695, %v5410_v37  ;;  %v6275_v57 = vmul.f32 %v15018_v39, %v15096_v27  ;;  %v6276_v20 = vmul.f32 %v15020_v55, %v15098_v17  ;;  %v16924_v27 = vld [vmem:[#allocation79_spill] sm:$0xff] }
 0x644   : > { %v6549_v51 = vsub.f32 %v6533_v33, %v6541_v61  ;;  %9980 = vpow2.f32 %v5423_v62  ;;  %v6491_v23 = vmul.f32 %v15022_v63, %v15112_v46  ;;  %9647 = vmatpush3.bf16.msra.mxu1 %v15224_v34  ;;  %v6492_v52 = vmul.f32 %v15028_v42, %v15114_v10  ;;  %v16925_v33 = vld [vmem:[#allocation75_spill] sm:$0xff]  ;;  %v16926_v62 = vld [vmem:[#allocation62_spill] sm:$0xff] }
 0x645   : > { %v6550_v28 = vsub.f32 %v6534_v49, %v6542_v25  ;;  %9982 = vpow2.f32 %v5425_v44  ;;  %v6283_v12 = vsub.f32 %v6267_v13, %v6275_v57  ;;  %9640 = vmatprep.subr.bf16.mxu1 %v15255_v41  ;;  %v6284_v37 = vsub.f32 %v6268_v32, %v6276_v20  ;;  %v15286_v49 = vld [vmem:[%s16041_s3 + $0x6b0] sm:$0xff]  }
 0x646   : > { %v6053_v61 = vmul.f32 %v16925_v33, %v16924_v27  ;;  %v6054_v17 = vmul.f32 %v16927_v53, %v16926_v62  ;;  %v6061_v46 = vmul.f32 %v15156_v5, %v15147_v15  ;;  %v6062_v25 = vmul.f32 %v15159_v29, %v15150_v50 }
 0x647   : > { %v6628_v13 = vpack.c.bf16 %v6550_v28, %v6549_v51  ;;  %v15289_v10 = vmul.f32 %v15018_v39, %v6283_v12  ;;  %v6483_v32 = vmul.f32 %v16920_v2, %v6283_v12  ;;  %v15295_v44 = vmul.f32 %v15020_v55, %v6284_v37 }
 0x648   : > { %v6484_v57 = vmul.f32 %v16922_v30, %v6284_v37  ;;  %v15298_v15 = vsub.f32 %v6053_v61, %v6061_v46  ;;  %v6301_v20 = vmul.f32 %v15169_v0, %v15203_v7  ;;  %9648 = vmatpush3.bf16.msra.mxu1 %v15255_v41  ;;  %v15303_v28 = vsub.f32 %v6054_v17, %v6062_v25  ;;  %v15311_v30 = vld [vmem:[%s16041_s3 + $0x6b8] sm:$0xff]  }
 0x649   : > { %7491 = vmatprep.mubr.bf16.mxu1 %v6628_v13  ;;  %v6499_v51 = vsub.f32 %v6483_v32, %v6491_v23  ;;  %v6302_v2 = vmul.f32 %v15172_v54, %v15205_v1  ;;  %v6517_v50 = vmul.f32 %v15175_v6, %v6333_v26  ;;  %v6518_v37 = vmul.f32 %v15178_v48, %v6334_v8 }
 0x64a   : > { %v6500_v12 = vsub.f32 %v6484_v57, %v6492_v52  ;;  %v6293_v7 = vmul.f32 %v16925_v33, %v15298_v15  ;;  %vm5631_vm11 = vcmp.ge.f32.partialorder %v15047_v21, 0.6  ;;  %9641 = vmatprep.subr.bf16.mxu1 %v15286_v49  ;;  %v6294_v1 = vmul.f32 %v16927_v53, %v15303_v28 }
 0x64b   : > { %vm5632_vm12 = vcmp.ge.f32.partialorder %v14899_v45, 0.6  ;;  %v8690_v6 = vsel %vm5631_vm11, 1.0, %v16623_v3  ;;  %vm5655_vm13 = vcmp.ge.f32.partialorder %v15047_v21, 1.0  ;;  %vm5656_vm14 = vcmp.ge.f32.partialorder %v14899_v45, 1.0 }
 0x64c   : > { %v15323_v26 = vpack.c.bf16 %v6500_v12, %v6499_v51  ;;  %v15325_v23 = vsub.f32 %v6293_v7, %v6301_v20  ;;  %v8691_v52 = vsel %vm5632_vm12, 1.0, %v16623_v3  ;;  %9649 = vmatpush3.bf16.msra.mxu1 %v15286_v49  ;;  %v15330_v48 = vsub.f32 %v6294_v1, %v6302_v2  ;;  %v16928_v12 = vld [vmem:[#allocation83_spill] sm:$0xff] }
 0x64d   : > { %v8698_v8 = vsel %vm5655_vm13, 1.0, %v16623_v3  ;;  %v8699_v27 = vsel %vm5656_vm14, 1.0, %v16623_v3  ;;  %vm5679_vm15 = vcmp.ge.f32.partialorder %v15047_v21, 1.4  ;;  %9642 = vmatprep.subr.bf16.mxu1 %v15311_v30  ;;  %vm5680_vm1 = vcmp.ge.f32.partialorder %v14899_v45, 1.4 }
 0x64e   : > { %v9981_v61 = vpop.eup %9980  ;;  %v6509_v62 = vmul.f32 %v16925_v33, %v15325_v23  ;;  %v8706_v17 = vsel %vm5679_vm15, 1.0, %v16623_v3  ;;  %vm5703_vm2 = vcmp.ge.f32.partialorder %v15047_v21, 1.8  ;;  %v6510_v32 = vmul.f32 %v16927_v53, %v15330_v48  ;;  %v16929_v53 = vld [vmem:[#allocation84_spill] sm:$0xff] }
 0x64f   : > { %v9983_v46 = vpop.eup %9982  ;;  %v5433_v13 = vadd.f32 1.0, %v9981_v61  ;;  %v8707_v25 = vsel %vm5680_vm1, 1.0, %v16623_v3  ;;  %vm5704_vm3 = vcmp.ge.f32.partialorder %v14899_v45, 1.8  ;;  %v15346_v51 = vsel %vm5703_vm2, 1.0, %v16623_v3 }
 0x650   : > { %v5434_v57 = vadd.f32 1.0, %v9983_v46  ;;  %v6525_v20 = vsub.f32 %v6509_v62, %v6517_v50  ;;  %v15349_v33 = vsel %vm5704_vm3, 1.0, %v16623_v3  ;;  %9650 = vmatpush3.bf16.msra.mxu1 %v15311_v30  ;;  %v6526_v2 = vsub.f32 %v6510_v32, %v6518_v37 }
 0x651   : > { %9984 = vrcp.f32 %v5433_v13  ;;  %v15353_v7 = vsub.f32 %v16928_v12, %v8690_v6  ;;  %v15356_v1 = vsub.f32 %v16929_v53, %v8691_v52  ;;  %v5807_v61 = vsub.f32 %v8690_v6, %v8698_v8 }
 0x652   : > { %9986 = vrcp.f32 %v5434_v57  ;;  %v5808_v46 = vsub.f32 %v8691_v52, %v8699_v27  ;;  %v5815_v50 = vsub.f32 %v8698_v8, %v8706_v17  ;;  %v6620_v62 = vpack.c.bf16 %v6526_v2, %v6525_v20 }
 0x653   : > { %v5816_v11 = vsub.f32 %v8699_v27, %v8707_v25  ;;  %v15359_v16 = vsub.f32 %v8706_v17, %v15346_v51  ;;  %v15362_v14 = vsub.f32 %v8707_v25, %v15349_v33  ;;  %v15365_v37 = vadd.f32 -0.6, %v15047_v21 }
 0x654   : > { %v15368_v13 = vadd.f32 -0.6, %v14899_v45  ;;  %v15371_v32 = vadd.f32 -1.0, %v15047_v21  ;;  %v15374_v6 = vadd.f32 -1.0, %v14899_v45  ;;  %7492 = vmatmul.mubr.bf16.gmra.mrb[92].mxu1 %v6620_v62  ;;  %v15377_v52 = vadd.f32 -1.4, %v15047_v21 }
 0x655   : > { %16930 = vst [vmem:[#allocation73_spill] sm:$0xff] %v15362_v14  ;;  %v15380_v8 = vadd.f32 -1.4, %v14899_v45  ;;  %v8810_v27 = vadd.f32 -1.8, %v15047_v21  ;;  %v6079_v17 = vmul.f32 %v14630_v38, %v15353_v7  ;;  %v6080_v57 = vmul.f32 %v14635_v36, %v15356_v1 }
 0x656   : > { %v8811_v25 = vadd.f32 -1.8, %v14899_v45  ;;  %v6087_v20 = vmul.f32 %v15371_v32, %v5807_v61  ;;  %v6088_v2 = vmul.f32 %v15374_v6, %v5808_v46  ;;  %v6103_v12 = vmul.f32 %v15365_v37, %v5807_v61 }
 0x657   : > { %v6104_v53 = vmul.f32 %v15368_v13, %v5808_v46  ;;  %v6111_v62 = vmul.f32 %v15377_v52, %v5815_v50  ;;  %v6112_v55 = vmul.f32 %v15380_v8, %v5816_v11  ;;  %v6127_v56 = vmul.f32 %v15371_v32, %v5815_v50 }
 0x658   : > { %v6095_v39 = vsub.f32 %v6079_v17, %v6087_v20  ;;  %v6096_v19 = vsub.f32 %v6080_v57, %v6088_v2  ;;  %v6128_v45 = vmul.f32 %v15374_v6, %v5816_v11  ;;  %v6135_v59 = vmul.f32 %v8810_v27, %v15359_v16  ;;  %v16932_v17 = vld [vmem:[#allocation67_spill] sm:$0xff] }
 0x659   : > { %v6119_v42 = vsub.f32 %v6103_v12, %v6111_v62  ;;  %v6120_v63 = vsub.f32 %v6104_v53, %v6112_v55  ;;  %v6136_v24 = vmul.f32 %v8811_v25, %v15362_v14  ;;  %v6475_v43 = vsub.f32 %v16931_v60, %v15289_v10 }
 0x65a   : > { %v6319_v61 = vmul.f32 %v14630_v38, %v6095_v39  ;;  %v6320_v46 = vmul.f32 %v14635_v36, %v6096_v19  ;;  %v6476_v57 = vsub.f32 %v16932_v17, %v15295_v44  ;;  %v15404_v50 = vsub.f32 %v6127_v56, %v6135_v59  ;;  %v16933_v59 = vld [vmem:[#allocation76_spill] sm:$0xff] }
 0x65b   : > { %v9985_v20 = vpop.eup %9984  ;;  %v15406_v11 = vsub.f32 %v6128_v45, %v6136_v24  ;;  %v6327_v55 = vmul.f32 %v15377_v52, %v6119_v42  ;;  %v6328_v2 = vmul.f32 %v15380_v8, %v6120_v63  ;;  %v6343_v62 = vmul.f32 %v15365_v37, %v6119_v42  ;;  %v16934_v45 = vld [vmem:[#allocation66_spill] sm:$0xff] }
 0x65c   : > { %v9987_v12 = vpop.eup %9986  ;;  %v5448_v53 = vmul.f32 %v14919_v22, %v9985_v20  ;;  %v6344_v31 = vmul.f32 %v15368_v13, %v6120_v63  ;;  %v6603_v60 = vpack.c.bf16 %v6476_v57, %v6475_v43  ;;  %v6351_v56 = vmul.f32 %v8810_v27, %v15404_v50 }
 0x65d   : > { %v5450_v10 = vmul.f32 %v14922_v40, %v9987_v12  ;;  %v6335_v44 = vsub.f32 %v6319_v61, %v6327_v55  ;;  %v6336_v17 = vsub.f32 %v6320_v46, %v6328_v2  ;;  %v6352_v24 = vmul.f32 %v8811_v25, %v15406_v11  ;;  %v16937_v12 = vld [vmem:[#allocation85_spill] sm:$0xff] }
 0x65e   : > { %v6269_v47 = vmul.f32 %v16934_v45, %v16933_v59  ;;  %v6270_v14 = vmul.f32 %v16936_v18, %v16935_v58  ;;  %v6277_v42 = vmul.f32 %v15156_v5, %v15298_v15  ;;  %v15422_v63 = vsub.f32 %v6343_v62, %v6351_v56 }
 0x65f   : > { %v5454_v20 = vpack.c.bf16 %v5450_v10, %v5448_v53  ;;  %v6535_v43 = vmul.f32 %v14630_v38, %v6335_v44  ;;  %v6536_v61 = vmul.f32 %v14635_v36, %v6336_v17  ;;  %v15426_v46 = vsub.f32 %v6344_v31, %v6352_v24  ;;  %v16938_v38 = vld [vmem:[#allocation89_spill] sm:$0xff]  ;;  %v16939_v36 = vld [vmem:[#allocation86_spill] sm:$0xff]  ;;  %v16940_v31 = vld [vmem:[#allocation95_spill] sm:$0xff] }
 0x660   : > { %v6278_v57 = vmul.f32 %v15159_v29, %v15303_v28  ;;  %v15430_v55 = vsub.f32 %v6269_v47, %v6277_v42  ;;  %v6493_v58 = vmul.f32 %v15169_v0, %v15325_v23  ;;  %v6543_v15 = vmul.f32 %v8810_v27, %v15422_v63 }
 0x661   : > { %7313 = vmatmul.mubr.bf16.gmra.mrb[84].mxu0 %v5454_v20  ;;  %v6494_v2 = vmul.f32 %v15172_v54, %v15330_v48  ;;  %v6055_v53 = vmul.f32 %v16938_v38, %v16937_v12  ;;  %v6056_v62 = vmul.f32 %v16940_v31, %v16939_v36  ;;  %v6544_v47 = vmul.f32 %v8811_v25, %v15426_v46 }
 0x662   : > { %7418 = vmatprep.mubr.bf16.mxu0 %v15323_v26  ;;  %v15443_v28 = vsub.f32 %v6270_v14, %v6278_v57  ;;  %v6485_v0 = vmul.f32 %v16934_v45, %v15430_v55  ;;  %v6063_v23 = vmul.f32 %v15365_v37, %v15353_v7  ;;  %v6551_v27 = vsub.f32 %v6535_v43, %v6543_v15  ;;  %v10009_v57 = vld [vmem:[%s16041_s3 + $0x680] sm:$0xff]  }
 0x663   : > { %v6064_v54 = vmul.f32 %v15368_v13, %v15356_v1  ;;  %v6303_v48 = vmul.f32 %v15371_v32, %v6095_v39  ;;  %v6304_v10 = vmul.f32 %v15374_v6, %v6096_v19  ;;  %v6552_v56 = vsub.f32 %v6536_v61, %v6544_v47  ;;  %v16944_v47 = vld [vmem:[#allocation98_spill] sm:$0xff] }
 0x664   : > { %v6486_v26 = vmul.f32 %v16936_v18, %v15443_v28  ;;  %v6501_v14 = vsub.f32 %v6485_v0, %v6493_v58  ;;  %v15455_v25 = vsub.f32 %v6055_v53, %v6063_v23  ;;  %v6519_v59 = vmul.f32 %v15377_v52, %v6335_v44  ;;  %v16945_v23 = vld [vmem:[#allocation90_spill] sm:$0xff] }
 0x665   : > { %v15457_v24 = vsub.f32 %v6056_v62, %v6064_v54  ;;  %v6520_v7 = vmul.f32 %v15380_v8, %v6336_v17  ;;  %vm5633_vm4 = vcmp.ge.f32.partialorder %v14919_v22, 0.6  ;;  %v6629_v1 = vpack.c.bf16 %v6552_v56, %v6551_v27 }
 0x666   : > { %v6502_v45 = vsub.f32 %v6486_v26, %v6494_v2  ;;  %v6295_v39 = vmul.f32 %v16938_v38, %v15455_v25  ;;  %vm5634_vm5 = vcmp.ge.f32.partialorder %v14922_v40, 0.6  ;;  %v8692_v19 = vsel %vm5633_vm4, 1.0, %v16623_v3 }
 0x667   : > { %v6296_v18 = vmul.f32 %v16940_v31, %v15457_v24  ;;  %v8693_v42 = vsel %vm5634_vm5, 1.0, %v16623_v3  ;;  %vm5657_vm6 = vcmp.ge.f32.partialorder %v14919_v22, 1.0  ;;  %7499 = vmatprep.mubr.bf16.mxu1 %v6629_v1  ;;  %vm5658_vm7 = vcmp.ge.f32.partialorder %v14922_v40, 1.0 }
 0x668   : > { %v6612_v44 = vpack.c.bf16 %v6502_v45, %v6501_v14  ;;  %v15470_v17 = vsub.f32 %v6295_v39, %v6303_v48  ;;  %v8700_v20 = vsel %vm5657_vm6, 1.0, %v16623_v3  ;;  %v8701_v61 = vsel %vm5658_vm7, 1.0, %v16623_v3 }
 0x669   : > { %7419 = vmatmul.mubr.bf16.vlgmr.msra.gmra.mrb[88].mxu0 %v6603_v60  ;;  %v15474_v43 = vsub.f32 %v6296_v18, %v6304_v10  ;;  %vm5681_vm10 = vcmp.ge.f32.partialorder %v14919_v22, 1.4  ;;  %vm5682_vm11 = vcmp.ge.f32.partialorder %v14922_v40, 1.4  ;;  %vm5705_vm12 = vcmp.ge.f32.partialorder %v14919_v22, 1.8 }
 0x66a   : > { %9612 = vmatpush3.bf16.msra.mxu0 %v10009_v57  ;;  %7426 = vmatprep.mubr.bf16.mxu0 %v6612_v44  ;;  %v6511_v58 = vmul.f32 %v16938_v38, %v15470_v17  ;;  %v8708_v15 = vsel %vm5681_vm10, 1.0, %v16623_v3  ;;  %v8709_v60 = vsel %vm5682_vm11, 1.0, %v16623_v3  ;;  %vm5706_vm13 = vcmp.ge.f32.partialorder %v14922_v40, 1.8  ;;  %v16946_v44 = vld [vmem:[#allocation15_spill] sm:$0xff] }
 0x66b   : > { %v6512_v2 = vmul.f32 %v16940_v31, %v15474_v43  ;;  %9613 = vmatprep.subr.bf16.mxu0 %v15136_v4  ;;  %v15492_v12 = vsel %vm5705_vm12, 1.0, %v16623_v3  ;;  %vm5729_vm14 = vcmp.ge.f32.partialorder %v14919_v22, 2.2  ;;  %v15496_v38 = vsel %vm5706_vm13, 1.0, %v16623_v3 }
 0x66c   : > { %v6527_v53 = vsub.f32 %v6511_v58, %v6519_v59  ;;  %16941 = vst [vmem:[#allocation5_spill] sm:$0xff] %v15496_v38  ;;  %vm5730_vm15 = vcmp.ge.f32.partialorder %v14922_v40, 2.2  ;;  %v15500_v36 = vsel %vm5729_vm14, 1.0, %v16623_v3  ;;  %v15506_v0 = vsub.f32 %v16944_v47, %v8692_v19  ;;  %v16947_v58 = vld [vmem:[#allocation8_spill] sm:$0xff] }
 0x66d   : > { %16942 = vst [vmem:[#allocation31_spill] sm:$0xff] %v15500_v36  ;;  %v6528_v62 = vsub.f32 %v6512_v2, %v6520_v7  ;;  %v15503_v31 = vsel %vm5730_vm15, 1.0, %v16623_v3  ;;  %v15509_v27 = vsub.f32 %v16945_v23, %v8693_v42  ;;  %v5809_v54 = vsub.f32 %v8692_v19, %v8700_v20 }
 0x66e   : > { %16943 = vst [vmem:[#allocation79_spill] sm:$0xff] %v15503_v31  ;;  %v5810_v48 = vsub.f32 %v8693_v42, %v8701_v61  ;;  %v5817_v10 = vsub.f32 %v8700_v20, %v8708_v15  ;;  %v5818_v56 = vsub.f32 %v8701_v61, %v8709_v60  ;;  %9614 = vmatpush3.bf16.msra.mxu0 %v15136_v4  ;;  %v15520_v45 = vadd.f32 -0.6, %v14919_v22 }
 0x66f   : > { %v6621_v26 = vpack.c.bf16 %v6528_v62, %v6527_v53  ;;  %v5825_v14 = vsub.f32 %v8708_v15, %v15492_v12  ;;  %v5826_v59 = vsub.f32 %v8709_v60, %v15496_v38  ;;  %9615 = vmatprep.subr.bf16.mxu0 %v15165_v9  ;;  %v15523_v39 = vadd.f32 -0.6, %v14922_v40 }
 0x670   : > { %v15526_v4 = vadd.f32 -1.0, %v14919_v22  ;;  %v15529_v18 = vadd.f32 -1.0, %v14922_v40  ;;  %v15532_v19 = vadd.f32 -1.4, %v14919_v22  ;;  %v15535_v42 = vadd.f32 -1.4, %v14922_v40 }
 0x671   : > { %7500 = vmatmul.mubr.bf16.gmra.mrb[96].mxu1 %v6621_v26  ;;  %v6081_v20 = vmul.f32 %v16946_v44, %v15506_v0  ;;  %v8812_v61 = vadd.f32 -1.8, %v14919_v22  ;;  %v8813_v57 = vadd.f32 -1.8, %v14922_v40  ;;  %v6082_v15 = vmul.f32 %v16947_v58, %v15509_v27 }
 0x672   : > { %v6089_v60 = vmul.f32 %v15526_v4, %v5809_v54  ;;  %9616 = vmatpush3.bf16.msra.mxu0 %v15165_v9  ;;  %v6090_v2 = vmul.f32 %v15529_v18, %v5810_v48  ;;  %v6105_v53 = vmul.f32 %v15520_v45, %v5809_v54  ;;  %v6106_v62 = vmul.f32 %v15523_v39, %v5810_v48 }
 0x673   : > { %v6113_v47 = vmul.f32 %v15532_v19, %v5817_v10  ;;  %9617 = vmatprep.subr.bf16.mxu0 %v15200_v35  ;;  %v6114_v40 = vmul.f32 %v15535_v42, %v5818_v56  ;;  %v6129_v23 = vmul.f32 %v15526_v4, %v5817_v10  ;;  %v6130_v26 = vmul.f32 %v15529_v18, %v5818_v56 }
 0x674   : > { %v6097_v22 = vsub.f32 %v6081_v20, %v6089_v60  ;;  %v6098_v1 = vsub.f32 %v6082_v15, %v6090_v2  ;;  %v6137_v9 = vmul.f32 %v8812_v61, %v5825_v14  ;;  %v6138_v31 = vmul.f32 %v8813_v57, %v5826_v59 }
 0x675   : > { %v6121_v7 = vsub.f32 %v6105_v53, %v6113_v47  ;;  %v6122_v38 = vsub.f32 %v6106_v62, %v6114_v40  ;;  %v15554_v54 = vmul.f32 %v15532_v19, %v5825_v14  ;;  %v15557_v48 = vmul.f32 %v15535_v42, %v5826_v59  ;;  %v16950_v59 = vld [vmem:[#allocation77_spill] sm:$0xff] }
 0x676   : > { %v6321_v36 = vmul.f32 %v16946_v44, %v6097_v22  ;;  %9618 = vmatpush3.bf16.msra.mxu0 %v15200_v35  ;;  %v6145_v20 = vsub.f32 %v6129_v23, %v6137_v9  ;;  %v6146_v60 = vsub.f32 %v6130_v26, %v6138_v31  ;;  %v6322_v10 = vmul.f32 %v16947_v58, %v6098_v1  ;;  %v16951_v53 = vld [vmem:[#allocation65_spill] sm:$0xff] }
 0x677   : > { %16948 = vst [vmem:[#allocation75_spill] sm:$0xff] %v15554_v54  ;;  %16949 = vst [vmem:[#allocation62_spill] sm:$0xff] %v15557_v48  ;;  %v6329_v56 = vmul.f32 %v15532_v19, %v6121_v7  ;;  %9619 = vmatprep.subr.bf16.mxu0 %v15224_v34  ;;  %v6330_v15 = vmul.f32 %v15535_v42, %v6122_v38  ;;  %v6345_v14 = vmul.f32 %v15520_v45, %v6121_v7  ;;  %v16952_v9 = vld [vmem:[#allocation69_spill] sm:$0xff]  ;;  %v16953_v48 = vld [vmem:[#allocation59_spill] sm:$0xff] }
 0x678   : > { %v6346_v2 = vmul.f32 %v15523_v39, %v6122_v38  ;;  %v6461_v62 = vmul.f32 %v16951_v53, %v16950_v59  ;;  %v6353_v40 = vmul.f32 %v8812_v61, %v6145_v20  ;;  %v6354_v35 = vmul.f32 %v8813_v57, %v6146_v60  ;;  %v16956_v53 = vld [vmem:[#allocation92_spill] sm:$0xff] }
 0x679   : > { %v6337_v47 = vsub.f32 %v6321_v36, %v6329_v56  ;;  %v15570_v31 = vmul.f32 %v15526_v4, %v6145_v20  ;;  %v6338_v23 = vsub.f32 %v6322_v10, %v6330_v15  ;;  %v15573_v26 = vmul.f32 %v15529_v18, %v6146_v60  ;;  %v16954_v56 = vld [vmem:[#allocation96_spill] sm:$0xff] }
 0x67a   : > { %v6462_v54 = vmul.f32 %v16953_v48, %v16952_v9  ;;  %v6469_v7 = vmul.f32 %v15156_v5, %v15430_v55  ;;  %9620 = vmatpush3.bf16.msra.mxu0 %v15224_v34  ;;  %v6361_v38 = vsub.f32 %v6345_v14, %v6353_v40  ;;  %v6362_v59 = vsub.f32 %v6346_v2, %v6354_v35  ;;  %v16955_v15 = vld [vmem:[#allocation88_spill] sm:$0xff]  ;;  %v16957_v9 = vld [vmem:[#allocation94_spill] sm:$0xff]  ;;  %v16958_v35 = vld [vmem:[#allocation99_spill] sm:$0xff] }
 0x67b   : > { %v6537_v36 = vmul.f32 %v16946_v44, %v6337_v47  ;;  %v6470_v20 = vmul.f32 %v15159_v29, %v15443_v28  ;;  %9621 = vmatprep.subr.bf16.mxu0 %v15255_v41  ;;  %v6538_v60 = vmul.f32 %v16947_v58, %v6338_v23  ;;  %v6271_v48 = vmul.f32 %v16955_v15, %v16954_v56 }
 0x67c   : > { %v6477_v10 = vsub.f32 %v6461_v62, %v6469_v7  ;;  %v6272_v55 = vmul.f32 %v16957_v9, %v16956_v53  ;;  %v6545_v5 = vmul.f32 %v8812_v61, %v6361_v38  ;;  %v6546_v34 = vmul.f32 %v8813_v57, %v6362_v59  ;;  %v16959_v7 = vld [vmem:[#allocation9_spill] sm:$0xff] }
 0x67d   : > { %v15590_v14 = vmul.f32 %v15520_v45, %v6361_v38  ;;  %v15593_v44 = vmul.f32 %v15523_v39, %v6362_v59  ;;  %v6478_v28 = vsub.f32 %v6462_v54, %v6470_v20  ;;  %v6279_v2 = vmul.f32 %v15365_v37, %v15455_v25  ;;  %v16960_v20 = vld [vmem:[#allocation91_spill] sm:$0xff] }
 0x67e   : > { %v6280_v58 = vmul.f32 %v15368_v13, %v15457_v24  ;;  %v6495_v62 = vmul.f32 %v15371_v32, %v15470_v17  ;;  %9622 = vmatpush3.bf16.msra.mxu0 %v15255_v41  ;;  %v6553_v61 = vsub.f32 %v6537_v36, %v6545_v5  ;;  %v6554_v57 = vsub.f32 %v6538_v60, %v6546_v34  ;;  %v16961_v24 = vld [vmem:[#allocation13_spill] sm:$0xff] }
 0x67f   : > { %v6496_v40 = vmul.f32 %v15374_v6, %v15474_v43  ;;  %v6057_v38 = vmul.f32 %v16959_v7, %v16958_v35  ;;  %9623 = vmatprep.subr.bf16.mxu0 %v15286_v49  ;;  %v6604_v54 = vpack.c.bf16 %v6478_v28, %v6477_v10  ;;  %v6287_v25 = vsub.f32 %v6271_v48, %v6279_v2 }
 0x680   : > { %v6288_v59 = vsub.f32 %v6272_v55, %v6280_v58  ;;  %v6058_v56 = vmul.f32 %v16961_v24, %v16960_v20  ;;  %v6630_v53 = vpack.c.bf16 %v6554_v57, %v6553_v61  ;;  %v6065_v41 = vmul.f32 %v15520_v45, %v15506_v0  ;;  %v16962_v61 = vld [vmem:[#allocation73_spill] sm:$0xff] }
 0x681   : > { %v6066_v5 = vmul.f32 %v15523_v39, %v15509_v27  ;;  %v6305_v17 = vmul.f32 %v15526_v4, %v6097_v22  ;;  %7427 = vmatmul.mubr.bf16.gmra.mrb[92].mxu0 %v6604_v54  ;;  %v6487_v43 = vmul.f32 %v16955_v15, %v6287_v25  ;;  %v6306_v60 = vmul.f32 %v15529_v18, %v6098_v1  ;;  %v10010_v22 = vld [vmem:[#allocation2 + $0x28] sm:$0xff] }
 0x682   : > { %v6488_v36 = vmul.f32 %v16957_v9, %v6288_v59  ;;  %v6521_v10 = vmul.f32 %v15532_v19, %v6337_v47  ;;  %7507 = vmatprep.mubr.bf16.mxu1 %v6630_v53  ;;  %v6073_v48 = vsub.f32 %v6057_v38, %v6065_v41  ;;  %v6522_v34 = vmul.f32 %v15535_v42, %v6338_v23 }
 0x683   : > { %v6074_v55 = vsub.f32 %v6058_v56, %v6066_v5  ;;  %vm5727_vm1 = vcmp.ge.f32.partialorder %v15047_v21, 2.2  ;;  %9624 = vmatpush3.bf16.msra.mxu0 %v15286_v49  ;;  %v6503_v0 = vsub.f32 %v6487_v43, %v6495_v62  ;;  %vm5728_vm2 = vcmp.ge.f32.partialorder %v10010_v22, 2.2 }
 0x684   : > { %v6504_v27 = vsub.f32 %v6488_v36, %v6496_v40  ;;  %v8722_v15 = vsel %vm5727_vm1, 1.0, %v16623_v3  ;;  %9625 = vmatprep.subr.bf16.mxu0 %v15311_v30  ;;  %v6297_v1 = vmul.f32 %v16959_v7, %v6073_v48  ;;  %v8723_v47 = vsel %vm5728_vm2, 1.0, %v16623_v3  ;;  %v16967_v36 = vld [vmem:[#allocation21_spill] sm:$0xff] }
 0x685   : > { %v6298_v19 = vmul.f32 %v16961_v24, %v6074_v55  ;;  %v5831_v42 = vsub.f32 %v15346_v51, %v8722_v15  ;;  %v5832_v9 = vsub.f32 %v15349_v33, %v8723_v47  ;;  %v8818_v49 = vadd.f32 -2.2, %v15047_v21 }
 0x686   : > { %v6613_v23 = vpack.c.bf16 %v6504_v27, %v6503_v0  ;;  %v8819_v28 = vadd.f32 -2.2, %v10010_v22  ;;  %v6313_v2 = vsub.f32 %v6297_v1, %v6305_v17  ;;  %v6151_v62 = vmul.f32 %v15377_v52, %v15359_v16  ;;  %v15638_v33 = vpop.f32.mrb[72].mxu1  ;;  %v16969_v27 = vld [vmem:[#allocation12_spill] sm:$0xff]  ;;  %v16970_v22 = vld [vmem:[#allocation22_spill] sm:$0xff] }
 0x687   : > { %v6314_v58 = vsub.f32 %v6298_v19, %v6306_v60  ;;  %v6152_v57 = vmul.f32 %v15380_v8, %v16962_v61  ;;  %9626 = vmatpush3.bf16.msra.mxu0 %v15311_v30  ;;  %v6159_v40 = vmul.f32 %v8818_v49, %v5831_v42  ;;  %v6367_v51 = vmul.f32 %v15371_v32, %v15404_v50  ;;  %v15646_v8 = vpop.f32.mrb[73].mxu1  ;;  %v16963_v32 = vld [vmem:[#allocation97_spill] sm:$0xff]  ;;  %v16964_v50 = vld [vmem:[#allocation63_spill] sm:$0xff]  ;;  %v16968_v60 = vld [vmem:[#allocation20_spill] sm:$0xff] }
 0x688   : > { %7434 = vmatprep.mubr.bf16.mxu0 %v6613_v23  ;;  %v6160_v35 = vmul.f32 %v8819_v28, %v5832_v9  ;;  %v6368_v21 = vmul.f32 %v15374_v6, %v15406_v11  ;;  %v6513_v38 = vmul.f32 %v16959_v7, %v6313_v2  ;;  %v6559_v52 = vmul.f32 %v15365_v37, %v15422_v63  ;;  %v16965_v6 = vld [vmem:[#allocation93_spill] sm:$0xff]  ;;  %v16966_v11 = vld [vmem:[#allocation87_spill] sm:$0xff]  ;;  %v15652_v41 = vpop.f32.mrb[74].mxu1 }
 0x689   : > { %v6514_v16 = vmul.f32 %v16961_v24, %v6314_v58  ;;  %v6560_v30 = vmul.f32 %v15368_v13, %v15426_v46  ;;  %v6167_v54 = vsub.f32 %v6151_v62, %v6159_v40  ;;  %v6463_v56 = vmul.f32 %v16964_v50, %v16963_v32  ;;  %v15656_v17 = vpop.f32.mrb[75].mxu1  ;;  %v10011_v9 = vld [vmem:[#allocation2 + $0x30] sm:$0xff] }
 0x68a   : > { %v6168_v20 = vsub.f32 %v6152_v57, %v6160_v35  ;;  %v6464_v53 = vmul.f32 %v16966_v11, %v16965_v6  ;;  %v6529_v7 = vsub.f32 %v6513_v38, %v6521_v10  ;;  %v6471_v5 = vmul.f32 %v15365_v37, %v6287_v25  ;;  %v10012_v35 = vld [vmem:[#allocation2 + $0x38] sm:$0xff]  ;;  %v16978_v50 = vld [vmem:[#allocation79_spill] sm:$0xff] }
 0x68b   : > { %v6530_v24 = vsub.f32 %v6514_v16, %v6522_v34  ;;  %v6472_v63 = vmul.f32 %v15368_v13, %v6288_v59  ;;  %v6375_v46 = vmul.f32 %v8818_v49, %v6167_v54  ;;  %v6273_v0 = vmul.f32 %v16968_v60, %v16967_v36  ;;  %v16975_v54 = vld [vmem:[#allocation36_spill] sm:$0xff]  ;;  %v10013_v36 = vld [vmem:[#allocation2] sm:$0xff] }
 0x68c   : > { %v6376_v43 = vmul.f32 %v8819_v28, %v6168_v20  ;;  %v6274_v15 = vmul.f32 %v16970_v22, %v16969_v27  ;;  %v6479_v19 = vsub.f32 %v6463_v56, %v6471_v5  ;;  %v6281_v10 = vmul.f32 %v15520_v45, %v6073_v48  ;;  %v16976_v20 = vld [vmem:[#allocation64_spill] sm:$0xff] }
 0x68d   : > { %v6622_v1 = vpack.c.bf16 %v6530_v24, %v6529_v7  ;;  %v6480_v47 = vsub.f32 %v6464_v53, %v6472_v63  ;;  %v6383_v34 = vsub.f32 %v6367_v51, %v6375_v46  ;;  %v6282_v37 = vmul.f32 %v15523_v39, %v6074_v55  ;;  %v16971_v51 = vld [vmem:[#allocation31_spill] sm:$0xff]  ;;  %v16981_v46 = vld [vmem:[#allocation62_spill] sm:$0xff] }
 0x68e   : > { %v6384_v42 = vsub.f32 %v6368_v21, %v6376_v43  ;;  %v6497_v13 = vmul.f32 %v15526_v4, %v6313_v2  ;;  %v6289_v59 = vsub.f32 %v6273_v0, %v6281_v10  ;;  %v6498_v23 = vmul.f32 %v15529_v18, %v6314_v58  ;;  %v16973_v4 = vld [vmem:[#allocation29_spill] sm:$0xff]  ;;  %v16974_v2 = vld [vmem:[#allocation10_spill] sm:$0xff]  ;;  %v16980_v53 = vld [vmem:[#allocation75_spill] sm:$0xff] }
 0x68f   : > { %7508 = vmatmul.mubr.bf16.gmra.mrb[100].mxu1 %v6622_v1  ;;  %v6605_v25 = vpack.c.bf16 %v6480_v47, %v6479_v19  ;;  %v8820_v62 = vadd.f32 -2.2, %v10011_v9  ;;  %v6567_v61 = vmul.f32 %v8818_v49, %v6383_v34  ;;  %v6290_v40 = vsub.f32 %v6274_v15, %v6282_v37  ;;  %v10014_v0 = vld [vmem:[#allocation2 + $0x8] sm:$0xff]  ;;  %v16982_v19 = vld [vmem:[#allocation37_spill] sm:$0xff]  ;;  %v16983_v10 = vld [vmem:[#allocation16_spill] sm:$0xff] }
 0x690   : > { %v6568_v57 = vmul.f32 %v8819_v28, %v6384_v42  ;;  %v8821_v38 = vadd.f32 -2.2, %v10012_v35  ;;  %v6489_v48 = vmul.f32 %v16968_v60, %v6289_v59  ;;  %v16972_v55 = vsub.f32 %v15492_v12, %v16971_v51  ;;  %v16977_v28 = vld [vmem:[#allocation5_spill] sm:$0xff]  ;;  %v16986_v9 = vld [vmem:[#allocation100_spill] sm:$0xff] }
 0x691   : > { %7435 = vmatmul.mubr.bf16.gmra.mrb[96].mxu0 %v6605_v25  ;;  %v6465_v16 = vmul.f32 %v16974_v2, %v16973_v4  ;;  %v6466_v18 = vmul.f32 %v16976_v20, %v16975_v54  ;;  %v6575_v58 = vsub.f32 %v6559_v52, %v6567_v61  ;;  %v6490_v49 = vmul.f32 %v16970_v22, %v6290_v40  ;;  %v16984_v25 = vld [vmem:[#allocation6_spill] sm:$0xff]  ;;  %v16987_v61 = vld [vmem:[#allocation17_spill] sm:$0xff]  ;;  %v16991_v51 = vld [vmem:[#allocation60_spill] sm:$0xff] }
 0x692   : > { %v6161_v21 = vmul.f32 %v8820_v62, %v16972_v55  ;;  %v6576_v32 = vsub.f32 %v6560_v30, %v6568_v57  ;;  %v16979_v56 = vsub.f32 %v16977_v28, %v16978_v50  ;;  %v6505_v11 = vsub.f32 %v6489_v48, %v6497_v13  ;;  %v16990_v48 = vld [vmem:[#allocation19_spill] sm:$0xff]  ;;  %v10016_v50 = vld [vmem:[#allocation2 + $0x18] sm:$0xff] }
 0x693   : > { %v6473_v12 = vmul.f32 %v15520_v45, %v6289_v59  ;;  %v6474_v24 = vmul.f32 %v15523_v39, %v6290_v40  ;;  %v6506_v63 = vsub.f32 %v6490_v49, %v6498_v23  ;;  %vm5723_vm3 = vcmp.ge.f32.partialorder %v10013_v36, 2.2  ;;  %v16985_v59 = vld [vmem:[#allocation30_spill] sm:$0xff]  ;;  %v16988_v40 = vld [vmem:[#allocation44_spill] sm:$0xff]  ;;  %v10015_v49 = vld [vmem:[#allocation2 + $0x10] sm:$0xff] }
 0x694   : > { %v6162_v6 = vmul.f32 %v8821_v38, %v16979_v56  ;;  %v6169_v7 = vsub.f32 %v16980_v53, %v6161_v21  ;;  %v6637_v5 = vpack.c.bf16 %v6576_v32, %v6575_v58  ;;  %vm5724_vm4 = vcmp.ge.f32.partialorder %v10014_v0, 2.2  ;;  %v16995_v58 = vld [vmem:[#allocation7_spill] sm:$0xff] }
 0x695   : > { %v6481_v30 = vsub.f32 %v6465_v16, %v6473_v12  ;;  %v6482_v60 = vsub.f32 %v6466_v18, %v6474_v24  ;;  %v6614_v27 = vpack.c.bf16 %v6506_v63, %v6505_v11  ;;  %v8718_v15 = vsel %vm5723_vm3, 1.0, %v16623_v3  ;;  %v16993_v16 = vld [vmem:[#allocation11_spill] sm:$0xff]  ;;  %v16994_v18 = vld [vmem:[#allocation58_spill] sm:$0xff]  ;;  %v16996_v63 = vld [vmem:[#allocation28_spill] sm:$0xff] }
 0x696   : > { %v6170_v43 = vsub.f32 %v16981_v46, %v6162_v6  ;;  %v6377_v52 = vmul.f32 %v8820_v62, %v6169_v7  ;;  %9631 = vmatprep.mubr.bf16.mxu1 %v6637_v5  ;;  %v8719_v45 = vsel %vm5724_vm4, 1.0, %v16623_v3  ;;  %v5827_v47 = vsub.f32 %v16982_v19, %v8718_v15  ;;  %v16989_v3 = vld [vmem:[#allocation26_spill] sm:$0xff]  ;;  %v17004_v19 = vld [vmem:[#allocation101_spill] sm:$0xff] }
 0x697   : > { %v6606_v1 = vpack.c.bf16 %v6482_v60, %v6481_v30  ;;  %v5828_v34 = vsub.f32 %v16983_v10, %v8719_v45  ;;  %7442 = vmatprep.mubr.bf16.mxu0 %v6614_v27  ;;  %v8814_v37 = vadd.f32 -2.2, %v10013_v36  ;;  %v8815_v13 = vadd.f32 -2.2, %v10014_v0  ;;  %v16998_v30 = vld [vmem:[#allocation72_spill] sm:$0xff]  ;;  %v16999_v60 = vld [vmem:[#allocation18_spill] sm:$0xff] }
 0x698   : > { %v6378_v22 = vmul.f32 %v8821_v38, %v6170_v43  ;;  %v6385_v39 = vsub.f32 %v15570_v31, %v6377_v52  ;;  %v6147_v23 = vmul.f32 %v16985_v59, %v16984_v25  ;;  %v5829_v57 = vsub.f32 %v16987_v61, %v16986_v9  ;;  %v16997_v43 = vld [vmem:[#allocation71_spill] sm:$0xff]  ;;  %v17000_v27 = vld [vmem:[#allocation61_spill] sm:$0xff]  ;;  %v17005_v10 = vld [vmem:[#allocation78_spill] sm:$0xff] }
 0x699   : > { %v5830_v35 = vsub.f32 %v16989_v3, %v16988_v40  ;;  %7443 = vmatmul.mubr.bf16.gmra.mrb[100].mxu0 %v6606_v1  ;;  %v6148_v55 = vmul.f32 %v16991_v51, %v16990_v48  ;;  %v6155_v4 = vmul.f32 %v8814_v37, %v5827_v47  ;;  %v6156_v2 = vmul.f32 %v8815_v13, %v5828_v34 }
 0x69a   : > { %v6386_v42 = vsub.f32 %v15573_v26, %v6378_v22  ;;  %v6569_v31 = vmul.f32 %v8820_v62, %v6385_v39  ;;  %v16992_v26 = vld [vmem:[#allocation14_spill] sm:$0xff]  ;;  %v6364_v32 = vmul.f32 %v16995_v58, %v16994_v18  ;;  %v8816_v28 = vadd.f32 -2.2, %v10015_v49  ;;  %v17003_v39 = vld [vmem:[#allocation32_spill] sm:$0xff] }
 0x69b   : > { %v6363_v54 = vmul.f32 %v16993_v16, %v16992_v26  ;;  %v8817_v56 = vadd.f32 -2.2, %v10016_v50  ;;  %v6163_v6 = vsub.f32 %v6147_v23, %v6155_v4  ;;  %v6164_v11 = vsub.f32 %v6148_v55, %v6156_v2 }
 0x69c   : > { %v6570_v21 = vmul.f32 %v8821_v38, %v6386_v42  ;;  %v6577_v20 = vsub.f32 %v15590_v14, %v6569_v31  ;;  %v9449_v38 = vadd.f32 %v15646_v8, %v15638_v33  ;;  %v6157_v53 = vmul.f32 %v8816_v28, %v5829_v57  ;;  %v17001_v33 = vld [vmem:[#allocation23_spill] sm:$0xff]  ;;  %v17006_v42 = vld [vmem:[#allocation81_spill] sm:$0xff] }
 0x69d   : > { %v6158_v7 = vmul.f32 %v8817_v56, %v5830_v35  ;;  %v9452_v12 = vadd.f32 %v15656_v17, %v15652_v41  ;;  %v6371_v24 = vmul.f32 %v8814_v37, %v6163_v6  ;;  %v6372_v5 = vmul.f32 %v8815_v13, %v6164_v11  ;;  %v17002_v17 = vld [vmem:[#allocation82_spill] sm:$0xff] }
 0x69e   : > { %v6578_v62 = vsub.f32 %v15593_v44, %v6570_v21  ;;  %v6165_v46 = vsub.f32 %v16996_v63, %v6157_v53  ;;  %v6555_v0 = vmul.f32 %v16999_v60, %v16998_v30  ;;  %v6556_v8 = vmul.f32 %v17001_v33, %v17000_v27 }
 0x69f   : > { %v6166_v36 = vsub.f32 %v16997_v43, %v6158_v7  ;;  %v6379_v52 = vsub.f32 %v6363_v54, %v6371_v24  ;;  %v6380_v44 = vsub.f32 %v6364_v32, %v6372_v5  ;;  %v6557_v1 = vmul.f32 %v17003_v39, %v17002_v17 }
 0x6a0   : > { %v6638_v14 = vpack.c.bf16 %v6578_v62, %v6577_v20  ;;  %v6373_v22 = vmul.f32 %v8816_v28, %v6165_v46  ;;  %v6558_v47 = vmul.f32 %v15159_v29, %v17004_v19 }
 0x6a1   : > { %v6374_v15 = vmul.f32 %v8817_v56, %v6166_v36  ;;  %v6563_v45 = vmul.f32 %v8814_v37, %v6379_v52  ;;  %v6564_v41 = vmul.f32 %v8815_v13, %v6380_v44 }
 0x6a2   : > { %9632 = vmatmul.mubr.bf16.vlgmr.msra.gmra.mrb[104].mxu1 %v6638_v14  ;;  %v6381_v34 = vsub.f32 %v17005_v10, %v6373_v22 }
 0x6a3   : > { %v6382_v25 = vsub.f32 %v17006_v42, %v6374_v15  ;;  %v6571_v59 = vsub.f32 %v6555_v0, %v6563_v45  ;;  %v6572_v23 = vsub.f32 %v6556_v8, %v6564_v41  ;;  %v9453_v9 = vpop.f32.mrb[76].mxu1 }
 0x6a4   : > { %v6565_v61 = vmul.f32 %v8816_v28, %v6381_v34  ;;  %v9454_v40 = vpop.f32.mrb[77].mxu1 }
 0x6a5   : > { %v6566_v57 = vmul.f32 %v8817_v56, %v6382_v25  ;;  %v6635_v3 = vpack.c.bf16 %v6572_v23, %v6571_v59  ;;  %v9455_v35 = vadd.f32 %v9454_v40, %v9453_v9  ;;  %v9456_v37 = vpop.f32.mrb[78].mxu1 }
 0x6a6   : > { %v6573_v13 = vsub.f32 %v6557_v1, %v6565_v61  ;;  %v9457_v48 = vpop.f32.mrb[79].mxu1 }
 0x6a7   : > { %v6574_v31 = vsub.f32 %v6558_v47, %v6566_v57  ;;  %9627 = vmatprep.mubr.bf16.mxu0 %v6635_v3  ;;  %v9458_v51 = vadd.f32 %v9457_v48, %v9456_v37 }
 0x6a9   : > { %v6636_v55 = vpack.c.bf16 %v6574_v31, %v6573_v13 }
 0x6ab   : > { %9628 = vmatmul.mubr.bf16.vlgmr.msra.gmra.mrb[104].mxu0 %v6636_v55 }
 0x6c6   : > { %v9459_v29 = vpop.f32.mrb[80].mxu1 }
 0x6c7   : > { %v9460_v21 = vpop.f32.mrb[81].mxu1 }
 0x6c8   : > { %v9407_v4 = vpop.f32.mrb[72].mxu0  ;;  %v9461_v2 = vadd.f32 %v9460_v21, %v9459_v29  ;;  %v9462_v26 = vpop.f32.mrb[82].mxu1 }
 0x6c9   : > { %v9408_v16 = vpop.f32.mrb[73].mxu0  ;;  %v9463_v54 = vpop.f32.mrb[83].mxu1 }
 0x6ca   : > { %v9409_v20 = vadd.f32 %v9408_v16, %v9407_v4  ;;  %v9410_v18 = vpop.f32.mrb[74].mxu0  ;;  %v9464_v58 = vadd.f32 %v9463_v54, %v9462_v26 }
 0x6cb   : > { %v9411_v32 = vpop.f32.mrb[75].mxu0 }
 0x6cc   : > { %v7356_v49 = vadd.f32 %v9449_v38, %v9409_v20  ;;  %v9412_v28 = vadd.f32 %v9411_v32, %v9410_v18 }
 0x6ce   : > { %v7359_v50 = vadd.f32 %v9452_v12, %v9412_v28 }
 0x6e9   : > { %v9465_v56 = vpop.f32.mrb[84].mxu1 }
 0x6ea   : > { %v9466_v62 = vpop.f32.mrb[85].mxu1 }
 0x6eb   : > { %v9467_v6 = vadd.f32 %v9466_v62, %v9465_v56  ;;  %v9468_v11 = vpop.f32.mrb[86].mxu1 }
 0x6ec   : > { %v9469_v53 = vpop.f32.mrb[87].mxu1 }
 0x6ed   : > { %v9413_v7 = vpop.f32.mrb[76].mxu0  ;;  %v9470_v14 = vadd.f32 %v9469_v53, %v9468_v11 }
 0x6ee   : > { %v9414_v24 = vpop.f32.mrb[77].mxu0 }
 0x6ef   : > { %v9415_v5 = vadd.f32 %v9414_v24, %v9413_v7  ;;  %v9416_v63 = vpop.f32.mrb[78].mxu0 }
 0x6f0   : > { %v9417_v46 = vpop.f32.mrb[79].mxu0 }
 0x6f1   : > { %v7364_v43 = vadd.f32 %v9455_v35, %v9415_v5  ;;  %v9418_v36 = vadd.f32 %v9417_v46, %v9416_v63 }
 0x6f3   : > { %v7367_v52 = vadd.f32 %v9458_v51, %v9418_v36 }
 0x706   : > { %v9527_v44 = vpop.f32.mrb[88].mxu1 }
 0x707   : > { %v9528_v30 = vpop.f32.mrb[89].mxu1 }
 0x708   : > { %v9529_v60 = vadd.f32 %v9528_v30, %v9527_v44  ;;  %v9530_v38 = vpop.f32.mrb[90].mxu1 }
 0x709   : > { %v9531_v0 = vpop.f32.mrb[91].mxu1 }
 0x70a   : > { %v9532_v12 = vadd.f32 %v9531_v0, %v9530_v38 }
 0x711   : > { %v9419_v27 = vpop.f32.mrb[80].mxu0 }
 0x712   : > { %v9420_v33 = vpop.f32.mrb[81].mxu0 }
 0x713   : > { %v9421_v8 = vadd.f32 %v9420_v33, %v9419_v27  ;;  %v9422_v22 = vpop.f32.mrb[82].mxu0 }
 0x714   : > { %v9423_v15 = vpop.f32.mrb[83].mxu0 }
 0x715   : > { %v7372_v45 = vadd.f32 %v9461_v2, %v9421_v8  ;;  %v9424_v41 = vadd.f32 %v9423_v15, %v9422_v22  ;;  %v9038_v8 = vld [vmem:[%s16042_s4 + $0x20] sm:$0xff] }
 0x717   : > { %v7375_v17 = vadd.f32 %v9464_v58, %v9424_v41 }
 0x727   : > { %v9533_v39 = vpop.f32.mrb[92].mxu1 }
 0x728   : > { %v9534_v1 = vpop.f32.mrb[93].mxu1 }
 0x729   : > { %v9535_v19 = vadd.f32 %v9534_v1, %v9533_v39  ;;  %v9536_v47 = vpop.f32.mrb[94].mxu1 }
 0x72a   : > { %v9537_v10 = vpop.f32.mrb[95].mxu1 }
 0x72b   : > { %v9538_v34 = vadd.f32 %v9537_v10, %v9536_v47  ;;  %v17008_v10 = vld [vmem:[#allocation42_spill] sm:$0xff] }
 0x734   : > { %v9425_v42 = vpop.f32.mrb[84].mxu0 }
 0x735   : > { %v9426_v25 = vpop.f32.mrb[85].mxu0 }
 0x736   : > { %v9427_v59 = vadd.f32 %v9426_v25, %v9425_v42  ;;  %v9428_v23 = vpop.f32.mrb[86].mxu0 }
 0x737   : > { %v9429_v9 = vpop.f32.mrb[87].mxu0 }
 0x738   : > { %v7380_v61 = vadd.f32 %v9467_v6, %v9427_v59  ;;  %v9430_v57 = vadd.f32 %v9429_v9, %v9428_v23  ;;  %v17010_v23 = vld [vmem:[#allocation43_spill] sm:$0xff] }
 0x739   : > { %v15739_v9 = vrot.slane %v9038_v8, %v17010_v23 }
 0x73a   : > { %v7383_v40 = vadd.f32 %v9470_v14, %v9430_v57  ;;  %v17011_v57 = vld [vmem:[#allocation49_spill] sm:$0xff] }
 0x73c   : > { %v9487_v3 = vpop.f32.mrb[88].mxu0 }
 0x73d   : > { %v9488_v35 = vpop.f32.mrb[89].mxu0 }
 0x73e   : > { %v9489_v37 = vadd.f32 %v9488_v35, %v9487_v3  ;;  %v9490_v13 = vpop.f32.mrb[90].mxu0  ;;  %v15742_v3 = vrot.slane %v9038_v8, %v17011_v57 }
 0x73f   : > { %v9491_v31 = vpop.f32.mrb[91].mxu0 }
 0x740   : > { %v7421_v48 = vadd.f32 %v9489_v37, %v7356_v49  ;;  %v9492_v51 = vadd.f32 %v9491_v31, %v9490_v13  ;;  %v17013_v37 = vld [vmem:[#allocation27_spill] sm:$0xff] }
 0x741   : > { %v15748_v13 = vrot.slane %v9038_v8, %v17013_v37 }
 0x742   : > { %v7424_v55 = vadd.f32 %v9492_v51, %v7359_v50  ;;  %v15718_v29 = vadd.f32 %v9529_v60, %v7421_v48 }
 0x744   : > { %v9539_v21 = vpop.f32.mrb[96].mxu1  ;;  %v15720_v4 = vadd.f32 %v9532_v12, %v7424_v55 }
 0x745   : > { %v9540_v2 = vpop.f32.mrb[97].mxu1 }
 0x746   : > { %v9541_v26 = vadd.f32 %v9540_v2, %v9539_v21  ;;  %v9542_v16 = vpop.f32.mrb[98].mxu1  ;;  %v17014_v21 = vld [vmem:[#allocation50_spill] sm:$0xff] }
 0x747   : > { %v9543_v54 = vpop.f32.mrb[99].mxu1  ;;  %v15757_v2 = vrot.slane %v9038_v8, %v17014_v21 }
 0x748   : > { %v9544_v20 = vadd.f32 %v9543_v54, %v9542_v16  ;;  %v7704_v54 = vmul.f32 0.0, %v15742_v3 }
 0x754   : > { %v9493_v18 = vpop.f32.mrb[92].mxu0 }
 0x755   : > { %v9494_v58 = vpop.f32.mrb[93].mxu0 }
 0x756   : > { %v9495_v32 = vadd.f32 %v9494_v58, %v9493_v18  ;;  %v9496_v28 = vpop.f32.mrb[94].mxu0  ;;  %v15764_v18 = vmul.f32 0.0, %v15748_v13 }
 0x757   : > { %v9497_v56 = vpop.f32.mrb[95].mxu0 }
 0x758   : > { %v7429_v62 = vadd.f32 %v9495_v32, %v7364_v43  ;;  %v9498_v6 = vadd.f32 %v9497_v56, %v9496_v28 }
 0x75a   : > { %v7432_v49 = vadd.f32 %v9498_v6, %v7367_v52  ;;  %v15722_v11 = vadd.f32 %v9535_v19, %v7429_v62  ;;  %v17007_v19 = vld [vmem:[#allocation38_spill] sm:$0xff]  ;;  %v15771_v62 = vmul.f32 0.0, %v15757_v2 }
 0x75b   : > { %v15730_v47 = vrot.slane %v9038_v8, %v17007_v19 }
 0x75c   : > { %v15724_v50 = vadd.f32 %v9538_v34, %v7432_v49 }
 0x762   : > { %v9545_v53 = vpop.f32.mrb[100].mxu1 }
 0x763   : > { %v9546_v7 = vpop.f32.mrb[101].mxu1 }
 0x764   : > { %v9547_v14 = vadd.f32 %v9546_v7, %v9545_v53  ;;  %v9548_v24 = vpop.f32.mrb[102].mxu1  ;;  %v9499_v5 = vpop.f32.mrb[96].mxu0 }
 0x765   : > { %v9549_v63 = vpop.f32.mrb[103].mxu1  ;;  %v9500_v46 = vpop.f32.mrb[97].mxu0 }
 0x766   : > { %v9550_v36 = vadd.f32 %v9549_v63, %v9548_v24  ;;  %v9501_v44 = vadd.f32 %v9500_v46, %v9499_v5  ;;  %v9502_v30 = vpop.f32.mrb[98].mxu0 }
 0x767   : > { %v9503_v60 = vpop.f32.mrb[99].mxu0 }
 0x768   : > { %v7437_v38 = vadd.f32 %v9501_v44, %v7372_v45  ;;  %v9504_v0 = vadd.f32 %v9503_v60, %v9502_v30  ;;  %v15733_v45 = vrot.slane %v9038_v8, %v17008_v10 }
 0x76a   : > { %v7440_v43 = vadd.f32 %v9504_v0, %v7375_v17  ;;  %v7502_v12 = vadd.f32 %v9541_v26, %v7437_v38  ;;  %v17009_v17 = vld [vmem:[#allocation39_spill] sm:$0xff]  ;;  %v7652_v55 = vmul.f32 0.0, %v15733_v45 }
 0x76b   : > { %v15736_v34 = vrot.slane %v9038_v8, %v17009_v17 }
 0x76c   : > { %v7505_v52 = vadd.f32 %v9544_v20, %v7440_v43  ;;  %v9505_v27 = vpop.f32.mrb[100].mxu0 }
 0x76d   : > { %v9506_v33 = vpop.f32.mrb[101].mxu0  ;;  %v15768_v56 = vmul.f32 0.0, %v15736_v34 }
 0x76e   : > { %v9507_v22 = vadd.f32 %v9506_v33, %v9505_v27  ;;  %v9508_v15 = vpop.f32.mrb[102].mxu0 }
 0x76f   : > { %v9509_v41 = vpop.f32.mrb[103].mxu0 }
 0x770   : > { %v7445_v39 = vadd.f32 %v9507_v22, %v7380_v61  ;;  %v9510_v1 = vadd.f32 %v9509_v41, %v9508_v15  ;;  %v17012_v61 = vld [vmem:[#allocation34_spill] sm:$0xff] }
 0x771   : > { %v15745_v35 = vrot.slane %v9038_v8, %v17012_v61 }
 0x772   : > { %v7510_v42 = vadd.f32 %v9547_v14, %v7445_v39  ;;  %v7448_v25 = vadd.f32 %v9510_v1, %v7383_v40  ;;  %v15753_v40 = vld [vmem:[%s16042_s4 + $0x28] ss:$0 sm:$0xff] }
 0x773   : > { %v15761_v20 = vmul.f32 0.0, %v15753_v40 }
 0x774   : > { %v7513_v51 = vadd.f32 %v9550_v36, %v7448_v25 }
 0x775   : > { %v9633_v59 = vpop.f32.mrb[104].mxu1 }
 0x776   : > { %v7566_v31 = vpop.f32.mrb[105].mxu1  ;;  %v7575_v48 = vadd.f32 %v9633_v59, %v7510_v42 }
 0x777   : > { %v7567_v26 = vadd.f32 %v7566_v31, %v7502_v12  ;;  %v9634_v16 = vpop.f32.mrb[106].mxu1 }
 0x778   : > { %v7569_v58 = vpop.f32.mrb[107].mxu1  ;;  %v7578_v32 = vadd.f32 %v9634_v16, %v7513_v51  ;;  %v7620_v28 = vmul.f32 %v15748_v13, %v7575_v48  ;;  %v7631_v53 = vmul.f32 %v15730_v47, %v7575_v48  ;;  %v7650_v7 = vmul.f32 %v15733_v45, %v7575_v48 }
 0x779   : > { %v15774_v6 = vmul.f32 %v15730_v47, %v7567_v26  ;;  %v15777_v49 = vmul.f32 %v15733_v45, %v7567_v26  ;;  %v7670_v14 = vmul.f32 %v15736_v34, %v7567_v26  ;;  %v15783_v24 = vmul.f32 %v15739_v9, %v7567_v26 }
 0x77a   : > { %v15786_v5 = vmul.f32 %v15742_v3, %v7567_v26  ;;  %v7570_v63 = vadd.f32 %v7569_v58, %v7505_v52  ;;  %v15789_v46 = vmul.f32 %v15745_v35, %v7567_v26  ;;  %v7618_v36 = vmul.f32 %v15748_v13, %v7567_v26 }
 0x77b   : > { %v7632_v44 = vmul.f32 %v15730_v47, %v7578_v32  ;;  %v7683_v30 = vmul.f32 %v15739_v9, %v7575_v48  ;;  %v7651_v0 = vmul.f32 %v15733_v45, %v7578_v32  ;;  %v7672_v43 = vmul.f32 %v15736_v34, %v7575_v48 }
 0x77c   : > { %v7682_v60 = vmul.f32 %v15739_v9, %v7570_v63  ;;  %v7619_v38 = vmul.f32 %v15748_v13, %v7570_v63  ;;  %v7630_v12 = vmul.f32 %v15730_v47, %v7570_v63  ;;  %v7671_v27 = vmul.f32 %v15736_v34, %v7570_v63 }
 0x77d   : > { %v7640_v52 = vadd.f32 %v7632_v44, %v7620_v28  ;;  %v7684_v33 = vmul.f32 %v15739_v9, %v7578_v32  ;;  %v7702_v15 = vmul.f32 %v15742_v3, %v7575_v48  ;;  %v7703_v41 = vmul.f32 %v15742_v3, %v7578_v32 }
 0x77e   : > { %v7639_v8 = vadd.f32 %v7631_v53, %v7619_v38  ;;  %v7690_v22 = vadd.f32 %v7682_v60, %v7670_v14  ;;  %v15804_v39 = vmul.f32 %v15733_v45, %v7570_v63  ;;  %v7638_v1 = vadd.f32 %v7630_v12, %v7618_v36  ;;  %v9629_v23 = vpop.f32.mrb[104].mxu0 }
 0x77f   : > { %v7691_v19 = vadd.f32 %v7683_v30, %v7671_v27  ;;  %v7692_v10 = vadd.f32 %v7684_v33, %v7672_v43  ;;  %v15807_v17 = vmul.f32 %v15742_v3, %v7570_v63  ;;  %v15809_v25 = vadd.f32 %v7652_v55, %v7640_v52  ;;  %v7550_v51 = vpop.f32.mrb[105].mxu0  ;;  %v15822_v55 = vld [vmem:[%s16043_s5 + $0x2] ss:$0 sm:$0xff] }
 0x780   : > { %v7659_v42 = vadd.f32 %v7651_v0, %v7639_v8  ;;  %v7710_v59 = vadd.f32 %v7702_v15, %v7690_v22  ;;  %v15811_v57 = vadd.f32 %v7650_v7, %v7638_v1  ;;  %v7722_v37 = vmul.f32 %v15757_v2, %v7567_v26  ;;  %v9630_v53 = vpop.f32.mrb[106].mxu0 }
 0x781   : > { %v7711_v61 = vadd.f32 %v7703_v41, %v7691_v19  ;;  %v7723_v31 = vmul.f32 %v15757_v2, %v7570_v63  ;;  %v7724_v21 = vmul.f32 %v15757_v2, %v7575_v48  ;;  %v7734_v16 = vmul.f32 %v15745_v35, %v7570_v63  ;;  %v15831_v30 = vpop.f32.mrb[107].mxu0 }
 0x782   : > { %v7735_v58 = vmul.f32 %v15745_v35, %v7575_v48  ;;  %v7736_v28 = vmul.f32 %v15745_v35, %v7578_v32  ;;  %v15824_v7 = vadd.f32 %v7704_v54, %v7692_v10  ;;  %v15827_v14 = vmul.f32 %v15753_v40, %v7567_v26  ;;  %v17016_v10 = vld [vmem:[#allocation41_spill] sm:$0xff] }
 0x783   : > { %v7754_v36 = vmul.f32 %v15753_v40, %v7575_v48  ;;  %v7755_v44 = vmul.f32 %v15753_v40, %v7578_v32  ;;  %v7742_v60 = vadd.f32 %v7734_v16, %v7722_v37  ;;  %v15834_v43 = vmul.f32 %v15753_v40, %v7570_v63  ;;  %v17018_v16 = vld [vmem:[#allocation57_spill] sm:$0xff] }
 0x784   : > { %v7743_v38 = vadd.f32 %v7735_v58, %v7723_v31  ;;  %v7744_v0 = vadd.f32 %v7736_v28, %v7724_v21  ;;  %v7778_v12 = vadd.f32 %v15822_v55, %v7710_v59  ;;  %v7818_v54 = vrot.slane %v15811_v57, 7 }
 0x785   : > { %v7819_v52 = vrot.slane %v7659_v42, 7  ;;  %v16393_v26 = vrot.slane %v15809_v25, 7  ;;  %v15839_v27 = vadd.f32 %v7754_v36, %v7742_v60  ;;  %v7559_v33 = vadd.f32 %v9629_v23, %v15722_v11 }
 0x786   : > { %v7763_v48 = vadd.f32 %v7755_v44, %v7743_v38  ;;  %v15842_v32 = vadd.f32 %v15761_v20, %v7744_v0  ;;  %v7551_v15 = vadd.f32 %v7550_v51, %v15718_v29  ;;  %v7562_v41 = vadd.f32 %v9630_v53, %v15724_v50  ;;  %v17017_v51 = vld [vmem:[#allocation56_spill] sm:$0xff] }
 0x787   : > { %v15849_v63 = vsel %vm2904_vm8, %v7819_v52, %v16393_v26  ;;  %v7822_v22 = vsel %vm2904_vm8, %v7818_v54, %v7819_v52  ;;  %v7779_v20 = vadd.f32 %v15822_v55, %v7711_v61  ;;  %v7786_v1 = vrot.slane %v15839_v27, 1 }
 0x788   : > { %v7787_v11 = vrot.slane %v7763_v48, 1  ;;  %v16392_v19 = vrot.slane %v15842_v32, 1  ;;  %v7835_v42 = vmul.f32 %v17016_v10, %v7822_v22  ;;  %v7616_v59 = vmul.f32 %v15748_v13, %v7559_v33 }
 0x789   : > { %v15863_v23 = vmul.f32 %v15730_v47, %v7559_v33  ;;  %v15866_v37 = vmul.f32 %v15733_v45, %v7559_v33  ;;  %v7668_v61 = vmul.f32 %v15736_v34, %v7559_v33  ;;  %v15878_v31 = vmul.f32 %v15739_v9, %v7559_v33 }
 0x78a   : > { %v7789_v29 = vsel %vm2871_vm9, %v7787_v11, %v16392_v19  ;;  %v7790_v50 = vsel %vm2871_vm9, %v7786_v1, %v7787_v11  ;;  %v15883_v28 = vmul.f32 %v15742_v3, %v7559_v33  ;;  %v7720_v53 = vmul.f32 %v15757_v2, %v7559_v33  ;;  %v7851_v11 = vld [vmem:[%s10077_s26 + $0x30] sm:$0xff] }
 0x78b   : > { %v7802_v21 = vmul.f32 %v17017_v51, %v7790_v50  ;;  %v7803_v58 = vmul.f32 %v17018_v16, %v7789_v29  ;;  %v15887_v36 = vmul.f32 %v15745_v35, %v7559_v33  ;;  %v15890_v44 = vmul.f32 %v15753_v40, %v7559_v33 }
 0x78c   : > { %v7614_v60 = vmul.f32 %v15748_v13, %v7551_v15  ;;  %v7625_v38 = vmul.f32 %v15730_v47, %v7551_v15  ;;  %v15895_v48 = vmul.f32 %v15736_v34, %v7551_v15  ;;  %v7677_v22 = vmul.f32 %v15739_v9, %v7551_v15 }
 0x78d   : > { %v7810_v0 = vadd.f32 %v7802_v21, %v7778_v12  ;;  %v7811_v52 = vadd.f32 %v7803_v58, %v7779_v20  ;;  %v15901_v29 = vmul.f32 %v15757_v2, %v7551_v15  ;;  %v7729_v33 = vmul.f32 %v15745_v35, %v7551_v15 }
 0x78e   : > { %v7633_v10 = vadd.f32 %v7625_v38, %v15764_v18  ;;  %v7617_v50 = vmul.f32 %v15748_v13, %v7562_v41  ;;  %v15906_v16 = vadd.f32 %v7677_v22, %v15768_v56  ;;  %v7628_v12 = vmul.f32 %v15730_v47, %v7562_v41 }
 0x78f   : > { %v7843_v51 = vadd.f32 %v7835_v42, %v7811_v52  ;;  %v7647_v20 = vmul.f32 %v15733_v45, %v7562_v41  ;;  %v15918_v18 = vadd.f32 %v7729_v33, %v15771_v62  ;;  %v7669_v42 = vmul.f32 %v15736_v34, %v7562_v41 }
 0x790   : > { %v7637_v15 = vadd.f32 %v15774_v6, %v7617_v50  ;;  %v7680_v56 = vmul.f32 %v15739_v9, %v7562_v41  ;;  %v7636_v58 = vadd.f32 %v7628_v12, %v7616_v59  ;;  %v7699_v38 = vmul.f32 %v15742_v3, %v7562_v41 }
 0x791   : > { %v7859_v21 = vadd.f32 %v7851_v11, %v7843_v51  ;;  %v7721_v52 = vmul.f32 %v15757_v2, %v7562_v41  ;;  %v7689_v26 = vadd.f32 %v15783_v24, %v7669_v42  ;;  %v7732_v62 = vmul.f32 %v15745_v35, %v7562_v41 }
 0x792   : > { %v7657_v22 = vadd.f32 %v15804_v39, %v7637_v15  ;;  %v7688_v19 = vadd.f32 %v7680_v56, %v7668_v61  ;;  %v15931_v6 = vadd.f32 %v15777_v49, %v7636_v58  ;;  %v7751_v59 = vmul.f32 %v15753_v40, %v7562_v41 }
 0x793   : > { %7867 = vst.msk [vmem:[%s15915_s24 + $0x30] sm:$0xff] %vm261_vm0, %v7859_v21  ;;  %v7741_v33 = vadd.f32 %v15789_v46, %v7721_v52  ;;  %v7554_v11 = vadd.f32 %v15831_v30, %v15720_v4  ;;  %v7709_v39 = vadd.f32 %v15807_v17, %v7689_v26  ;;  %v7740_v61 = vadd.f32 %v7732_v62, %v7720_v53  ;;  %v17021_v52 = vld [vmem:[#allocation55_spill] sm:$0xff] }
 0x794   : > { %v7708_v50 = vadd.f32 %v15786_v5, %v7688_v19  ;;  %v7817_v24 = vrot.slane %v7657_v22, 7  ;;  %v7816_v12 = vrot.slane %v15931_v6, 7 }
 0x795   : > { %v7761_v51 = vadd.f32 %v15834_v43, %v7741_v33  ;;  %v7615_v49 = vmul.f32 %v15748_v13, %v7554_v11  ;;  %v7626_v46 = vmul.f32 %v15730_v47, %v7554_v11  ;;  %v7760_v41 = vadd.f32 %v15827_v14, %v7740_v61  ;;  %v17019_v43 = vld [vmem:[#allocation40_spill] sm:$0xff]  ;;  %v17020_v47 = vld [vmem:[#allocation47_spill] sm:$0xff]  ;;  %v7850_v14 = vld [vmem:[%s10077_s26 + $0x28] sm:$0xff] }
 0x796   : > { %v7776_v15 = vadd.f32 %v15822_v55, %v7708_v50  ;;  %v7777_v4 = vadd.f32 %v15822_v55, %v7709_v39  ;;  %v7823_v5 = vsel %vm2904_vm8, %v7817_v24, %v7818_v54  ;;  %v7824_v30 = vsel %vm2904_vm8, %v7816_v12, %v7817_v24  ;;  %v7849_v61 = vld [vmem:[%s10077_s26 + $0x20] sm:$0xff] }
 0x797   : > { %v7785_v17 = vrot.slane %v7761_v51, 1  ;;  %v7834_v26 = vmul.f32 %v17019_v43, %v7823_v5  ;;  %v7634_v13 = vadd.f32 %v7626_v46, %v7614_v60  ;;  %v7784_v19 = vrot.slane %v7760_v41, 1 }
 0x798   : > { %v7833_v53 = vmul.f32 %v17020_v47, %v7824_v30  ;;  %v7635_v42 = vadd.f32 %v15863_v23, %v7615_v49  ;;  %v7645_v56 = vmul.f32 %v15733_v45, %v7554_v11  ;;  %v7667_v60 = vmul.f32 %v15736_v34, %v7554_v11  ;;  %v17022_v45 = vld [vmem:[#allocation48_spill] sm:$0xff]  ;;  %v17027_v47 = vld [vmem:[#allocation51_spill] sm:$0xff] }
 0x799   : > { %v7791_v57 = vsel %vm2871_vm9, %v7785_v17, %v7786_v1  ;;  %v7842_v54 = vadd.f32 %v7834_v26, %v7810_v0  ;;  %v7654_v21 = vadd.f32 %v15866_v37, %v7634_v13  ;;  %v7792_v58 = vsel %vm2871_vm9, %v7784_v19, %v7785_v17  ;;  %v17026_v26 = vld [vmem:[#allocation54_spill] sm:$0xff] }
 0x79a   : > { %v7801_v22 = vmul.f32 %v17021_v52, %v7791_v57  ;;  %v7653_v23 = vadd.f32 %v7645_v56, %v7633_v10  ;;  %v7655_v62 = vadd.f32 %v7647_v20, %v7635_v42  ;;  %v7800_v6 = vmul.f32 %v17022_v45, %v7792_v58  ;;  %v17029_v56 = vld [vmem:[#allocation52_spill] sm:$0xff] }
 0x79b   : > { %v7858_v27 = vadd.f32 %v7850_v14, %v7842_v54  ;;  %v7678_v33 = vmul.f32 %v15739_v9, %v7554_v11  ;;  %v7687_v1 = vadd.f32 %v15878_v31, %v7667_v60  ;;  %v7697_v37 = vmul.f32 %v15742_v3, %v7554_v11  ;;  %v17028_v14 = vld [vmem:[#allocation53_spill] sm:$0xff]  ;;  %v17030_v54 = vld [vmem:[#allocation35_spill] sm:$0xff]  ;;  %v17032_v58 = vld [vmem:[#allocation24_spill] sm:$0xff] }
 0x79c   : > { %v7809_v0 = vadd.f32 %v7801_v22, %v7777_v4  ;;  %v7719_v50 = vmul.f32 %v15757_v2, %v7554_v11  ;;  %v7730_v34 = vmul.f32 %v15745_v35, %v7554_v11  ;;  %v7808_v39 = vadd.f32 %v7800_v6, %v7776_v15  ;;  %v17031_v60 = vld [vmem:[#allocation25_spill] sm:$0xff]  ;;  %v7848_v6 = vld [vmem:[%s10077_s26 + $0x18] sm:$0xff] }
 0x79d   : > { %7866 = vst.msk [vmem:[%s15915_s24 + $0x28] sm:$0xff] %vm261_vm0, %v7858_v27  ;;  %v7686_v10 = vadd.f32 %v7678_v33, %v15895_v48  ;;  %v7707_v20 = vadd.f32 %v7699_v38, %v7687_v1  ;;  %v7749_v24 = vmul.f32 %v15753_v40, %v7554_v11  ;;  %v7705_v9 = vadd.f32 %v7697_v37, %v15906_v16  ;;  %v17023_v48 = vld [vmem:[#allocation46_spill] sm:$0xff]  ;;  %v7852_v27 = vld [vmem:[%s10077_s26 + $0x38] sm:$0xff] }
 0x79e   : > { %v7841_v51 = vadd.f32 %v7833_v53, %v7809_v0  ;;  %v7738_v31 = vadd.f32 %v7730_v34, %v15901_v29  ;;  %v7739_v3 = vadd.f32 %v15887_v36, %v7719_v50  ;;  %v7780_v35 = vadd.f32 %v15822_v55, %v15824_v7  ;;  %v7845_v0 = vld [vmem:[%s10077_s26] sm:$0xff]  ;;  %v7846_v37 = vld [vmem:[%s10077_s26 + $0x8] sm:$0xff]  ;;  %v7847_v50 = vld [vmem:[%s10077_s26 + $0x10] sm:$0xff] }
 0x79f   : > { %v7706_v2 = vadd.f32 %v15883_v28, %v7686_v10  ;;  %v7757_v49 = vadd.f32 %v7749_v24, %v15918_v18  ;;  %v7813_v46 = vrot.slane %v7653_v23, 7  ;;  %v7836_v38 = vmul.f32 %v17023_v48, %v15849_v63 }
 0x7a0   : > { %v7857_v40 = vadd.f32 %v7849_v61, %v7841_v51  ;;  %v7758_v11 = vadd.f32 %v15890_v44, %v7738_v31  ;;  %v7759_v41 = vadd.f32 %v7751_v59, %v7739_v3  ;;  %v7775_v16 = vadd.f32 %v15822_v55, %v7707_v20 }
 0x7a1   : > { %v7781_v29 = vrot.slane %v7757_v49, 1  ;;  %v7814_v15 = vrot.slane %v7654_v21, 7  ;;  %v7815_v36 = vrot.slane %v7655_v62, 7  ;;  %v7773_v7 = vadd.f32 %v15822_v55, %v7705_v9 }
 0x7a2   : > { %7865 = vst.msk [vmem:[%s15915_s24 + $0x20] sm:$0xff] %vm261_vm0, %v7857_v40  ;;  %v7782_v28 = vrot.slane %v7758_v11, 1  ;;  %v7783_v4 = vrot.slane %v7759_v41, 1  ;;  %v17024_v18 = vrot.slane %v15809_v25, 7  ;;  %v17025_v5 = vrot.slane %v15842_v32, 1 }
 0x7a3   : > { %v7825_v59 = vsel %vm2904_vm8, %v7815_v36, %v7816_v12  ;;  %v7826_v17 = vsel %vm2904_vm8, %v7814_v15, %v7815_v36  ;;  %v7827_v30 = vsel %vm2904_vm8, %v7813_v46, %v7814_v15  ;;  %v7774_v12 = vadd.f32 %v15822_v55, %v7706_v2  ;;  %v17033_v55 = vld [vmem:[#allocation45_spill] sm:$0xff] }
 0x7a4   : > { %v7828_v63 = vsel %vm2904_vm8, %v17024_v18, %v7813_v46  ;;  %v7796_v44 = vsel %vm2871_vm9, %v17025_v5, %v7781_v29  ;;  %v7793_v25 = vsel %vm2871_vm9, %v7783_v4, %v7784_v19  ;;  %v7794_v43 = vsel %vm2871_vm9, %v7782_v28, %v7783_v4 }
 0x7a5   : > { %v7795_v32 = vsel %vm2871_vm9, %v7781_v29, %v7782_v28  ;;  %v7804_v13 = vmul.f32 %v17026_v26, %v7796_v44  ;;  %v7798_v42 = vmul.f32 %v17028_v14, %v7794_v43  ;;  %v7799_v19 = vmul.f32 %v17029_v56, %v7793_v25 }
 0x7a6   : > { %v7797_v53 = vmul.f32 %v17027_v47, %v7795_v32  ;;  %v7829_v21 = vmul.f32 %v17030_v54, %v7828_v63  ;;  %v7830_v8 = vmul.f32 %v17031_v60, %v7827_v30  ;;  %v7832_v52 = vmul.f32 %v17032_v58, %v7825_v59 }
 0x7a7   : > { %v7812_v57 = vadd.f32 %v7804_v13, %v7780_v35  ;;  %v7806_v23 = vadd.f32 %v7798_v42, %v7774_v12  ;;  %v7807_v62 = vadd.f32 %v7799_v19, %v7775_v16  ;;  %v7831_v45 = vmul.f32 %v17033_v55, %v7826_v17 }
 0x7a8   : > { %v7805_v22 = vadd.f32 %v7797_v53, %v7773_v7  ;;  %v7840_v33 = vadd.f32 %v7832_v52, %v7808_v39 }
 0x7a9   : > { %v7844_v1 = vadd.f32 %v7836_v38, %v7812_v57  ;;  %v7838_v61 = vadd.f32 %v7830_v8, %v7806_v23  ;;  %v7839_v10 = vadd.f32 %v7831_v45, %v7807_v62 }
 0x7aa   : > { %v7837_v34 = vadd.f32 %v7829_v21, %v7805_v22  ;;  %v7856_v20 = vadd.f32 %v7848_v6, %v7840_v33 }
 0x7ab   : > { %v7860_v24 = vadd.f32 %v7852_v27, %v7844_v1  ;;  %v7854_v9 = vadd.f32 %v7846_v37, %v7838_v61  ;;  %v7855_v31 = vadd.f32 %v7847_v50, %v7839_v10 }
 0x7ac   : > { %v7853_v51 = vadd.f32 %v7845_v0, %v7837_v34  ;;  %7864 = vst.msk [vmem:[%s15915_s24 + $0x18] sm:$0xff] %vm261_vm0, %v7856_v20 }
 0x7ad   : > { %7868 = vst.msk [vmem:[%s15915_s24 + $0x38] sm:$0xff] %vm261_vm0, %v7860_v24  ;;  %7862 = vst.msk [vmem:[%s15915_s24 + $0x8] sm:$0xff] %vm261_vm0, %v7854_v9 }
 0x7ae   : > { %7861 = vst.msk [vmem:[%s15915_s24] sm:$0xff] %vm261_vm0, %v7853_v51  ;;  %7863 = vst.msk [vmem:[%s15915_s24 + $0x10] sm:$0xff] %vm261_vm0, %v7855_v31 }
 0x7af PF: > { %s16_s21 = sadd.s32 1, %s10023_s21  }
 0x7b0   : > { %p13_p4 = scmp.ge.s32.totalorder %s16_s21, 6  }
 0x7b2   :  { %15 = sbr.rel (!%p13_p4) target bundleno = 1 (0x1), region = 80 }

</bundles_post_ra>
